<compile_context>
chip_gen: v7x
topology: tpu7x:2x2x1
jax: 0.10.0
libtpu: 0.0.40
codegen_flags: <defaults>
</compile_context>

<pallas_src>
import functools

import jax
import jax.numpy as jnp
from jax.experimental import pallas as pl
from jax.experimental.pallas import tpu as pltpu

_BN_EPS = 1e-5


# ----------------------------------------------------------------------------
# Kernel 1: fused Linear -> bias -> ReLU -> BatchNorm1d (training-mode stats).
# Whole batch in one M block; grid tiles the feature (N) axis only, so every
# output tile contains the full batch-reduction axis.
# ----------------------------------------------------------------------------
def _linear_relu_bn_kernel(x_ref, w_ref, b_ref, g_ref, be_ref, o_ref, *, eps):
    w = w_ref[...]
    # Activation is cast to the weight dtype (bf16 for w2) before the MXU dot;
    # accumulation and the BN epilogue stay f32.
    y = jnp.dot(x_ref[...].astype(w.dtype), w,
                preferred_element_type=jnp.float32)
    y = jnp.maximum(y + b_ref[...], 0.0)                       # bias + ReLU
    m = y.shape[0]                                             # real batch rows
    mean = jnp.sum(y, axis=0, keepdims=True) * (1.0 / m)
    xc = y - mean
    var = jnp.sum(xc * xc, axis=0, keepdims=True) * (1.0 / m)  # biased (torch fwd)
    inv = jax.lax.rsqrt(var + eps)
    o_ref[...] = (xc * inv * g_ref[...] + be_ref[...]).astype(o_ref.dtype)


def linear_relu_bn(x, w, b, g, be, *, tn=None, eps=_BN_EPS):
    M, K = x.shape
    K2, N = w.shape
    assert K == K2
    if tn is None or tn >= N:
        tn = N
    assert N % tn == 0
    kernel = functools.partial(_linear_relu_bn_kernel, eps=eps)
    # Advisory cost estimate: this call is HBM-DMA bound on the weight matrix.
    cost = pl.CostEstimate(
        flops=2 * M * K * N + 10 * M * N,
        transcendentals=N,
        bytes_accessed=(M * K * x.dtype.itemsize
                        + K * N * w.dtype.itemsize
                        + 3 * N * 4 + M * N * 4),
    )
    return pl.pallas_call(
        kernel,
        out_shape=jax.ShapeDtypeStruct((M, N), jnp.float32),
        grid_spec=pltpu.PrefetchScalarGridSpec(
            num_scalar_prefetch=0,
            grid=(N // tn,),
            in_specs=[
                pl.BlockSpec((M, K), lambda j: (0, 0)),
                pl.BlockSpec((K, tn), lambda j: (0, j)),
                pl.BlockSpec((1, tn), lambda j: (0, j)),
                pl.BlockSpec((1, tn), lambda j: (0, j)),
                pl.BlockSpec((1, tn), lambda j: (0, j)),
            ],
            out_specs=pl.BlockSpec((M, tn), lambda j: (0, j)),
        ),
        compiler_params=pltpu.CompilerParams(
            dimension_semantics=("parallel",)),
        cost_estimate=cost,
    )(x, w, b, g, be)


# ----------------------------------------------------------------------------
# Kernel 2: fused phase-combined ConvTranspose matmul -> bias -> ReLU ->
# BatchNorm2d.  Output columns are ordered (ry, rx, cout); channel c owns the
# 4 columns {c, c+64, c+128, c+192}.  Per-channel statistics are computed with
# two tiny 0/1 "phase-group" matmuls (pg: (N, C), pgt: (C, N)) so no lane
# reshapes/slices are needed; everything is dots, axis-0 sums and elementwise.
# ----------------------------------------------------------------------------
def _convt_relu_bn_kernel(x_ref, w_ref, b_ref, g_ref, be_ref, pg_ref, pgt_ref,
                          o_ref, *, eps, group):
    y = jnp.dot(x_ref[...], w_ref[...], preferred_element_type=jnp.float32)
    y = jnp.maximum(y + b_ref[...], 0.0)                 # bias + ReLU
    n = y.shape[0] * group                               # samples per channel
    pg = pg_ref[...]                                     # (N, C)
    pgt = pgt_ref[...]                                   # (C, N)
    mean_c = jnp.dot(jnp.sum(y, axis=0, keepdims=True), pg,
                     preferred_element_type=jnp.float32) * (1.0 / n)   # (1, C)
    xc = y - jnp.dot(mean_c, pgt, preferred_element_type=jnp.float32)  # (M, N)
    var_c = jnp.dot(jnp.sum(xc * xc, axis=0, keepdims=True), pg,
                    preferred_element_type=jnp.float32) * (1.0 / n)    # (1, C)
    scale_c = g_ref[...] * jax.lax.rsqrt(var_c + eps)                  # (1, C)
    scale = jnp.dot(scale_c, pgt, preferred_element_type=jnp.float32)  # (1, N)
    shift = jnp.dot(be_ref[...], pgt, preferred_element_type=jnp.float32)
    o_ref[...] = (xc * scale + shift).astype(o_ref.dtype)


def convt_relu_bn(cols, w, b, g, be, pg, pgt, *, eps=_BN_EPS):
    M, K = cols.shape
    K2, N = w.shape
    C = pg.shape[1]
    assert K == K2 and b.shape == (1, N)
    assert pg.shape == (N, C) and pgt.shape == (C, N) and N % C == 0
    kernel = functools.partial(_convt_relu_bn_kernel, eps=eps, group=N // C)
    return pl.pallas_call(
        kernel,
        out_shape=jax.ShapeDtypeStruct((M, N), jnp.float32),
        grid_spec=pltpu.PrefetchScalarGridSpec(
            num_scalar_prefetch=0,
            grid=(1,),
            in_specs=[
                pl.BlockSpec((M, K), lambda i: (0, 0)),
                pl.BlockSpec((K, N), lambda i: (0, 0)),
                pl.BlockSpec((1, N), lambda i: (0, 0)),
                pl.BlockSpec((1, C), lambda i: (0, 0)),
                pl.BlockSpec((1, C), lambda i: (0, 0)),
                pl.BlockSpec((N, C), lambda i: (0, 0)),
                pl.BlockSpec((C, N), lambda i: (0, 0)),
            ],
            out_specs=pl.BlockSpec((M, N), lambda i: (0, 0)),
        ),
        compiler_params=pltpu.CompilerParams(
            dimension_semantics=("arbitrary",)),
    )(cols, w, b, g, be, pg, pgt)


# ----------------------------------------------------------------------------
# Kernel 3: matmul + scalar bias (SMEM) + tanh for the last transposed conv
# (Cout=1), computed transposed so the long spatial axis is the lane axis.
# ----------------------------------------------------------------------------
def _matmul_scalar_bias_tanh_kernel(x_ref, w_ref, b_ref, o_ref):
    y = jnp.dot(x_ref[...], w_ref[...], preferred_element_type=jnp.float32)
    o_ref[...] = jnp.tanh(y + b_ref[0, 0]).astype(o_ref.dtype)


def matmul_scalar_bias_tanh(x, w, b_scalar):
    M, K = x.shape
    K2, N = w.shape
    assert K == K2 and b_scalar.shape == (1, 1)
    return pl.pallas_call(
        _matmul_scalar_bias_tanh_kernel,
        out_shape=jax.ShapeDtypeStruct((M, N), jnp.float32),
        grid_spec=pltpu.PrefetchScalarGridSpec(
            num_scalar_prefetch=0,
            grid=(1,),
            in_specs=[
                pl.BlockSpec((M, K), lambda i: (0, 0)),
                pl.BlockSpec((K, N), lambda i: (0, 0)),
                pl.BlockSpec((1, 1), lambda i: (0, 0),
                             memory_space=pltpu.MemorySpace.SMEM),
            ],
            out_specs=pl.BlockSpec((M, N), lambda i: (0, 0)),
        ),
        compiler_params=pltpu.CompilerParams(
            dimension_semantics=("arbitrary",)),
    )(x, w, b_scalar)


# ----------------------------------------------------------------------------
# Phase decomposition of ConvTranspose2d(k=4, stride=2, padding=1).
# Output parity r with neighborhood offset nd (0..2, i.e. input row a-1,a,a+1)
# uses transposed-conv kernel index k = _PHASE_TAP_TO_K[(r, nd)]; other taps
# contribute zero.  Derived from ky = oy + p - 2*iy.
# ----------------------------------------------------------------------------
_PHASE_TAP_TO_K = {(0, 0): 3, (0, 1): 1, (1, 1): 2, (1, 2): 0}


def build_convt_phase_weight(w):
    """PyTorch ConvTranspose2d weight (Cin, Cout, 4, 4) -> (9*Cin, 4*Cout).
    Rows: (ndy, ndx, cin) 3x3-neighborhood taps.  Cols: (ry, rx, cout) parities."""
    Cin, Cout, KH, KW = w.shape
    assert KH == 4 and KW == 4
    wc = jnp.zeros((3, 3, Cin, 2, 2, Cout), w.dtype)
    for (ry, ndy), ky in _PHASE_TAP_TO_K.items():
        for (rx, ndx), kx in _PHASE_TAP_TO_K.items():
            wc = wc.at[ndy, ndx, :, ry, rx, :].set(w[:, :, ky, kx])
    return wc.reshape(9 * Cin, 4 * Cout)


def _neighborhood_cols_nhwc(x):
    """x: (B, H, W, C) NHWC -> (B*H*W, 9*C) zero-padded 3x3 neighborhoods."""
    B, H, W, C = x.shape
    xp = jnp.pad(x, ((0, 0), (1, 1), (1, 1), (0, 0)))
    cols = jnp.concatenate(
        [xp[:, dy:dy + H, dx:dx + W, :] for dy in range(3) for dx in range(3)],
        axis=-1)
    return cols.reshape(B * H * W, 9 * C)


def _neighborhood_colsT_cf(x_cf):
    """x_cf: (C, B, H, W) channel-first -> (9*C, B*H*W) transposed columns."""
    C, B, H, W = x_cf.shape
    xp = jnp.pad(x_cf, ((0, 0), (0, 0), (1, 1), (1, 1)))
    return jnp.concatenate(
        [xp[:, :, dy:dy + H, dx:dx + W].reshape(C, B * H * W)
         for dy in range(3) for dx in range(3)],
        axis=0)


# ----------------------------------------------------------------------------
# Parameters: PyTorch-shaped init + one-time preprocessing (hoisted out of the
# per-call forward path).
# ----------------------------------------------------------------------------
def init_params(key, noise_dim):
    ks = jax.random.split(key, 4)
    s = 0.02
    return {
        "w1": s * jax.random.normal(ks[0], (noise_dim, 1024), jnp.float32),
        "b1": jnp.zeros((1024,), jnp.float32),
        "g1": jnp.ones((1024,), jnp.float32),
        "be1": jnp.zeros((1024,), jnp.float32),
        "w2": s * jax.random.normal(ks[1], (1024, 7 * 7 * 128), jnp.float32),
        "b2": jnp.zeros((7 * 7 * 128,), jnp.float32),
        "g2": jnp.ones((7 * 7 * 128,), jnp.float32),
        "be2": jnp.zeros((7 * 7 * 128,), jnp.float32),
        "wt1": s * jax.random.normal(ks[2], (128, 64, 4, 4), jnp.float32),
        "bt1": jnp.zeros((64,), jnp.float32),
        "g3": jnp.ones((64,), jnp.float32),
        "be3": jnp.zeros((64,), jnp.float32),
        "wt2": s * jax.random.normal(ks[3], (64, 1, 4, 4), jnp.float32),
        "bt2": jnp.zeros((1,), jnp.float32),
    }


def prepare_params(p):
    """One-time weight prep: bf16-cast the dominant w2 (the forward is DMA
    bound on it; accumulate/epilogue stay f32), reshape biases, permute the
    second linear's output columns from (c,h,w) to (h,w,c) so the activation
    is directly NHWC, build the combined phase-weight matrices for both
    transposed convs, and the 0/1 phase->channel group matrices for the fused
    BatchNorm2d.  (w1 / wc1 could also be bf16; they are small.)"""
    perm = jnp.arange(7 * 7 * 128).reshape(128, 7, 7).transpose(1, 2, 0).reshape(-1)
    n1, c1 = 256, 64                                   # convT1: 4 phases x 64 ch
    pg1 = (jnp.arange(n1)[:, None] % c1 == jnp.arange(c1)[None, :]
           ).astype(jnp.float32)                        # (256, 64)
    return {
        "w1": p["w1"],
        "b1": p["b1"].reshape(1, -1),
        "g1": p["g1"].reshape(1, -1),
        "be1": p["be1"].reshape(1, -1),
        "w2": p["w2"][:, perm].astype(jnp.bfloat16),    # dominant DMA: halved
        "b2": p["b2"][perm].reshape(1, -1),
        "g2": p["g2"][perm].reshape(1, -1),
        "be2": p["be2"][perm].reshape(1, -1),
        "wc1": build_convt_phase_weight(p["wt1"]),      # (1152, 256)
        "bc1": jnp.tile(p["bt1"], 4).reshape(1, -1),    # (1, 256), per (phase,co)
        "g3": p["g3"].reshape(1, -1),                   # (1, 64)
        "be3": p["be3"].reshape(1, -1),                 # (1, 64)
        "pg1": pg1,                                     # (256, 64)
        "pg1t": pg1.T,                                  # (64, 256)
        "wc2T": build_convt_phase_weight(p["wt2"]).T,   # (4, 576)
        "bt2": p["bt2"].reshape(1, 1),                  # SMEM scalar
    }


# ----------------------------------------------------------------------------
# Generator forward
# ----------------------------------------------------------------------------
@jax.jit
def generator_forward(z, prep):
    B = z.shape[0]

    # pre_gen: two fused (Linear + ReLU + BatchNorm1d) kernels.
    h = linear_relu_bn(z, prep["w1"], prep["b1"], prep["g1"], prep["be1"])
    h = linear_relu_bn(h, prep["w2"], prep["b2"], prep["g2"], prep["be2"], tn=896)
    # Columns were permuted at prep time -> this is NHWC (B, 7, 7, 128),
    # equivalent to PyTorch's view(B, 128, 7, 7).
    x = h.reshape(B, 7, 7, 128)

    # ConvTranspose2d(128->64, k4, s2, p1) + ReLU + BatchNorm2d(64):
    # one fused phase-combined matmul with the BN in the epilogue.
    cols = _neighborhood_cols_nhwc(x)                                   # (B*49, 1152)
    y = convt_relu_bn(cols, prep["wc1"], prep["bc1"], prep["g3"],
                      prep["be3"], prep["pg1"], prep["pg1t"])           # (B*49, 256)
    # Interleave parities -> channel-first (64, B, 14, 14).
    y = y.reshape(B, 7, 7, 2, 2, 64).transpose(5, 0, 1, 3, 2, 4).reshape(64, B, 14, 14)

    # ConvTranspose2d(64->1, k4, s2, p1) + Tanh, computed transposed so the
    # long spatial axis (B*14*14) is the lane axis of the output; bias is a
    # single SMEM scalar added in-kernel.
    colsT = _neighborhood_colsT_cf(y)                                   # (576, B*196)
    o = matmul_scalar_bias_tanh(prep["wc2T"], colsT, prep["bt2"])       # (4, B*196)

    # Interleave parities into the (B, 1, 28, 28) image (NCHW, Cout=1).
    img = o.reshape(2, 2, B, 14, 14).transpose(2, 3, 0, 4, 1).reshape(B, 28, 28)
    return img[:, None, :, :]


if __name__ == "__main__":
    key = jax.random.PRNGKey(0)
    k_noise, k_params = jax.random.split(key)
    noise_dim = 32
    batch = 4
    z = jax.random.normal(k_noise, (batch, noise_dim), jnp.float32)
    params = init_params(k_params, noise_dim)
    prep = prepare_params(params)

    out = generator_forward(z, prep)
    out = jax.block_until_ready(out)

    assert out.shape == (batch, 1, 28, 28), out.shape
    assert bool(jnp.all(jnp.isfinite(out)))
    assert bool(jnp.all(jnp.abs(out) <= 1.0 + 1e-6))        # tanh range
    print("KERNEL_OK")
</pallas_src>

<mosaic_0001>
module attributes {stable_mosaic.version = 11 : i64} {
  func.func @_linear_relu_bn_kernel(%arg0: i32, %arg1: memref<4x1024xf32, #tpu.memory_space<vmem>>, %arg2: memref<1024x896xbf16, #tpu.memory_space<vmem>>, %arg3: memref<1x896xf32, #tpu.memory_space<vmem>>, %arg4: memref<1x896xf32, #tpu.memory_space<vmem>>, %arg5: memref<1x896xf32, #tpu.memory_space<vmem>>, %arg6: memref<4x896xf32, #tpu.memory_space<vmem>>) attributes {dimension_semantics = [#tpu.dimension_semantics<parallel>], iteration_bounds = array<i64: 7>, scalar_prefetch = 0 : i64, scratch_operands = 0 : i64, tpu.core_type = #tpu.core_type<tc>, window_params = [{pipeline_mode = #tpu.pipeline_mode<synchronous>, transform_indices = @transform_0, window_bounds = array<i64: 4, 1024>}, {transform_indices = @transform_1, window_bounds = array<i64: 1024, 896>}, {transform_indices = @transform_2, window_bounds = array<i64: 1, 896>}, {transform_indices = @transform_3, window_bounds = array<i64: 1, 896>}, {transform_indices = @transform_4, window_bounds = array<i64: 1, 896>}, {transform_indices = @transform_5, window_bounds = array<i64: 4, 896>}]} {
    %c0 = arith.constant 0 : index
    %c0_0 = arith.constant 0 : index
    %0 = vector.load %arg2[%c0, %c0_0] : memref<1024x896xbf16, #tpu.memory_space<vmem>>, vector<1024x896xbf16>
    %c0_1 = arith.constant 0 : index
    %c0_2 = arith.constant 0 : index
    %1 = vector.load %arg1[%c0_1, %c0_2] : memref<4x1024xf32, #tpu.memory_space<vmem>>, vector<4x1024xf32>
    %2 = arith.truncf %1 : vector<4x1024xf32> to vector<4x1024xbf16>
    %cst = arith.constant dense<0.000000e+00> : vector<4x896xf32>
    %3 = tpu.matmul %2, %0, %cst {dimension_numbers = #tpu.dot_dimension_numbers<[1], [0], [0], [1], [0, 0, 1, 1], [], []>} : vector<4x1024xbf16>, vector<1024x896xbf16>, vector<4x896xf32> -> vector<4x896xf32>
    %c0_3 = arith.constant 0 : index
    %c0_4 = arith.constant 0 : index
    %4 = vector.load %arg3[%c0_3, %c0_4] : memref<1x896xf32, #tpu.memory_space<vmem>>, vector<1x896xf32>
    %5 = vector.broadcast %4 : vector<1x896xf32> to vector<4x896xf32>
    %6 = arith.addf %3, %5 : vector<4x896xf32>
    %cst_5 = arith.constant 0.000000e+00 : f32
    %7 = vector.broadcast %cst_5 : f32 to vector<4x896xf32>
    %8 = arith.maximumf %6, %7 : vector<4x896xf32>
    %cst_6 = arith.constant dense<0.000000e+00> : vector<896xf32>
    %9 = vector.multi_reduction <add>, %8, %cst_6 [0] : vector<4x896xf32> to vector<896xf32>
    %10 = vector.shape_cast %9 : vector<896xf32> to vector<1x896xf32>
    %cst_7 = arith.constant 2.500000e-01 : f32
    %11 = vector.broadcast %cst_7 : f32 to vector<1x896xf32>
    %12 = arith.mulf %10, %11 : vector<1x896xf32>
    %13 = vector.broadcast %12 : vector<1x896xf32> to vector<4x896xf32>
    %14 = arith.subf %8, %13 : vector<4x896xf32>
    %15 = arith.mulf %14, %14 : vector<4x896xf32>
    %cst_8 = arith.constant dense<0.000000e+00> : vector<896xf32>
    %16 = vector.multi_reduction <add>, %15, %cst_8 [0] : vector<4x896xf32> to vector<896xf32>
    %17 = vector.shape_cast %16 : vector<896xf32> to vector<1x896xf32>
    %cst_9 = arith.constant 2.500000e-01 : f32
    %18 = vector.broadcast %cst_9 : f32 to vector<1x896xf32>
    %19 = arith.mulf %17, %18 : vector<1x896xf32>
    %cst_10 = arith.constant 9.99999974E-6 : f32
    %20 = vector.broadcast %cst_10 : f32 to vector<1x896xf32>
    %21 = arith.addf %19, %20 : vector<1x896xf32>
    %22 = math.rsqrt %21 : vector<1x896xf32>
    %23 = vector.broadcast %22 : vector<1x896xf32> to vector<4x896xf32>
    %24 = arith.mulf %14, %23 : vector<4x896xf32>
    %c0_11 = arith.constant 0 : index
    %c0_12 = arith.constant 0 : index
    %25 = vector.load %arg4[%c0_11, %c0_12] : memref<1x896xf32, #tpu.memory_space<vmem>>, vector<1x896xf32>
    %26 = vector.broadcast %25 : vector<1x896xf32> to vector<4x896xf32>
    %27 = arith.mulf %24, %26 : vector<4x896xf32>
    %c0_13 = arith.constant 0 : index
    %c0_14 = arith.constant 0 : index
    %28 = vector.load %arg5[%c0_13, %c0_14] : memref<1x896xf32, #tpu.memory_space<vmem>>, vector<1x896xf32>
    %29 = vector.broadcast %28 : vector<1x896xf32> to vector<4x896xf32>
    %30 = arith.addf %27, %29 : vector<4x896xf32>
    %c0_15 = arith.constant 0 : index
    %c0_16 = arith.constant 0 : index
    %31 = vector.load %arg6[%c0_15, %c0_16] : memref<4x896xf32, #tpu.memory_space<vmem>>, vector<4x896xf32>
    tpu.vector_store %arg6[%c0_15, %c0_16], %30 {strides = array<i32>} : memref<4x896xf32, #tpu.memory_space<vmem>>, vector<4x896xf32>,
    return
  }
  func.func @transform_0(%arg0: i32) -> (i32, i32) {
    %c0_i32 = arith.constant 0 : i32
    %c0_i32_0 = arith.constant 0 : i32
    %c0_i32_1 = arith.constant 0 : i32
    return %c0_i32, %c0_i32_0 : i32, i32
  }
  func.func @transform_1(%arg0: i32) -> (i32, i32) {
    %c0_i32 = arith.constant 0 : i32
    %c0_i32_0 = arith.constant 0 : i32
    return %c0_i32, %arg0 : i32, i32
  }
  func.func @transform_2(%arg0: i32) -> (i32, i32) {
    %c0_i32 = arith.constant 0 : i32
    %c0_i32_0 = arith.constant 0 : i32
    return %c0_i32, %arg0 : i32, i32
  }
  func.func @transform_3(%arg0: i32) -> (i32, i32) {
    %c0_i32 = arith.constant 0 : i32
    %c0_i32_0 = arith.constant 0 : i32
    return %c0_i32, %arg0 : i32, i32
  }
  func.func @transform_4(%arg0: i32) -> (i32, i32) {
    %c0_i32 = arith.constant 0 : i32
    %c0_i32_0 = arith.constant 0 : i32
    return %c0_i32, %arg0 : i32, i32
  }
  func.func @transform_5(%arg0: i32) -> (i32, i32) {
    %c0_i32 = arith.constant 0 : i32
    %c0_i32_0 = arith.constant 0 : i32
    return %c0_i32, %arg0 : i32, i32
  }
}

module attributes {stable_mosaic.version = 11 : i64} {
  func.func @_linear_relu_bn_kernel(%arg0: i32, %arg1: memref<4x32xf32, #tpu.memory_space<vmem>>, %arg2: memref<32x1024xf32, #tpu.memory_space<vmem>>, %arg3: memref<1x1024xf32, #tpu.memory_space<vmem>>, %arg4: memref<1x1024xf32, #tpu.memory_space<vmem>>, %arg5: memref<1x1024xf32, #tpu.memory_space<vmem>>, %arg6: memref<4x1024xf32, #tpu.memory_space<vmem>>) attributes {dimension_semantics = [#tpu.dimension_semantics<parallel>], iteration_bounds = array<i64: 1>, scalar_prefetch = 0 : i64, scratch_operands = 0 : i64, tpu.core_type = #tpu.core_type<tc>, window_params = [{pipeline_mode = #tpu.pipeline_mode<synchronous>, transform_indices = @transform_0, window_bounds = array<i64: 4, 32>}, {transform_indices = @transform_1, window_bounds = array<i64: 32, 1024>}, {transform_indices = @transform_2, window_bounds = array<i64: 1, 1024>}, {transform_indices = @transform_3, window_bounds = array<i64: 1, 1024>}, {transform_indices = @transform_4, window_bounds = array<i64: 1, 1024>}, {transform_indices = @transform_5, window_bounds = array<i64: 4, 1024>}]} {
    %c0 = arith.constant 0 : index
    %c0_0 = arith.constant 0 : index
    %0 = vector.load %arg2[%c0, %c0_0] : memref<32x1024xf32, #tpu.memory_space<vmem>>, vector<32x1024xf32>
    %c0_1 = arith.constant 0 : index
    %c0_2 = arith.constant 0 : index
    %1 = vector.load %arg1[%c0_1, %c0_2] : memref<4x32xf32, #tpu.memory_space<vmem>>, vector<4x32xf32>
    %cst = arith.constant dense<0.000000e+00> : vector<4x1024xf32>
    %2 = tpu.matmul %1, %0, %cst {dimension_numbers = #tpu.dot_dimension_numbers<[1], [0], [0], [1], [0, 0, 1, 1], [], []>} : vector<4x32xf32>, vector<32x1024xf32>, vector<4x1024xf32> -> vector<4x1024xf32>
    %c0_3 = arith.constant 0 : index
    %c0_4 = arith.constant 0 : index
    %3 = vector.load %arg3[%c0_3, %c0_4] : memref<1x1024xf32, #tpu.memory_space<vmem>>, vector<1x1024xf32>
    %4 = vector.broadcast %3 : vector<1x1024xf32> to vector<4x1024xf32>
    %5 = arith.addf %2, %4 : vector<4x1024xf32>
    %cst_5 = arith.constant 0.000000e+00 : f32
    %6 = vector.broadcast %cst_5 : f32 to vector<4x1024xf32>
    %7 = arith.maximumf %5, %6 : vector<4x1024xf32>
    %cst_6 = arith.constant dense<0.000000e+00> : vector<1024xf32>
    %8 = vector.multi_reduction <add>, %7, %cst_6 [0] : vector<4x1024xf32> to vector<1024xf32>
    %9 = vector.shape_cast %8 : vector<1024xf32> to vector<1x1024xf32>
    %cst_7 = arith.constant 2.500000e-01 : f32
    %10 = vector.broadcast %cst_7 : f32 to vector<1x1024xf32>
    %11 = arith.mulf %9, %10 : vector<1x1024xf32>
    %12 = vector.broadcast %11 : vector<1x1024xf32> to vector<4x1024xf32>
    %13 = arith.subf %7, %12 : vector<4x1024xf32>
    %14 = arith.mulf %13, %13 : vector<4x1024xf32>
    %cst_8 = arith.constant dense<0.000000e+00> : vector<1024xf32>
    %15 = vector.multi_reduction <add>, %14, %cst_8 [0] : vector<4x1024xf32> to vector<1024xf32>
    %16 = vector.shape_cast %15 : vector<1024xf32> to vector<1x1024xf32>
    %cst_9 = arith.constant 2.500000e-01 : f32
    %17 = vector.broadcast %cst_9 : f32 to vector<1x1024xf32>
    %18 = arith.mulf %16, %17 : vector<1x1024xf32>
    %cst_10 = arith.constant 9.99999974E-6 : f32
    %19 = vector.broadcast %cst_10 : f32 to vector<1x1024xf32>
    %20 = arith.addf %18, %19 : vector<1x1024xf32>
    %21 = math.rsqrt %20 : vector<1x1024xf32>
    %22 = vector.broadcast %21 : vector<1x1024xf32> to vector<4x1024xf32>
    %23 = arith.mulf %13, %22 : vector<4x1024xf32>
    %c0_11 = arith.constant 0 : index
    %c0_12 = arith.constant 0 : index
    %24 = vector.load %arg4[%c0_11, %c0_12] : memref<1x1024xf32, #tpu.memory_space<vmem>>, vector<1x1024xf32>
    %25 = vector.broadcast %24 : vector<1x1024xf32> to vector<4x1024xf32>
    %26 = arith.mulf %23, %25 : vector<4x1024xf32>
    %c0_13 = arith.constant 0 : index
    %c0_14 = arith.constant 0 : index
    %27 = vector.load %arg5[%c0_13, %c0_14] : memref<1x1024xf32, #tpu.memory_space<vmem>>, vector<1x1024xf32>
    %28 = vector.broadcast %27 : vector<1x1024xf32> to vector<4x1024xf32>
    %29 = arith.addf %26, %28 : vector<4x1024xf32>
    %c0_15 = arith.constant 0 : index
    %c0_16 = arith.constant 0 : index
    %30 = vector.load %arg6[%c0_15, %c0_16] : memref<4x1024xf32, #tpu.memory_space<vmem>>, vector<4x1024xf32>
    tpu.vector_store %arg6[%c0_15, %c0_16], %29 {strides = array<i32>} : memref<4x1024xf32, #tpu.memory_space<vmem>>, vector<4x1024xf32>,
    return
  }
  func.func @transform_0(%arg0: i32) -> (i32, i32) {
    %c0_i32 = arith.constant 0 : i32
    %c0_i32_0 = arith.constant 0 : i32
    %c0_i32_1 = arith.constant 0 : i32
    return %c0_i32, %c0_i32_0 : i32, i32
  }
  func.func @transform_1(%arg0: i32) -> (i32, i32) {
    %c0_i32 = arith.constant 0 : i32
    %c0_i32_0 = arith.constant 0 : i32
    return %c0_i32, %arg0 : i32, i32
  }
  func.func @transform_2(%arg0: i32) -> (i32, i32) {
    %c0_i32 = arith.constant 0 : i32
    %c0_i32_0 = arith.constant 0 : i32
    return %c0_i32, %arg0 : i32, i32
  }
  func.func @transform_3(%arg0: i32) -> (i32, i32) {
    %c0_i32 = arith.constant 0 : i32
    %c0_i32_0 = arith.constant 0 : i32
    return %c0_i32, %arg0 : i32, i32
  }
  func.func @transform_4(%arg0: i32) -> (i32, i32) {
    %c0_i32 = arith.constant 0 : i32
    %c0_i32_0 = arith.constant 0 : i32
    return %c0_i32, %arg0 : i32, i32
  }
  func.func @transform_5(%arg0: i32) -> (i32, i32) {
    %c0_i32 = arith.constant 0 : i32
    %c0_i32_0 = arith.constant 0 : i32
    return %c0_i32, %arg0 : i32, i32
  }
}

module attributes {stable_mosaic.version = 11 : i64} {
  func.func @_convt_relu_bn_kernel(%arg0: i32, %arg1: memref<196x1152xf32, #tpu.memory_space<vmem>>, %arg2: memref<1152x256xf32, #tpu.memory_space<vmem>>, %arg3: memref<1x256xf32, #tpu.memory_space<vmem>>, %arg4: memref<1x64xf32, #tpu.memory_space<vmem>>, %arg5: memref<1x64xf32, #tpu.memory_space<vmem>>, %arg6: memref<256x64xf32, #tpu.memory_space<vmem>>, %arg7: memref<64x256xf32, #tpu.memory_space<vmem>>, %arg8: memref<196x256xf32, #tpu.memory_space<vmem>>) attributes {dimension_semantics = [#tpu.dimension_semantics<arbitrary>], iteration_bounds = array<i64: 1>, scalar_prefetch = 0 : i64, scratch_operands = 0 : i64, tpu.core_type = #tpu.core_type<tc>, window_params = [{pipeline_mode = #tpu.pipeline_mode<synchronous>, transform_indices = @transform_0, window_bounds = array<i64: 196, 1152>}, {pipeline_mode = #tpu.pipeline_mode<synchronous>, transform_indices = @transform_1, window_bounds = array<i64: 1152, 256>}, {pipeline_mode = #tpu.pipeline_mode<synchronous>, transform_indices = @transform_2, window_bounds = array<i64: 1, 256>}, {pipeline_mode = #tpu.pipeline_mode<synchronous>, transform_indices = @transform_3, window_bounds = array<i64: 1, 64>}, {pipeline_mode = #tpu.pipeline_mode<synchronous>, transform_indices = @transform_4, window_bounds = array<i64: 1, 64>}, {pipeline_mode = #tpu.pipeline_mode<synchronous>, transform_indices = @transform_5, window_bounds = array<i64: 256, 64>}, {pipeline_mode = #tpu.pipeline_mode<synchronous>, transform_indices = @transform_6, window_bounds = array<i64: 64, 256>}, {pipeline_mode = #tpu.pipeline_mode<synchronous>, transform_indices = @transform_7, window_bounds = array<i64: 196, 256>}]} {
    %c0 = arith.constant 0 : index
    %c0_0 = arith.constant 0 : index
    %0 = vector.load %arg1[%c0, %c0_0] : memref<196x1152xf32, #tpu.memory_space<vmem>>, vector<196x1152xf32>
    %c0_1 = arith.constant 0 : index
    %c0_2 = arith.constant 0 : index
    %1 = vector.load %arg2[%c0_1, %c0_2] : memref<1152x256xf32, #tpu.memory_space<vmem>>, vector<1152x256xf32>
    %cst = arith.constant dense<0.000000e+00> : vector<196x256xf32>
    %2 = tpu.matmul %0, %1, %cst {dimension_numbers = #tpu.dot_dimension_numbers<[1], [0], [0], [1], [0, 0, 1, 1], [], []>} : vector<196x1152xf32>, vector<1152x256xf32>, vector<196x256xf32> -> vector<196x256xf32>
    %c0_3 = arith.constant 0 : index
    %c0_4 = arith.constant 0 : index
    %3 = vector.load %arg3[%c0_3, %c0_4] : memref<1x256xf32, #tpu.memory_space<vmem>>, vector<1x256xf32>
    %4 = vector.broadcast %3 : vector<1x256xf32> to vector<196x256xf32>
    %5 = arith.addf %2, %4 : vector<196x256xf32>
    %cst_5 = arith.constant 0.000000e+00 : f32
    %6 = vector.broadcast %cst_5 : f32 to vector<196x256xf32>
    %7 = arith.maximumf %5, %6 : vector<196x256xf32>
    %c0_6 = arith.constant 0 : index
    %c0_7 = arith.constant 0 : index
    %8 = vector.load %arg6[%c0_6, %c0_7] : memref<256x64xf32, #tpu.memory_space<vmem>>, vector<256x64xf32>
    %c0_8 = arith.constant 0 : index
    %c0_9 = arith.constant 0 : index
    %9 = vector.load %arg7[%c0_8, %c0_9] : memref<64x256xf32, #tpu.memory_space<vmem>>, vector<64x256xf32>
    %cst_10 = arith.constant dense<0.000000e+00> : vector<256xf32>
    %10 = vector.multi_reduction <add>, %7, %cst_10 [0] : vector<196x256xf32> to vector<256xf32>
    %11 = vector.shape_cast %10 : vector<256xf32> to vector<1x256xf32>
    %cst_11 = arith.constant dense<0.000000e+00> : vector<1x64xf32>
    %12 = tpu.matmul %11, %8, %cst_11 {dimension_numbers = #tpu.dot_dimension_numbers<[1], [0], [0], [1], [0, 0, 1, 1], [], []>} : vector<1x256xf32>, vector<256x64xf32>, vector<1x64xf32> -> vector<1x64xf32>
    %cst_12 = arith.constant 0.00127551018 : f32
    %13 = vector.broadcast %cst_12 : f32 to vector<1x64xf32>
    %14 = arith.mulf %12, %13 : vector<1x64xf32>
    %cst_13 = arith.constant dense<0.000000e+00> : vector<1x256xf32>
    %15 = tpu.matmul %14, %9, %cst_13 {dimension_numbers = #tpu.dot_dimension_numbers<[1], [0], [0], [1], [0, 0, 1, 1], [], []>} : vector<1x64xf32>, vector<64x256xf32>, vector<1x256xf32> -> vector<1x256xf32>
    %16 = vector.broadcast %15 : vector<1x256xf32> to vector<196x256xf32>
    %17 = arith.subf %7, %16 : vector<196x256xf32>
    %18 = arith.mulf %17, %17 : vector<196x256xf32>
    %cst_14 = arith.constant dense<0.000000e+00> : vector<256xf32>
    %19 = vector.multi_reduction <add>, %18, %cst_14 [0] : vector<196x256xf32> to vector<256xf32>
    %20 = vector.shape_cast %19 : vector<256xf32> to vector<1x256xf32>
    %cst_15 = arith.constant dense<0.000000e+00> : vector<1x64xf32>
    %21 = tpu.matmul %20, %8, %cst_15 {dimension_numbers = #tpu.dot_dimension_numbers<[1], [0], [0], [1], [0, 0, 1, 1], [], []>} : vector<1x256xf32>, vector<256x64xf32>, vector<1x64xf32> -> vector<1x64xf32>
    %cst_16 = arith.constant 0.00127551018 : f32
    %22 = vector.broadcast %cst_16 : f32 to vector<1x64xf32>
    %23 = arith.mulf %21, %22 : vector<1x64xf32>
    %c0_17 = arith.constant 0 : index
    %c0_18 = arith.constant 0 : index
    %24 = vector.load %arg4[%c0_17, %c0_18] : memref<1x64xf32, #tpu.memory_space<vmem>>, vector<1x64xf32>
    %cst_19 = arith.constant 9.99999974E-6 : f32
    %25 = vector.broadcast %cst_19 : f32 to vector<1x64xf32>
    %26 = arith.addf %23, %25 : vector<1x64xf32>
    %27 = math.rsqrt %26 : vector<1x64xf32>
    %28 = arith.mulf %24, %27 : vector<1x64xf32>
    %cst_20 = arith.constant dense<0.000000e+00> : vector<1x256xf32>
    %29 = tpu.matmul %28, %9, %cst_20 {dimension_numbers = #tpu.dot_dimension_numbers<[1], [0], [0], [1], [0, 0, 1, 1], [], []>} : vector<1x64xf32>, vector<64x256xf32>, vector<1x256xf32> -> vector<1x256xf32>
    %c0_21 = arith.constant 0 : index
    %c0_22 = arith.constant 0 : index
    %30 = vector.load %arg5[%c0_21, %c0_22] : memref<1x64xf32, #tpu.memory_space<vmem>>, vector<1x64xf32>
    %cst_23 = arith.constant dense<0.000000e+00> : vector<1x256xf32>
    %31 = tpu.matmul %30, %9, %cst_23 {dimension_numbers = #tpu.dot_dimension_numbers<[1], [0], [0], [1], [0, 0, 1, 1], [], []>} : vector<1x64xf32>, vector<64x256xf32>, vector<1x256xf32> -> vector<1x256xf32>
    %32 = vector.broadcast %29 : vector<1x256xf32> to vector<196x256xf32>
    %33 = arith.mulf %17, %32 : vector<196x256xf32>
    %34 = vector.broadcast %31 : vector<1x256xf32> to vector<196x256xf32>
    %35 = arith.addf %33, %34 : vector<196x256xf32>
    %c0_24 = arith.constant 0 : index
    %c0_25 = arith.constant 0 : index
    %36 = vector.load %arg8[%c0_24, %c0_25] : memref<196x256xf32, #tpu.memory_space<vmem>>, vector<196x256xf32>
    tpu.vector_store %arg8[%c0_24, %c0_25], %35 {strides = array<i32>} : memref<196x256xf32, #tpu.memory_space<vmem>>, vector<196x256xf32>,
    return
  }
  func.func @transform_0(%arg0: i32) -> (i32, i32) {
    %c0_i32 = arith.constant 0 : i32
    %c0_i32_0 = arith.constant 0 : i32
    %c0_i32_1 = arith.constant 0 : i32
    return %c0_i32, %c0_i32_0 : i32, i32
  }
  func.func @transform_1(%arg0: i32) -> (i32, i32) {
    %c0_i32 = arith.constant 0 : i32
    %c0_i32_0 = arith.constant 0 : i32
    %c0_i32_1 = arith.constant 0 : i32
    return %c0_i32, %c0_i32_0 : i32, i32
  }
  func.func @transform_2(%arg0: i32) -> (i32, i32) {
    %c0_i32 = arith.constant 0 : i32
    %c0_i32_0 = arith.constant 0 : i32
    %c0_i32_1 = arith.constant 0 : i32
    return %c0_i32, %c0_i32_0 : i32, i32
  }
  func.func @transform_3(%arg0: i32) -> (i32, i32) {
    %c0_i32 = arith.constant 0 : i32
    %c0_i32_0 = arith.constant 0 : i32
    %c0_i32_1 = arith.constant 0 : i32
    return %c0_i32, %c0_i32_0 : i32, i32
  }
  func.func @transform_4(%arg0: i32) -> (i32, i32) {
    %c0_i32 = arith.constant 0 : i32
    %c0_i32_0 = arith.constant 0 : i32
    %c0_i32_1 = arith.constant 0 : i32
    return %c0_i32, %c0_i32_0 : i32, i32
  }
  func.func @transform_5(%arg0: i32) -> (i32, i32) {
    %c0_i32 = arith.constant 0 : i32
    %c0_i32_0 = arith.constant 0 : i32
    %c0_i32_1 = arith.constant 0 : i32
    return %c0_i32, %c0_i32_0 : i32, i32
  }
  func.func @transform_6(%arg0: i32) -> (i32, i32) {
    %c0_i32 = arith.constant 0 : i32
    %c0_i32_0 = arith.constant 0 : i32
    %c0_i32_1 = arith.constant 0 : i32
    return %c0_i32, %c0_i32_0 : i32, i32
  }
  func.func @transform_7(%arg0: i32) -> (i32, i32) {
    %c0_i32 = arith.constant 0 : i32
    %c0_i32_0 = arith.constant 0 : i32
    %c0_i32_1 = arith.constant 0 : i32
    return %c0_i32, %c0_i32_0 : i32, i32
  }
}

module attributes {stable_mosaic.version = 11 : i64} {
  func.func @_matmul_scalar_bias_tanh_kernel(%arg0: i32, %arg1: memref<4x576xf32, #tpu.memory_space<vmem>>, %arg2: memref<576x784xf32, #tpu.memory_space<vmem>>, %arg3: memref<1x1xf32, #tpu.memory_space<smem>>, %arg4: memref<4x784xf32, #tpu.memory_space<vmem>>) attributes {dimension_semantics = [#tpu.dimension_semantics<arbitrary>], iteration_bounds = array<i64: 1>, scalar_prefetch = 0 : i64, scratch_operands = 0 : i64, tpu.core_type = #tpu.core_type<tc>, window_params = [{pipeline_mode = #tpu.pipeline_mode<synchronous>, transform_indices = @transform_0, window_bounds = array<i64: 4, 576>}, {pipeline_mode = #tpu.pipeline_mode<synchronous>, transform_indices = @transform_1, window_bounds = array<i64: 576, 784>}, {transform_indices = @transform_2, window_bounds = array<i64: 1, 1>}, {pipeline_mode = #tpu.pipeline_mode<synchronous>, transform_indices = @transform_3, window_bounds = array<i64: 4, 784>}]} {
    %c0 = arith.constant 0 : index
    %c0_0 = arith.constant 0 : index
    %0 = vector.load %arg1[%c0, %c0_0] : memref<4x576xf32, #tpu.memory_space<vmem>>, vector<4x576xf32>
    %c0_1 = arith.constant 0 : index
    %c0_2 = arith.constant 0 : index
    %1 = vector.load %arg2[%c0_1, %c0_2] : memref<576x784xf32, #tpu.memory_space<vmem>>, vector<576x784xf32>
    %cst = arith.constant dense<0.000000e+00> : vector<4x784xf32>
    %2 = tpu.matmul %0, %1, %cst {dimension_numbers = #tpu.dot_dimension_numbers<[1], [0], [0], [1], [0, 0, 1, 1], [], []>} : vector<4x576xf32>, vector<576x784xf32>, vector<4x784xf32> -> vector<4x784xf32>
    %c0_3 = arith.constant 0 : index
    %c0_4 = arith.constant 0 : index
    %3 = memref.load %arg3[%c0_3, %c0_4] : memref<1x1xf32, #tpu.memory_space<smem>>
    %4 = vector.broadcast %3 : f32 to vector<4x784xf32>
    %5 = arith.addf %2, %4 : vector<4x784xf32>
    %6 = math.tanh %5 : vector<4x784xf32>
    %c0_5 = arith.constant 0 : index
    %c0_6 = arith.constant 0 : index
    %7 = vector.load %arg4[%c0_5, %c0_6] : memref<4x784xf32, #tpu.memory_space<vmem>>, vector<4x784xf32>
    tpu.vector_store %arg4[%c0_5, %c0_6], %6 {strides = array<i32>} : memref<4x784xf32, #tpu.memory_space<vmem>>, vector<4x784xf32>,
    return
  }
  func.func @transform_0(%arg0: i32) -> (i32, i32) {
    %c0_i32 = arith.constant 0 : i32
    %c0_i32_0 = arith.constant 0 : i32
    %c0_i32_1 = arith.constant 0 : i32
    return %c0_i32, %c0_i32_0 : i32, i32
  }
  func.func @transform_1(%arg0: i32) -> (i32, i32) {
    %c0_i32 = arith.constant 0 : i32
    %c0_i32_0 = arith.constant 0 : i32
    %c0_i32_1 = arith.constant 0 : i32
    return %c0_i32, %c0_i32_0 : i32, i32
  }
  func.func @transform_2(%arg0: i32) -> (i32, i32) {
    %c0_i32 = arith.constant 0 : i32
    %c0_i32_0 = arith.constant 0 : i32
    %c0_i32_1 = arith.constant 0 : i32
    return %c0_i32, %c0_i32_0 : i32, i32
  }
  func.func @transform_3(%arg0: i32) -> (i32, i32) {
    %c0_i32 = arith.constant 0 : i32
    %c0_i32_0 = arith.constant 0 : i32
    %c0_i32_1 = arith.constant 0 : i32
    return %c0_i32, %c0_i32_0 : i32, i32
  }
}

</mosaic_0001>

<bundles_post_ra>
// kernel: generator_forward.4
= control target key start
LH: loop header
LB: loop body
LE: loop exit
PB: predicated region body
PF: predicated region fallthrough
CT: control target
= control target key end

     0   :  { %10 = vsyncpa [#allocation3], 0  ;;  %s1213_s0 = inlined_call_operand.hbm [shape: f32[4,32], index: 0, kind: input, shape index: {}]   ;;  %s1214_s1 = inlined_call_operand.hbm [shape: f32[32,1024], index: 1, kind: input, shape index: {}]   ;;  %s1215_s2 = inlined_call_operand.hbm [shape: f32[1,1024], index: 2, kind: input, shape index: {}]   ;;  %s1216_s3 = inlined_call_operand.hbm [shape: f32[1,1024], index: 3, kind: input, shape index: {}]   ;;  %s1217_s4 = inlined_call_operand.hbm [shape: f32[1,1024], index: 4, kind: input, shape index: {}]   ;;  %s1218_s5 = inlined_call_operand.vmem [shape: f32[4,1024], index: 5, kind: output, shape index: {}]  }
   0x1   :  { %11 = vsyncpa [#allocation5], 0 }
   0x2   :  { %12 = vsyncpa [#allocation8], 0  ;;  %s923_s18 = smov [#allocation4]   ;;  %s807_s22 = scalar_lea.hbm %s1214_s1, 4096 }
   0x3   :  { %s28_s19 = sshll.u32 %s923_s18, 4  ;;  %p808_p0 = scmp.ne.s32.totalorder %s1214_s1, %s807_s22  ;;  %s29_s19 = int_to_ptr.vmem [resolvable:$true] %s28_s19 }
   0x4   :  { %p811_p1 = scmp.lt.u32.totalorder %s807_s22, %s1214_s1 }
   0x6   :  { %p813_p2 = pnand %p811_p1, %p808_p0 }
   0x8   :  { %816 = shalt.err (!%p813_p2)
}
   0x9   :  { %s817_s27 = scalar_lea.vmem %s29_s19, 4096  ;;  %p822_p4 = scmp.lt.s32.totalorder %s29_s19, %s29_s19 }
   0xa   :  { %p818_p3 = scmp.ne.s32.totalorder %s29_s19, %s817_s27  ;;  %p823_p5 = scmp.lt.s32.totalorder %s817_s27, %s817_s27 }
   0xc   :  { %p824_p6 = por %p823_p5, %p822_p4 }
   0xe   :  { %p825_p7 = pnand %p824_p6, %p818_p3 }
  0x10   :  { %828 = shalt.err (!%p825_p7)
}
  0x11   :  { %s924_s28 = smov 1024   ;;  %s925_s29 = smov 64  }
  0x12   :  { %34 = dma.hbm_to_vmem [thread:$0]  %s1214_s1, 4096, %s29_s19, [#allocation5], %s924_s28, %s924_s28, %s925_s29  }
  0x13   :  { %s926_s7 = smov [#allocation7]   ;;  %s927_s9 = smov [#allocation2]  }
  0x14   :  { %s51_s8 = sshll.u32 %s926_s7, 4  ;;  %s19_s10 = sshll.u32 %s927_s9, 4  ;;  %s52_s8 = int_to_ptr.vmem [resolvable:$true] %s51_s8  ;;  %s20_s10 = int_to_ptr.vmem [resolvable:$true] %s19_s10 }
  0x15   :  { %s829_s13 = scalar_lea.hbm %s1216_s3, 128 }
  0x16   :  { %p830_p8 = scmp.ne.s32.totalorder %s1216_s3, %s829_s13  ;;  %p833_p9 = scmp.lt.u32.totalorder %s829_s13, %s1216_s3 }
  0x18   :  { %p835_p10 = pnand %p833_p9, %p830_p8 }
  0x1a   :  { %838 = shalt.err (!%p835_p10)
}
  0x1b   :  { %s839_s1 = scalar_lea.vmem %s52_s8, 128  ;;  %p844_p12 = scmp.lt.s32.totalorder %s52_s8, %s52_s8 }
  0x1c   :  { %p840_p11 = scmp.ne.s32.totalorder %s52_s8, %s839_s1  ;;  %p845_p13 = scmp.lt.s32.totalorder %s839_s1, %s839_s1 }
  0x1e   :  { %p846_p0 = por %p845_p13, %p844_p12 }
  0x20   :  { %p847_p1 = pnand %p846_p0, %p840_p11 }
  0x22   :  { %850 = shalt.err (!%p847_p1)
}
  0x23   :  { %54 = dma.hbm_to_vmem [thread:$0]  %s1216_s3, 128, %s52_s8, [#allocation8]  }
  0x24   :  { %s851_s22 = scalar_lea.hbm %s1213_s0, 64 }
  0x25   :  { %p852_p2 = scmp.ne.s32.totalorder %s1213_s0, %s851_s22  ;;  %p855_p3 = scmp.lt.u32.totalorder %s851_s22, %s1213_s0 }
  0x27   :  { %p857_p4 = pnand %p855_p3, %p852_p2 }
  0x29   :  { %860 = shalt.err (!%p857_p4)
}
  0x2a   :  { %s861_s27 = scalar_lea.vmem %s20_s10, 64  ;;  %p866_p6 = scmp.lt.s32.totalorder %s20_s10, %s20_s10 }
  0x2b   :  { %p862_p5 = scmp.ne.s32.totalorder %s20_s10, %s861_s27  ;;  %p867_p7 = scmp.lt.s32.totalorder %s861_s27, %s861_s27 }
  0x2d   :  { %p868_p8 = por %p867_p7, %p866_p6 }
  0x2f   :  { %p869_p9 = pnand %p868_p8, %p862_p5 }
  0x31   :  { %872 = shalt.err (!%p869_p9)
}
  0x32   :  { %22 = dma.hbm_to_vmem [thread:$0]  %s1213_s0, 64, %s20_s10, [#allocation3]  }
  0x33   :  { %s928_s29 = smov [#allocation6]   ;;  %s929_s6 = smov [#allocation9]  }
  0x34   :  { %s41_s30 = sshll.u32 %s928_s29, 4  ;;  %s61_s7 = sshll.u32 %s929_s6, 4  ;;  %s42_s30 = int_to_ptr.vmem [resolvable:$true] %s41_s30  ;;  %s62_s7 = int_to_ptr.vmem [resolvable:$true] %s61_s7 }
  0x35   :  { %s873_s11 = scalar_lea.hbm %s1215_s2, 128 }
  0x36   :  { %p874_p10 = scmp.ne.s32.totalorder %s1215_s2, %s873_s11  ;;  %p877_p11 = scmp.lt.u32.totalorder %s873_s11, %s1215_s2 }
  0x38   :  { %p879_p12 = pnand %p877_p11, %p874_p10 }
  0x3a   :  { %882 = shalt.err (!%p879_p12)
}
  0x3b   :  { %s883_s0 = scalar_lea.vmem %s42_s30, 128  ;;  %p888_p0 = scmp.lt.s32.totalorder %s42_s30, %s42_s30 }
  0x3c   :  { %p884_p13 = scmp.ne.s32.totalorder %s42_s30, %s883_s0  ;;  %p889_p1 = scmp.lt.s32.totalorder %s883_s0, %s883_s0 }
  0x3e   :  { %p890_p2 = por %p889_p1, %p888_p0 }
  0x40   :  { %p891_p3 = pnand %p890_p2, %p884_p13 }
  0x42   :  { %894 = shalt.err (!%p891_p3)
}
  0x43   :  { %44 = dma.hbm_to_vmem [thread:$0]  %s1215_s2, 128, %s42_s30, [#allocation5]  }
  0x44   :  { %s895_s18 = scalar_lea.hbm %s1217_s4, 128 }
  0x45   :  { %p896_p4 = scmp.ne.s32.totalorder %s1217_s4, %s895_s18  ;;  %p899_p5 = scmp.lt.u32.totalorder %s895_s18, %s1217_s4 }
  0x47   :  { %p901_p6 = pnand %p899_p5, %p896_p4 }
  0x49   :  { %904 = shalt.err (!%p901_p6)
}
  0x4a   :  { %s905_s23 = scalar_lea.vmem %s62_s7, 128  ;;  %p910_p8 = scmp.lt.s32.totalorder %s62_s7, %s62_s7 }
  0x4b   :  { %p906_p7 = scmp.ne.s32.totalorder %s62_s7, %s905_s23  ;;  %p911_p9 = scmp.lt.s32.totalorder %s905_s23, %s905_s23 }
  0x4d   :  { %p912_p10 = por %p911_p9, %p910_p8 }
  0x4f   :  { %p913_p11 = pnand %p912_p10, %p906_p7 }
  0x51   :  { %916 = shalt.err (!%p913_p11)
}
  0x52   :  { %64 = dma.hbm_to_vmem [thread:$0]  %s1217_s4, 128, %s62_s7, [#allocation8]  }
  0x53   :  { %917 = dma.done.wait [#allocation3], 64  }
  0x54   :  { %918 = vsyncadd [#allocation3], 4294967232 }
  0x55   :  { %919 = dma.done.wait [#allocation5], 4224  }
  0x56   :  { %920 = vsyncadd [#allocation5], 4294963072 }
  0x57   :  { %921 = dma.done.wait [#allocation8], 256  }
  0x58   :  { %922 = vsyncadd [#allocation8], 4294967040  ;;  %v930_v0 = vmov 0.0   ;;  %v81_v1 = vld [vmem:[#allocation4 + $0x8] sm:$0xff]  ;;  %v83_v3 = vld [vmem:[#allocation4 + $0x18] sm:$0xff]  ;;  %vm155_vm0 = vcmask 261120   ;;  %v115_v50 = vlaneseq }
  0x59   :  { %223 = vmatprep.mubr.f32.mxu0 %v930_v0  ;;  %294 = vmatprep.mubr.f32.mxu1 %v930_v0  ;;  %v89_v2 = vld [vmem:[#allocation4 + $0x48] sm:$0xff]  ;;  %v91_v5 = vld [vmem:[#allocation4 + $0x58] sm:$0xff]  ;;  %v80_v6 = vld [vmem:[#allocation4] sm:$0xff]  ;;  %vm451_vm1 = vcmask 1043456  }
  0x5a   :  { %v751_v4 = vpack.c.bf16 %v89_v2, %v81_v1  ;;  %v88_v7 = vld [vmem:[#allocation4 + $0x40] sm:$0xff]  ;;  %v759_v8 = vpack.c.bf16 %v91_v5, %v83_v3  ;;  %v82_v10 = vld [vmem:[#allocation4 + $0x10] sm:$0xff]  ;;  %v97_v12 = vld [vmem:[#allocation4 + $0x88] sm:$0xff]  ;;  %v116_v51 = vshrl.u32 %v115_v50, 7 }
  0x5b   :  { %v753_v9 = vpack.c.bf16 %v88_v7, %v80_v6  ;;  %v90_v11 = vld [vmem:[#allocation4 + $0x50] sm:$0xff]  ;;  %v105_v14 = vld [vmem:[#allocation4 + $0xc8] sm:$0xff]  ;;  %v99_v15 = vld [vmem:[#allocation4 + $0x98] sm:$0xff] }
  0x5c   :  { %752 = vmatprep.subr.bf16.mxu0 %v751_v4  ;;  %v761_v13 = vpack.c.bf16 %v90_v11, %v82_v10  ;;  %v107_v16 = vld [vmem:[#allocation4 + $0xd8] sm:$0xff]  ;;  %760 = vmatprep.subr.bf16.mxu1 %v759_v8  ;;  %v755_v17 = vpack.c.bf16 %v105_v14, %v97_v12  ;;  %v96_v19 = vld [vmem:[#allocation4 + $0x80] sm:$0xff]  ;;  %v98_v21 = vld [vmem:[#allocation4 + $0x90] sm:$0xff]  ;;  %v1029_v52 = vsub.s32 0, %v116_v51  ;;  %v1031_v54 = vsub.s32 2, %v116_v51 }
  0x5d   :  { %754 = vmatpush1.bf16.msra.mxu0 %v753_v9  ;;  %v763_v18 = vpack.c.bf16 %v107_v16, %v99_v15  ;;  %v104_v20 = vld [vmem:[#allocation4 + $0xc0] sm:$0xff]  ;;  %v106_v23 = vld [vmem:[#allocation4 + $0xd0] sm:$0xff]  ;;  %v85_v24 = vld [vmem:[#allocation4 + $0x28] sm:$0xff]  ;;  %v1033_v55 = vsub.s32 1, %v116_v51  ;;  %v1035_v56 = vsub.s32 3, %v116_v51  ;;  %v1043_v1 = vsub.s32 4, %v116_v51 }
  0x5e   :  { %762 = vmatpush1.bf16.msra.mxu1 %v761_v13  ;;  %v757_v22 = vpack.c.bf16 %v104_v20, %v96_v19  ;;  %756 = vmatprep.subr.bf16.mxu0 %v755_v17  ;;  %v765_v25 = vpack.c.bf16 %v106_v23, %v98_v21  ;;  %v112_v26 = vld [vmem:[#allocation2] sm:$0xf]  ;;  %v93_v27 = vld [vmem:[#allocation4 + $0x68] sm:$0xff]  ;;  %v84_v32 = vld [vmem:[#allocation4 + $0x20] sm:$0xff]  ;;  %v1045_v2 = vsub.s32 6, %v116_v51  ;;  %v1051_v6 = vsub.s32 5, %v116_v51 }
  0x5f   :  { %764 = vmatprep.subr.bf16.mxu1 %v763_v18  ;;  %v87_v28 = vld [vmem:[#allocation4 + $0x38] sm:$0xff]  ;;  %v767_v30 = vpack.c.bf16 %v93_v27, %v85_v24  ;;  %v92_v33 = vld [vmem:[#allocation4 + $0x60] sm:$0xff]  ;;  %v86_v34 = vld [vmem:[#allocation4 + $0x30] sm:$0xff]  ;;  %v1056_v9 = vsub.s32 7, %v116_v51 }
  0x60   :  { %v95_v29 = vld [vmem:[#allocation4 + $0x78] sm:$0xff]  ;;  %v769_v35 = vpack.c.bf16 %v92_v33, %v84_v32  ;;  %v94_v36 = vld [vmem:[#allocation4 + $0x70] sm:$0xff]  ;;  %v101_v37 = vld [vmem:[#allocation4 + $0xa8] sm:$0xff] }
  0x61   :  { %v775_v31 = vpack.c.bf16 %v95_v29, %v87_v28  ;;  %758 = vmatpush1.bf16.msra.mxu0 %v757_v22  ;;  %v109_v38 = vld [vmem:[#allocation4 + $0xe8] sm:$0xff]  ;;  %v777_v39 = vpack.c.bf16 %v94_v36, %v86_v34  ;;  %v103_v41 = vld [vmem:[#allocation4 + $0xb8] sm:$0xff]  ;;  %v100_v43 = vld [vmem:[#allocation4 + $0xa0] sm:$0xff] }
  0x62   :  { %766 = vmatpush1.bf16.msra.mxu1 %v765_v25  ;;  %768 = vmatprep.subr.bf16.mxu0 %v767_v30  ;;  %v771_v40 = vpack.c.bf16 %v109_v38, %v101_v37  ;;  %v111_v42 = vld [vmem:[#allocation4 + $0xf8] sm:$0xff]  ;;  %v108_v45 = vld [vmem:[#allocation4 + $0xe0] sm:$0xff]  ;;  %v102_v46 = vld [vmem:[#allocation4 + $0xb0] sm:$0xff] }
  0x63   :  { %776 = vmatprep.subr.bf16.mxu1 %v775_v31  ;;  %v779_v44 = vpack.c.bf16 %v111_v42, %v103_v41  ;;  %v110_v47 = vld [vmem:[#allocation4 + $0xf0] sm:$0xff]  ;;  %v773_v48 = vpack.c.bf16 %v108_v45, %v100_v43  ;;  %v113_v53 = vld [vmem:[#allocation6] sm:$0xff] }
  0x64   :  { %747 = vmatmul.mubr.msk.f32.vlgmr.msra.gmra.mrb[0].mxu0 %vm155_vm0, %v112_v26  ;;  %v781_v49 = vpack.c.bf16 %v110_v47, %v102_v46  ;;  %v118_v57 = vrot.slane %v113_v53, %v1029_v52  ;;  %v126_v58 = vrot.slane %v113_v53, %v1031_v54  ;;  %v122_v59 = vrot.slane %v113_v53, %v1033_v55 }
  0x65   :  { %748 = vmatmul.mubr.msk.f32.vlgmr.msra.gmra.mrb[0].mxu1 %vm155_vm0, %v112_v26  ;;  %770 = vmatpush1.bf16.msra.mxu0 %v769_v35  ;;  %v130_v60 = vrot.slane %v113_v53, %v1035_v56  ;;  %v134_v14 = vrot.slane %v113_v53, %v1043_v1  ;;  %v142_v15 = vrot.slane %v113_v53, %v1045_v2 }
  0x66   :  { %778 = vmatpush1.bf16.msra.mxu1 %v777_v39  ;;  %772 = vmatprep.subr.bf16.mxu0 %v771_v40  ;;  %v138_v19 = vrot.slane %v113_v53, %v1051_v6  ;;  %v146_v23 = vrot.slane %v113_v53, %v1056_v9 }
  0x67   :  { %780 = vmatprep.subr.bf16.mxu1 %v779_v44  ;;  %365 = vmatprep.mubr.f32.mxu0 %v930_v0 }
  0x68   :  { %436 = vmatprep.mubr.f32.mxu1 %v930_v0 }
  0x69   :  { %774 = vmatpush1.bf16.msra.mxu0 %v773_v48 }
  0x6a   :  { %782 = vmatpush1.bf16.msra.mxu1 %v781_v49 }
  0x6c   :  { %749 = vmatmul.mubr.msk.f32.vlgmr.msra.gmra.mrb[2].mxu0 %vm155_vm0, %v112_v26 }
  0x6d   :  { %750 = vmatmul.mubr.msk.f32.vlgmr.msra.gmra.mrb[2].mxu1 %vm155_vm0, %v112_v26 }
 0x137   :  { %v225_v61 = vpop.f32.mrb[0].mxu0 }
 0x138   :  { %v1041_v62 = vadd.f32 %v225_v61, %v118_v57  ;;  %v296_v63 = vpop.f32.mrb[0].mxu1  ;;  %v227_v0 = vpop.f32.mrb[1].mxu0 }
 0x139   :  { %v1047_v3 = vadd.f32 %v296_v63, %v126_v58  ;;  %v1049_v4 = vadd.f32 %v227_v0, %v122_v59  ;;  %v298_v5 = vpop.f32.mrb[1].mxu1 }
 0x13a   :  { %v443_v7 = vmax.f32 %v1041_v62, 0.0  ;;  %v1054_v8 = vadd.f32 %v298_v5, %v130_v60 }
 0x13b   :  { %v445_v10 = vmax.f32 %v1047_v3, 0.0  ;;  %v444_v11 = vmax.f32 %v1049_v4, 0.0 }
 0x13c   :  { %v452_v12 = vsel %vm451_vm1, %v443_v7, 0.0  ;;  %v446_v13 = vmax.f32 %v1054_v8, 0.0 }
 0x13d   :  { %v453_v16 = vrot.slane %v452_v12, 4  ;;  %v466_v17 = vsel %vm451_vm1, %v445_v10, 0.0  ;;  %v459_v18 = vsel %vm451_vm1, %v444_v11, 0.0 }
 0x13e   :  { %v467_v20 = vrot.slane %v466_v17, 4  ;;  %v460_v21 = vrot.slane %v459_v18, 4  ;;  %v473_v22 = vsel %vm451_vm1, %v446_v13, 0.0 }
 0x13f   :  { %v454_v24 = vadd.f32 %v453_v16, %v452_v12  ;;  %v474_v25 = vrot.slane %v473_v22, 4  ;;  %v367_v26 = vpop.f32.mrb[2].mxu0 }
 0x140   :  { %v468_v27 = vadd.f32 %v467_v20, %v466_v17  ;;  %v461_v28 = vadd.f32 %v460_v21, %v459_v18  ;;  %v1077_v29 = vadd.f32 %v367_v26, %v134_v14  ;;  %v438_v30 = vpop.f32.mrb[2].mxu1  ;;  %v369_v31 = vpop.f32.mrb[3].mxu0 }
 0x141   :  { %v455_v32 = vrot.slane %v454_v24, 2  ;;  %v475_v33 = vadd.f32 %v474_v25, %v473_v22  ;;  %v1079_v34 = vadd.f32 %v438_v30, %v142_v15  ;;  %v1081_v35 = vadd.f32 %v369_v31, %v138_v19  ;;  %v440_v36 = vpop.f32.mrb[3].mxu1 }
 0x142   :  { %v469_v37 = vrot.slane %v468_v27, 2  ;;  %v462_v38 = vrot.slane %v461_v28, 2  ;;  %v447_v39 = vmax.f32 %v1077_v29, 0.0  ;;  %v1084_v40 = vadd.f32 %v440_v36, %v146_v23 }
 0x143   :  { %v456_v41 = vadd.f32 %v455_v32, %v454_v24  ;;  %v476_v42 = vrot.slane %v475_v33, 2  ;;  %v449_v43 = vmax.f32 %v1079_v34, 0.0  ;;  %v448_v44 = vmax.f32 %v1081_v35, 0.0 }
 0x144   :  { %v470_v45 = vadd.f32 %v469_v37, %v468_v27  ;;  %v463_v46 = vadd.f32 %v462_v38, %v461_v28  ;;  %v480_v47 = vsel %vm451_vm1, %v447_v39, 0.0  ;;  %v450_v48 = vmax.f32 %v1084_v40, 0.0 }
 0x145   :  { %v457_v49 = vrot.slane %v456_v41, 1  ;;  %v477_v50 = vadd.f32 %v476_v42, %v475_v33  ;;  %v481_v51 = vrot.slane %v480_v47, 4  ;;  %v494_v53 = vsel %vm451_vm1, %v449_v43, 0.0 }
 0x146   :  { %v471_v57 = vrot.slane %v470_v45, 1  ;;  %v464_v58 = vrot.slane %v463_v46, 1  ;;  %v495_v59 = vrot.slane %v494_v53, 4  ;;  %v487_v60 = vsel %vm451_vm1, %v448_v44, 0.0 }
 0x147   :  { %v458_v61 = vadd.f32 %v457_v49, %v456_v41  ;;  %v478_v63 = vrot.slane %v477_v50, 1  ;;  %v482_v0 = vadd.f32 %v481_v51, %v480_v47  ;;  %v488_v5 = vrot.slane %v487_v60, 4 }
 0x148   :  { %v472_v12 = vadd.f32 %v471_v57, %v470_v45  ;;  %v465_v14 = vadd.f32 %v464_v58, %v463_v46  ;;  %v496_v15 = vadd.f32 %v495_v59, %v494_v53  ;;  %v501_v16 = vsel %vm451_vm1, %v450_v48, 0.0 }
 0x149   :  { %v508_v17 = vmul.f32 0.25, %v458_v61  ;;  %v479_v18 = vadd.f32 %v478_v63, %v477_v50  ;;  %v483_v19 = vrot.slane %v482_v0, 2  ;;  %v489_v20 = vadd.f32 %v488_v5, %v487_v60 }
 0x14a   :  { %v510_v21 = vmul.f32 0.25, %v472_v12  ;;  %v509_v22 = vmul.f32 0.25, %v465_v14  ;;  %v497_v23 = vrot.slane %v496_v15, 2  ;;  %v502_v24 = vrot.slane %v501_v16, 4 }
 0x14b   :  { %v1103_v25 = vsub.f32 %v443_v7, %v508_v17  ;;  %v511_v26 = vmul.f32 0.25, %v479_v18  ;;  %v484_v27 = vadd.f32 %v483_v19, %v482_v0  ;;  %v490_v28 = vrot.slane %v489_v20, 2 }
 0x14c   :  { %v1107_v30 = vsub.f32 %v445_v10, %v510_v21  ;;  %v1111_v31 = vsub.f32 %v444_v11, %v509_v22  ;;  %v498_v32 = vadd.f32 %v497_v23, %v496_v15  ;;  %v503_v33 = vadd.f32 %v502_v24, %v501_v16 }
 0x14d   :  { %v524_v36 = vmul.f32 %v1103_v25, %v1103_v25  ;;  %v1117_v62 = vsub.f32 %v446_v13, %v511_v26  ;;  %v485_v7 = vrot.slane %v484_v27, 1  ;;  %v491_v37 = vadd.f32 %v490_v28, %v489_v20 }
 0x14e   :  { %v526_v3 = vmul.f32 %v1107_v30, %v1107_v30  ;;  %v525_v10 = vmul.f32 %v1111_v31, %v1111_v31  ;;  %v499_v4 = vrot.slane %v498_v32, 1  ;;  %v504_v11 = vrot.slane %v503_v33, 2 }
 0x14f   :  { %v532_v38 = vsel %vm451_vm1, %v524_v36, 0.0  ;;  %v527_v41 = vmul.f32 %v1117_v62, %v1117_v62  ;;  %v486_v42 = vadd.f32 %v485_v7, %v484_v27  ;;  %v492_v45 = vrot.slane %v491_v37, 1 }
 0x150   :  { %v533_v8 = vrot.slane %v532_v38, 4  ;;  %v546_v13 = vsel %vm451_vm1, %v526_v3, 0.0  ;;  %v539_v46 = vsel %vm451_vm1, %v525_v10, 0.0  ;;  %v500_v47 = vadd.f32 %v499_v4, %v498_v32 }
 0x151   :  { %v547_v49 = vrot.slane %v546_v13, 4  ;;  %v540_v50 = vrot.slane %v539_v46, 4  ;;  %v553_v51 = vsel %vm451_vm1, %v527_v41, 0.0  ;;  %v512_v53 = vmul.f32 0.25, %v486_v42 }
 0x152   :  { %v534_v57 = vadd.f32 %v533_v8, %v532_v38  ;;  %v554_v58 = vrot.slane %v553_v51, 4  ;;  %v514_v59 = vmul.f32 0.25, %v500_v47  ;;  %v493_v60 = vadd.f32 %v492_v45, %v491_v37 }
 0x153   :  { %v548_v61 = vadd.f32 %v547_v49, %v546_v13  ;;  %v541_v63 = vadd.f32 %v540_v50, %v539_v46  ;;  %v1131_v0 = vsub.f32 %v447_v39, %v512_v53  ;;  %v505_v5 = vadd.f32 %v504_v11, %v503_v33 }
 0x154   :  { %v535_v12 = vrot.slane %v534_v57, 2  ;;  %v555_v14 = vadd.f32 %v554_v58, %v553_v51  ;;  %v1135_v15 = vsub.f32 %v449_v43, %v514_v59  ;;  %v513_v16 = vmul.f32 0.25, %v493_v60 }
 0x155   :  { %v549_v17 = vrot.slane %v548_v61, 2  ;;  %v542_v18 = vrot.slane %v541_v63, 2  ;;  %v528_v19 = vmul.f32 %v1131_v0, %v1131_v0  ;;  %v506_v20 = vrot.slane %v505_v5, 1 }
 0x156   :  { %v536_v21 = vadd.f32 %v535_v12, %v534_v57  ;;  %v556_v22 = vrot.slane %v555_v14, 2  ;;  %v530_v29 = vmul.f32 %v1135_v15, %v1135_v15  ;;  %v1143_v39 = vsub.f32 %v448_v44, %v513_v16 }
 0x157   :  { %v550_v23 = vadd.f32 %v549_v17, %v548_v61  ;;  %v543_v34 = vadd.f32 %v542_v18, %v541_v63  ;;  %v560_v43 = vsel %vm451_vm1, %v528_v19, 0.0  ;;  %v507_v24 = vadd.f32 %v506_v20, %v505_v5 }
 0x158   :  { %v537_v26 = vrot.slane %v536_v21, 1  ;;  %v557_v27 = vadd.f32 %v556_v22, %v555_v14  ;;  %v561_v28 = vrot.slane %v560_v43, 4  ;;  %v574_v32 = vsel %vm451_vm1, %v530_v29, 0.0 }
 0x159   :  { %v551_v33 = vrot.slane %v550_v23, 1  ;;  %v544_v36 = vrot.slane %v543_v34, 1  ;;  %v575_v7 = vrot.slane %v574_v32, 4  ;;  %v529_v37 = vmul.f32 %v1143_v39, %v1143_v39 }
 0x15a   :  { %v538_v3 = vadd.f32 %v537_v26, %v536_v21  ;;  %v558_v35 = vrot.slane %v557_v27, 1  ;;  %v562_v44 = vadd.f32 %v561_v28, %v560_v43  ;;  %v515_v10 = vmul.f32 0.25, %v507_v24 }
 0x15b   :  { %v552_v4 = vadd.f32 %v551_v33, %v550_v23  ;;  %v545_v11 = vadd.f32 %v544_v36, %v543_v34  ;;  %v576_v38 = vadd.f32 %v575_v7, %v574_v32  ;;  %v567_v41 = vsel %vm451_vm1, %v529_v37, 0.0  ;;  %v1157_v23 = vld [vmem:[#allocation7] sm:$0xff] }
 0x15c   :  { %v588_v42 = vmul.f32 0.25, %v538_v3  ;;  %v559_v45 = vadd.f32 %v558_v35, %v557_v27  ;;  %v563_v8 = vrot.slane %v562_v44, 2  ;;  %v568_v13 = vrot.slane %v567_v41, 4  ;;  %v1159_v27 = vld [vmem:[#allocation9] sm:$0xff] }
 0x15d   :  { %v590_v46 = vmul.f32 0.25, %v552_v4  ;;  %v589_v47 = vmul.f32 0.25, %v545_v11  ;;  %v577_v49 = vrot.slane %v576_v38, 2  ;;  %v1152_v50 = vsub.f32 %v450_v48, %v515_v10 }
 0x15e   :  { %v596_v51 = vadd.f32 1e-05, %v588_v42  ;;  %v591_v53 = vmul.f32 0.25, %v559_v45  ;;  %v564_v57 = vadd.f32 %v563_v8, %v562_v44  ;;  %v569_v58 = vadd.f32 %v568_v13, %v567_v41 }
 0x15f   :  { %v598_v59 = vadd.f32 1e-05, %v590_v46  ;;  %v597_v60 = vadd.f32 1e-05, %v589_v47  ;;  %v578_v61 = vadd.f32 %v577_v49, %v576_v38  ;;  %v531_v63 = vmul.f32 %v1152_v50, %v1152_v50 }
 0x160   :  { %791 = vrsqrt.f32 %v596_v51  ;;  %v599_v5 = vadd.f32 1e-05, %v591_v53  ;;  %v565_v12 = vrot.slane %v564_v57, 1  ;;  %v570_v14 = vrot.slane %v569_v58, 2 }
 0x161   :  { %793 = vrsqrt.f32 %v598_v59  ;;  %v579_v16 = vrot.slane %v578_v61, 1  ;;  %v581_v40 = vsel %vm451_vm1, %v531_v63, 0.0  ;;  %v625_v33 = vrot.slane %v1157_v23, %v1029_v52 }
 0x162   :  { %795 = vrsqrt.f32 %v597_v60  ;;  %v566_v48 = vadd.f32 %v565_v12, %v564_v57  ;;  %v571_v17 = vadd.f32 %v570_v14, %v569_v58  ;;  %v582_v18 = vrot.slane %v581_v40, 4 }
 0x163   :  { %797 = vrsqrt.f32 %v599_v5  ;;  %v580_v19 = vadd.f32 %v579_v16, %v578_v61  ;;  %v633_v7 = vrot.slane %v1157_v23, %v1031_v54  ;;  %v675_v10 = vrot.slane %v1159_v27, %v1029_v52 }
 0x164   :  { %v592_v20 = vmul.f32 0.25, %v566_v48  ;;  %v572_v21 = vrot.slane %v571_v17, 1  ;;  %v583_v22 = vadd.f32 %v582_v18, %v581_v40  ;;  %v683_v4 = vrot.slane %v1159_v27, %v1031_v54 }
 0x165   :  { %v594_v29 = vmul.f32 0.25, %v580_v19  ;;  %v629_v11 = vrot.slane %v1157_v23, %v1033_v55  ;;  %v637_v42 = vrot.slane %v1157_v23, %v1035_v56  ;;  %v679_v52 = vrot.slane %v1159_v27, %v1033_v55 }
 0x166   :  { %v600_v34 = vadd.f32 1e-05, %v592_v20  ;;  %v573_v43 = vadd.f32 %v572_v21, %v571_v17  ;;  %v584_v24 = vrot.slane %v583_v22, 2  ;;  %v687_v47 = vrot.slane %v1159_v27, %v1035_v56 }
 0x167   :  { %v602_v26 = vadd.f32 1e-05, %v594_v29  ;;  %v641_v60 = vrot.slane %v1157_v23, %v1043_v1  ;;  %v691_v12 = vrot.slane %v1159_v27, %v1043_v1  ;;  %v645_v14 = vrot.slane %v1157_v23, %v1051_v6 }
 0x168   :  { %799 = vrsqrt.f32 %v600_v34  ;;  %v593_v28 = vmul.f32 0.25, %v573_v43  ;;  %v585_v32 = vadd.f32 %v584_v24, %v583_v22  ;;  %v649_v40 = vrot.slane %v1157_v23, %v1045_v2 }
 0x169   :  { %801 = vrsqrt.f32 %v602_v26  ;;  %v695_v17 = vrot.slane %v1159_v27, %v1051_v6  ;;  %v699_v20 = vrot.slane %v1159_v27, %v1045_v2  ;;  %v653_v22 = vrot.slane %v1157_v23, %v1056_v9 }
 0x16a   :  { %v792_v36 = vpop.eup %791  ;;  %v601_v37 = vadd.f32 1e-05, %v593_v28  ;;  %v586_v3 = vrot.slane %v585_v32, 1 }
 0x16b   :  { %v794_v35 = vpop.eup %793  ;;  %v612_v44 = vmul.f32 %v792_v36, %v1103_v25 }
 0x16c   :  { %v796_v38 = vpop.eup %795  ;;  %v614_v41 = vmul.f32 %v794_v35, %v1107_v30  ;;  %803 = vrsqrt.f32 %v601_v37  ;;  %v587_v45 = vadd.f32 %v586_v3, %v585_v32 }
 0x16d   :  { %v798_v8 = vpop.eup %797  ;;  %v662_v13 = vmul.f32 %v625_v33, %v612_v44  ;;  %v613_v25 = vmul.f32 %v796_v38, %v1111_v31 }
 0x16e   :  { %v664_v46 = vmul.f32 %v633_v7, %v614_v41  ;;  %v615_v54 = vmul.f32 %v798_v8, %v1117_v62  ;;  %v595_v49 = vmul.f32 0.25, %v587_v45 }
 0x16f   :  { %v712_v30 = vadd.f32 %v675_v10, %v662_v13  ;;  %v663_v51 = vmul.f32 %v629_v11, %v613_v25 }
 0x170   :  { %v714_v53 = vadd.f32 %v683_v4, %v664_v46  ;;  %v665_v57 = vmul.f32 %v637_v42, %v615_v54  ;;  %v603_v58 = vadd.f32 1e-05, %v595_v49 }
 0x171   :  { %v713_v59 = vadd.f32 %v679_v52, %v663_v51 }
 0x172   :  { %v800_v31 = vpop.eup %799  ;;  %v715_v61 = vadd.f32 %v687_v47, %v665_v57  ;;  %805 = vrsqrt.f32 %v603_v58 }
 0x173   :  { %v728_v55 = vcombine.low %v712_v30, %v713_v59  ;;  %v616_v63 = vmul.f32 %v800_v31, %v1131_v0  ;;  %v802_v62 = vpop.eup %801 }
 0x174   :  { %v729_v5 = vcombine.low %v714_v53, %v715_v61  ;;  %v618_v0 = vmul.f32 %v802_v62, %v1135_v15 }
 0x175   :  { %736 = vst [vmem:[%s1218_s5] sm:$0xff] %v728_v55  ;;  %v666_v56 = vmul.f32 %v641_v60, %v616_v63 }
 0x176   :  { %v804_v16 = vpop.eup %803  ;;  %737 = vst [vmem:[%s1218_s5 + $0x8] sm:$0xff] %v729_v5  ;;  %v668_v19 = vmul.f32 %v649_v40, %v618_v0 }
 0x177   :  { %v617_v48 = vmul.f32 %v804_v16, %v1143_v39  ;;  %v716_v18 = vadd.f32 %v691_v12, %v666_v56  ;;  %v703_v39 = vrot.slane %v1159_v27, %v1056_v9 }
 0x178   :  { %v718_v43 = vadd.f32 %v699_v20, %v668_v19 }
 0x179   :  { %v667_v1 = vmul.f32 %v645_v14, %v617_v48 }
 0x17b   :  { %v717_v21 = vadd.f32 %v695_v17, %v667_v1 }
 0x17c   :  { %v806_v29 = vpop.eup %805 }
 0x17d   :  { %v730_v15 = vcombine.low %v716_v18, %v717_v21  ;;  %v619_v34 = vmul.f32 %v806_v29, %v1152_v50 }
 0x17f   :  { %738 = vst [vmem:[%s1218_s5 + $0x10] sm:$0xff] %v730_v15  ;;  %v669_v6 = vmul.f32 %v653_v22, %v619_v34 }
 0x181   :  { %v719_v24 = vadd.f32 %v703_v39, %v669_v6 }
 0x183   :  { %v731_v26 = vcombine.low %v718_v43, %v719_v24 }
 0x185   :  { %739 = vst [vmem:[%s1218_s5 + $0x18] sm:$0xff] %v731_v26 }
 0x186   :  { %744 = vsyncpa [#allocation3], 1 }
 0x187   :  { %745 = vsyncpa [#allocation5], 1 }
 0x188   :  { %746 = vsyncpa [#allocation8], 1 }

// kernel: generator_forward.5
= control target key start
LH: loop header
LB: loop body
LE: loop exit
PB: predicated region body
PF: predicated region fallthrough
CT: control target
= control target key end

     0   :  { %s6662_s0 = inlined_call_operand.vmem [shape: f32[4,1024], index: 0, kind: input, shape index: {}]   ;;  %s6663_s1 = inlined_call_operand.hbm [shape: bf16[1024,6272], index: 1, kind: input, shape index: {}]   ;;  %s6664_s2 = inlined_call_operand.hbm [shape: f32[1,6272], index: 2, kind: input, shape index: {}]   ;;  %s6665_s3 = inlined_call_operand.hbm [shape: f32[1,6272], index: 3, kind: input, shape index: {}]   ;;  %s6666_s4 = inlined_call_operand.hbm [shape: f32[1,6272], index: 4, kind: input, shape index: {}]   ;;  %s6667_s5 = inlined_call_operand.vmem [shape: f32[4,6272], index: 5, kind: output, shape index: {}]  }
   0x1   :  { %6671 = sst [smem:[#allocation12_spill]] %s6663_s1 }
   0x2   :  { %6672 = sst [smem:[#allocation13_spill]] %s6664_s2 }
   0x3   :  { %10 = vsyncpa [#allocation3], 0 }
   0x4   :  { %12 = vsyncpa [#allocation3 + $0x1], 0 }
   0x5   :  { %13 = vsyncpa [#allocation5], 0 }
   0x6   :  { %15 = vsyncpa [#allocation5 + $0x1], 0 }
   0x7   :  { %16 = vsyncpa [#allocation8], 0 }
   0x8   :  { %18 = vsyncpa [#allocation8 + $0x1], 0  ;;  %s5797_s18 = smov 0   ;;  %s5799_s19 = smov 0  }
   0x9   :  { %s5801_s20 = smov 0   ;;  %s5803_s21 = smov 0  }
   0xa LB: > { %s5816_s22 = sadd.s32 4294967295, %s5758_s21   ;;  %s5819_s23 = sadd.s32 1, %s5758_s21   ;;  %s5758_s21 = sphi %s5803_s21, %s6688_s21   ;;  %s5754_s20 = sphi %s5801_s20, %s6687_s20   ;;  %s5750_s19 = sphi %s5799_s19, %s6686_s19   ;;  %s5746_s18 = sphi %s5797_s18, %s6685_s18  }
   0xb   : > { %s49_s24 = ssub.s32 %s5758_s21, %s5819_s23  ;;  %s52_s25 = sadd.s32 1, %s5754_s20 }
   0xc   : > { %p50_p0 = scmp.eq.s32.totalorder %s49_s24, 0  ;;  %p59_p1 = scmp.ne.s32.totalorder %s5754_s20, %s5750_s19 }
   0xd   : > { %p60_p2 = scmp.eq.s32.totalorder %s5758_s21, 0  ;;  %p65_p3 = scmp.ne.s32.totalorder %s5750_s19, %s5746_s18 }
   0xe   : > { %s5829_s26 = scalar_select %p50_p0, %s5754_s20, %s52_s25  }
   0xf   : > { %p61_p4 = por %p60_p2, %p59_p1  ;;  %p66_p5 = scmp.eq.s32.totalorder %s5816_s22, 0 }
  0x10   : > { %p4902_p6 = scmp.lt.s32.totalorder %s5758_s21, 7  ;;  %s5838_s28 = sand.u32 1, %s5754_s20  }
  0x11   : > { %p5833_p7 = por %p66_p5, %p65_p3  ;;  %s217_s30 = sand.u32 1, %s5758_s21  }
  0x12   : > { %p5840_p8 = pnand %p4902_p6, %p61_p4  ;;  %s5846_s6 = smul.u32 7, %s5838_s28 }
  0x13   : > { %s6673_s27 = scalar_select %p5833_p7, 1, 0 }
  0x14   : > { %s6674_s29 = scalar_select %p5840_p8, 1, 0 }
  0x15   : > { %s5849_s7 = smul.u32 112, %s5758_s21  ;;  %s6675_s2 = sld [smem:[#allocation13_spill]] }
  0x16   : > { %s221_s11 = scalar_lea.vmem [#allocation4], %s5846_s6  ;;  %s5862_s13 = scalar_lea.sflag [#allocation5], %s217_s30 }
  0x17   : > { %s229_s12 = sshll.u32 %s221_s11, 4  ;;  %p5868_p12 = pneg %p5840_p8  ;;  %s5859_s12 = int_to_ptr.vmem [resolvable:$true] %s229_s12 }
  0x1b   : > { %s5856_s10 = scalar_lea.hbm %s6675_s2, %s5849_s7  ;;  %s5601_s18 = scalar_lea.hbm %s6675_s2, 784 }
  0x1c   : > { %s5596_s14 = scalar_lea.hbm %s5856_s10, 112  ;;  %p5602_p1 = scmp.lt.u32.totalorder %s5856_s10, %s6675_s2 }
  0x1d   : > { %p5597_p11 = scmp.ne.s32.totalorder %s5856_s10, %s5596_s14  ;;  %p5603_p2 = scmp.lt.u32.totalorder %s5601_s18, %s5596_s14 }
  0x1e   : > { %p5605_p4 = scmp.lt.u32.totalorder %s5596_s14, %s5856_s10 }
  0x1f   : > { %p5599_p13 = pnand %p5868_p12, %p5597_p11  ;;  %p5604_p3 = por %p5603_p2, %p5602_p1 }
  0x21   : > { %p5600_p0 = pneg %p5599_p13  ;;  %p5606_p5 = por %p5605_p4, %p5604_p3 }
  0x23   : > { %p5607_p6 = pnand %p5606_p5, %p5600_p0 }
  0x25   : > { %5610 = shalt.err (!%p5607_p6)
}
  0x26   : > { %s5611_s30 = scalar_lea.vmem %s5859_s12, 112  ;;  %s5760_s8 = smov [#allocation4]  }
  0x27   : > { %p5612_p11 = scmp.ne.s32.totalorder %s5859_s12, %s5611_s30  ;;  %s5616_s9 = sshll.u32 %s5760_s8, 4  ;;  %s5617_s9 = int_to_ptr.vmem [resolvable:$false] %s5616_s9 }
  0x28   : > { %s5618_s11 = scalar_lea.vmem %s5617_s9, 224  ;;  %p5619_p10 = scmp.lt.s32.totalorder %s5859_s12, %s5617_s9 }
  0x29   : > { %p5614_p13 = pnand %p5612_p11, %p5868_p12  ;;  %p5620_p7 = scmp.lt.s32.totalorder %s5618_s11, %s5611_s30 }
  0x2b   : > { %p5615_p9 = pneg %p5614_p13  ;;  %p5621_p1 = por %p5620_p7, %p5619_p10 }
  0x2d   : > { %p5622_p2 = pnand %p5621_p1, %p5615_p9 }
  0x2f   : > { %5625 = shalt.err (!%p5622_p2)
}
  0x30   : > { %4895 = dma.hbm_to_vmem [thread:$0]  (!%p5840_p8), %s5856_s10, 112, %s5859_s12, %s5862_s13  }
  0x31   : > { %p6677_p0 = scmp.lt.s32.totalorder %s5758_s21, 8  ;;  %p6678_p3 = scmp.ge.s32.totalorder %s5758_s21, 1 }
  0x32   : > { %s4875_s16 = smul.u32 3584, %s5838_s28  ;;  %s6680_s1 = sld [smem:[#allocation12_spill]] }
  0x33   : > { %p5896_p4 = pnand %p6678_p3, %p6677_p0  ;;  %s4743_s17 = smul.u32 448, %s5758_s21 }
  0x34   : > { %s200_s30 = scalar_lea.vmem [#allocation2], %s4875_s16  ;;  %s197_s10 = scalar_lea.sflag [#allocation3], %s5838_s28 }
  0x35   : > { %s6679_s14 = scalar_select %p5896_p4, 1, 0 }
  0x36   : > { %s207_s8 = sshll.u32 %s200_s30, 4  ;;  %s5907_s8 = int_to_ptr.vmem [resolvable:$true] %s207_s8 }
  0x38   : > { %s5905_s25 = scalar_lea.hbm %s6680_s1, %s4743_s17  ;;  %s5631_s11 = scalar_lea.hbm %s6680_s1, 401408 }
  0x39   : > { %s5626_s12 = scalar_lea.hbm %s5905_s25, 57344  ;;  %p5632_p5 = scmp.lt.u32.totalorder %s5905_s25, %s6680_s1 }
  0x3a   : > { %p5627_p7 = scmp.ne.s32.totalorder %s5905_s25, %s5626_s12  ;;  %p5633_p6 = scmp.lt.u32.totalorder %s5631_s11, %s5626_s12 }
  0x3b   : > { %p5635_p13 = scmp.lt.u32.totalorder %s5626_s12, %s5905_s25 }
  0x3c   : > { %p5629_p9 = pnand %p5627_p7, %p5868_p12  ;;  %p5634_p11 = por %p5633_p6, %p5632_p5 }
  0x3e   : > { %p5630_p10 = pneg %p5629_p9  ;;  %p5636_p1 = por %p5635_p13, %p5634_p11 }
  0x40   : > { %p5637_p2 = pnand %p5636_p1, %p5630_p10 }
  0x42   : > { %5640 = shalt.err (!%p5637_p2)
}
  0x43   : > { %s5641_s16 = scalar_lea.vmem %s5907_s8, 57344  ;;  %s5761_s24 = smov [#allocation2]  }
  0x44   : > { %p5642_p0 = scmp.ne.s32.totalorder %s5907_s8, %s5641_s16  ;;  %s5646_s30 = sshll.u32 %s5761_s24, 4  ;;  %s5647_s30 = int_to_ptr.vmem [resolvable:$false] %s5646_s30 }
  0x45   : > { %s5648_s21 = scalar_lea.vmem %s5647_s30, 114688  ;;  %p5649_p9 = scmp.lt.s32.totalorder %s5907_s8, %s5647_s30 }
  0x46   : > { %p5644_p3 = pnand %p5642_p0, %p5868_p12  ;;  %p5650_p4 = scmp.lt.s32.totalorder %s5648_s21, %s5641_s16 }
  0x48   : > { %p5645_p7 = pneg %p5644_p3  ;;  %p5651_p5 = por %p5650_p4, %p5649_p9 }
  0x4a   : > { %p5652_p6 = pnand %p5651_p5, %p5645_p7 }
  0x4c   : > { %5655 = shalt.err (!%p5652_p6)
}
  0x4d   : > { %s5762_s12 = smov 3136   ;;  %s5763_s9 = smov 448  }
  0x4e   : > { %s5764_s11 = smov 28   ;;  %s5937_s16 = scalar_lea.hbm %s6665_s3, %s5849_s7 }
  0x4f   : > { %4892 = dma.hbm_to_vmem [thread:$0]  (!%p5840_p8), %s5905_s25, 57344, %s5907_s8, %s197_s10, %s5762_s12, %s5763_s9, %s5764_s11  }
  0x50   : > { %s240_s24 = scalar_lea.vmem [#allocation6], %s5846_s6  ;;  %s5656_s21 = scalar_lea.hbm %s5937_s16, 112 }
  0x51   : > { %s248_s30 = sshll.u32 %s240_s24, 4  ;;  %p5657_p4 = scmp.ne.s32.totalorder %s5937_s16, %s5656_s21  ;;  %s249_s30 = int_to_ptr.vmem [resolvable:$true] %s248_s30 }
  0x52   : > { %s5661_s25 = scalar_lea.hbm %s6665_s3, 784  ;;  %p5662_p13 = scmp.lt.u32.totalorder %s5937_s16, %s6665_s3 }
  0x53   : > { %p5659_p10 = pnand %p5657_p4, %p5868_p12  ;;  %p5663_p1 = scmp.lt.u32.totalorder %s5661_s25, %s5656_s21 }
  0x54   : > { %p5665_p0 = scmp.lt.u32.totalorder %s5656_s21, %s5937_s16 }
  0x55   : > { %p5660_p11 = pneg %p5659_p10  ;;  %p5664_p2 = por %p5663_p1, %p5662_p13 }
  0x57   : > { %p5666_p3 = por %p5665_p0, %p5664_p2 }
  0x59   : > { %p5667_p7 = pnand %p5666_p3, %p5660_p11 }
  0x5b   : > { %5670 = shalt.err (!%p5667_p7)
}
  0x5c   : > { %s5671_s12 = scalar_lea.vmem %s249_s30, 112  ;;  %s5765_s9 = smov [#allocation6]  }
  0x5d   : > { %p5672_p9 = scmp.ne.s32.totalorder %s249_s30, %s5671_s12  ;;  %s5676_s11 = sshll.u32 %s5765_s9, 4  ;;  %s5677_s11 = int_to_ptr.vmem [resolvable:$false] %s5676_s11 }
  0x5e   : > { %s5678_s1 = scalar_lea.vmem %s5677_s11, 224  ;;  %p5679_p4 = scmp.lt.s32.totalorder %s249_s30, %s5677_s11 }
  0x5f   : > { %p5674_p5 = pnand %p5672_p9, %p5868_p12  ;;  %p5680_p10 = scmp.lt.s32.totalorder %s5678_s1, %s5671_s12 }
  0x61   : > { %p5675_p6 = pneg %p5674_p5  ;;  %p5681_p8 = por %p5680_p10, %p5679_p4 }
  0x63   : > { %p5682_p1 = pnand %p5681_p8, %p5675_p6 }
  0x65   : > { %5685 = shalt.err (!%p5682_p1)
}
  0x66   : > { %p6681_p13 = scmp.ne.s32.totalorder %s6674_s29, 0  ;;  %s5962_s18 = scalar_lea.hbm %s6666_s4, %s5849_s7 }
  0x67   : > { %s259_s24 = scalar_lea.vmem [#allocation7], %s5846_s6  ;;  %s256_s25 = scalar_lea.sflag [#allocation8], %s5838_s28 }
  0x68   : > { %4898 = dma.hbm_to_vmem [thread:$0]  (!%p6681_p13), %s5937_s16, 112, %s249_s30, %s5862_s13  }
  0x69   : > { %s267_s21 = sshll.u32 %s259_s24, 4  ;;  %s5686_s8 = scalar_lea.hbm %s5962_s18, 112  ;;  %s268_s21 = int_to_ptr.vmem [resolvable:$true] %s267_s21 }
  0x6a   : > { %p5687_p8 = scmp.ne.s32.totalorder %s5962_s18, %s5686_s8  ;;  %s5691_s16 = scalar_lea.hbm %s6666_s4, 784 }
  0x6b   : > { %p5692_p0 = scmp.lt.u32.totalorder %s5962_s18, %s6666_s4  ;;  %p5693_p3 = scmp.lt.u32.totalorder %s5691_s16, %s5686_s8 }
  0x6c   : > { %p5689_p11 = pnand %p5687_p8, %p5868_p12  ;;  %p5695_p9 = scmp.lt.u32.totalorder %s5686_s8, %s5962_s18 }
  0x6d   : > { %p5694_p7 = por %p5693_p3, %p5692_p0 }
  0x6e   : > { %p5690_p2 = pneg %p5689_p11 }
  0x6f   : > { %p5696_p5 = por %p5695_p9, %p5694_p7 }
  0x71   : > { %p5697_p6 = pnand %p5696_p5, %p5690_p2 }
  0x73   : > { %5700 = shalt.err (!%p5697_p6)
}
  0x74   : > { %s5701_s28 = scalar_lea.vmem %s268_s21, 112  ;;  %s5766_s6 = smov [#allocation7]  }
  0x75   : > { %p5702_p4 = scmp.ne.s32.totalorder %s268_s21, %s5701_s28  ;;  %s5706_s12 = sshll.u32 %s5766_s6, 4  ;;  %s5707_s12 = int_to_ptr.vmem [resolvable:$false] %s5706_s12 }
  0x76   : > { %s5708_s9 = scalar_lea.vmem %s5707_s12, 224  ;;  %p5709_p8 = scmp.lt.s32.totalorder %s268_s21, %s5707_s12 }
  0x77   : > { %p5704_p10 = pnand %p5702_p4, %p5868_p12  ;;  %p5710_p11 = scmp.lt.s32.totalorder %s5708_s9, %s5701_s28 }
  0x79   : > { %p5705_p1 = pneg %p5704_p10  ;;  %p5711_p13 = por %p5710_p11, %p5709_p8 }
  0x7b   : > { %p5712_p0 = pnand %p5711_p13, %p5705_p1 }
  0x7d   : > { %5715 = shalt.err (!%p5712_p0)
}
  0x7e   : > { %p6682_p3 = scmp.ne.s32.totalorder %s6674_s29, 0  ;;  %p6683_p2 = scmp.ne.s32.totalorder %s6679_s14, 0 }
  0x7f   : > { %s278_s15 = sand.u32 (!%p6683_p2), 1, %s5750_s19   ;;  %p6684_p12 = scmp.ne.s32.totalorder (!%p6683_p2), %s6673_s27, 0 }
  0x80   : > { %4901 = dma.hbm_to_vmem [thread:$0]  (!%p6682_p3), %s5962_s18, 112, %s268_s21, %s256_s25  }
  0x81   : > { %276 = sbr.rel (%p6683_p2) target bundleno = 868 (0x364), region = 40  ;;  %s279_s1 = scalar_lea.sflag (!%p6683_p2), [#allocation3], %s278_s15 }
  0x82   : > { %s4879_s11 = smul.u32 (!%p6683_p2), 3584, %s278_s15 }
  0x84   : > { %s5986_s2 = scalar_lea.vmem (!%p6683_p2), [#allocation2], %s4879_s11 }
  0x88   : > { %5733 = dma.done.wait (%p6684_p12), %s279_s1, 57344  }
  0x89   : > { %5735 = vsyncadd (%p6684_p12), %s279_s1, 4294909952  ;;  %s287_s29 = sand.u32 1, %s5816_s22   ;;  %s5993_s17 = smul.u32 7, %s278_s15 }
  0x8a   : > { %s288_s14 = scalar_lea.sflag [#allocation5], %s287_s29 }
  0x8b   : > { %s291_s18 = scalar_lea.vmem [#allocation4], %s5993_s17 }
  0x8c   : > { %5737 = dma.done.wait (%p6684_p12), %s288_s14, 224  }
  0x8d   : > { %5739 = vsyncadd (%p6684_p12), %s288_s14, 4294967072  ;;  %s300_s24 = scalar_lea.vmem [#allocation6], %s5993_s17  ;;  %s306_s21 = scalar_lea.sflag [#allocation8], %s278_s15 }
  0x8e   : > { %s309_s25 = scalar_lea.vmem [#allocation7], %s5993_s17 }
  0x8f   : > { %5741 = dma.done.wait (%p6684_p12), %s306_s21, 112  }
  0x90   : > { %5743 = vsyncadd (%p6684_p12), %s306_s21, 4294967184  ;;  %v4938_v0 = vld [vmem:[%s5986_s2 + $0x4] ss:$28 sps:$4 sm:$0xff]   ;;  %v4944_v4 = vld [vmem:[%s5986_s2 + $0x3c] ss:$28 sps:$4 sm:$0xff]   ;;  %vm3898_vm0 = vcmask 1043456  }
  0x91   : > { %v4940_v1 = vld [vmem:[%s5986_s2 + $0x384] ss:$28 sps:$4 sm:$0xff]   ;;  %3239 = vmatprep.subr.bf16.mxu1 %v4938_v0  ;;  %v4946_v5 = vld [vmem:[%s5986_s2 + $0x3bc] ss:$28 sps:$4 sm:$0xff]   ;;  %v4950_v8 = vld [vmem:[%s5986_s2 + $0x74] ss:$28 sps:$4 sm:$0xff]  }
  0x92   : > { %v4942_v2 = vld [vmem:[%s5986_s2] ss:$28 sps:$4 sm:$0xff]   ;;  %3280 = vmatprep.subr.bf16.mxu0 %v4940_v1  ;;  %v4948_v6 = vld [vmem:[%s5986_s2 + $0x38] ss:$28 sps:$4 sm:$0xff]   ;;  %v4954_v10 = vld [vmem:[%s5986_s2 + $0x70] ss:$28 sps:$4 sm:$0xff]  }
  0x93   : > { %v4943_v3 = vld [vmem:[%s5986_s2 + $0x380] ss:$28 sps:$4 sm:$0xff]   ;;  %3240 = vmatpush1.bf16.msra.mxu1 %v4942_v2  ;;  %v4949_v7 = vld [vmem:[%s5986_s2 + $0x3b8] ss:$28 sps:$4 sm:$0xff]   ;;  %v4955_v11 = vld [vmem:[%s5986_s2 + $0x3f0] ss:$28 sps:$4 sm:$0xff]  }
  0x94   : > { %3281 = vmatpush1.bf16.msra.mxu0 %v4943_v3  ;;  %3241 = vmatprep.subr.bf16.mxu1 %v4944_v4  ;;  %v4952_v9 = vld [vmem:[%s5986_s2 + $0x3f4] ss:$28 sps:$4 sm:$0xff]   ;;  %v4956_v12 = vld [vmem:[%s5986_s2 + $0xac] ss:$28 sps:$4 sm:$0xff]   ;;  %v4962_v16 = vld [vmem:[%s5986_s2 + $0xe4] ss:$28 sps:$4 sm:$0xff]  }
  0x95   : > { %3282 = vmatprep.subr.bf16.mxu0 %v4946_v5  ;;  %v4958_v13 = vld [vmem:[%s5986_s2 + $0x42c] ss:$28 sps:$4 sm:$0xff]   ;;  %v4964_v17 = vld [vmem:[%s5986_s2 + $0x464] ss:$28 sps:$4 sm:$0xff]   ;;  %v4968_v20 = vld [vmem:[%s5986_s2 + $0x11c] ss:$28 sps:$4 sm:$0xff]  }
  0x96   : > { %v4960_v14 = vld [vmem:[%s5986_s2 + $0xa8] ss:$28 sps:$4 sm:$0xff]   ;;  %v4966_v18 = vld [vmem:[%s5986_s2 + $0xe0] ss:$28 sps:$4 sm:$0xff]   ;;  %v4972_v22 = vld [vmem:[%s5986_s2 + $0x118] ss:$28 sps:$4 sm:$0xff]  }
  0x97   : > { %3242 = vmatpush1.bf16.msra.mxu1 %v4948_v6  ;;  %v4961_v15 = vld [vmem:[%s5986_s2 + $0x428] ss:$28 sps:$4 sm:$0xff]   ;;  %v4967_v19 = vld [vmem:[%s5986_s2 + $0x460] ss:$28 sps:$4 sm:$0xff]   ;;  %v4973_v23 = vld [vmem:[%s5986_s2 + $0x498] ss:$28 sps:$4 sm:$0xff]  }
  0x98   : > { %3283 = vmatpush1.bf16.msra.mxu0 %v4949_v7  ;;  %3243 = vmatprep.subr.bf16.mxu1 %v4950_v8  ;;  %v4970_v21 = vld [vmem:[%s5986_s2 + $0x49c] ss:$28 sps:$4 sm:$0xff]   ;;  %v4974_v24 = vld [vmem:[%s5986_s2 + $0x154] ss:$28 sps:$4 sm:$0xff]   ;;  %v4980_v28 = vld [vmem:[%s5986_s2 + $0x18c] ss:$28 sps:$4 sm:$0xff]  }
  0x99   : > { %3284 = vmatprep.subr.bf16.mxu0 %v4952_v9  ;;  %v4976_v25 = vld [vmem:[%s5986_s2 + $0x4d4] ss:$28 sps:$4 sm:$0xff]   ;;  %v4982_v29 = vld [vmem:[%s5986_s2 + $0x50c] ss:$28 sps:$4 sm:$0xff]   ;;  %v4986_v32 = vld [vmem:[%s5986_s2 + $0x1c4] ss:$28 sps:$4 sm:$0xff]  }
  0x9a   : > { %v4978_v26 = vld [vmem:[%s5986_s2 + $0x150] ss:$28 sps:$4 sm:$0xff]   ;;  %v4984_v30 = vld [vmem:[%s5986_s2 + $0x188] ss:$28 sps:$4 sm:$0xff]   ;;  %v4990_v34 = vld [vmem:[%s5986_s2 + $0x1c0] ss:$28 sps:$4 sm:$0xff]  }
  0x9b   : > { %3244 = vmatpush1.bf16.msra.mxu1 %v4954_v10  ;;  %v4979_v27 = vld [vmem:[%s5986_s2 + $0x4d0] ss:$28 sps:$4 sm:$0xff]   ;;  %v4985_v31 = vld [vmem:[%s5986_s2 + $0x508] ss:$28 sps:$4 sm:$0xff]   ;;  %v4991_v35 = vld [vmem:[%s5986_s2 + $0x540] ss:$28 sps:$4 sm:$0xff]  }
  0x9c   : > { %3285 = vmatpush1.bf16.msra.mxu0 %v4955_v11  ;;  %3245 = vmatprep.subr.bf16.mxu1 %v4956_v12  ;;  %v4988_v33 = vld [vmem:[%s5986_s2 + $0x544] ss:$28 sps:$4 sm:$0xff]   ;;  %v4992_v36 = vld [vmem:[%s5986_s2 + $0x1fc] ss:$28 sps:$4 sm:$0xff]   ;;  %v4998_v40 = vld [vmem:[%s5986_s2 + $0x234] ss:$28 sps:$4 sm:$0xff]  }
  0x9d   : > { %3286 = vmatprep.subr.bf16.mxu0 %v4958_v13  ;;  %v4994_v37 = vld [vmem:[%s5986_s2 + $0x57c] ss:$28 sps:$4 sm:$0xff]   ;;  %v5000_v41 = vld [vmem:[%s5986_s2 + $0x5b4] ss:$28 sps:$4 sm:$0xff]   ;;  %v5004_v44 = vld [vmem:[%s5986_s2 + $0x26c] ss:$28 sps:$4 sm:$0xff]  }
  0x9e   : > { %v4996_v38 = vld [vmem:[%s5986_s2 + $0x1f8] ss:$28 sps:$4 sm:$0xff]   ;;  %v5002_v42 = vld [vmem:[%s5986_s2 + $0x230] ss:$28 sps:$4 sm:$0xff]   ;;  %v874_v46 = vld [vmem:[%s6662_s0] sm:$0xff]  ;;  %s355_s6 = smul.u32 7, %s5816_s22 }
  0x9f   : > { %3246 = vmatpush1.bf16.msra.mxu1 %v4960_v14  ;;  %v4997_v39 = vld [vmem:[%s5986_s2 + $0x578] ss:$28 sps:$4 sm:$0xff]   ;;  %v5003_v43 = vld [vmem:[%s5986_s2 + $0x5b0] ss:$28 sps:$4 sm:$0xff]   ;;  %v882_v47 = vcombine.high %v874_v46, %v874_v46  ;;  %v5008_v49 = vld [vmem:[%s5986_s2 + $0x268] ss:$28 sps:$4 sm:$0xff]   ;;  %v6084_v8 = vpack.c.bf16 %v874_v46, %v874_v46 }
  0xa0   : > { %3287 = vmatpush1.bf16.msra.mxu0 %v4961_v15  ;;  %3247 = vmatprep.subr.bf16.mxu1 %v4962_v16  ;;  %v5006_v45 = vld [vmem:[%s5986_s2 + $0x5ec] ss:$28 sps:$4 sm:$0xff]   ;;  %v5010_v52 = vld [vmem:[%s5986_s2 + $0x2a4] ss:$28 sps:$4 sm:$0xff]   ;;  %v5016_v58 = vld [vmem:[%s5986_s2 + $0x2dc] ss:$28 sps:$4 sm:$0xff]  }
  0xa1   : > { %3288 = vmatprep.subr.bf16.mxu0 %v4964_v17  ;;  %v875_v48 = vld [vmem:[%s6662_s0 + $0x8] sm:$0xff]  ;;  %v5012_v53 = vld [vmem:[%s5986_s2 + $0x624] ss:$28 sps:$4 sm:$0xff]   ;;  %v6062_v54 = vpack.c.bf16 %v882_v47, %v882_v47  ;;  %v5018_v59 = vld [vmem:[%s5986_s2 + $0x65c] ss:$28 sps:$4 sm:$0xff]   ;;  %p356_p13 = scmp.lt.s32.totalorder %s355_s6, 48 }
  0xa2   : > { %v5009_v50 = vld [vmem:[%s5986_s2 + $0x5e8] ss:$28 sps:$4 sm:$0xff]   ;;  %v883_v51 = vcombine.high %v875_v48, %v875_v48  ;;  %v5014_v56 = vld [vmem:[%s5986_s2 + $0x2a0] ss:$28 sps:$4 sm:$0xff]   ;;  %v5020_v60 = vld [vmem:[%s5986_s2 + $0x2d8] ss:$28 sps:$4 sm:$0xff]   ;;  %v6086_v9 = vpack.c.bf16 %v875_v48, %v875_v48 }
  0xa3   : > { %3248 = vmatpush1.bf16.msra.mxu1 %v4966_v18  ;;  %3271 = vmatprep.mubr.bf16.mxu1 %v6062_v54  ;;  %v5015_v57 = vld [vmem:[%s5986_s2 + $0x620] ss:$28 sps:$4 sm:$0xff]   ;;  %v5021_v61 = vld [vmem:[%s5986_s2 + $0x658] ss:$28 sps:$4 sm:$0xff]   ;;  %v5026_v0 = vld [vmem:[%s5986_s2 + $0x310] ss:$28 sps:$4 sm:$0xff]  }
  0xa4   : > { %3289 = vmatpush1.bf16.msra.mxu0 %v4967_v19  ;;  %3249 = vmatprep.subr.bf16.mxu1 %v4968_v20  ;;  %v6064_v55 = vpack.c.bf16 %v883_v51, %v883_v51  ;;  %v5022_v62 = vld [vmem:[%s5986_s2 + $0x314] ss:$28 sps:$4 sm:$0xff]   ;;  %v5028_v2 = vld [vmem:[%s5986_s2 + $0x34c] ss:$28 sps:$4 sm:$0xff]   ;;  %v5038_v6 = vld [vmem:[%s5986_s2 + $0x704] ss:$28 sps:$4 sm:$0xff]  }
  0xa5   : > { %3290 = vmatprep.subr.bf16.mxu0 %v4970_v21  ;;  %v5024_v63 = vld [vmem:[%s5986_s2 + $0x694] ss:$28 sps:$4 sm:$0xff]   ;;  %v5030_v3 = vld [vmem:[%s5986_s2 + $0x6cc] ss:$28 sps:$4 sm:$0xff]   ;;  %v5036_v10 = vld [vmem:[%s5986_s2 + $0x700] ss:$28 sps:$4 sm:$0xff]  }
  0xa6   : > { %3312 = vmatprep.mubr.bf16.mxu0 %v6064_v55  ;;  %v5027_v1 = vld [vmem:[%s5986_s2 + $0x690] ss:$28 sps:$4 sm:$0xff]   ;;  %v5032_v4 = vld [vmem:[%s5986_s2 + $0x348] ss:$28 sps:$4 sm:$0xff]   ;;  %v5044_v12 = vld [vmem:[%s5986_s2 + $0x73c] ss:$28 sps:$4 sm:$0xff]  }
  0xa7   : > { %3250 = vmatpush1.bf16.msra.mxu1 %v4972_v22  ;;  %v5033_v5 = vld [vmem:[%s5986_s2 + $0x6c8] ss:$28 sps:$4 sm:$0xff]   ;;  %v5042_v14 = vld [vmem:[%s5986_s2 + $0x738] ss:$28 sps:$4 sm:$0xff]   ;;  %v5045_v15 = vld [vmem:[%s5986_s2 + $0x40] ss:$28 sps:$4 sm:$0xff]  }
  0xa8   : > { %3291 = vmatpush1.bf16.msra.mxu0 %v4973_v23  ;;  %3251 = vmatprep.subr.bf16.mxu1 %v4974_v24  ;;  %v5041_v7 = vld [vmem:[%s5986_s2 + $0xc] ss:$28 sps:$4 sm:$0xff]   ;;  %v5047_v13 = vld [vmem:[%s5986_s2 + $0x44] ss:$28 sps:$4 sm:$0xff]   ;;  %v5050_v16 = vld [vmem:[%s5986_s2 + $0x774] ss:$28 sps:$4 sm:$0xff]  }
  0xa9   : > { %3292 = vmatprep.subr.bf16.mxu0 %v4976_v25  ;;  %v5039_v11 = vld [vmem:[%s5986_s2 + $0x8] ss:$28 sps:$4 sm:$0xff]   ;;  %v5053_v17 = vld [vmem:[%s5986_s2 + $0x7c] ss:$28 sps:$4 sm:$0xff]   ;;  %v5048_v18 = vld [vmem:[%s5986_s2 + $0x770] ss:$28 sps:$4 sm:$0xff]  }
  0xaa   : > { %v5051_v19 = vld [vmem:[%s5986_s2 + $0x78] ss:$28 sps:$4 sm:$0xff]   ;;  %v5056_v20 = vld [vmem:[%s5986_s2 + $0x7ac] ss:$28 sps:$4 sm:$0xff]   ;;  %v5062_v24 = vld [vmem:[%s5986_s2 + $0x7e4] ss:$28 sps:$4 sm:$0xff]  }
  0xab   : > { %3252 = vmatpush1.bf16.msra.mxu1 %v4978_v26  ;;  %v5059_v21 = vld [vmem:[%s5986_s2 + $0xb4] ss:$28 sps:$4 sm:$0xff]   ;;  %v5054_v22 = vld [vmem:[%s5986_s2 + $0x7a8] ss:$28 sps:$4 sm:$0xff]   ;;  %v5060_v26 = vld [vmem:[%s5986_s2 + $0x7e0] ss:$28 sps:$4 sm:$0xff]  }
  0xac   : > { %3293 = vmatpush1.bf16.msra.mxu0 %v4979_v27  ;;  %3253 = vmatprep.subr.bf16.mxu1 %v4980_v28  ;;  %v5057_v23 = vld [vmem:[%s5986_s2 + $0xb0] ss:$28 sps:$4 sm:$0xff]   ;;  %v5063_v27 = vld [vmem:[%s5986_s2 + $0xe8] ss:$28 sps:$4 sm:$0xff]   ;;  %v5068_v28 = vld [vmem:[%s5986_s2 + $0x81c] ss:$28 sps:$4 sm:$0xff]  }
  0xad   : > { %3294 = vmatprep.subr.bf16.mxu0 %v4982_v29  ;;  %v5065_v25 = vld [vmem:[%s5986_s2 + $0xec] ss:$28 sps:$4 sm:$0xff]   ;;  %v5071_v29 = vld [vmem:[%s5986_s2 + $0x124] ss:$28 sps:$4 sm:$0xff]   ;;  %v5092_v47 = vld [vmem:[%s5986_s2 + $0x8fc] ss:$28 sps:$4 sm:$0xff]  }
  0xae   : > { %v5087_v46 = vld [vmem:[%s5986_s2 + $0x1c8] ss:$28 sps:$4 sm:$0xff]   ;;  %v5098_v51 = vld [vmem:[%s5986_s2 + $0x934] ss:$28 sps:$4 sm:$0xff]   ;;  %s6690_s6 = smov (!%p356_p13, %s355_s6), 48 }
  0xaf   : > { %3254 = vmatpush1.bf16.msra.mxu1 %v4984_v30  ;;  %v5066_v30 = vld [vmem:[%s5986_s2 + $0x818] ss:$28 sps:$4 sm:$0xff]   ;;  %v5095_v48 = vld [vmem:[%s5986_s2 + $0x204] ss:$28 sps:$4 sm:$0xff]   ;;  %s4292_s22 = sshll.u32 %s6690_s6, 2 }
  0xb0   : > { %3295 = vmatpush1.bf16.msra.mxu0 %v4985_v31  ;;  %3255 = vmatprep.subr.bf16.mxu1 %v4986_v32  ;;  %v5069_v31 = vld [vmem:[%s5986_s2 + $0x120] ss:$28 sps:$4 sm:$0xff]   ;;  %v5074_v32 = vld [vmem:[%s5986_s2 + $0x854] ss:$28 sps:$4 sm:$0xff]   ;;  %s6588_s15 = scalar_lea.vmem %s6667_s5, %s4292_s22 }
  0xb1   : > { %3296 = vmatprep.subr.bf16.mxu0 %v4988_v33  ;;  %v5077_v33 = vld [vmem:[%s5986_s2 + $0x15c] ss:$28 sps:$4 sm:$0xff]  }
  0xb3   : > { %3256 = vmatpush1.bf16.msra.mxu1 %v4990_v34  ;;  %v6118_v34 = vld [vmem:[%s6662_s0 + $0x10] sm:$0xff] }
  0xb4   : > { %3297 = vmatpush1.bf16.msra.mxu0 %v4991_v35  ;;  %3257 = vmatprep.subr.bf16.mxu1 %v4992_v36  ;;  %v5072_v35 = vld [vmem:[%s5986_s2 + $0x850] ss:$28 sps:$4 sm:$0xff]   ;;  %v884_v36 = vcombine.high %v6118_v34, %v6118_v34 }
  0xb5   : > { %3298 = vmatprep.subr.bf16.mxu0 %v4994_v37  ;;  %v5075_v37 = vld [vmem:[%s5986_s2 + $0x158] ss:$28 sps:$4 sm:$0xff]  }
  0xb7   : > { %3258 = vmatpush1.bf16.msra.mxu1 %v4996_v38  ;;  %v5080_v38 = vld [vmem:[%s5986_s2 + $0x88c] ss:$28 sps:$4 sm:$0xff]  }
  0xb8   : > { %3299 = vmatpush1.bf16.msra.mxu0 %v4997_v39  ;;  %3259 = vmatprep.subr.bf16.mxu1 %v4998_v40  ;;  %v5083_v39 = vld [vmem:[%s5986_s2 + $0x194] ss:$28 sps:$4 sm:$0xff]   ;;  %v6126_v40 = vpack.c.bf16 %v884_v36, %v884_v36  ;;  %v5162_v36 = vld [vmem:[%s5986_s2 + $0x46c] ss:$28 sps:$4 sm:$0xff]  }
  0xb9   : > { %3300 = vmatprep.subr.bf16.mxu0 %v5000_v41  ;;  %v5078_v41 = vld [vmem:[%s5986_s2 + $0x888] ss:$28 sps:$4 sm:$0xff]  }
  0xbb   : > { %3260 = vmatpush1.bf16.msra.mxu1 %v5002_v42  ;;  %v5081_v42 = vld [vmem:[%s5986_s2 + $0x190] ss:$28 sps:$4 sm:$0xff]  }
  0xbc   : > { %3301 = vmatpush1.bf16.msra.mxu0 %v5003_v43  ;;  %3261 = vmatprep.subr.bf16.mxu1 %v5004_v44  ;;  %v5086_v43 = vld [vmem:[%s5986_s2 + $0x8c4] ss:$28 sps:$4 sm:$0xff]   ;;  %v5089_v44 = vld [vmem:[%s5986_s2 + $0x1cc] ss:$28 sps:$4 sm:$0xff]  }
  0xbd   : > { %3302 = vmatprep.subr.bf16.mxu0 %v5006_v45  ;;  %v5084_v45 = vld [vmem:[%s5986_s2 + $0x8c0] ss:$28 sps:$4 sm:$0xff]  }
  0xbf   : > { %3262 = vmatpush1.bf16.msra.mxu1 %v5008_v49  ;;  %v5090_v49 = vld [vmem:[%s5986_s2 + $0x8f8] ss:$28 sps:$4 sm:$0xff]  }
  0xc0   : > { %3303 = vmatpush1.bf16.msra.mxu0 %v5009_v50  ;;  %3263 = vmatprep.subr.bf16.mxu1 %v5010_v52  ;;  %v5093_v50 = vld [vmem:[%s5986_s2 + $0x200] ss:$28 sps:$4 sm:$0xff]  }
  0xc1   : > { %3304 = vmatprep.subr.bf16.mxu0 %v5012_v53  ;;  %v5101_v52 = vld [vmem:[%s5986_s2 + $0x23c] ss:$28 sps:$4 sm:$0xff]   ;;  %v5096_v53 = vld [vmem:[%s5986_s2 + $0x930] ss:$28 sps:$4 sm:$0xff]  }
  0xc3   : > { %3264 = vmatpush1.bf16.msra.mxu1 %v5014_v56  ;;  %v5099_v56 = vld [vmem:[%s5986_s2 + $0x238] ss:$28 sps:$4 sm:$0xff]  }
  0xc4   : > { %3305 = vmatpush1.bf16.msra.mxu0 %v5015_v57  ;;  %3265 = vmatprep.subr.bf16.mxu1 %v5016_v58  ;;  %v5104_v57 = vld [vmem:[%s5986_s2 + $0x96c] ss:$28 sps:$4 sm:$0xff]   ;;  %v5107_v58 = vld [vmem:[%s5986_s2 + $0x274] ss:$28 sps:$4 sm:$0xff]  }
  0xc5   : > { %3306 = vmatprep.subr.bf16.mxu0 %v5018_v59  ;;  %v5102_v59 = vld [vmem:[%s5986_s2 + $0x968] ss:$28 sps:$4 sm:$0xff]  }
  0xc7   : > { %3266 = vmatpush1.bf16.msra.mxu1 %v5020_v60  ;;  %v5105_v60 = vld [vmem:[%s5986_s2 + $0x270] ss:$28 sps:$4 sm:$0xff]  }
  0xc8   : > { %3307 = vmatpush1.bf16.msra.mxu0 %v5021_v61  ;;  %3267 = vmatprep.subr.bf16.mxu1 %v5022_v62  ;;  %v5110_v61 = vld [vmem:[%s5986_s2 + $0x9a4] ss:$28 sps:$4 sm:$0xff]   ;;  %v5113_v62 = vld [vmem:[%s5986_s2 + $0x2ac] ss:$28 sps:$4 sm:$0xff]  }
  0xc9   : > { %3308 = vmatprep.subr.bf16.mxu0 %v5024_v63  ;;  %v5108_v63 = vld [vmem:[%s5986_s2 + $0x9a0] ss:$28 sps:$4 sm:$0xff]  }
  0xcb   : > { %3268 = vmatpush1.bf16.msra.mxu1 %v5026_v0  ;;  %v5111_v0 = vld [vmem:[%s5986_s2 + $0x2a8] ss:$28 sps:$4 sm:$0xff]  }
  0xcc   : > { %3309 = vmatpush1.bf16.msra.mxu0 %v5027_v1  ;;  %3269 = vmatprep.subr.bf16.mxu1 %v5028_v2  ;;  %v5116_v1 = vld [vmem:[%s5986_s2 + $0x9dc] ss:$28 sps:$4 sm:$0xff]   ;;  %v5119_v2 = vld [vmem:[%s5986_s2 + $0x2e4] ss:$28 sps:$4 sm:$0xff]  }
  0xcd   : > { %3310 = vmatprep.subr.bf16.mxu0 %v5030_v3  ;;  %v5114_v3 = vld [vmem:[%s5986_s2 + $0x9d8] ss:$28 sps:$4 sm:$0xff]  }
  0xcf   : > { %3270 = vmatpush1.bf16.msra.mxu1 %v5032_v4  ;;  %v5117_v4 = vld [vmem:[%s5986_s2 + $0x2e0] ss:$28 sps:$4 sm:$0xff]  }
  0xd0   : > { %3311 = vmatpush1.bf16.msra.mxu0 %v5033_v5  ;;  %3403 = vmatprep.subr.bf16.mxu1 %v5041_v7  ;;  %v5122_v5 = vld [vmem:[%s5986_s2 + $0xa14] ss:$28 sps:$4 sm:$0xff]  }
  0xd1   : > { %3321 = vmatprep.subr.bf16.mxu0 %v5038_v6  ;;  %v5125_v6 = vld [vmem:[%s5986_s2 + $0x31c] ss:$28 sps:$4 sm:$0xff]   ;;  %v5120_v7 = vld [vmem:[%s5986_s2 + $0xa10] ss:$28 sps:$4 sm:$0xff]  }
  0xd2   : > { %3272 = vmatmul.mubr.bf16.vlgmr.msra.gmra.mrb[0].mxu1 %v6084_v8 }
  0xd3   : > { %3313 = vmatmul.mubr.bf16.vlgmr.msra.gmra.mrb[0].mxu0 %v6086_v9  ;;  %3404 = vmatpush1.bf16.msra.mxu1 %v5039_v11  ;;  %v5128_v11 = vld [vmem:[%s5986_s2 + $0xa4c] ss:$28 sps:$4 sm:$0xff]  }
  0xd4   : > { %3322 = vmatpush1.bf16.msra.mxu0 %v5036_v10  ;;  %3405 = vmatprep.subr.bf16.mxu1 %v5047_v13  ;;  %v5123_v10 = vld [vmem:[%s5986_s2 + $0x318] ss:$28 sps:$4 sm:$0xff]   ;;  %v5126_v13 = vld [vmem:[%s5986_s2 + $0xa48] ss:$28 sps:$4 sm:$0xff]  }
  0xd5   : > { %3323 = vmatprep.subr.bf16.mxu0 %v5044_v12  ;;  %3435 = vmatprep.mubr.bf16.mxu1 %v6062_v54  ;;  %v5131_v12 = vld [vmem:[%s5986_s2 + $0x354] ss:$28 sps:$4 sm:$0xff]  }
  0xd6   : > { %3353 = vmatprep.mubr.bf16.mxu0 %v6126_v40 }
  0xd7   : > { %3406 = vmatpush1.bf16.msra.mxu1 %v5045_v15  ;;  %v5135_v15 = vld [vmem:[%s5986_s2 + $0xa84] ss:$28 sps:$4 sm:$0xff]  }
  0xd8   : > { %3324 = vmatpush1.bf16.msra.mxu0 %v5042_v14  ;;  %3407 = vmatprep.subr.bf16.mxu1 %v5053_v17  ;;  %v5129_v14 = vld [vmem:[%s5986_s2 + $0x350] ss:$28 sps:$4 sm:$0xff]   ;;  %v5133_v17 = vld [vmem:[%s5986_s2 + $0xa80] ss:$28 sps:$4 sm:$0xff]  }
  0xd9   : > { %3325 = vmatprep.subr.bf16.mxu0 %v5050_v16  ;;  %v5138_v16 = vld [vmem:[%s5986_s2 + $0x38c] ss:$28 sps:$4 sm:$0xff]  }
  0xdb   : > { %3408 = vmatpush1.bf16.msra.mxu1 %v5051_v19  ;;  %v6169_v19 = vpack.c.bf16 %v6118_v34, %v6118_v34  ;;  %v5154_v34 = vld [vmem:[%s5986_s2 + $0x430] ss:$28 sps:$4 sm:$0xff]  }
  0xdc   : > { %3326 = vmatpush1.bf16.msra.mxu0 %v5048_v18  ;;  %3409 = vmatprep.subr.bf16.mxu1 %v5059_v21  ;;  %v5136_v18 = vld [vmem:[%s5986_s2 + $0x388] ss:$28 sps:$4 sm:$0xff]  }
  0xdd   : > { %3327 = vmatprep.subr.bf16.mxu0 %v5056_v20  ;;  %v5141_v20 = vld [vmem:[%s5986_s2 + $0xabc] ss:$28 sps:$4 sm:$0xff]   ;;  %v5144_v21 = vld [vmem:[%s5986_s2 + $0x3c4] ss:$28 sps:$4 sm:$0xff]  }
  0xdf   : > { %3410 = vmatpush1.bf16.msra.mxu1 %v5057_v23 }
  0xe0   : > { %3328 = vmatpush1.bf16.msra.mxu0 %v5054_v22  ;;  %3411 = vmatprep.subr.bf16.mxu1 %v5065_v25  ;;  %v6176_v22 = vld [vmem:[%s6662_s0 + $0x18] sm:$0xff] }
  0xe1   : > { %3329 = vmatprep.subr.bf16.mxu0 %v5062_v24  ;;  %v885_v23 = vcombine.high %v6176_v22, %v6176_v22  ;;  %v5139_v24 = vld [vmem:[%s5986_s2 + $0xab8] ss:$28 sps:$4 sm:$0xff]   ;;  %v5142_v25 = vld [vmem:[%s5986_s2 + $0x3c0] ss:$28 sps:$4 sm:$0xff]  }
  0xe3   : > { %3412 = vmatpush1.bf16.msra.mxu1 %v5063_v27  ;;  %v6185_v27 = vpack.c.bf16 %v885_v23, %v885_v23  ;;  %v5228_v23 = vld [vmem:[%s5986_s2 + $0x6d4] ss:$28 sps:$4 sm:$0xff]  }
  0xe4   : > { %3330 = vmatpush1.bf16.msra.mxu0 %v5060_v26  ;;  %3413 = vmatprep.subr.bf16.mxu1 %v5071_v29  ;;  %v5147_v26 = vld [vmem:[%s5986_s2 + $0xaf4] ss:$28 sps:$4 sm:$0xff]  }
  0xe5   : > { %3331 = vmatprep.subr.bf16.mxu0 %v5068_v28  ;;  %v5150_v28 = vld [vmem:[%s5986_s2 + $0x3fc] ss:$28 sps:$4 sm:$0xff]   ;;  %v5145_v29 = vld [vmem:[%s5986_s2 + $0xaf0] ss:$28 sps:$4 sm:$0xff]  }
  0xe7   : > { %3414 = vmatpush1.bf16.msra.mxu1 %v5069_v31  ;;  %v5153_v31 = vld [vmem:[%s5986_s2 + $0xb2c] ss:$28 sps:$4 sm:$0xff]  }
  0xe8   : > { %3332 = vmatpush1.bf16.msra.mxu0 %v5066_v30  ;;  %3415 = vmatprep.subr.bf16.mxu1 %v5077_v33  ;;  %v5148_v30 = vld [vmem:[%s5986_s2 + $0x3f8] ss:$28 sps:$4 sm:$0xff]   ;;  %v5151_v33 = vld [vmem:[%s5986_s2 + $0xb28] ss:$28 sps:$4 sm:$0xff]  }
  0xe9   : > { %3333 = vmatprep.subr.bf16.mxu0 %v5074_v32  ;;  %v5156_v32 = vld [vmem:[%s5986_s2 + $0x434] ss:$28 sps:$4 sm:$0xff]  }
  0xeb   : > { %3416 = vmatpush1.bf16.msra.mxu1 %v5075_v37  ;;  %v5157_v37 = vld [vmem:[%s5986_s2 + $0xb60] ss:$28 sps:$4 sm:$0xff]  }
  0xec   : > { %3334 = vmatpush1.bf16.msra.mxu0 %v5072_v35  ;;  %3417 = vmatprep.subr.bf16.mxu1 %v5083_v39  ;;  %v5159_v35 = vld [vmem:[%s5986_s2 + $0xb64] ss:$28 sps:$4 sm:$0xff]   ;;  %v5165_v39 = vld [vmem:[%s5986_s2 + $0xb9c] ss:$28 sps:$4 sm:$0xff]  }
  0xed   : > { %3335 = vmatprep.subr.bf16.mxu0 %v5080_v38  ;;  %v5160_v38 = vld [vmem:[%s5986_s2 + $0x468] ss:$28 sps:$4 sm:$0xff]  }
  0xef   : > { %3418 = vmatpush1.bf16.msra.mxu1 %v5081_v42  ;;  %v5163_v42 = vld [vmem:[%s5986_s2 + $0xb98] ss:$28 sps:$4 sm:$0xff]  }
  0xf0   : > { %3336 = vmatpush1.bf16.msra.mxu0 %v5078_v41  ;;  %3419 = vmatprep.subr.bf16.mxu1 %v5089_v44  ;;  %v5168_v41 = vld [vmem:[%s5986_s2 + $0x4a4] ss:$28 sps:$4 sm:$0xff]   ;;  %v5171_v44 = vld [vmem:[%s5986_s2 + $0xbd4] ss:$28 sps:$4 sm:$0xff]  }
  0xf1   : > { %3337 = vmatprep.subr.bf16.mxu0 %v5086_v43  ;;  %v5166_v43 = vld [vmem:[%s5986_s2 + $0x4a0] ss:$28 sps:$4 sm:$0xff]  }
  0xf3   : > { %3420 = vmatpush1.bf16.msra.mxu1 %v5087_v46  ;;  %v5169_v46 = vld [vmem:[%s5986_s2 + $0xbd0] ss:$28 sps:$4 sm:$0xff]  }
  0xf4   : > { %3338 = vmatpush1.bf16.msra.mxu0 %v5084_v45  ;;  %3421 = vmatprep.subr.bf16.mxu1 %v5095_v48  ;;  %v5174_v45 = vld [vmem:[%s5986_s2 + $0x4dc] ss:$28 sps:$4 sm:$0xff]   ;;  %v5177_v48 = vld [vmem:[%s5986_s2 + $0xc0c] ss:$28 sps:$4 sm:$0xff]  }
  0xf5   : > { %3339 = vmatprep.subr.bf16.mxu0 %v5092_v47  ;;  %v5172_v47 = vld [vmem:[%s5986_s2 + $0x4d8] ss:$28 sps:$4 sm:$0xff]  }
  0xf7   : > { %3422 = vmatpush1.bf16.msra.mxu1 %v5093_v50  ;;  %v5175_v50 = vld [vmem:[%s5986_s2 + $0xc08] ss:$28 sps:$4 sm:$0xff]  }
  0xf8   : > { %3340 = vmatpush1.bf16.msra.mxu0 %v5090_v49  ;;  %3423 = vmatprep.subr.bf16.mxu1 %v5101_v52  ;;  %v5180_v49 = vld [vmem:[%s5986_s2 + $0x514] ss:$28 sps:$4 sm:$0xff]   ;;  %v5183_v52 = vld [vmem:[%s5986_s2 + $0xc44] ss:$28 sps:$4 sm:$0xff]  }
  0xf9   : > { %3341 = vmatprep.subr.bf16.mxu0 %v5098_v51  ;;  %v5178_v51 = vld [vmem:[%s5986_s2 + $0x510] ss:$28 sps:$4 sm:$0xff]  }
  0xfb   : > { %3424 = vmatpush1.bf16.msra.mxu1 %v5099_v56  ;;  %v5181_v56 = vld [vmem:[%s5986_s2 + $0xc40] ss:$28 sps:$4 sm:$0xff]  }
  0xfc   : > { %3342 = vmatpush1.bf16.msra.mxu0 %v5096_v53  ;;  %3425 = vmatprep.subr.bf16.mxu1 %v5107_v58  ;;  %v5186_v53 = vld [vmem:[%s5986_s2 + $0x54c] ss:$28 sps:$4 sm:$0xff]   ;;  %v5189_v58 = vld [vmem:[%s5986_s2 + $0xc7c] ss:$28 sps:$4 sm:$0xff]  }
  0xfd   : > { %3343 = vmatprep.subr.bf16.mxu0 %v5104_v57  ;;  %v5184_v57 = vld [vmem:[%s5986_s2 + $0x548] ss:$28 sps:$4 sm:$0xff]  }
  0xff   : > { %3426 = vmatpush1.bf16.msra.mxu1 %v5105_v60  ;;  %v5187_v60 = vld [vmem:[%s5986_s2 + $0xc78] ss:$28 sps:$4 sm:$0xff]  }
 0x100   : > { %3344 = vmatpush1.bf16.msra.mxu0 %v5102_v59  ;;  %3427 = vmatprep.subr.bf16.mxu1 %v5113_v62  ;;  %v5192_v59 = vld [vmem:[%s5986_s2 + $0x584] ss:$28 sps:$4 sm:$0xff]   ;;  %v5195_v62 = vld [vmem:[%s5986_s2 + $0xcb4] ss:$28 sps:$4 sm:$0xff]  }
 0x101   : > { %3345 = vmatprep.subr.bf16.mxu0 %v5110_v61  ;;  %v5190_v61 = vld [vmem:[%s5986_s2 + $0x580] ss:$28 sps:$4 sm:$0xff]  }
 0x103   : > { %3428 = vmatpush1.bf16.msra.mxu1 %v5111_v0  ;;  %v5193_v0 = vld [vmem:[%s5986_s2 + $0xcb0] ss:$28 sps:$4 sm:$0xff]  }
 0x104   : > { %3346 = vmatpush1.bf16.msra.mxu0 %v5108_v63  ;;  %3429 = vmatprep.subr.bf16.mxu1 %v5119_v2  ;;  %v5198_v63 = vld [vmem:[%s5986_s2 + $0x5bc] ss:$28 sps:$4 sm:$0xff]   ;;  %v5201_v2 = vld [vmem:[%s5986_s2 + $0xcec] ss:$28 sps:$4 sm:$0xff]  }
 0x105   : > { %3347 = vmatprep.subr.bf16.mxu0 %v5116_v1  ;;  %v5196_v1 = vld [vmem:[%s5986_s2 + $0x5b8] ss:$28 sps:$4 sm:$0xff]  }
 0x107   : > { %3430 = vmatpush1.bf16.msra.mxu1 %v5117_v4  ;;  %v5199_v4 = vld [vmem:[%s5986_s2 + $0xce8] ss:$28 sps:$4 sm:$0xff]  }
 0x108   : > { %3348 = vmatpush1.bf16.msra.mxu0 %v5114_v3  ;;  %3431 = vmatprep.subr.bf16.mxu1 %v5125_v6  ;;  %v5204_v3 = vld [vmem:[%s5986_s2 + $0x5f4] ss:$28 sps:$4 sm:$0xff]   ;;  %v5207_v6 = vld [vmem:[%s5986_s2 + $0xd24] ss:$28 sps:$4 sm:$0xff]  }
 0x109   : > { %3349 = vmatprep.subr.bf16.mxu0 %v5122_v5  ;;  %v5202_v5 = vld [vmem:[%s5986_s2 + $0x5f0] ss:$28 sps:$4 sm:$0xff]  }
 0x10b   : > { %3432 = vmatpush1.bf16.msra.mxu1 %v5123_v10  ;;  %v5205_v10 = vld [vmem:[%s5986_s2 + $0xd20] ss:$28 sps:$4 sm:$0xff]  }
 0x10c   : > { %3350 = vmatpush1.bf16.msra.mxu0 %v5120_v7  ;;  %3433 = vmatprep.subr.bf16.mxu1 %v5131_v12  ;;  %v5210_v7 = vld [vmem:[%s5986_s2 + $0x62c] ss:$28 sps:$4 sm:$0xff]   ;;  %v5213_v12 = vld [vmem:[%s5986_s2 + $0xd5c] ss:$28 sps:$4 sm:$0xff]  }
 0x10d   : > { %3351 = vmatprep.subr.bf16.mxu0 %v5128_v11  ;;  %v5208_v11 = vld [vmem:[%s5986_s2 + $0x628] ss:$28 sps:$4 sm:$0xff]  }
 0x10f   : > { %3434 = vmatpush1.bf16.msra.mxu1 %v5129_v14  ;;  %v5211_v14 = vld [vmem:[%s5986_s2 + $0xd58] ss:$28 sps:$4 sm:$0xff]  }
 0x110   : > { %3352 = vmatpush1.bf16.msra.mxu0 %v5126_v13  ;;  %3444 = vmatprep.subr.bf16.mxu1 %v5138_v16  ;;  %v5216_v13 = vld [vmem:[%s5986_s2 + $0x664] ss:$28 sps:$4 sm:$0xff]   ;;  %v5219_v16 = vld [vmem:[%s5986_s2 + $0xd94] ss:$28 sps:$4 sm:$0xff]  }
 0x111   : > { %3362 = vmatprep.subr.bf16.mxu0 %v5135_v15  ;;  %v5214_v15 = vld [vmem:[%s5986_s2 + $0x660] ss:$28 sps:$4 sm:$0xff]  }
 0x112   : > { %3436 = vmatmul.mubr.bf16.vlgmr.msra.gmra.mrb[4].mxu1 %v6084_v8 }
 0x113   : > { %3354 = vmatmul.mubr.bf16.vlgmr.msra.gmra.mrb[0].mxu0 %v6169_v19  ;;  %3445 = vmatpush1.bf16.msra.mxu1 %v5136_v18  ;;  %v5217_v18 = vld [vmem:[%s5986_s2 + $0xd90] ss:$28 sps:$4 sm:$0xff]  }
 0x114   : > { %3363 = vmatpush1.bf16.msra.mxu0 %v5133_v17  ;;  %3446 = vmatprep.subr.bf16.mxu1 %v5144_v21  ;;  %v5222_v17 = vld [vmem:[%s5986_s2 + $0x69c] ss:$28 sps:$4 sm:$0xff]   ;;  %v5225_v21 = vld [vmem:[%s5986_s2 + $0xdcc] ss:$28 sps:$4 sm:$0xff]  }
 0x115   : > { %3364 = vmatprep.subr.bf16.mxu0 %v5141_v20  ;;  %3394 = vmatprep.mubr.bf16.mxu0 %v6185_v27  ;;  %v5220_v20 = vld [vmem:[%s5986_s2 + $0x698] ss:$28 sps:$4 sm:$0xff]  }
 0x116   : > { %3476 = vmatprep.mubr.bf16.mxu1 %v6064_v55 }
 0x117   : > { %3447 = vmatpush1.bf16.msra.mxu1 %v5142_v25  ;;  %v5226_v25 = vld [vmem:[%s5986_s2 + $0x6d0] ss:$28 sps:$4 sm:$0xff]  }
 0x118   : > { %3365 = vmatpush1.bf16.msra.mxu0 %v5139_v24  ;;  %3448 = vmatprep.subr.bf16.mxu1 %v5150_v28  ;;  %v5223_v24 = vld [vmem:[%s5986_s2 + $0xdc8] ss:$28 sps:$4 sm:$0xff]   ;;  %v5235_v28 = vld [vmem:[%s5986_s2 + $0x14] ss:$28 sps:$4 sm:$0xff]  }
 0x119   : > { %3366 = vmatprep.subr.bf16.mxu0 %v5147_v26  ;;  %v5232_v26 = vld [vmem:[%s5986_s2 + $0x70c] ss:$28 sps:$4 sm:$0xff]  }
 0x11b   : > { %3449 = vmatpush1.bf16.msra.mxu1 %v5148_v30  ;;  %v5230_v30 = vld [vmem:[%s5986_s2 + $0x708] ss:$28 sps:$4 sm:$0xff]  }
 0x11c   : > { %3367 = vmatpush1.bf16.msra.mxu0 %v5145_v29  ;;  %3450 = vmatprep.subr.bf16.mxu1 %v5156_v32  ;;  %v6248_v29 = vpack.c.bf16 %v6176_v22, %v6176_v22  ;;  %v5238_v32 = vld [vmem:[%s5986_s2 + $0x744] ss:$28 sps:$4 sm:$0xff]  }
 0x11d   : > { %3368 = vmatprep.subr.bf16.mxu0 %v5153_v31  ;;  %v5233_v31 = vld [vmem:[%s5986_s2 + $0x10] ss:$28 sps:$4 sm:$0xff]   ;;  %v5239_v22 = vld [vmem:[%s5986_s2 + $0x48] ss:$28 sps:$4 sm:$0xff]  }
 0x11f   : > { %3451 = vmatpush1.bf16.msra.mxu1 %v5154_v34  ;;  %v5236_v34 = vld [vmem:[%s5986_s2 + $0x740] ss:$28 sps:$4 sm:$0xff]  }
 0x120   : > { %3369 = vmatpush1.bf16.msra.mxu0 %v5151_v33  ;;  %3452 = vmatprep.subr.bf16.mxu1 %v5162_v36  ;;  %v5241_v33 = vld [vmem:[%s5986_s2 + $0x4c] ss:$28 sps:$4 sm:$0xff]   ;;  %v5247_v36 = vld [vmem:[%s5986_s2 + $0x84] ss:$28 sps:$4 sm:$0xff]  }
 0x121   : > { %3370 = vmatprep.subr.bf16.mxu0 %v5159_v35  ;;  %v5244_v35 = vld [vmem:[%s5986_s2 + $0x77c] ss:$28 sps:$4 sm:$0xff]  }
 0x123   : > { %3453 = vmatpush1.bf16.msra.mxu1 %v5160_v38  ;;  %v5245_v38 = vld [vmem:[%s5986_s2 + $0x80] ss:$28 sps:$4 sm:$0xff]  }
 0x124   : > { %3371 = vmatpush1.bf16.msra.mxu0 %v5157_v37  ;;  %3454 = vmatprep.subr.bf16.mxu1 %v5168_v41  ;;  %v5242_v37 = vld [vmem:[%s5986_s2 + $0x778] ss:$28 sps:$4 sm:$0xff]  }
 0x125   : > { %3372 = vmatprep.subr.bf16.mxu0 %v5165_v39  ;;  %v5250_v39 = vld [vmem:[%s5986_s2 + $0x7b4] ss:$28 sps:$4 sm:$0xff]   ;;  %v5253_v41 = vld [vmem:[%s5986_s2 + $0xbc] ss:$28 sps:$4 sm:$0xff]  }
 0x127   : > { %3455 = vmatpush1.bf16.msra.mxu1 %v5166_v43  ;;  %v5251_v43 = vld [vmem:[%s5986_s2 + $0xb8] ss:$28 sps:$4 sm:$0xff]  }
 0x128   : > { %3373 = vmatpush1.bf16.msra.mxu0 %v5163_v42  ;;  %3456 = vmatprep.subr.bf16.mxu1 %v5174_v45  ;;  %v5248_v42 = vld [vmem:[%s5986_s2 + $0x7b0] ss:$28 sps:$4 sm:$0xff]  }
 0x129   : > { %3374 = vmatprep.subr.bf16.mxu0 %v5171_v44  ;;  %v5256_v44 = vld [vmem:[%s5986_s2 + $0x7ec] ss:$28 sps:$4 sm:$0xff]   ;;  %v5259_v45 = vld [vmem:[%s5986_s2 + $0xf4] ss:$28 sps:$4 sm:$0xff]  }
 0x12b   : > { %3457 = vmatpush1.bf16.msra.mxu1 %v5172_v47  ;;  %v5257_v47 = vld [vmem:[%s5986_s2 + $0xf0] ss:$28 sps:$4 sm:$0xff]  }
 0x12c   : > { %3375 = vmatpush1.bf16.msra.mxu0 %v5169_v46  ;;  %3458 = vmatprep.subr.bf16.mxu1 %v5180_v49  ;;  %v5254_v46 = vld [vmem:[%s5986_s2 + $0x7e8] ss:$28 sps:$4 sm:$0xff]  }
 0x12d   : > { %3376 = vmatprep.subr.bf16.mxu0 %v5177_v48  ;;  %v5262_v48 = vld [vmem:[%s5986_s2 + $0x824] ss:$28 sps:$4 sm:$0xff]   ;;  %v5265_v49 = vld [vmem:[%s5986_s2 + $0x12c] ss:$28 sps:$4 sm:$0xff]  }
 0x12f   : > { %3459 = vmatpush1.bf16.msra.mxu1 %v5178_v51  ;;  %v5263_v51 = vld [vmem:[%s5986_s2 + $0x128] ss:$28 sps:$4 sm:$0xff]  }
 0x130   : > { %3377 = vmatpush1.bf16.msra.mxu0 %v5175_v50  ;;  %3460 = vmatprep.subr.bf16.mxu1 %v5186_v53  ;;  %v5260_v50 = vld [vmem:[%s5986_s2 + $0x820] ss:$28 sps:$4 sm:$0xff]  }
 0x131   : > { %3378 = vmatprep.subr.bf16.mxu0 %v5183_v52  ;;  %v5268_v52 = vld [vmem:[%s5986_s2 + $0x85c] ss:$28 sps:$4 sm:$0xff]   ;;  %v5271_v53 = vld [vmem:[%s5986_s2 + $0x164] ss:$28 sps:$4 sm:$0xff]  }
 0x133   : > { %3461 = vmatpush1.bf16.msra.mxu1 %v5184_v57  ;;  %v5269_v57 = vld [vmem:[%s5986_s2 + $0x160] ss:$28 sps:$4 sm:$0xff]  }
 0x134   : > { %3379 = vmatpush1.bf16.msra.mxu0 %v5181_v56  ;;  %3462 = vmatprep.subr.bf16.mxu1 %v5192_v59  ;;  %v5266_v56 = vld [vmem:[%s5986_s2 + $0x858] ss:$28 sps:$4 sm:$0xff]  }
 0x135   : > { %3380 = vmatprep.subr.bf16.mxu0 %v5189_v58  ;;  %v5274_v58 = vld [vmem:[%s5986_s2 + $0x894] ss:$28 sps:$4 sm:$0xff]   ;;  %v5277_v59 = vld [vmem:[%s5986_s2 + $0x19c] ss:$28 sps:$4 sm:$0xff]  }
 0x137   : > { %3463 = vmatpush1.bf16.msra.mxu1 %v5190_v61  ;;  %v5275_v61 = vld [vmem:[%s5986_s2 + $0x198] ss:$28 sps:$4 sm:$0xff]  }
 0x138   : > { %3381 = vmatpush1.bf16.msra.mxu0 %v5187_v60  ;;  %3464 = vmatprep.subr.bf16.mxu1 %v5198_v63  ;;  %v5272_v60 = vld [vmem:[%s5986_s2 + $0x890] ss:$28 sps:$4 sm:$0xff]  }
 0x139   : > { %3382 = vmatprep.subr.bf16.mxu0 %v5195_v62  ;;  %v5280_v62 = vld [vmem:[%s5986_s2 + $0x8cc] ss:$28 sps:$4 sm:$0xff]   ;;  %v5283_v63 = vld [vmem:[%s5986_s2 + $0x1d4] ss:$28 sps:$4 sm:$0xff]  }
 0x13b   : > { %3465 = vmatpush1.bf16.msra.mxu1 %v5196_v1  ;;  %v5281_v1 = vld [vmem:[%s5986_s2 + $0x1d0] ss:$28 sps:$4 sm:$0xff]  }
 0x13c   : > { %3383 = vmatpush1.bf16.msra.mxu0 %v5193_v0  ;;  %3466 = vmatprep.subr.bf16.mxu1 %v5204_v3  ;;  %v5278_v0 = vld [vmem:[%s5986_s2 + $0x8c8] ss:$28 sps:$4 sm:$0xff]  }
 0x13d   : > { %3384 = vmatprep.subr.bf16.mxu0 %v5201_v2  ;;  %v5286_v2 = vld [vmem:[%s5986_s2 + $0x904] ss:$28 sps:$4 sm:$0xff]   ;;  %v5289_v3 = vld [vmem:[%s5986_s2 + $0x20c] ss:$28 sps:$4 sm:$0xff]  }
 0x13f   : > { %3467 = vmatpush1.bf16.msra.mxu1 %v5202_v5  ;;  %v5287_v5 = vld [vmem:[%s5986_s2 + $0x208] ss:$28 sps:$4 sm:$0xff]  }
 0x140   : > { %3385 = vmatpush1.bf16.msra.mxu0 %v5199_v4  ;;  %3468 = vmatprep.subr.bf16.mxu1 %v5210_v7  ;;  %v5284_v4 = vld [vmem:[%s5986_s2 + $0x900] ss:$28 sps:$4 sm:$0xff]  }
 0x141   : > { %3386 = vmatprep.subr.bf16.mxu0 %v5207_v6  ;;  %v5292_v6 = vld [vmem:[%s5986_s2 + $0x93c] ss:$28 sps:$4 sm:$0xff]   ;;  %v5295_v7 = vld [vmem:[%s5986_s2 + $0x244] ss:$28 sps:$4 sm:$0xff]  }
 0x143   : > { %3469 = vmatpush1.bf16.msra.mxu1 %v5208_v11  ;;  %v5293_v11 = vld [vmem:[%s5986_s2 + $0x240] ss:$28 sps:$4 sm:$0xff]  }
 0x144   : > { %3387 = vmatpush1.bf16.msra.mxu0 %v5205_v10  ;;  %3470 = vmatprep.subr.bf16.mxu1 %v5216_v13  ;;  %v5290_v10 = vld [vmem:[%s5986_s2 + $0x938] ss:$28 sps:$4 sm:$0xff]  }
 0x145   : > { %3388 = vmatprep.subr.bf16.mxu0 %v5213_v12  ;;  %v5298_v12 = vld [vmem:[%s5986_s2 + $0x974] ss:$28 sps:$4 sm:$0xff]   ;;  %v5301_v13 = vld [vmem:[%s5986_s2 + $0x27c] ss:$28 sps:$4 sm:$0xff]  }
 0x147   : > { %3471 = vmatpush1.bf16.msra.mxu1 %v5214_v15  ;;  %v5299_v15 = vld [vmem:[%s5986_s2 + $0x278] ss:$28 sps:$4 sm:$0xff]  }
 0x148   : > { %3389 = vmatpush1.bf16.msra.mxu0 %v5211_v14  ;;  %3472 = vmatprep.subr.bf16.mxu1 %v5222_v17  ;;  %v5296_v14 = vld [vmem:[%s5986_s2 + $0x970] ss:$28 sps:$4 sm:$0xff]  }
 0x149   : > { %3390 = vmatprep.subr.bf16.mxu0 %v5219_v16  ;;  %v5304_v16 = vld [vmem:[%s5986_s2 + $0x9ac] ss:$28 sps:$4 sm:$0xff]   ;;  %v5307_v17 = vld [vmem:[%s5986_s2 + $0x2b4] ss:$28 sps:$4 sm:$0xff]  }
 0x14b   : > { %3473 = vmatpush1.bf16.msra.mxu1 %v5220_v20  ;;  %v5305_v20 = vld [vmem:[%s5986_s2 + $0x2b0] ss:$28 sps:$4 sm:$0xff]  }
 0x14c   : > { %3391 = vmatpush1.bf16.msra.mxu0 %v5217_v18  ;;  %3474 = vmatprep.subr.bf16.mxu1 %v5228_v23  ;;  %v5302_v18 = vld [vmem:[%s5986_s2 + $0x9a8] ss:$28 sps:$4 sm:$0xff]  }
 0x14d   : > { %3392 = vmatprep.subr.bf16.mxu0 %v5225_v21  ;;  %v5310_v21 = vld [vmem:[%s5986_s2 + $0x9e4] ss:$28 sps:$4 sm:$0xff]   ;;  %v5313_v23 = vld [vmem:[%s5986_s2 + $0x2ec] ss:$28 sps:$4 sm:$0xff]  }
 0x14f   : > { %3475 = vmatpush1.bf16.msra.mxu1 %v5226_v25  ;;  %v5311_v25 = vld [vmem:[%s5986_s2 + $0x2e8] ss:$28 sps:$4 sm:$0xff]  }
 0x150   : > { %3393 = vmatpush1.bf16.msra.mxu0 %v5223_v24  ;;  %3485 = vmatprep.subr.bf16.mxu1 %v5232_v26  ;;  %v5308_v24 = vld [vmem:[%s5986_s2 + $0x9e0] ss:$28 sps:$4 sm:$0xff]  }
 0x151   : > { %3567 = vmatprep.subr.bf16.mxu0 %v5235_v28  ;;  %v5316_v26 = vld [vmem:[%s5986_s2 + $0xa1c] ss:$28 sps:$4 sm:$0xff]   ;;  %v5319_v28 = vld [vmem:[%s5986_s2 + $0x324] ss:$28 sps:$4 sm:$0xff]  }
 0x152   : > { %3477 = vmatmul.mubr.bf16.vlgmr.msra.gmra.mrb[4].mxu1 %v6086_v9 }
 0x153   : > { %3395 = vmatmul.mubr.bf16.vlgmr.msra.gmra.mrb[0].mxu0 %v6248_v29  ;;  %3486 = vmatpush1.bf16.msra.mxu1 %v5230_v30  ;;  %v5314_v30 = vld [vmem:[%s5986_s2 + $0xa18] ss:$28 sps:$4 sm:$0xff]  }
 0x154   : > { %3568 = vmatpush1.bf16.msra.mxu0 %v5233_v31  ;;  %3487 = vmatprep.subr.bf16.mxu1 %v5238_v32  ;;  %v5317_v31 = vld [vmem:[%s5986_s2 + $0x320] ss:$28 sps:$4 sm:$0xff]   ;;  %v5322_v32 = vld [vmem:[%s5986_s2 + $0xa54] ss:$28 sps:$4 sm:$0xff]  }
 0x155   : > { %3569 = vmatprep.subr.bf16.mxu0 %v5241_v33  ;;  %3517 = vmatprep.mubr.bf16.mxu1 %v6126_v40  ;;  %v5325_v33 = vld [vmem:[%s5986_s2 + $0x35c] ss:$28 sps:$4 sm:$0xff]  }
 0x156   : > { %3599 = vmatprep.mubr.bf16.mxu0 %v6062_v54 }
 0x157   : > { %3488 = vmatpush1.bf16.msra.mxu1 %v5236_v34  ;;  %v5320_v34 = vld [vmem:[%s5986_s2 + $0xa50] ss:$28 sps:$4 sm:$0xff]  }
 0x158   : > { %3570 = vmatpush1.bf16.msra.mxu0 %v5239_v22  ;;  %3489 = vmatprep.subr.bf16.mxu1 %v5244_v35  ;;  %v5323_v22 = vld [vmem:[%s5986_s2 + $0x358] ss:$28 sps:$4 sm:$0xff]   ;;  %v5328_v35 = vld [vmem:[%s5986_s2 + $0xa8c] ss:$28 sps:$4 sm:$0xff]  }
 0x159   : > { %3571 = vmatprep.subr.bf16.mxu0 %v5247_v36  ;;  %v5331_v36 = vld [vmem:[%s5986_s2 + $0x394] ss:$28 sps:$4 sm:$0xff]  }
 0x15b   : > { %3490 = vmatpush1.bf16.msra.mxu1 %v5242_v37  ;;  %v5326_v37 = vld [vmem:[%s5986_s2 + $0xa88] ss:$28 sps:$4 sm:$0xff]  }
 0x15c   : > { %3572 = vmatpush1.bf16.msra.mxu0 %v5245_v38  ;;  %3491 = vmatprep.subr.bf16.mxu1 %v5250_v39  ;;  %v5329_v38 = vld [vmem:[%s5986_s2 + $0x390] ss:$28 sps:$4 sm:$0xff]   ;;  %v5334_v39 = vld [vmem:[%s5986_s2 + $0xac4] ss:$28 sps:$4 sm:$0xff]  }
 0x15d   : > { %3573 = vmatprep.subr.bf16.mxu0 %v5253_v41  ;;  %v5337_v41 = vld [vmem:[%s5986_s2 + $0x3cc] ss:$28 sps:$4 sm:$0xff]  }
 0x15f   : > { %3492 = vmatpush1.bf16.msra.mxu1 %v5248_v42  ;;  %v5332_v42 = vld [vmem:[%s5986_s2 + $0xac0] ss:$28 sps:$4 sm:$0xff]  }
 0x160   : > { %3574 = vmatpush1.bf16.msra.mxu0 %v5251_v43  ;;  %3493 = vmatprep.subr.bf16.mxu1 %v5256_v44  ;;  %v5335_v43 = vld [vmem:[%s5986_s2 + $0x3c8] ss:$28 sps:$4 sm:$0xff]   ;;  %v5340_v44 = vld [vmem:[%s5986_s2 + $0xafc] ss:$28 sps:$4 sm:$0xff]  }
 0x161   : > { %3575 = vmatprep.subr.bf16.mxu0 %v5259_v45  ;;  %v5343_v45 = vld [vmem:[%s5986_s2 + $0x404] ss:$28 sps:$4 sm:$0xff]  }
 0x163   : > { %3494 = vmatpush1.bf16.msra.mxu1 %v5254_v46  ;;  %v5338_v46 = vld [vmem:[%s5986_s2 + $0xaf8] ss:$28 sps:$4 sm:$0xff]  }
 0x164   : > { %3576 = vmatpush1.bf16.msra.mxu0 %v5257_v47  ;;  %3495 = vmatprep.subr.bf16.mxu1 %v5262_v48  ;;  %v5341_v47 = vld [vmem:[%s5986_s2 + $0x400] ss:$28 sps:$4 sm:$0xff]   ;;  %v5346_v48 = vld [vmem:[%s5986_s2 + $0xb34] ss:$28 sps:$4 sm:$0xff]  }
 0x165   : > { %3577 = vmatprep.subr.bf16.mxu0 %v5265_v49  ;;  %v5349_v49 = vld [vmem:[%s5986_s2 + $0x43c] ss:$28 sps:$4 sm:$0xff]  }
 0x167   : > { %3496 = vmatpush1.bf16.msra.mxu1 %v5260_v50  ;;  %v5344_v50 = vld [vmem:[%s5986_s2 + $0xb30] ss:$28 sps:$4 sm:$0xff]  }
 0x168   : > { %3578 = vmatpush1.bf16.msra.mxu0 %v5263_v51  ;;  %3497 = vmatprep.subr.bf16.mxu1 %v5268_v52  ;;  %v5347_v51 = vld [vmem:[%s5986_s2 + $0x438] ss:$28 sps:$4 sm:$0xff]   ;;  %v5352_v52 = vld [vmem:[%s5986_s2 + $0xb6c] ss:$28 sps:$4 sm:$0xff]  }
 0x169   : > { %3579 = vmatprep.subr.bf16.mxu0 %v5271_v53  ;;  %v5355_v53 = vld [vmem:[%s5986_s2 + $0x474] ss:$28 sps:$4 sm:$0xff]  }
 0x16b   : > { %3498 = vmatpush1.bf16.msra.mxu1 %v5266_v56  ;;  %v5350_v56 = vld [vmem:[%s5986_s2 + $0xb68] ss:$28 sps:$4 sm:$0xff]  }
 0x16c   : > { %3580 = vmatpush1.bf16.msra.mxu0 %v5269_v57  ;;  %3499 = vmatprep.subr.bf16.mxu1 %v5274_v58  ;;  %v5353_v57 = vld [vmem:[%s5986_s2 + $0x470] ss:$28 sps:$4 sm:$0xff]   ;;  %v5358_v58 = vld [vmem:[%s5986_s2 + $0xba4] ss:$28 sps:$4 sm:$0xff]  }
 0x16d   : > { %3581 = vmatprep.subr.bf16.mxu0 %v5277_v59  ;;  %v5361_v59 = vld [vmem:[%s5986_s2 + $0x4ac] ss:$28 sps:$4 sm:$0xff]  }
 0x16f   : > { %3500 = vmatpush1.bf16.msra.mxu1 %v5272_v60  ;;  %v5356_v60 = vld [vmem:[%s5986_s2 + $0xba0] ss:$28 sps:$4 sm:$0xff]  }
 0x170   : > { %3582 = vmatpush1.bf16.msra.mxu0 %v5275_v61  ;;  %3501 = vmatprep.subr.bf16.mxu1 %v5280_v62  ;;  %v5359_v61 = vld [vmem:[%s5986_s2 + $0x4a8] ss:$28 sps:$4 sm:$0xff]   ;;  %v5364_v62 = vld [vmem:[%s5986_s2 + $0xbdc] ss:$28 sps:$4 sm:$0xff]  }
 0x171   : > { %3583 = vmatprep.subr.bf16.mxu0 %v5283_v63  ;;  %v5367_v63 = vld [vmem:[%s5986_s2 + $0x4e4] ss:$28 sps:$4 sm:$0xff]  }
 0x173   : > { %3502 = vmatpush1.bf16.msra.mxu1 %v5278_v0 }
 0x174   : > { %3584 = vmatpush1.bf16.msra.mxu0 %v5281_v1  ;;  %3503 = vmatprep.subr.bf16.mxu1 %v5286_v2  ;;  %v5362_v1 = vld [vmem:[%s5986_s2 + $0xbd8] ss:$28 sps:$4 sm:$0xff]  }
 0x175   : > { %3585 = vmatprep.subr.bf16.mxu0 %v5289_v3  ;;  %v5365_v3 = vld [vmem:[%s5986_s2 + $0x4e0] ss:$28 sps:$4 sm:$0xff]  }
 0x177   : > { %3504 = vmatpush1.bf16.msra.mxu1 %v5284_v4  ;;  %v5370_v4 = vld [vmem:[%s5986_s2 + $0xc14] ss:$28 sps:$4 sm:$0xff]  }
 0x178   : > { %3586 = vmatpush1.bf16.msra.mxu0 %v5287_v5  ;;  %3505 = vmatprep.subr.bf16.mxu1 %v5292_v6 }
 0x179   : > { %3587 = vmatprep.subr.bf16.mxu0 %v5295_v7  ;;  %v5373_v7 = vld [vmem:[%s5986_s2 + $0x51c] ss:$28 sps:$4 sm:$0xff]  }
 0x17b   : > { %3506 = vmatpush1.bf16.msra.mxu1 %v5290_v10  ;;  %v5368_v10 = vld [vmem:[%s5986_s2 + $0xc10] ss:$28 sps:$4 sm:$0xff]  }
 0x17c   : > { %3588 = vmatpush1.bf16.msra.mxu0 %v5293_v11  ;;  %3507 = vmatprep.subr.bf16.mxu1 %v5298_v12  ;;  %v5371_v11 = vld [vmem:[%s5986_s2 + $0x518] ss:$28 sps:$4 sm:$0xff]   ;;  %v5376_v12 = vld [vmem:[%s5986_s2 + $0xc4c] ss:$28 sps:$4 sm:$0xff]  }
 0x17d   : > { %3589 = vmatprep.subr.bf16.mxu0 %v5301_v13  ;;  %v5379_v13 = vld [vmem:[%s5986_s2 + $0x554] ss:$28 sps:$4 sm:$0xff]  }
 0x17f   : > { %3508 = vmatpush1.bf16.msra.mxu1 %v5296_v14  ;;  %v5374_v14 = vld [vmem:[%s5986_s2 + $0xc48] ss:$28 sps:$4 sm:$0xff]  }
 0x180   : > { %3590 = vmatpush1.bf16.msra.mxu0 %v5299_v15  ;;  %3509 = vmatprep.subr.bf16.mxu1 %v5304_v16  ;;  %v5377_v15 = vld [vmem:[%s5986_s2 + $0x550] ss:$28 sps:$4 sm:$0xff]   ;;  %v5382_v16 = vld [vmem:[%s5986_s2 + $0xc84] ss:$28 sps:$4 sm:$0xff]  }
 0x181   : > { %3591 = vmatprep.subr.bf16.mxu0 %v5307_v17  ;;  %v5385_v17 = vld [vmem:[%s5986_s2 + $0x58c] ss:$28 sps:$4 sm:$0xff]  }
 0x183   : > { %3510 = vmatpush1.bf16.msra.mxu1 %v5302_v18  ;;  %v5380_v18 = vld [vmem:[%s5986_s2 + $0xc80] ss:$28 sps:$4 sm:$0xff]  }
 0x184   : > { %3592 = vmatpush1.bf16.msra.mxu0 %v5305_v20  ;;  %3511 = vmatprep.subr.bf16.mxu1 %v5310_v21  ;;  %v5383_v20 = vld [vmem:[%s5986_s2 + $0x588] ss:$28 sps:$4 sm:$0xff]   ;;  %v5388_v21 = vld [vmem:[%s5986_s2 + $0xcbc] ss:$28 sps:$4 sm:$0xff]  }
 0x185   : > { %3593 = vmatprep.subr.bf16.mxu0 %v5313_v23  ;;  %v5391_v23 = vld [vmem:[%s5986_s2 + $0x5c4] ss:$28 sps:$4 sm:$0xff]  }
 0x187   : > { %3512 = vmatpush1.bf16.msra.mxu1 %v5308_v24  ;;  %v5386_v24 = vld [vmem:[%s5986_s2 + $0xcb8] ss:$28 sps:$4 sm:$0xff]  }
 0x188   : > { %3594 = vmatpush1.bf16.msra.mxu0 %v5311_v25  ;;  %3513 = vmatprep.subr.bf16.mxu1 %v5316_v26  ;;  %v5389_v25 = vld [vmem:[%s5986_s2 + $0x5c0] ss:$28 sps:$4 sm:$0xff]   ;;  %v5394_v26 = vld [vmem:[%s5986_s2 + $0xcf4] ss:$28 sps:$4 sm:$0xff]  }
 0x189   : > { %3595 = vmatprep.subr.bf16.mxu0 %v5319_v28  ;;  %v5397_v28 = vld [vmem:[%s5986_s2 + $0x5fc] ss:$28 sps:$4 sm:$0xff]  }
 0x18b   : > { %3514 = vmatpush1.bf16.msra.mxu1 %v5314_v30  ;;  %v5392_v30 = vld [vmem:[%s5986_s2 + $0xcf0] ss:$28 sps:$4 sm:$0xff]  }
 0x18c   : > { %3596 = vmatpush1.bf16.msra.mxu0 %v5317_v31  ;;  %3515 = vmatprep.subr.bf16.mxu1 %v5322_v32  ;;  %v5395_v31 = vld [vmem:[%s5986_s2 + $0x5f8] ss:$28 sps:$4 sm:$0xff]   ;;  %v5400_v32 = vld [vmem:[%s5986_s2 + $0xd2c] ss:$28 sps:$4 sm:$0xff]  }
 0x18d   : > { %3597 = vmatprep.subr.bf16.mxu0 %v5325_v33  ;;  %v5403_v33 = vld [vmem:[%s5986_s2 + $0x634] ss:$28 sps:$4 sm:$0xff]  }
 0x18f   : > { %3516 = vmatpush1.bf16.msra.mxu1 %v5320_v34  ;;  %v5398_v34 = vld [vmem:[%s5986_s2 + $0xd28] ss:$28 sps:$4 sm:$0xff]  }
 0x190   : > { %3598 = vmatpush1.bf16.msra.mxu0 %v5323_v22  ;;  %3526 = vmatprep.subr.bf16.mxu1 %v5328_v35  ;;  %v5401_v22 = vld [vmem:[%s5986_s2 + $0x630] ss:$28 sps:$4 sm:$0xff]   ;;  %v5406_v35 = vld [vmem:[%s5986_s2 + $0xd64] ss:$28 sps:$4 sm:$0xff]  }
 0x191   : > { %3608 = vmatprep.subr.bf16.mxu0 %v5331_v36  ;;  %v5409_v36 = vld [vmem:[%s5986_s2 + $0x66c] ss:$28 sps:$4 sm:$0xff]  }
 0x192   : > { %3518 = vmatmul.mubr.bf16.vlgmr.msra.gmra.mrb[4].mxu1 %v6169_v19 }
 0x193   : > { %3600 = vmatmul.mubr.bf16.vlgmr.msra.gmra.mrb[4].mxu0 %v6084_v8  ;;  %3527 = vmatpush1.bf16.msra.mxu1 %v5326_v37  ;;  %v5404_v37 = vld [vmem:[%s5986_s2 + $0xd60] ss:$28 sps:$4 sm:$0xff]  }
 0x194   : > { %3609 = vmatpush1.bf16.msra.mxu0 %v5329_v38  ;;  %3528 = vmatprep.subr.bf16.mxu1 %v5334_v39  ;;  %v5407_v38 = vld [vmem:[%s5986_s2 + $0x668] ss:$28 sps:$4 sm:$0xff]   ;;  %v5412_v39 = vld [vmem:[%s5986_s2 + $0xd9c] ss:$28 sps:$4 sm:$0xff]  }
 0x195   : > { %3610 = vmatprep.subr.bf16.mxu0 %v5337_v41  ;;  %3558 = vmatprep.mubr.bf16.mxu1 %v6185_v27  ;;  %v5415_v41 = vld [vmem:[%s5986_s2 + $0x6a4] ss:$28 sps:$4 sm:$0xff]  }
 0x196   : > { %3640 = vmatprep.mubr.bf16.mxu0 %v6064_v55 }
 0x197   : > { %3529 = vmatpush1.bf16.msra.mxu1 %v5332_v42  ;;  %v5410_v42 = vld [vmem:[%s5986_s2 + $0xd98] ss:$28 sps:$4 sm:$0xff]  }
 0x198   : > { %3611 = vmatpush1.bf16.msra.mxu0 %v5335_v43  ;;  %3530 = vmatprep.subr.bf16.mxu1 %v5340_v44  ;;  %v5413_v43 = vld [vmem:[%s5986_s2 + $0x6a0] ss:$28 sps:$4 sm:$0xff]   ;;  %v5418_v44 = vld [vmem:[%s5986_s2 + $0xdd4] ss:$28 sps:$4 sm:$0xff]  }
 0x199   : > { %3612 = vmatprep.subr.bf16.mxu0 %v5343_v45  ;;  %v5421_v45 = vld [vmem:[%s5986_s2 + $0x6dc] ss:$28 sps:$4 sm:$0xff]  }
 0x19b   : > { %3531 = vmatpush1.bf16.msra.mxu1 %v5338_v46  ;;  %v5416_v46 = vld [vmem:[%s5986_s2 + $0xdd0] ss:$28 sps:$4 sm:$0xff]  }
 0x19c   : > { %3613 = vmatpush1.bf16.msra.mxu0 %v5341_v47  ;;  %3532 = vmatprep.subr.bf16.mxu1 %v5346_v48  ;;  %v5419_v47 = vld [vmem:[%s5986_s2 + $0x6d8] ss:$28 sps:$4 sm:$0xff]  }
 0x19d   : > { %3614 = vmatprep.subr.bf16.mxu0 %v5349_v49  ;;  %v5424_v48 = vld [vmem:[%s5986_s2 + $0x714] ss:$28 sps:$4 sm:$0xff]  }
 0x19e   : > { %v5425_v49 = vld [vmem:[%s5986_s2 + $0x1d8] ss:$28 sps:$4 sm:$0xff]  }
 0x19f   : > { %3533 = vmatpush1.bf16.msra.mxu1 %v5344_v50  ;;  %v5422_v50 = vld [vmem:[%s5986_s2 + $0x710] ss:$28 sps:$4 sm:$0xff]  }
 0x1a0   : > { %3615 = vmatpush1.bf16.msra.mxu0 %v5347_v51  ;;  %3534 = vmatprep.subr.bf16.mxu1 %v5352_v52  ;;  %v5426_v51 = vld [vmem:[%s5986_s2 + $0x18] ss:$28 sps:$4 sm:$0xff]   ;;  %v5429_v52 = vld [vmem:[%s5986_s2 + $0x74c] ss:$28 sps:$4 sm:$0xff]  }
 0x1a1   : > { %3616 = vmatprep.subr.bf16.mxu0 %v5355_v53  ;;  %v5430_v53 = vld [vmem:[%s5986_s2 + $0x210] ss:$28 sps:$4 sm:$0xff]  }
 0x1a3   : > { %3535 = vmatpush1.bf16.msra.mxu1 %v5350_v56  ;;  %v5427_v56 = vld [vmem:[%s5986_s2 + $0x748] ss:$28 sps:$4 sm:$0xff]  }
 0x1a4   : > { %3617 = vmatpush1.bf16.msra.mxu0 %v5353_v57  ;;  %3536 = vmatprep.subr.bf16.mxu1 %v5358_v58  ;;  %v5431_v57 = vld [vmem:[%s5986_s2 + $0x50] ss:$28 sps:$4 sm:$0xff]   ;;  %v5434_v58 = vld [vmem:[%s5986_s2 + $0x784] ss:$28 sps:$4 sm:$0xff]  }
 0x1a5   : > { %3618 = vmatprep.subr.bf16.mxu0 %v5361_v59  ;;  %v6346_v0 = vpop.f32.mrb[0].mxu1  ;;  %v5435_v59 = vld [vmem:[%s5986_s2 + $0x248] ss:$28 sps:$4 sm:$0xff]  }
 0x1a6   : > { %v6349_v2 = vpop.f32.mrb[1].mxu1 }
 0x1a7   : > { %v3277_v5 = vpop.f32.mrb[2].mxu1  ;;  %3537 = vmatpush1.bf16.msra.mxu1 %v5356_v60  ;;  %v5432_v60 = vld [vmem:[%s5986_s2 + $0x780] ss:$28 sps:$4 sm:$0xff]  }
 0x1a8   : > { %3619 = vmatpush1.bf16.msra.mxu0 %v5359_v61  ;;  %v3278_v6 = vpop.f32.mrb[3].mxu1  ;;  %3538 = vmatprep.subr.bf16.mxu1 %v5364_v62  ;;  %v5436_v61 = vld [vmem:[%s5986_s2 + $0x88] ss:$28 sps:$4 sm:$0xff]   ;;  %v5439_v62 = vld [vmem:[%s5986_s2 + $0x7bc] ss:$28 sps:$4 sm:$0xff]  }
 0x1a9   : > { %3620 = vmatprep.subr.bf16.mxu0 %v5367_v63  ;;  %v5440_v63 = vld [vmem:[%s5986_s2 + $0x280] ss:$28 sps:$4 sm:$0xff]   ;;  %v5442_v5 = vld [vmem:[%s5986_s2 + $0x7f0] ss:$28 sps:$4 sm:$0xff]   ;;  %v5446_v6 = vld [vmem:[%s5986_s2 + $0xf8] ss:$28 sps:$4 sm:$0xff]  }
 0x1ab   : > { %3539 = vmatpush1.bf16.msra.mxu1 %v5362_v1  ;;  %v5437_v1 = vld [vmem:[%s5986_s2 + $0x7b8] ss:$28 sps:$4 sm:$0xff]  }
 0x1ac   : > { %3621 = vmatpush1.bf16.msra.mxu0 %v5365_v3  ;;  %3540 = vmatprep.subr.bf16.mxu1 %v5370_v4  ;;  %v5444_v3 = vld [vmem:[%s5986_s2 + $0x7f4] ss:$28 sps:$4 sm:$0xff]  }
 0x1ad   : > { %3622 = vmatprep.subr.bf16.mxu0 %v5373_v7  ;;  %v5445_v4 = vld [vmem:[%s5986_s2 + $0x2b8] ss:$28 sps:$4 sm:$0xff]   ;;  %v5449_v7 = vld [vmem:[%s5986_s2 + $0x82c] ss:$28 sps:$4 sm:$0xff]  }
 0x1af   : > { %3541 = vmatpush1.bf16.msra.mxu1 %v5368_v10  ;;  %v5450_v10 = vld [vmem:[%s5986_s2 + $0x2f0] ss:$28 sps:$4 sm:$0xff]  }
 0x1b0   : > { %3623 = vmatpush1.bf16.msra.mxu0 %v5371_v11  ;;  %3542 = vmatprep.subr.bf16.mxu1 %v5376_v12  ;;  %v5447_v11 = vld [vmem:[%s5986_s2 + $0x828] ss:$28 sps:$4 sm:$0xff]   ;;  %v5451_v12 = vld [vmem:[%s5986_s2 + $0x130] ss:$28 sps:$4 sm:$0xff]  }
 0x1b1   : > { %3624 = vmatprep.subr.bf16.mxu0 %v5379_v13  ;;  %v5454_v13 = vld [vmem:[%s5986_s2 + $0x864] ss:$28 sps:$4 sm:$0xff]  }
 0x1b3   : > { %3543 = vmatpush1.bf16.msra.mxu1 %v5374_v14  ;;  %v5455_v14 = vld [vmem:[%s5986_s2 + $0x328] ss:$28 sps:$4 sm:$0xff]  }
 0x1b4   : > { %3625 = vmatpush1.bf16.msra.mxu0 %v5377_v15  ;;  %3544 = vmatprep.subr.bf16.mxu1 %v5382_v16  ;;  %v5452_v15 = vld [vmem:[%s5986_s2 + $0x860] ss:$28 sps:$4 sm:$0xff]   ;;  %v5456_v16 = vld [vmem:[%s5986_s2 + $0x168] ss:$28 sps:$4 sm:$0xff]  }
 0x1b5   : > { %3626 = vmatprep.subr.bf16.mxu0 %v5385_v17  ;;  %v5459_v17 = vld [vmem:[%s5986_s2 + $0x89c] ss:$28 sps:$4 sm:$0xff]  }
 0x1b7   : > { %3545 = vmatpush1.bf16.msra.mxu1 %v5380_v18  ;;  %v5460_v18 = vld [vmem:[%s5986_s2 + $0x360] ss:$28 sps:$4 sm:$0xff]  }
 0x1b8   : > { %3627 = vmatpush1.bf16.msra.mxu0 %v5383_v20  ;;  %3546 = vmatprep.subr.bf16.mxu1 %v5388_v21  ;;  %v5457_v20 = vld [vmem:[%s5986_s2 + $0x898] ss:$28 sps:$4 sm:$0xff]   ;;  %v5461_v21 = vld [vmem:[%s5986_s2 + $0x1a0] ss:$28 sps:$4 sm:$0xff]  }
 0x1b9   : > { %3628 = vmatprep.subr.bf16.mxu0 %v5391_v23  ;;  %v5464_v23 = vld [vmem:[%s5986_s2 + $0x8d4] ss:$28 sps:$4 sm:$0xff]  }
 0x1bb   : > { %3547 = vmatpush1.bf16.msra.mxu1 %v5386_v24  ;;  %v5465_v24 = vld [vmem:[%s5986_s2 + $0x558] ss:$28 sps:$4 sm:$0xff]  }
 0x1bc   : > { %3629 = vmatpush1.bf16.msra.mxu0 %v5389_v25  ;;  %3548 = vmatprep.subr.bf16.mxu1 %v5394_v26  ;;  %v5462_v25 = vld [vmem:[%s5986_s2 + $0x8d0] ss:$28 sps:$4 sm:$0xff]   ;;  %v5466_v26 = vld [vmem:[%s5986_s2 + $0x398] ss:$28 sps:$4 sm:$0xff]  }
 0x1bd   : > { %3630 = vmatprep.subr.bf16.mxu0 %v5397_v28  ;;  %v5469_v28 = vld [vmem:[%s5986_s2 + $0x90c] ss:$28 sps:$4 sm:$0xff]  }
 0x1bf   : > { %3549 = vmatpush1.bf16.msra.mxu1 %v5392_v30  ;;  %v5470_v30 = vld [vmem:[%s5986_s2 + $0x590] ss:$28 sps:$4 sm:$0xff]  }
 0x1c0   : > { %3631 = vmatpush1.bf16.msra.mxu0 %v5395_v31  ;;  %3550 = vmatprep.subr.bf16.mxu1 %v5400_v32  ;;  %v5467_v31 = vld [vmem:[%s5986_s2 + $0x908] ss:$28 sps:$4 sm:$0xff]   ;;  %v5471_v32 = vld [vmem:[%s5986_s2 + $0x3d0] ss:$28 sps:$4 sm:$0xff]  }
 0x1c1   : > { %3632 = vmatprep.subr.bf16.mxu0 %v5403_v33  ;;  %v5474_v33 = vld [vmem:[%s5986_s2 + $0x944] ss:$28 sps:$4 sm:$0xff]  }
 0x1c3   : > { %3551 = vmatpush1.bf16.msra.mxu1 %v5398_v34  ;;  %v5475_v34 = vld [vmem:[%s5986_s2 + $0x5c8] ss:$28 sps:$4 sm:$0xff]  }
 0x1c4   : > { %3633 = vmatpush1.bf16.msra.mxu0 %v5401_v22  ;;  %3552 = vmatprep.subr.bf16.mxu1 %v5406_v35  ;;  %v5472_v22 = vld [vmem:[%s5986_s2 + $0x940] ss:$28 sps:$4 sm:$0xff]  }
 0x1c5   : > { %3634 = vmatprep.subr.bf16.mxu0 %v5409_v36  ;;  %v5479_v35 = vld [vmem:[%s5986_s2 + $0x97c] ss:$28 sps:$4 sm:$0xff]  }
 0x1c6   : > { %v5480_v36 = vld [vmem:[%s5986_s2 + $0x600] ss:$28 sps:$4 sm:$0xff]  }
 0x1c7   : > { %3553 = vmatpush1.bf16.msra.mxu1 %v5404_v37  ;;  %v5477_v37 = vld [vmem:[%s5986_s2 + $0x978] ss:$28 sps:$4 sm:$0xff]  }
 0x1c8   : > { %3635 = vmatpush1.bf16.msra.mxu0 %v5407_v38  ;;  %3554 = vmatprep.subr.bf16.mxu1 %v5412_v39  ;;  %v5481_v38 = vld [vmem:[%s5986_s2 + $0x440] ss:$28 sps:$4 sm:$0xff]   ;;  %v5485_v39 = vld [vmem:[%s5986_s2 + $0x638] ss:$28 sps:$4 sm:$0xff]  }
 0x1c9   : > { %3636 = vmatprep.subr.bf16.mxu0 %v5415_v41  ;;  %v5482_v41 = vld [vmem:[%s5986_s2 + $0x9b0] ss:$28 sps:$4 sm:$0xff]  }
 0x1cb   : > { %3555 = vmatpush1.bf16.msra.mxu1 %v5410_v42  ;;  %v5486_v42 = vld [vmem:[%s5986_s2 + $0x478] ss:$28 sps:$4 sm:$0xff]  }
 0x1cc   : > { %3637 = vmatpush1.bf16.msra.mxu0 %v5413_v43  ;;  %3556 = vmatprep.subr.bf16.mxu1 %v5418_v44  ;;  %v5489_v43 = vld [vmem:[%s5986_s2 + $0x9ec] ss:$28 sps:$4 sm:$0xff]  }
 0x1cd   : > { %3638 = vmatprep.subr.bf16.mxu0 %v5421_v45  ;;  %v5490_v44 = vld [vmem:[%s5986_s2 + $0x670] ss:$28 sps:$4 sm:$0xff]   ;;  %v5487_v45 = vld [vmem:[%s5986_s2 + $0x9e8] ss:$28 sps:$4 sm:$0xff]  }
 0x1cf   : > { %3557 = vmatpush1.bf16.msra.mxu1 %v5416_v46  ;;  %v5491_v46 = vld [vmem:[%s5986_s2 + $0x4b0] ss:$28 sps:$4 sm:$0xff]  }
 0x1d0   : > { %3639 = vmatpush1.bf16.msra.mxu0 %v5419_v47  ;;  %4747 = vmatprep.subr.bf16.mxu1 %v5425_v49  ;;  %v5494_v47 = vld [vmem:[%s5986_s2 + $0xa24] ss:$28 sps:$4 sm:$0xff]  }
 0x1d1   : > { %3649 = vmatprep.subr.bf16.mxu0 %v5424_v48  ;;  %v5495_v48 = vld [vmem:[%s5986_s2 + $0x6a8] ss:$28 sps:$4 sm:$0xff]   ;;  %v5492_v49 = vld [vmem:[%s5986_s2 + $0xa20] ss:$28 sps:$4 sm:$0xff]  }
 0x1d2   : > { %3559 = vmatmul.mubr.bf16.vlgmr.msra.gmra.mrb[4].mxu1 %v6248_v29 }
 0x1d3   : > { %3641 = vmatmul.mubr.bf16.vlgmr.msra.gmra.mrb[4].mxu0 %v6086_v9  ;;  %4748 = vmatpush3.bf16.msra.mxu1 %v5426_v51  ;;  %v5499_v51 = vld [vmem:[%s5986_s2 + $0xa5c] ss:$28 sps:$4 sm:$0xff]  }
 0x1d4   : > { %3650 = vmatpush1.bf16.msra.mxu0 %v5422_v50  ;;  %4749 = vmatprep.subr.bf16.mxu1 %v5430_v53  ;;  %v5496_v50 = vld [vmem:[%s5986_s2 + $0x4e8] ss:$28 sps:$4 sm:$0xff]   ;;  %v5497_v53 = vld [vmem:[%s5986_s2 + $0xa58] ss:$28 sps:$4 sm:$0xff]  }
 0x1d5   : > { %3651 = vmatprep.subr.bf16.mxu0 %v5429_v52  ;;  %3763 = vmatprep.mubr.bf16.mxu1 %v6062_v54  ;;  %v5441_v54 = vld [vmem:[%s5986_s2 + $0xc0] ss:$28 sps:$4 sm:$0xff]  }
 0x1d6   : > { %3681 = vmatprep.mubr.bf16.mxu0 %v6126_v40  ;;  %v5500_v52 = vld [vmem:[%s5986_s2 + $0x6e0] ss:$28 sps:$4 sm:$0xff]  }
 0x1d7   : > { %4750 = vmatpush3.bf16.msra.mxu1 %v5431_v57  ;;  %v5504_v57 = vld [vmem:[%s5986_s2 + $0xa94] ss:$28 sps:$4 sm:$0xff]  }
 0x1d8   : > { %3652 = vmatpush1.bf16.msra.mxu0 %v5427_v56  ;;  %4751 = vmatprep.subr.bf16.mxu1 %v5435_v59  ;;  %v5501_v56 = vld [vmem:[%s5986_s2 + $0x520] ss:$28 sps:$4 sm:$0xff]   ;;  %v5502_v59 = vld [vmem:[%s5986_s2 + $0xa90] ss:$28 sps:$4 sm:$0xff]  }
 0x1d9   : > { %3653 = vmatprep.subr.bf16.mxu0 %v5434_v58  ;;  %v5505_v58 = vld [vmem:[%s5986_s2 + $0x8d8] ss:$28 sps:$4 sm:$0xff]  }
 0x1db   : > { %4752 = vmatpush3.bf16.msra.mxu1 %v5436_v61  ;;  %v5509_v61 = vld [vmem:[%s5986_s2 + $0xacc] ss:$28 sps:$4 sm:$0xff]  }
 0x1dc   : > { %3654 = vmatpush1.bf16.msra.mxu0 %v5432_v60  ;;  %4753 = vmatprep.subr.bf16.mxu1 %v5440_v63  ;;  %v5506_v60 = vld [vmem:[%s5986_s2 + $0x718] ss:$28 sps:$4 sm:$0xff]   ;;  %v5507_v63 = vld [vmem:[%s5986_s2 + $0xac8] ss:$28 sps:$4 sm:$0xff]  }
 0x1dd   : > { %3655 = vmatprep.subr.bf16.mxu0 %v5439_v62  ;;  %v5510_v62 = vld [vmem:[%s5986_s2 + $0x910] ss:$28 sps:$4 sm:$0xff]  }
 0x1df   : > { %4754 = vmatpush3.bf16.msra.mxu1 %v5441_v54  ;;  %v900_v54 = vlaneseq }
 0x1e0   : > { %3656 = vmatpush1.bf16.msra.mxu0 %v5437_v1  ;;  %4755 = vmatprep.subr.bf16.mxu1 %v5445_v4  ;;  %v5511_v1 = vld [vmem:[%s5986_s2 + $0x750] ss:$28 sps:$4 sm:$0xff]   ;;  %v5515_v4 = vld [vmem:[%s5986_s2 + $0x948] ss:$28 sps:$4 sm:$0xff]  }
 0x1e1   : > { %3657 = vmatprep.subr.bf16.mxu0 %v5444_v3  ;;  %v5514_v3 = vld [vmem:[%s5986_s2 + $0xb04] ss:$28 sps:$4 sm:$0xff]  }
 0x1e3   : > { %4756 = vmatpush3.bf16.msra.mxu1 %v5446_v6  ;;  %v6474_v6 = vshrl.u32 %v900_v54, 7  ;;  %v5554_v54 = vld [vmem:[%s5986_s2 + $0xcc4] ss:$28 sps:$4 sm:$0xff]  }
 0x1e4   : > { %3658 = vmatpush1.bf16.msra.mxu0 %v5442_v5  ;;  %4757 = vmatprep.subr.bf16.mxu1 %v5450_v10  ;;  %v5516_v5 = vld [vmem:[%s5986_s2 + $0x788] ss:$28 sps:$4 sm:$0xff]   ;;  %v5520_v10 = vld [vmem:[%s5986_s2 + $0x980] ss:$28 sps:$4 sm:$0xff]  }
 0x1e5   : > { %3659 = vmatprep.subr.bf16.mxu0 %v5449_v7  ;;  %v5519_v7 = vld [vmem:[%s5986_s2 + $0xb3c] ss:$28 sps:$4 sm:$0xff]  }
 0x1e7   : > { %4758 = vmatpush3.bf16.msra.mxu1 %v5451_v12  ;;  %v6481_v12 = vsub.s32 0, %v6474_v6 }
 0x1e8   : > { %3660 = vmatpush1.bf16.msra.mxu0 %v5447_v11  ;;  %4759 = vmatprep.subr.bf16.mxu1 %v5455_v14  ;;  %v5521_v11 = vld [vmem:[%s5986_s2 + $0x7c0] ss:$28 sps:$4 sm:$0xff]   ;;  %v5525_v14 = vld [vmem:[%s5986_s2 + $0x9b8] ss:$28 sps:$4 sm:$0xff]  }
 0x1e9   : > { %3661 = vmatprep.subr.bf16.mxu0 %v5454_v13  ;;  %v5524_v13 = vld [vmem:[%s5986_s2 + $0xb74] ss:$28 sps:$4 sm:$0xff]  }
 0x1eb   : > { %4760 = vmatpush3.bf16.msra.mxu1 %v5456_v16  ;;  %v6490_v16 = vsub.s32 1, %v6474_v6 }
 0x1ec   : > { %3662 = vmatpush1.bf16.msra.mxu0 %v5452_v15  ;;  %4761 = vmatprep.subr.bf16.mxu1 %v5460_v18  ;;  %v6487_v15 = vld [vmem:[%s291_s18] sm:$0xff]  ;;  %v5526_v18 = vld [vmem:[%s5986_s2 + $0x7f8] ss:$28 sps:$4 sm:$0xff]  }
 0x1ed   : > { %3663 = vmatprep.subr.bf16.mxu0 %v5459_v17  ;;  %v5522_v17 = vld [vmem:[%s5986_s2 + $0xb70] ss:$28 sps:$4 sm:$0xff]  }
 0x1ef   : > { %4762 = vmatpush3.bf16.msra.mxu1 %v5461_v21  ;;  %v5529_v21 = vld [vmem:[%s5986_s2 + $0xbac] ss:$28 sps:$4 sm:$0xff]  }
 0x1f0   : > { %3664 = vmatpush1.bf16.msra.mxu0 %v5457_v20  ;;  %4769 = vmatprep.subr.bf16.mxu1 %v5465_v24  ;;  %v903_v20 = vrot.slane %v6487_v15, %v6481_v12  ;;  %v907_v24 = vrot.slane %v6487_v15, %v6490_v16 }
 0x1f1   : > { %3665 = vmatprep.subr.bf16.mxu0 %v5464_v23  ;;  %v5530_v23 = vld [vmem:[%s5986_s2 + $0x9f0] ss:$28 sps:$4 sm:$0xff]  }
 0x1f2   : > { %3764 = vmatmul.mubr.bf16.vlgmr.msra.gmra.mrb[8].mxu1 %v6084_v8  ;;  %v5476_v8 = vld [vmem:[%s5986_s2 + $0x408] ss:$28 sps:$4 sm:$0xff]  }
 0x1f3   : > { %4770 = vmatpush3.bf16.msra.mxu1 %v5466_v26  ;;  %3803 = vmatprep.mubr.bf16.mxu1 %v6064_v55  ;;  %v5484_v55 = vld [vmem:[%s5986_s2 + $0x9b4] ss:$28 sps:$4 sm:$0xff]  }
 0x1f4   : > { %3666 = vmatpush1.bf16.msra.mxu0 %v5462_v25  ;;  %4771 = vmatprep.subr.bf16.mxu1 %v5470_v30  ;;  %v5527_v25 = vld [vmem:[%s5986_s2 + $0xba8] ss:$28 sps:$4 sm:$0xff]   ;;  %v5531_v26 = vld [vmem:[%s5986_s2 + $0x830] ss:$28 sps:$4 sm:$0xff]  }
 0x1f5   : > { %3667 = vmatprep.subr.bf16.mxu0 %v5469_v28  ;;  %v3274_v28 = vadd.f32 %v6346_v0, %v903_v20  ;;  %v5534_v30 = vld [vmem:[%s5986_s2 + $0xbe4] ss:$28 sps:$4 sm:$0xff]  }
 0x1f6   : > { %v5532_v0 = vld [vmem:[%s5986_s2 + $0xbe0] ss:$28 sps:$4 sm:$0xff]  }
 0x1f7   : > { %4772 = vmatpush3.bf16.msra.mxu1 %v5471_v32  ;;  %v3276_v32 = vadd.f32 %v6349_v2, %v907_v24  ;;  %v5539_v2 = vld [vmem:[%s5986_s2 + $0xc1c] ss:$28 sps:$4 sm:$0xff]  }
 0x1f8   : > { %3668 = vmatpush1.bf16.msra.mxu0 %v5467_v31  ;;  %4773 = vmatprep.subr.bf16.mxu1 %v5475_v34  ;;  %v5535_v31 = vld [vmem:[%s5986_s2 + $0xa28] ss:$28 sps:$4 sm:$0xff]  }
 0x1f9   : > { %3669 = vmatprep.subr.bf16.mxu0 %v5474_v33 }
 0x1fb   : > { %4774 = vmatpush3.bf16.msra.mxu1 %v5476_v8 }
 0x1fc   : > { %3670 = vmatpush1.bf16.msra.mxu0 %v5472_v22  ;;  %4775 = vmatprep.subr.bf16.mxu1 %v5480_v36  ;;  %v5536_v36 = vld [vmem:[%s5986_s2 + $0x868] ss:$28 sps:$4 sm:$0xff]  }
 0x1fd   : > { %3671 = vmatprep.subr.bf16.mxu0 %v5479_v35 }
 0x1ff   : > { %4776 = vmatpush3.bf16.msra.mxu1 %v5481_v38 }
 0x200   : > { %3672 = vmatpush1.bf16.msra.mxu0 %v5477_v37  ;;  %4777 = vmatprep.subr.bf16.mxu1 %v5485_v39 }
 0x201   : > { %3673 = vmatprep.subr.bf16.mxu0 %v5484_v55  ;;  %v5540_v55 = vld [vmem:[%s5986_s2 + $0xa60] ss:$28 sps:$4 sm:$0xff]  }
 0x203   : > { %4778 = vmatpush3.bf16.msra.mxu1 %v5486_v42 }
 0x204   : > { %3674 = vmatpush1.bf16.msra.mxu0 %v5482_v41  ;;  %4779 = vmatprep.subr.bf16.mxu1 %v5490_v44  ;;  %v5537_v44 = vld [vmem:[%s5986_s2 + $0xc18] ss:$28 sps:$4 sm:$0xff]  }
 0x205   : > { %3675 = vmatprep.subr.bf16.mxu0 %v5489_v43 }
 0x207   : > { %4780 = vmatpush3.bf16.msra.mxu1 %v5491_v46 }
 0x208   : > { %3676 = vmatpush1.bf16.msra.mxu0 %v5487_v45  ;;  %4781 = vmatprep.subr.bf16.mxu1 %v5495_v48  ;;  %v5541_v45 = vld [vmem:[%s5986_s2 + $0x8a0] ss:$28 sps:$4 sm:$0xff]   ;;  %v5545_v48 = vld [vmem:[%s5986_s2 + $0xc58] ss:$28 sps:$4 sm:$0xff]  }
 0x209   : > { %3677 = vmatprep.subr.bf16.mxu0 %v5494_v47  ;;  %v5544_v47 = vld [vmem:[%s5986_s2 + $0xc54] ss:$28 sps:$4 sm:$0xff]  }
 0x20b   : > { %4782 = vmatpush3.bf16.msra.mxu1 %v5496_v50 }
 0x20c   : > { %3678 = vmatpush1.bf16.msra.mxu0 %v5492_v49  ;;  %4783 = vmatprep.subr.bf16.mxu1 %v5500_v52  ;;  %v5542_v52 = vld [vmem:[%s5986_s2 + $0xc50] ss:$28 sps:$4 sm:$0xff]  }
 0x20d   : > { %3679 = vmatprep.subr.bf16.mxu0 %v5499_v51 }
 0x20f   : > { %4784 = vmatpush3.bf16.msra.mxu1 %v5501_v56 }
 0x210   : > { %3680 = vmatpush1.bf16.msra.mxu0 %v5497_v53  ;;  %4791 = vmatprep.subr.bf16.mxu1 %v5505_v58  ;;  %v5546_v53 = vld [vmem:[%s5986_s2 + $0xa98] ss:$28 sps:$4 sm:$0xff]   ;;  %v5550_v58 = vld [vmem:[%s5986_s2 + $0xc90] ss:$28 sps:$4 sm:$0xff]  }
 0x211   : > { %3690 = vmatprep.subr.bf16.mxu0 %v5504_v57  ;;  %v5549_v57 = vld [vmem:[%s5986_s2 + $0xc8c] ss:$28 sps:$4 sm:$0xff]  }
 0x212   : > { %3804 = vmatmul.mubr.bf16.vlgmr.msra.gmra.mrb[12].mxu1 %v6086_v9  ;;  %v5512_v9 = vld [vmem:[%s5986_s2 + $0xb00] ss:$28 sps:$4 sm:$0xff]  }
 0x213   : > { %3682 = vmatmul.mubr.bf16.vlgmr.msra.gmra.mrb[4].mxu0 %v6169_v19  ;;  %4792 = vmatpush3.bf16.msra.mxu1 %v5506_v60 }
 0x214   : > { %3691 = vmatpush1.bf16.msra.mxu0 %v5502_v59  ;;  %4793 = vmatprep.subr.bf16.mxu1 %v5510_v62  ;;  %v5547_v62 = vld [vmem:[%s5986_s2 + $0xc88] ss:$28 sps:$4 sm:$0xff]  }
 0x215   : > { %3692 = vmatprep.subr.bf16.mxu0 %v5509_v61  ;;  %3843 = vmatprep.mubr.bf16.mxu1 %v6126_v40  ;;  %v5517_v40 = vld [vmem:[%s5986_s2 + $0xb38] ss:$28 sps:$4 sm:$0xff]  }
 0x216   : > { %3722 = vmatprep.mubr.bf16.mxu0 %v6185_v27 }
 0x217   : > { %4794 = vmatpush3.bf16.msra.mxu1 %v5511_v1 }
 0x218   : > { %3693 = vmatpush1.bf16.msra.mxu0 %v5507_v63  ;;  %4795 = vmatprep.subr.bf16.mxu1 %v5515_v4  ;;  %v5551_v63 = vld [vmem:[%s5986_s2 + $0xad0] ss:$28 sps:$4 sm:$0xff]  }
 0x219   : > { %3694 = vmatprep.subr.bf16.mxu0 %v5514_v3  ;;  %v5555_v3 = vld [vmem:[%s5986_s2 + $0xcc8] ss:$28 sps:$4 sm:$0xff]  }
 0x21b   : > { %4796 = vmatpush3.bf16.msra.mxu1 %v5516_v5  ;;  %v5552_v5 = vld [vmem:[%s5986_s2 + $0xcc0] ss:$28 sps:$4 sm:$0xff]  }
 0x21c   : > { %3695 = vmatpush1.bf16.msra.mxu0 %v5512_v9  ;;  %4797 = vmatprep.subr.bf16.mxu1 %v5520_v10 }
 0x21d   : > { %3696 = vmatprep.subr.bf16.mxu0 %v5519_v7  ;;  %v5556_v7 = vld [vmem:[%s5986_s2 + $0xb08] ss:$28 sps:$4 sm:$0xff]  }
 0x21f   : > { %4798 = vmatpush3.bf16.msra.mxu1 %v5521_v11  ;;  %v5560_v11 = vld [vmem:[%s5986_s2 + $0xd00] ss:$28 sps:$4 sm:$0xff]  }
 0x220   : > { %3697 = vmatpush1.bf16.msra.mxu0 %v5517_v40  ;;  %4799 = vmatprep.subr.bf16.mxu1 %v5525_v14  ;;  %v5559_v40 = vld [vmem:[%s5986_s2 + $0xcfc] ss:$28 sps:$4 sm:$0xff]  }
 0x221   : > { %3698 = vmatprep.subr.bf16.mxu0 %v5524_v13 }
 0x223   : > { %4800 = vmatpush3.bf16.msra.mxu1 %v5526_v18  ;;  %v5561_v18 = vld [vmem:[%s5986_s2 + $0xb40] ss:$28 sps:$4 sm:$0xff]  }
 0x224   : > { %3699 = vmatpush1.bf16.msra.mxu0 %v5522_v17  ;;  %4801 = vmatprep.subr.bf16.mxu1 %v5530_v23  ;;  %v5557_v17 = vld [vmem:[%s5986_s2 + $0xcf8] ss:$28 sps:$4 sm:$0xff]  }
 0x225   : > { %3700 = vmatprep.subr.bf16.mxu0 %v5529_v21  ;;  %v5564_v21 = vld [vmem:[%s5986_s2 + $0xd34] ss:$28 sps:$4 sm:$0xff]  }
 0x226   : > { %v3396_v33 = vpop.f32.mrb[0].mxu0  ;;  %v5565_v23 = vld [vmem:[%s5986_s2 + $0xd38] ss:$28 sps:$4 sm:$0xff]  }
 0x227   : > { %v6506_v34 = vadd.f32 %v3396_v33, %v3274_v28  ;;  %v3398_v22 = vpop.f32.mrb[1].mxu0  ;;  %4802 = vmatpush3.bf16.msra.mxu1 %v5531_v26  ;;  %v5569_v33 = vld [vmem:[%s5986_s2 + $0xd6c] ss:$28 sps:$4 sm:$0xff]  }
 0x228   : > { %v6508_v8 = vadd.f32 %v3398_v22, %v3276_v32  ;;  %v3400_v35 = vpop.f32.mrb[2].mxu0  ;;  %3701 = vmatpush1.bf16.msra.mxu0 %v5527_v25  ;;  %4803 = vmatprep.subr.bf16.mxu1 %v5535_v31  ;;  %v5566_v31 = vld [vmem:[%s5986_s2 + $0xb78] ss:$28 sps:$4 sm:$0xff]  }
 0x229   : > { %v3891_v37 = vmax.f32 %v6506_v34, 0.0  ;;  %v3401_v38 = vpop.f32.mrb[3].mxu0  ;;  %3702 = vmatprep.subr.bf16.mxu0 %v5534_v30  ;;  %v5562_v30 = vld [vmem:[%s5986_s2 + $0xd30] ss:$28 sps:$4 sm:$0xff]  }
 0x22a   : > { %v3892_v39 = vmax.f32 %v6508_v8, 0.0  ;;  %v5570_v34 = vld [vmem:[%s5986_s2 + $0xd70] ss:$28 sps:$4 sm:$0xff]   ;;  %v5574_v38 = vld [vmem:[%s5986_s2 + $0xda4] ss:$28 sps:$4 sm:$0xff]  }
 0x22b   : > { %v3899_v41 = vsel %vm3898_vm0, %v3891_v37, 0.0  ;;  %4804 = vmatpush3.bf16.msra.mxu1 %v5536_v36  ;;  %v5571_v36 = vld [vmem:[%s5986_s2 + $0xbb0] ss:$28 sps:$4 sm:$0xff]  }
 0x22c   : > { %v3900_v42 = vrot.slane %v3899_v41, 4  ;;  %v3906_v43 = vsel %vm3898_vm0, %v3892_v39, 0.0  ;;  %3703 = vmatpush1.bf16.msra.mxu0 %v5532_v0  ;;  %4805 = vmatprep.subr.bf16.mxu1 %v5540_v55  ;;  %v5567_v0 = vld [vmem:[%s5986_s2 + $0xd68] ss:$28 sps:$4 sm:$0xff]  }
 0x22d   : > { %v3907_v46 = vrot.slane %v3906_v43, 4  ;;  %3704 = vmatprep.subr.bf16.mxu0 %v5539_v2  ;;  %v5575_v2 = vld [vmem:[%s5986_s2 + $0xda8] ss:$28 sps:$4 sm:$0xff]  }
 0x22e   : > { %v3901_v49 = vadd.f32 %v3900_v42, %v3899_v41  ;;  %v5572_v42 = vld [vmem:[%s5986_s2 + $0xda0] ss:$28 sps:$4 sm:$0xff]  }
 0x22f   : > { %v3908_v50 = vadd.f32 %v3907_v46, %v3906_v43  ;;  %4806 = vmatpush3.bf16.msra.mxu1 %v5541_v45  ;;  %v5576_v43 = vld [vmem:[%s5986_s2 + $0xbe8] ss:$28 sps:$4 sm:$0xff]   ;;  %v5579_v45 = vld [vmem:[%s5986_s2 + $0xddc] ss:$28 sps:$4 sm:$0xff]  }
 0x230   : > { %v3902_v51 = vrot.slane %v3901_v49, 2  ;;  %3705 = vmatpush1.bf16.msra.mxu0 %v5537_v44  ;;  %4813 = vmatprep.subr.bf16.mxu1 %v5545_v48  ;;  %v5580_v46 = vld [vmem:[%s5986_s2 + $0xde0] ss:$28 sps:$4 sm:$0xff]  }
 0x231   : > { %v3909_v56 = vrot.slane %v3908_v50, 2  ;;  %3706 = vmatprep.subr.bf16.mxu0 %v5544_v47 }
 0x232   : > { %v3903_v59 = vadd.f32 %v3902_v51, %v3901_v49  ;;  %3844 = vmatmul.mubr.bf16.vlgmr.msra.gmra.mrb[16].mxu1 %v6169_v19  ;;  %v5581_v51 = vld [vmem:[%s5986_s2 + $0xc20] ss:$28 sps:$4 sm:$0xff]  }
 0x233   : > { %v3910_v60 = vadd.f32 %v3909_v56, %v3908_v50  ;;  %4814 = vmatpush3.bf16.msra.mxu1 %v5546_v53  ;;  %3883 = vmatprep.mubr.bf16.mxu1 %v6185_v27  ;;  %v5577_v50 = vld [vmem:[%s5986_s2 + $0xdd8] ss:$28 sps:$4 sm:$0xff]  }
 0x234   : > { %v3904_v61 = vrot.slane %v3903_v59, 1  ;;  %3707 = vmatpush1.bf16.msra.mxu0 %v5542_v52  ;;  %4815 = vmatprep.subr.bf16.mxu1 %v5550_v58  ;;  %v6569_v56 = vld [vmem:[%s300_s24] sm:$0xff] }
 0x235   : > { %v3911_v1 = vrot.slane %v3910_v60, 1  ;;  %3708 = vmatprep.subr.bf16.mxu0 %v5549_v57  ;;  %v6573_v57 = vld [vmem:[%s309_s25] sm:$0xff]  ;;  %v4051_v58 = vrot.slane %v6569_v56, %v6481_v12 }
 0x236   : > { %v3905_v4 = vadd.f32 %v3904_v61, %v3903_v59 }
 0x237   : > { %v3912_v9 = vadd.f32 %v3911_v1, %v3910_v60  ;;  %4816 = vmatpush3.bf16.msra.mxu1 %v5551_v63  ;;  %v4055_v60 = vrot.slane %v6569_v56, %v6490_v16  ;;  %v4099_v1 = vrot.slane %v6573_v57, %v6490_v16 }
 0x238   : > { %v3948_v19 = vmul.f32 0.25, %v3905_v4  ;;  %3709 = vmatpush1.bf16.msra.mxu0 %v5547_v62  ;;  %4817 = vmatprep.subr.bf16.mxu1 %v5555_v3 }
 0x239   : > { %v3949_v10 = vmul.f32 0.25, %v3912_v9  ;;  %3710 = vmatprep.subr.bf16.mxu0 %v5554_v54 }
 0x23a   : > { %v6536_v13 = vsub.f32 %v3891_v37, %v3948_v19 }
 0x23b   : > { %v6538_v14 = vsub.f32 %v3892_v39, %v3949_v10  ;;  %4818 = vmatpush3.bf16.msra.mxu1 %v5556_v7 }
 0x23c   : > { %v3962_v27 = vmul.f32 %v6536_v13, %v6536_v13  ;;  %3711 = vmatpush1.bf16.msra.mxu0 %v5552_v5  ;;  %4819 = vmatprep.subr.bf16.mxu1 %v5560_v11  ;;  %v6595_v5 = vsub.s32 3, %v6474_v6 }
 0x23d   : > { %v3963_v20 = vmul.f32 %v6538_v14, %v6538_v14  ;;  %3712 = vmatprep.subr.bf16.mxu0 %v5559_v40 }
 0x23e   : > { %v3969_v24 = vsel %vm3898_vm0, %v3962_v27, 0.0  ;;  %v915_v7 = vrot.slane %v6487_v15, %v6595_v5 }
 0x23f   : > { %v3970_v25 = vrot.slane %v3969_v24, 4  ;;  %v3976_v26 = vsel %vm3898_vm0, %v3963_v20, 0.0  ;;  %4820 = vmatpush3.bf16.msra.mxu1 %v5561_v18 }
 0x240   : > { %v3977_v28 = vrot.slane %v3976_v26, 4  ;;  %3713 = vmatpush1.bf16.msra.mxu0 %v5557_v17  ;;  %4821 = vmatprep.subr.bf16.mxu1 %v5565_v23 }
 0x241   : > { %v3971_v32 = vadd.f32 %v3970_v25, %v3969_v24  ;;  %3714 = vmatprep.subr.bf16.mxu0 %v5564_v21 }
 0x242   : > { %v3978_v22 = vadd.f32 %v3977_v28, %v3976_v26 }
 0x243   : > { %v3972_v8 = vrot.slane %v3971_v32, 2  ;;  %4822 = vmatpush3.bf16.msra.mxu1 %v5566_v31 }
 0x244   : > { %v3979_v35 = vrot.slane %v3978_v22, 2  ;;  %3715 = vmatpush1.bf16.msra.mxu0 %v5562_v30  ;;  %4823 = vmatprep.subr.bf16.mxu1 %v5570_v34 }
 0x245   : > { %v3973_v37 = vadd.f32 %v3972_v8, %v3971_v32  ;;  %3716 = vmatprep.subr.bf16.mxu0 %v5569_v33 }
 0x246   : > { %v3980_v55 = vadd.f32 %v3979_v35, %v3978_v22 }
 0x247   : > { %v3974_v39 = vrot.slane %v3973_v37, 1  ;;  %4824 = vmatpush3.bf16.msra.mxu1 %v5571_v36 }
 0x248   : > { %v3981_v41 = vrot.slane %v3980_v55, 1  ;;  %3717 = vmatpush1.bf16.msra.mxu0 %v5567_v0  ;;  %4825 = vmatprep.subr.bf16.mxu1 %v5575_v2 }
 0x249   : > { %v3975_v44 = vadd.f32 %v3974_v39, %v3973_v37  ;;  %3718 = vmatprep.subr.bf16.mxu0 %v5574_v38 }
 0x24a   : > { %v3982_v47 = vadd.f32 %v3981_v41, %v3980_v55 }
 0x24b   : > { %v4018_v48 = vmul.f32 0.25, %v3975_v44  ;;  %4826 = vmatpush3.bf16.msra.mxu1 %v5576_v43 }
 0x24c   : > { %v4019_v49 = vmul.f32 0.25, %v3982_v47  ;;  %3719 = vmatpush1.bf16.msra.mxu0 %v5572_v42  ;;  %4827 = vmatprep.subr.bf16.mxu1 %v5580_v46 }
 0x24d   : > { %v4025_v52 = vadd.f32 1e-05, %v4018_v48  ;;  %3720 = vmatprep.subr.bf16.mxu0 %v5579_v45 }
 0x24e   : > { %v4026_v53 = vadd.f32 1e-05, %v4019_v49 }
 0x24f   : > { %5582 = vrsqrt.f32 %v4025_v52  ;;  %4828 = vmatpush3.bf16.msra.mxu1 %v5581_v51 }
 0x250   : > { %5584 = vrsqrt.f32 %v4026_v53  ;;  %3721 = vmatpush1.bf16.msra.mxu0 %v5577_v50 }
 0x252   : > { %3884 = vmatmul.mubr.bf16.vlgmr.msra.gmra.mrb[20].mxu1 %v6248_v29 }
 0x253   : > { %3723 = vmatmul.mubr.bf16.vlgmr.msra.gmra.mrb[4].mxu0 %v6248_v29  ;;  %v4095_v29 = vrot.slane %v6573_v57, %v6481_v12  ;;  %v6592_v12 = vsub.s32 2, %v6474_v6 }
 0x255   : > { %v911_v16 = vrot.slane %v6487_v15, %v6592_v12 }
 0x259   : > { %v5583_v59 = vpop.eup %5582 }
 0x25a   : > { %v5585_v61 = vpop.eup %5584  ;;  %v4039_v62 = vmul.f32 %v5583_v59, %v6536_v13 }
 0x25b   : > { %v4040_v63 = vmul.f32 %v5585_v61, %v6538_v14 }
 0x25c   : > { %v4083_v54 = vmul.f32 %v4051_v58, %v4039_v62 }
 0x25d   : > { %v4084_v3 = vmul.f32 %v4055_v60, %v4040_v63 }
 0x25e   : > { %v4127_v4 = vadd.f32 %v4095_v29, %v4083_v54  ;;  %v4059_v54 = vrot.slane %v6569_v56, %v6592_v12 }
 0x25f   : > { %v4128_v9 = vadd.f32 %v4099_v1, %v4084_v3 }
 0x261   : > { %v4140_v19 = vcombine.low %v4127_v4, %v4128_v9  ;;  %v4063_v4 = vrot.slane %v6569_v56, %v6595_v5 }
 0x263   : > { %4146 = vst [vmem:[%s6588_s15] sm:$0xff] %v4140_v19 }
 0x2a5   : > { %v3560_v10 = vpop.f32.mrb[4].mxu1 }
 0x2a6   : > { %v4839_v40 = vadd.f32 %v3560_v10, %v911_v16  ;;  %v3562_v11 = vpop.f32.mrb[5].mxu1  ;;  %v4103_v16 = vrot.slane %v6573_v57, %v6592_v12  ;;  %v4107_v10 = vrot.slane %v6573_v57, %v6595_v5 }
 0x2a7   : > { %v4840_v13 = vadd.f32 %v3562_v11, %v915_v7  ;;  %v3564_v14 = vpop.f32.mrb[6].mxu1 }
 0x2a8   : > { %v3893_v27 = vmax.f32 %v4839_v40, 0.0  ;;  %v3565_v17 = vpop.f32.mrb[7].mxu1 }
 0x2a9   : > { %v3894_v18 = vmax.f32 %v4840_v13, 0.0 }
 0x2aa   : > { %v3913_v20 = vsel %vm3898_vm0, %v3893_v27, 0.0 }
 0x2ab   : > { %v3914_v21 = vrot.slane %v3913_v20, 4  ;;  %v3920_v23 = vsel %vm3898_vm0, %v3894_v18, 0.0 }
 0x2ac   : > { %v3921_v24 = vrot.slane %v3920_v23, 4 }
 0x2ad   : > { %v3915_v25 = vadd.f32 %v3914_v21, %v3913_v20 }
 0x2ae   : > { %v3922_v26 = vadd.f32 %v3921_v24, %v3920_v23 }
 0x2af   : > { %v3916_v28 = vrot.slane %v3915_v25, 2 }
 0x2b0   : > { %v3923_v30 = vrot.slane %v3922_v26, 2 }
 0x2b1   : > { %v3917_v31 = vadd.f32 %v3916_v28, %v3915_v25 }
 0x2b2   : > { %v3924_v32 = vadd.f32 %v3923_v30, %v3922_v26 }
 0x2b3   : > { %v3918_v33 = vrot.slane %v3917_v31, 1 }
 0x2b4   : > { %v3925_v34 = vrot.slane %v3924_v32, 1 }
 0x2b5   : > { %v3919_v22 = vadd.f32 %v3918_v33, %v3917_v31 }
 0x2b6   : > { %v3926_v8 = vadd.f32 %v3925_v34, %v3924_v32  ;;  %v6620_v34 = vsub.s32 4, %v6474_v6 }
 0x2b7   : > { %v3950_v35 = vmul.f32 0.25, %v3919_v22  ;;  %v6623_v22 = vsub.s32 5, %v6474_v6 }
 0x2b8   : > { %v3951_v0 = vmul.f32 0.25, %v3926_v8  ;;  %v919_v8 = vrot.slane %v6487_v15, %v6620_v34 }
 0x2b9   : > { %v3957_v36 = vsub.f32 %v3893_v27, %v3950_v35  ;;  %v6614_v27 = vsub.s32 6, %v6474_v6  ;;  %v923_v35 = vrot.slane %v6487_v15, %v6623_v22 }
 0x2ba   : > { %v3958_v37 = vsub.f32 %v3894_v18, %v3951_v0 }
 0x2bb   : > { %v3964_v38 = vmul.f32 %v3957_v36, %v3957_v36  ;;  %v927_v18 = vrot.slane %v6487_v15, %v6614_v27 }
 0x2bc   : > { %v3965_v2 = vmul.f32 %v3958_v37, %v3958_v37 }
 0x2bd   : > { %v3983_v55 = vsel %vm3898_vm0, %v3964_v38, 0.0 }
 0x2be   : > { %v3984_v39 = vrot.slane %v3983_v55, 4  ;;  %v3990_v41 = vsel %vm3898_vm0, %v3965_v2, 0.0 }
 0x2bf   : > { %v3991_v42 = vrot.slane %v3990_v41, 4 }
 0x2c0   : > { %v3985_v43 = vadd.f32 %v3984_v39, %v3983_v55 }
 0x2c1   : > { %v3992_v44 = vadd.f32 %v3991_v42, %v3990_v41 }
 0x2c2   : > { %v3986_v45 = vrot.slane %v3985_v43, 2 }
 0x2c3   : > { %v3993_v46 = vrot.slane %v3992_v44, 2 }
 0x2c4   : > { %v3987_v47 = vadd.f32 %v3986_v45, %v3985_v43 }
 0x2c5   : > { %v3994_v48 = vadd.f32 %v3993_v46, %v3992_v44  ;;  %v4763_v49 = vpop.f32.mrb[8].mxu1 }
 0x2c6   : > { %v3988_v50 = vrot.slane %v3987_v47, 1  ;;  %v4764_v51 = vpop.f32.mrb[9].mxu1 }
 0x2c7   : > { %v3995_v52 = vrot.slane %v3994_v48, 1  ;;  %v4765_v53 = vadd.f32 %v4764_v51, %v4763_v49  ;;  %v4766_v58 = vpop.f32.mrb[10].mxu1 }
 0x2c8   : > { %v3989_v59 = vadd.f32 %v3988_v50, %v3987_v47  ;;  %v4767_v60 = vpop.f32.mrb[11].mxu1 }
 0x2c9   : > { %v3996_v61 = vadd.f32 %v3995_v52, %v3994_v48  ;;  %v3766_v23 = vadd.f32 %v4765_v53, %v927_v18 }
 0x2ca   : > { %v4020_v62 = vmul.f32 0.25, %v3989_v59 }
 0x2cb   : > { %v4021_v29 = vmul.f32 0.25, %v3996_v61 }
 0x2cc   : > { %v4027_v63 = vadd.f32 1e-05, %v4020_v62 }
 0x2cd   : > { %v4028_v1 = vadd.f32 1e-05, %v4021_v29 }
 0x2ce   : > { %5586 = vrsqrt.f32 %v4027_v63 }
 0x2cf   : > { %5588 = vrsqrt.f32 %v4028_v1 }
 0x2d8   : > { %v5587_v3 = vpop.eup %5586 }
 0x2d9   : > { %v5589_v9 = vpop.eup %5588  ;;  %v4041_v19 = vmul.f32 %v5587_v3, %v3957_v36 }
 0x2da   : > { %v4042_v7 = vmul.f32 %v5589_v9, %v3958_v37 }
 0x2db   : > { %v4085_v40 = vmul.f32 %v4059_v54, %v4041_v19 }
 0x2dc   : > { %v4086_v11 = vmul.f32 %v4063_v4, %v4042_v7 }
 0x2dd   : > { %v4129_v13 = vadd.f32 %v4103_v16, %v4085_v40 }
 0x2de   : > { %v4130_v14 = vadd.f32 %v4107_v10, %v4086_v11 }
 0x2e0   : > { %v4141_v17 = vcombine.low %v4129_v13, %v4130_v14 }
 0x2e2   : > { %4147 = vst [vmem:[%s6588_s15 + $0x8] sm:$0xff] %v4141_v17 }
 0x2e5   : > { %v4785_v20 = vpop.f32.mrb[12].mxu1 }
 0x2e6   : > { %v4786_v21 = vpop.f32.mrb[13].mxu1 }
 0x2e7   : > { %v4787_v12 = vadd.f32 %v4786_v21, %v4785_v20  ;;  %v4788_v24 = vpop.f32.mrb[14].mxu1 }
 0x2e8   : > { %v4789_v25 = vpop.f32.mrb[15].mxu1 }
 0x2e9   : > { %v3806_v26 = vadd.f32 %v4787_v12, %v3766_v23 }
 0x305   : > { %v4807_v5 = vpop.f32.mrb[16].mxu1 }
 0x306   : > { %v4808_v28 = vpop.f32.mrb[17].mxu1 }
 0x307   : > { %v4809_v30 = vadd.f32 %v4808_v28, %v4807_v5  ;;  %v4810_v31 = vpop.f32.mrb[18].mxu1 }
 0x308   : > { %v4811_v32 = vpop.f32.mrb[19].mxu1 }
 0x309   : > { %v3846_v33 = vadd.f32 %v4809_v30, %v3806_v26 }
 0x325   : > { %v4829_v36 = vpop.f32.mrb[20].mxu1 }
 0x326   : > { %v3724_v0 = vpop.f32.mrb[4].mxu0  ;;  %v4830_v2 = vpop.f32.mrb[21].mxu1 }
 0x327   : > { %v4841_v37 = vadd.f32 %v3724_v0, %v919_v8  ;;  %v3726_v38 = vpop.f32.mrb[5].mxu0  ;;  %v4831_v39 = vadd.f32 %v4830_v2, %v4829_v36  ;;  %v4832_v42 = vpop.f32.mrb[22].mxu1 }
 0x328   : > { %v4842_v55 = vadd.f32 %v3726_v38, %v923_v35  ;;  %v3728_v41 = vpop.f32.mrb[6].mxu0  ;;  %v4833_v45 = vpop.f32.mrb[23].mxu1 }
 0x329   : > { %v3895_v43 = vmax.f32 %v4841_v37, 0.0  ;;  %v3729_v44 = vpop.f32.mrb[7].mxu0  ;;  %v3886_v46 = vadd.f32 %v4831_v39, %v3846_v33 }
 0x32a   : > { %v3896_v6 = vmax.f32 %v4842_v55, 0.0 }
 0x32b   : > { %v3927_v47 = vsel %vm3898_vm0, %v3895_v43, 0.0  ;;  %v3897_v15 = vmax.f32 %v3886_v46, 0.0  ;;  %v4067_v46 = vrot.slane %v6569_v56, %v6620_v34 }
 0x32c   : > { %v3928_v48 = vrot.slane %v3927_v47, 4  ;;  %v3934_v49 = vsel %vm3898_vm0, %v3896_v6, 0.0 }
 0x32d   : > { %v3935_v50 = vrot.slane %v3934_v49, 4  ;;  %v3941_v52 = vsel %vm3898_vm0, %v3897_v15, 0.0 }
 0x32e   : > { %v3929_v51 = vadd.f32 %v3928_v48, %v3927_v47  ;;  %v3942_v58 = vrot.slane %v3941_v52, 4  ;;  %v4071_v48 = vrot.slane %v6569_v56, %v6623_v22 }
 0x32f   : > { %v3936_v53 = vadd.f32 %v3935_v50, %v3934_v49  ;;  %v4111_v50 = vrot.slane %v6573_v57, %v6620_v34 }
 0x330   : > { %v3930_v59 = vrot.slane %v3929_v51, 2  ;;  %v3943_v61 = vadd.f32 %v3942_v58, %v3941_v52  ;;  %v4115_v52 = vrot.slane %v6573_v57, %v6623_v22 }
 0x331   : > { %v3937_v60 = vrot.slane %v3936_v53, 2 }
 0x332   : > { %v3931_v62 = vadd.f32 %v3930_v59, %v3929_v51  ;;  %v3944_v63 = vrot.slane %v3943_v61, 2 }
 0x333   : > { %v3938_v29 = vadd.f32 %v3937_v60, %v3936_v53  ;;  %v4075_v53 = vrot.slane %v6569_v56, %v6614_v27 }
 0x334   : > { %v3932_v1 = vrot.slane %v3931_v62, 1  ;;  %v3945_v3 = vadd.f32 %v3944_v63, %v3943_v61 }
 0x335   : > { %v3939_v54 = vrot.slane %v3938_v29, 1 }
 0x336   : > { %v3933_v4 = vadd.f32 %v3932_v1, %v3931_v62  ;;  %v3946_v19 = vrot.slane %v3945_v3, 1  ;;  %v4119_v62 = vrot.slane %v6573_v57, %v6614_v27 }
 0x337   : > { %v3940_v9 = vadd.f32 %v3939_v54, %v3938_v29 }
 0x338   : > { %v3952_v16 = vmul.f32 0.25, %v3933_v4  ;;  %v3947_v10 = vadd.f32 %v3946_v19, %v3945_v3 }
 0x339   : > { %v3953_v7 = vmul.f32 0.25, %v3940_v9 }
 0x33a   : > { %v3959_v40 = vsub.f32 %v3895_v43, %v3952_v16  ;;  %v3954_v13 = vmul.f32 0.25, %v3947_v10 }
 0x33b   : > { %v3960_v11 = vsub.f32 %v3896_v6, %v3953_v7 }
 0x33c   : > { %v3966_v14 = vmul.f32 %v3959_v40, %v3959_v40  ;;  %v3961_v18 = vsub.f32 %v3897_v15, %v3954_v13 }
 0x33d   : > { %v3967_v17 = vmul.f32 %v3960_v11, %v3960_v11 }
 0x33e   : > { %v3997_v20 = vsel %vm3898_vm0, %v3966_v14, 0.0  ;;  %v3968_v12 = vmul.f32 %v3961_v18, %v3961_v18 }
 0x33f   : > { %v3998_v21 = vrot.slane %v3997_v20, 4  ;;  %v4004_v23 = vsel %vm3898_vm0, %v3967_v17, 0.0 }
 0x340   : > { %v4005_v24 = vrot.slane %v4004_v23, 4  ;;  %v4011_v26 = vsel %vm3898_vm0, %v3968_v12, 0.0 }
 0x341   : > { %v3999_v25 = vadd.f32 %v3998_v21, %v3997_v20  ;;  %v4012_v28 = vrot.slane %v4011_v26, 4 }
 0x342   : > { %v4006_v5 = vadd.f32 %v4005_v24, %v4004_v23 }
 0x343   : > { %v4000_v30 = vrot.slane %v3999_v25, 2  ;;  %v4013_v32 = vadd.f32 %v4012_v28, %v4011_v26 }
 0x344   : > { %v4007_v31 = vrot.slane %v4006_v5, 2 }
 0x345   : > { %v4001_v33 = vadd.f32 %v4000_v30, %v3999_v25  ;;  %v4014_v35 = vrot.slane %v4013_v32, 2 }
 0x346   : > { %v4008_v8 = vadd.f32 %v4007_v31, %v4006_v5 }
 0x347   : > { %v4002_v0 = vrot.slane %v4001_v33, 1  ;;  %v4015_v37 = vadd.f32 %v4014_v35, %v4013_v32 }
 0x348   : > { %v4009_v36 = vrot.slane %v4008_v8, 1 }
 0x349   : > { %v4003_v38 = vadd.f32 %v4002_v0, %v4001_v33  ;;  %v4016_v55 = vrot.slane %v4015_v37, 1 }
 0x34a   : > { %v4010_v2 = vadd.f32 %v4009_v36, %v4008_v8 }
 0x34b   : > { %v4022_v39 = vmul.f32 0.25, %v4003_v38  ;;  %v4017_v42 = vadd.f32 %v4016_v55, %v4015_v37 }
 0x34c   : > { %v4023_v41 = vmul.f32 0.25, %v4010_v2 }
 0x34d   : > { %v4029_v43 = vadd.f32 1e-05, %v4022_v39  ;;  %v4024_v45 = vmul.f32 0.25, %v4017_v42 }
 0x34e   : > { %v4030_v44 = vadd.f32 1e-05, %v4023_v41 }
 0x34f   : > { %5590 = vrsqrt.f32 %v4029_v43  ;;  %v4031_v6 = vadd.f32 1e-05, %v4024_v45 }
 0x350   : > { %5592 = vrsqrt.f32 %v4030_v44 }
 0x351   : > { %5594 = vrsqrt.f32 %v4031_v6 }
 0x359   : > { %v5591_v47 = vpop.eup %5590 }
 0x35a   : > { %v5593_v49 = vpop.eup %5592  ;;  %v4043_v15 = vmul.f32 %v5591_v47, %v3959_v40 }
 0x35b   : > { %v4044_v51 = vmul.f32 %v5593_v49, %v3960_v11  ;;  %v5595_v58 = vpop.eup %5594 }
 0x35c   : > { %v4087_v59 = vmul.f32 %v4067_v46, %v4043_v15  ;;  %v4045_v61 = vmul.f32 %v5595_v58, %v3961_v18 }
 0x35d   : > { %v4088_v60 = vmul.f32 %v4071_v48, %v4044_v51 }
 0x35e   : > { %v4131_v29 = vadd.f32 %v4111_v50, %v4087_v59  ;;  %v4089_v1 = vmul.f32 %v4075_v53, %v4045_v61 }
 0x35f   : > { %v4132_v63 = vadd.f32 %v4115_v52, %v4088_v60 }
 0x360   : > { %v4133_v3 = vadd.f32 %v4119_v62, %v4089_v1 }
 0x361   : > { %v4142_v54 = vcombine.low %v4131_v29, %v4132_v63 }
 0x362   : > { %4149 = vst [vmem:[%s6588_s15 + $0x18] sm:$0xf] %v4133_v3 }
 0x363   : > { %4148 = vst [vmem:[%s6588_s15 + $0x10] sm:$0xff] %v4142_v54 }
 0x364 PF: > { %p21_p7 = scmp.ge.s32.totalorder %s5819_s23, 9   ;;  %s6685_s18 = smov %s5750_s19 }
 0x365   : > { %s6686_s19 = smov %s5754_s20  ;;  %s6687_s20 = smov %s5829_s26 }
 0x366   : > { %s6688_s21 = smov %s5819_s23  ;;  %23 = sbr.rel (!%p21_p7) target bundleno = 10 (0xa), region = 117 }
 0x36d   :  { %4172 = vsyncpa [#allocation3], 1 }
 0x36e   :  { %4174 = vsyncpa [#allocation3 + $0x1], 1 }
 0x36f   :  { %4175 = vsyncpa [#allocation5], 1 }
 0x370   :  { %4177 = vsyncpa [#allocation5 + $0x1], 1 }
 0x371   :  { %4178 = vsyncpa [#allocation8], 1 }
 0x372   :  { %4180 = vsyncpa [#allocation8 + $0x1], 1 }

// kernel: generator_forward.6
= control target key start
LH: loop header
LB: loop body
LE: loop exit
PB: predicated region body
PF: predicated region fallthrough
CT: control target
= control target key end

     0   :  { %vm1747_vm0 = vcmask 1043456   ;;  %vm1858_vm1 = vcmask 523264   ;;  %s6241_s1 = inlined_call_operand.vmem [shape: f32[1152,256], index: 1, kind: input, shape index: {}]   ;;  %s6242_s0 = inlined_call_operand.vmem [shape: f32[196,1152], index: 0, kind: input, shape index: {}]   ;;  %s6243_s5 = inlined_call_operand.vmem [shape: f32[256,64], index: 5, kind: input, shape index: {}]   ;;  %s6244_s2 = inlined_call_operand.vmem [shape: f32[1,256], index: 2, kind: input, shape index: {}]   ;;  %s6245_s6 = inlined_call_operand.vmem [shape: f32[64,256], index: 6, kind: input, shape index: {}]   ;;  %s6246_s3 = inlined_call_operand.vmem [shape: f32[1,64], index: 3, kind: input, shape index: {}]   ;;  %s6247_s4 = inlined_call_operand.vmem [shape: f32[1,64], index: 4, kind: input, shape index: {}]   ;;  %s6248_s7 = inlined_call_operand.vmem [shape: f32[196,256], index: 7, kind: output, shape index: {}]  }
   0x1   :  { %v252_v0 = vld [vmem:[%s6241_s1 + $0x8] sm:$0xff]  ;;  %v254_v1 = vld [vmem:[%s6241_s1 + $0x18] sm:$0xff]  ;;  %v251_v5 = vld [vmem:[%s6241_s1] sm:$0xff] }
   0x2   :  { %v380_v2 = vld [vmem:[%s6241_s1 + $0x408] sm:$0xff]  ;;  %v2570_v3 = vpack.c.bf16 %v254_v1, %v252_v0  ;;  %v382_v4 = vld [vmem:[%s6241_s1 + $0x418] sm:$0xff]  ;;  %v253_v6 = vld [vmem:[%s6241_s1 + $0x10] sm:$0xff] }
   0x3   :  { %v2698_v7 = vpack.c.bf16 %v382_v4, %v380_v2  ;;  %v2572_v8 = vpack.c.bf16 %v253_v6, %v251_v5  ;;  %v379_v9 = vld [vmem:[%s6241_s1 + $0x400] sm:$0xff]  ;;  %v381_v10 = vld [vmem:[%s6241_s1 + $0x410] sm:$0xff]  ;;  %v256_v11 = vld [vmem:[%s6241_s1 + $0x28] sm:$0xff] }
   0x4   :  { %2571 = vmatprep.subr.bf16.mxu1 %v2570_v3  ;;  %v2700_v12 = vpack.c.bf16 %v381_v10, %v379_v9  ;;  %v258_v13 = vld [vmem:[%s6241_s1 + $0x38] sm:$0xff]  ;;  %v384_v14 = vld [vmem:[%s6241_s1 + $0x428] sm:$0xff]  ;;  %v255_v18 = vld [vmem:[%s6241_s1 + $0x20] sm:$0xff] }
   0x5   :  { %v386_v15 = vld [vmem:[%s6241_s1 + $0x438] sm:$0xff]  ;;  %2699 = vmatprep.subr.bf16.mxu0 %v2698_v7  ;;  %2573 = vmatpush1.bf16.msra.mxu1 %v2572_v8  ;;  %v2574_v16 = vpack.c.bf16 %v258_v13, %v256_v11  ;;  %v257_v19 = vld [vmem:[%s6241_s1 + $0x30] sm:$0xff]  ;;  %v383_v20 = vld [vmem:[%s6241_s1 + $0x420] sm:$0xff] }
   0x6   :  { %v2702_v17 = vpack.c.bf16 %v386_v15, %v384_v14  ;;  %2701 = vmatpush1.bf16.msra.mxu0 %v2700_v12  ;;  %v2576_v21 = vpack.c.bf16 %v257_v19, %v255_v18  ;;  %v385_v22 = vld [vmem:[%s6241_s1 + $0x430] sm:$0xff]  ;;  %v260_v23 = vld [vmem:[%s6241_s1 + $0x48] sm:$0xff]  ;;  %v262_v24 = vld [vmem:[%s6241_s1 + $0x58] sm:$0xff] }
   0x7   :  { %2575 = vmatprep.subr.bf16.mxu1 %v2574_v16  ;;  %v2704_v25 = vpack.c.bf16 %v385_v22, %v383_v20  ;;  %v2578_v26 = vpack.c.bf16 %v262_v24, %v260_v23  ;;  %v388_v27 = vld [vmem:[%s6241_s1 + $0x448] sm:$0xff]  ;;  %v390_v28 = vld [vmem:[%s6241_s1 + $0x458] sm:$0xff]  ;;  %v259_v29 = vld [vmem:[%s6241_s1 + $0x40] sm:$0xff] }
   0x8   :  { %2703 = vmatprep.subr.bf16.mxu0 %v2702_v17  ;;  %v2706_v30 = vpack.c.bf16 %v390_v28, %v388_v27  ;;  %v261_v31 = vld [vmem:[%s6241_s1 + $0x50] sm:$0xff]  ;;  %v387_v32 = vld [vmem:[%s6241_s1 + $0x440] sm:$0xff]  ;;  %v264_v35 = vld [vmem:[%s6241_s1 + $0x68] sm:$0xff] }
   0x9   :  { %v389_v33 = vld [vmem:[%s6241_s1 + $0x450] sm:$0xff]  ;;  %2577 = vmatpush1.bf16.msra.mxu1 %v2576_v21  ;;  %v2580_v34 = vpack.c.bf16 %v261_v31, %v259_v29  ;;  %v266_v36 = vld [vmem:[%s6241_s1 + $0x78] sm:$0xff]  ;;  %v392_v37 = vld [vmem:[%s6241_s1 + $0x468] sm:$0xff] }
   0xa   :  { %2705 = vmatpush1.bf16.msra.mxu0 %v2704_v25  ;;  %2579 = vmatprep.subr.bf16.mxu1 %v2578_v26  ;;  %v2708_v38 = vpack.c.bf16 %v389_v33, %v387_v32  ;;  %v2582_v39 = vpack.c.bf16 %v266_v36, %v264_v35  ;;  %v394_v40 = vld [vmem:[%s6241_s1 + $0x478] sm:$0xff]  ;;  %v263_v41 = vld [vmem:[%s6241_s1 + $0x60] sm:$0xff]  ;;  %v265_v42 = vld [vmem:[%s6241_s1 + $0x70] sm:$0xff] }
   0xb   :  { %2707 = vmatprep.subr.bf16.mxu0 %v2706_v30  ;;  %v2710_v43 = vpack.c.bf16 %v394_v40, %v392_v37  ;;  %v391_v44 = vld [vmem:[%s6241_s1 + $0x460] sm:$0xff]  ;;  %v393_v45 = vld [vmem:[%s6241_s1 + $0x470] sm:$0xff]  ;;  %v268_v46 = vld [vmem:[%s6241_s1 + $0x88] sm:$0xff]  ;;  %v2584_v50 = vpack.c.bf16 %v265_v42, %v263_v41 }
   0xc   :  { %v270_v47 = vld [vmem:[%s6241_s1 + $0x98] sm:$0xff]  ;;  %v396_v48 = vld [vmem:[%s6241_s1 + $0x488] sm:$0xff]  ;;  %v2712_v51 = vpack.c.bf16 %v393_v45, %v391_v44  ;;  %v267_v53 = vld [vmem:[%s6241_s1 + $0x80] sm:$0xff] }
   0xd   :  { %v398_v49 = vld [vmem:[%s6241_s1 + $0x498] sm:$0xff]  ;;  %2581 = vmatpush1.bf16.msra.mxu1 %v2580_v34  ;;  %v2586_v52 = vpack.c.bf16 %v270_v47, %v268_v46  ;;  %v269_v54 = vld [vmem:[%s6241_s1 + $0x90] sm:$0xff]  ;;  %v395_v55 = vld [vmem:[%s6241_s1 + $0x480] sm:$0xff] }
   0xe   :  { %2709 = vmatpush1.bf16.msra.mxu0 %v2708_v38  ;;  %2583 = vmatprep.subr.bf16.mxu1 %v2582_v39  ;;  %v2714_v56 = vpack.c.bf16 %v398_v49, %v396_v48  ;;  %v397_v57 = vld [vmem:[%s6241_s1 + $0x490] sm:$0xff]  ;;  %v272_v58 = vld [vmem:[%s6241_s1 + $0xa8] sm:$0xff]  ;;  %v274_v59 = vld [vmem:[%s6241_s1 + $0xb8] sm:$0xff]  ;;  %v2588_v62 = vpack.c.bf16 %v269_v54, %v267_v53 }
   0xf   :  { %2711 = vmatprep.subr.bf16.mxu0 %v2710_v43  ;;  %v400_v60 = vld [vmem:[%s6241_s1 + $0x4a8] sm:$0xff]  ;;  %v402_v61 = vld [vmem:[%s6241_s1 + $0x4b8] sm:$0xff]  ;;  %v2716_v63 = vpack.c.bf16 %v397_v57, %v395_v55  ;;  %v2590_v0 = vpack.c.bf16 %v274_v59, %v272_v58  ;;  %v271_v1 = vld [vmem:[%s6241_s1 + $0xa0] sm:$0xff] }
  0x10   :  { %v273_v2 = vld [vmem:[%s6241_s1 + $0xb0] sm:$0xff]  ;;  %v399_v3 = vld [vmem:[%s6241_s1 + $0x4a0] sm:$0xff]  ;;  %v2718_v4 = vpack.c.bf16 %v402_v61, %v400_v60  ;;  %v276_v6 = vld [vmem:[%s6241_s1 + $0xc8] sm:$0xff] }
  0x11   :  { %2585 = vmatpush1.bf16.msra.mxu1 %v2584_v50  ;;  %v401_v5 = vld [vmem:[%s6241_s1 + $0x4b0] sm:$0xff]  ;;  %v278_v7 = vld [vmem:[%s6241_s1 + $0xd8] sm:$0xff]  ;;  %v404_v8 = vld [vmem:[%s6241_s1 + $0x4c8] sm:$0xff]  ;;  %v2592_v10 = vpack.c.bf16 %v273_v2, %v271_v1 }
  0x12   :  { %2713 = vmatpush1.bf16.msra.mxu0 %v2712_v51  ;;  %2587 = vmatprep.subr.bf16.mxu1 %v2586_v52  ;;  %v406_v9 = vld [vmem:[%s6241_s1 + $0x4d8] sm:$0xff]  ;;  %v2720_v11 = vpack.c.bf16 %v401_v5, %v399_v3  ;;  %v2594_v12 = vpack.c.bf16 %v278_v7, %v276_v6  ;;  %v275_v13 = vld [vmem:[%s6241_s1 + $0xc0] sm:$0xff]  ;;  %v277_v14 = vld [vmem:[%s6241_s1 + $0xd0] sm:$0xff] }
  0x13   :  { %2715 = vmatprep.subr.bf16.mxu0 %v2714_v56  ;;  %v403_v15 = vld [vmem:[%s6241_s1 + $0x4c0] sm:$0xff]  ;;  %v2722_v16 = vpack.c.bf16 %v406_v9, %v404_v8  ;;  %v405_v17 = vld [vmem:[%s6241_s1 + $0x4d0] sm:$0xff]  ;;  %v280_v18 = vld [vmem:[%s6241_s1 + $0xe8] sm:$0xff]  ;;  %v2596_v22 = vpack.c.bf16 %v277_v14, %v275_v13 }
  0x14   :  { %v282_v19 = vld [vmem:[%s6241_s1 + $0xf8] sm:$0xff]  ;;  %v408_v20 = vld [vmem:[%s6241_s1 + $0x4e8] sm:$0xff]  ;;  %v2724_v23 = vpack.c.bf16 %v405_v17, %v403_v15  ;;  %v279_v25 = vld [vmem:[%s6241_s1 + $0xe0] sm:$0xff] }
  0x15   :  { %2589 = vmatpush1.bf16.msra.mxu1 %v2588_v62  ;;  %v410_v21 = vld [vmem:[%s6241_s1 + $0x4f8] sm:$0xff]  ;;  %v2598_v24 = vpack.c.bf16 %v282_v19, %v280_v18  ;;  %v281_v26 = vld [vmem:[%s6241_s1 + $0xf0] sm:$0xff]  ;;  %v407_v27 = vld [vmem:[%s6241_s1 + $0x4e0] sm:$0xff] }
  0x16   :  { %2717 = vmatpush1.bf16.msra.mxu0 %v2716_v63  ;;  %2591 = vmatprep.subr.bf16.mxu1 %v2590_v0  ;;  %v2726_v28 = vpack.c.bf16 %v410_v21, %v408_v20  ;;  %v409_v29 = vld [vmem:[%s6241_s1 + $0x4f0] sm:$0xff]  ;;  %v284_v30 = vld [vmem:[%s6241_s1 + $0x108] sm:$0xff]  ;;  %v286_v31 = vld [vmem:[%s6241_s1 + $0x118] sm:$0xff]  ;;  %v2600_v34 = vpack.c.bf16 %v281_v26, %v279_v25 }
  0x17   :  { %2719 = vmatprep.subr.bf16.mxu0 %v2718_v4  ;;  %v412_v32 = vld [vmem:[%s6241_s1 + $0x508] sm:$0xff]  ;;  %v414_v33 = vld [vmem:[%s6241_s1 + $0x518] sm:$0xff]  ;;  %v2728_v35 = vpack.c.bf16 %v409_v29, %v407_v27  ;;  %v2602_v36 = vpack.c.bf16 %v286_v31, %v284_v30  ;;  %v283_v37 = vld [vmem:[%s6241_s1 + $0x100] sm:$0xff] }
  0x18   :  { %v285_v38 = vld [vmem:[%s6241_s1 + $0x110] sm:$0xff]  ;;  %v411_v39 = vld [vmem:[%s6241_s1 + $0x500] sm:$0xff]  ;;  %v2730_v40 = vpack.c.bf16 %v414_v33, %v412_v32  ;;  %v288_v42 = vld [vmem:[%s6241_s1 + $0x128] sm:$0xff] }
  0x19   :  { %2593 = vmatpush1.bf16.msra.mxu1 %v2592_v10  ;;  %v413_v41 = vld [vmem:[%s6241_s1 + $0x510] sm:$0xff]  ;;  %v290_v43 = vld [vmem:[%s6241_s1 + $0x138] sm:$0xff]  ;;  %v416_v44 = vld [vmem:[%s6241_s1 + $0x528] sm:$0xff]  ;;  %v2604_v46 = vpack.c.bf16 %v285_v38, %v283_v37 }
  0x1a   :  { %2721 = vmatpush1.bf16.msra.mxu0 %v2720_v11  ;;  %2595 = vmatprep.subr.bf16.mxu1 %v2594_v12  ;;  %v418_v45 = vld [vmem:[%s6241_s1 + $0x538] sm:$0xff]  ;;  %v2732_v47 = vpack.c.bf16 %v413_v41, %v411_v39  ;;  %v2606_v48 = vpack.c.bf16 %v290_v43, %v288_v42  ;;  %v287_v49 = vld [vmem:[%s6241_s1 + $0x120] sm:$0xff]  ;;  %v289_v50 = vld [vmem:[%s6241_s1 + $0x130] sm:$0xff] }
  0x1b   :  { %2723 = vmatprep.subr.bf16.mxu0 %v2722_v16  ;;  %v415_v51 = vld [vmem:[%s6241_s1 + $0x520] sm:$0xff]  ;;  %v2734_v52 = vpack.c.bf16 %v418_v45, %v416_v44  ;;  %v417_v53 = vld [vmem:[%s6241_s1 + $0x530] sm:$0xff]  ;;  %v292_v54 = vld [vmem:[%s6241_s1 + $0x148] sm:$0xff]  ;;  %v2608_v58 = vpack.c.bf16 %v289_v50, %v287_v49 }
  0x1c   :  { %v294_v55 = vld [vmem:[%s6241_s1 + $0x158] sm:$0xff]  ;;  %v420_v56 = vld [vmem:[%s6241_s1 + $0x548] sm:$0xff]  ;;  %v2736_v59 = vpack.c.bf16 %v417_v53, %v415_v51  ;;  %v291_v61 = vld [vmem:[%s6241_s1 + $0x140] sm:$0xff] }
  0x1d   :  { %2597 = vmatpush1.bf16.msra.mxu1 %v2596_v22  ;;  %v422_v57 = vld [vmem:[%s6241_s1 + $0x558] sm:$0xff]  ;;  %v2610_v60 = vpack.c.bf16 %v294_v55, %v292_v54  ;;  %v293_v62 = vld [vmem:[%s6241_s1 + $0x150] sm:$0xff]  ;;  %v419_v63 = vld [vmem:[%s6241_s1 + $0x540] sm:$0xff] }
  0x1e   :  { %2725 = vmatpush1.bf16.msra.mxu0 %v2724_v23  ;;  %2599 = vmatprep.subr.bf16.mxu1 %v2598_v24  ;;  %v2738_v0 = vpack.c.bf16 %v422_v57, %v420_v56  ;;  %v421_v1 = vld [vmem:[%s6241_s1 + $0x550] sm:$0xff]  ;;  %v296_v2 = vld [vmem:[%s6241_s1 + $0x168] sm:$0xff]  ;;  %v298_v3 = vld [vmem:[%s6241_s1 + $0x178] sm:$0xff]  ;;  %v2612_v6 = vpack.c.bf16 %v293_v62, %v291_v61 }
  0x1f   :  { %2727 = vmatprep.subr.bf16.mxu0 %v2726_v28  ;;  %v424_v4 = vld [vmem:[%s6241_s1 + $0x568] sm:$0xff]  ;;  %v426_v5 = vld [vmem:[%s6241_s1 + $0x578] sm:$0xff]  ;;  %v295_v7 = vld [vmem:[%s6241_s1 + $0x160] sm:$0xff]  ;;  %v2740_v8 = vpack.c.bf16 %v421_v1, %v419_v63  ;;  %v2614_v9 = vpack.c.bf16 %v298_v3, %v296_v2 }
  0x20   :  { %v297_v10 = vld [vmem:[%s6241_s1 + $0x170] sm:$0xff]  ;;  %v423_v11 = vld [vmem:[%s6241_s1 + $0x560] sm:$0xff]  ;;  %v2742_v13 = vpack.c.bf16 %v426_v5, %v424_v4  ;;  %v300_v14 = vld [vmem:[%s6241_s1 + $0x188] sm:$0xff] }
  0x21   :  { %2601 = vmatpush1.bf16.msra.mxu1 %v2600_v34  ;;  %v425_v12 = vld [vmem:[%s6241_s1 + $0x570] sm:$0xff]  ;;  %v302_v15 = vld [vmem:[%s6241_s1 + $0x198] sm:$0xff]  ;;  %v27_v16 = vld [vmem:[%s6242_s0 + $0x8] sm:$0xff]  ;;  %v2616_v20 = vpack.c.bf16 %v297_v10, %v295_v7 }
  0x22   :  { %2729 = vmatpush1.bf16.msra.mxu0 %v2728_v35  ;;  %2603 = vmatprep.subr.bf16.mxu1 %v2602_v36  ;;  %v428_v17 = vld [vmem:[%s6241_s1 + $0x588] sm:$0xff]  ;;  %v430_v18 = vld [vmem:[%s6241_s1 + $0x598] sm:$0xff]  ;;  %v2744_v21 = vpack.c.bf16 %v425_v12, %v423_v11  ;;  %v2618_v22 = vpack.c.bf16 %v302_v15, %v300_v14  ;;  %v299_v23 = vld [vmem:[%s6241_s1 + $0x180] sm:$0xff] }
  0x23   :  { %2731 = vmatprep.subr.bf16.mxu0 %v2730_v40  ;;  %615 = vmatprep.mubr.f32.mxu1 %v27_v16  ;;  %v31_v19 = vld [vmem:[%s6242_s0 + $0x28] sm:$0xff]  ;;  %v301_v24 = vld [vmem:[%s6241_s1 + $0x190] sm:$0xff]  ;;  %v427_v25 = vld [vmem:[%s6241_s1 + $0x580] sm:$0xff]  ;;  %v2746_v26 = vpack.c.bf16 %v430_v18, %v428_v17 }
  0x24   :  { %1045 = vmatprep.mubr.f32.mxu0 %v31_v19  ;;  %v429_v27 = vld [vmem:[%s6241_s1 + $0x590] sm:$0xff]  ;;  %v304_v28 = vld [vmem:[%s6241_s1 + $0x1a8] sm:$0xff]  ;;  %v306_v29 = vld [vmem:[%s6241_s1 + $0x1b8] sm:$0xff]  ;;  %v2620_v32 = vpack.c.bf16 %v301_v24, %v299_v23 }
  0x25   :  { %2605 = vmatpush1.bf16.msra.mxu1 %v2604_v46  ;;  %v432_v30 = vld [vmem:[%s6241_s1 + $0x5a8] sm:$0xff]  ;;  %v434_v31 = vld [vmem:[%s6241_s1 + $0x5b8] sm:$0xff]  ;;  %v2748_v33 = vpack.c.bf16 %v429_v27, %v427_v25  ;;  %v2622_v34 = vpack.c.bf16 %v306_v29, %v304_v28  ;;  %v303_v35 = vld [vmem:[%s6241_s1 + $0x1a0] sm:$0xff] }
  0x26   :  { %2733 = vmatpush1.bf16.msra.mxu0 %v2732_v47  ;;  %2607 = vmatprep.subr.bf16.mxu1 %v2606_v48  ;;  %v305_v36 = vld [vmem:[%s6241_s1 + $0x1b0] sm:$0xff]  ;;  %v431_v37 = vld [vmem:[%s6241_s1 + $0x5a0] sm:$0xff]  ;;  %v2750_v38 = vpack.c.bf16 %v434_v31, %v432_v30  ;;  %v308_v40 = vld [vmem:[%s6241_s1 + $0x1c8] sm:$0xff] }
  0x27   :  { %2735 = vmatprep.subr.bf16.mxu0 %v2734_v52  ;;  %v433_v39 = vld [vmem:[%s6241_s1 + $0x5b0] sm:$0xff]  ;;  %v310_v41 = vld [vmem:[%s6241_s1 + $0x1d8] sm:$0xff]  ;;  %v436_v42 = vld [vmem:[%s6241_s1 + $0x5c8] sm:$0xff]  ;;  %v2624_v44 = vpack.c.bf16 %v305_v36, %v303_v35 }
  0x28   :  { %v438_v43 = vld [vmem:[%s6241_s1 + $0x5d8] sm:$0xff]  ;;  %v2752_v45 = vpack.c.bf16 %v433_v39, %v431_v37  ;;  %v2626_v46 = vpack.c.bf16 %v310_v41, %v308_v40  ;;  %v307_v47 = vld [vmem:[%s6241_s1 + $0x1c0] sm:$0xff]  ;;  %v309_v48 = vld [vmem:[%s6241_s1 + $0x1d0] sm:$0xff] }
  0x29   :  { %2609 = vmatpush1.bf16.msra.mxu1 %v2608_v58  ;;  %v435_v49 = vld [vmem:[%s6241_s1 + $0x5c0] sm:$0xff]  ;;  %v2754_v50 = vpack.c.bf16 %v438_v43, %v436_v42  ;;  %v437_v51 = vld [vmem:[%s6241_s1 + $0x5d0] sm:$0xff]  ;;  %v312_v52 = vld [vmem:[%s6241_s1 + $0x1e8] sm:$0xff]  ;;  %v2628_v56 = vpack.c.bf16 %v309_v48, %v307_v47 }
  0x2a   :  { %2737 = vmatpush1.bf16.msra.mxu0 %v2736_v59  ;;  %2611 = vmatprep.subr.bf16.mxu1 %v2610_v60  ;;  %v314_v53 = vld [vmem:[%s6241_s1 + $0x1f8] sm:$0xff]  ;;  %v440_v54 = vld [vmem:[%s6241_s1 + $0x5e8] sm:$0xff]  ;;  %v2756_v57 = vpack.c.bf16 %v437_v51, %v435_v49  ;;  %v311_v59 = vld [vmem:[%s6241_s1 + $0x1e0] sm:$0xff] }
  0x2b   :  { %2739 = vmatprep.subr.bf16.mxu0 %v2738_v0  ;;  %v442_v55 = vld [vmem:[%s6241_s1 + $0x5f8] sm:$0xff]  ;;  %v2630_v58 = vpack.c.bf16 %v314_v53, %v312_v52  ;;  %v313_v60 = vld [vmem:[%s6241_s1 + $0x1f0] sm:$0xff]  ;;  %v439_v62 = vld [vmem:[%s6241_s1 + $0x5e0] sm:$0xff] }
  0x2c   :  { %v2758_v61 = vpack.c.bf16 %v442_v55, %v440_v54  ;;  %v441_v63 = vld [vmem:[%s6241_s1 + $0x5f0] sm:$0xff]  ;;  %v444_v0 = vld [vmem:[%s6241_s1 + $0x608] sm:$0xff]  ;;  %v446_v1 = vld [vmem:[%s6241_s1 + $0x618] sm:$0xff]  ;;  %v2632_v2 = vpack.c.bf16 %v313_v60, %v311_v59 }
  0x2d   :  { %2613 = vmatpush1.bf16.msra.mxu1 %v2612_v6  ;;  %v2760_v3 = vpack.c.bf16 %v441_v63, %v439_v62  ;;  %v26_v4 = vld [vmem:[%s6242_s0] sm:$0xff]  ;;  %v2762_v5 = vpack.c.bf16 %v446_v1, %v444_v0  ;;  %v445_v7 = vld [vmem:[%s6241_s1 + $0x610] sm:$0xff]  ;;  %v316_v10 = vld [vmem:[%s6241_s1 + $0x208] sm:$0xff] }
  0x2e   :  { %2741 = vmatpush1.bf16.msra.mxu0 %v2740_v8  ;;  %2615 = vmatprep.subr.bf16.mxu1 %v2614_v9  ;;  %v443_v6 = vld [vmem:[%s6241_s1 + $0x600] sm:$0xff]  ;;  %v448_v8 = vld [vmem:[%s6241_s1 + $0x628] sm:$0xff]  ;;  %v450_v9 = vld [vmem:[%s6241_s1 + $0x638] sm:$0xff] }
  0x2f   :  { %2743 = vmatprep.subr.bf16.mxu0 %v2742_v13  ;;  %v30_v11 = vld [vmem:[%s6242_s0 + $0x20] sm:$0xff]  ;;  %v318_v12 = vld [vmem:[%s6241_s1 + $0x218] sm:$0xff]  ;;  %v2764_v14 = vpack.c.bf16 %v445_v7, %v443_v6  ;;  %v36_v15 = vld [vmem:[%s6242_s0 + $0x50] sm:$0xff] }
  0x30   :  { %v315_v13 = vld [vmem:[%s6241_s1 + $0x200] sm:$0xff]  ;;  %v40_v16 = vld [vmem:[%s6242_s0 + $0x70] sm:$0xff]  ;;  %v2634_v17 = vpack.c.bf16 %v318_v12, %v316_v10  ;;  %v35_v19 = vld [vmem:[%s6242_s0 + $0x48] sm:$0xff] }
  0x31   :  { %2617 = vmatpush1.bf16.msra.mxu1 %v2616_v20  ;;  %v317_v18 = vld [vmem:[%s6241_s1 + $0x210] sm:$0xff]  ;;  %v2766_v20 = vpack.c.bf16 %v450_v9, %v448_v8  ;;  %v39_v24 = vld [vmem:[%s6242_s0 + $0x68] sm:$0xff]  ;;  %v45_v28 = vld [vmem:[%s6242_s0 + $0x98] sm:$0xff] }
  0x32   :  { %2745 = vmatpush1.bf16.msra.mxu0 %v2744_v21  ;;  %2619 = vmatprep.subr.bf16.mxu1 %v2618_v22  ;;  %v447_v21 = vld [vmem:[%s6241_s1 + $0x620] sm:$0xff]  ;;  %v449_v22 = vld [vmem:[%s6241_s1 + $0x630] sm:$0xff]  ;;  %v2636_v23 = vpack.c.bf16 %v317_v18, %v315_v13  ;;  %v452_v25 = vld [vmem:[%s6241_s1 + $0x648] sm:$0xff] }
  0x33   :  { %2747 = vmatprep.subr.bf16.mxu0 %v2746_v26  ;;  %v454_v26 = vld [vmem:[%s6241_s1 + $0x658] sm:$0xff]  ;;  %v320_v27 = vld [vmem:[%s6241_s1 + $0x228] sm:$0xff]  ;;  %v319_v30 = vld [vmem:[%s6241_s1 + $0x220] sm:$0xff] }
  0x34   :  { %v322_v29 = vld [vmem:[%s6241_s1 + $0x238] sm:$0xff]  ;;  %v321_v35 = vld [vmem:[%s6241_s1 + $0x230] sm:$0xff]  ;;  %v2770_v37 = vpack.c.bf16 %v454_v26, %v452_v25  ;;  %v324_v40 = vld [vmem:[%s6241_s1 + $0x248] sm:$0xff] }
  0x35   :  { %2621 = vmatpush1.bf16.msra.mxu1 %v2620_v32  ;;  %v49_v31 = vld [vmem:[%s6242_s0 + $0xb8] sm:$0xff]  ;;  %v2768_v32 = vpack.c.bf16 %v449_v22, %v447_v21  ;;  %v44_v36 = vld [vmem:[%s6242_s0 + $0x90] sm:$0xff]  ;;  %v2640_v39 = vpack.c.bf16 %v321_v35, %v319_v30  ;;  %v456_v43 = vld [vmem:[%s6241_s1 + $0x668] sm:$0xff] }
  0x36   :  { %2749 = vmatpush1.bf16.msra.mxu0 %v2748_v33  ;;  %2623 = vmatprep.subr.bf16.mxu1 %v2622_v34  ;;  %v451_v33 = vld [vmem:[%s6241_s1 + $0x640] sm:$0xff]  ;;  %v2638_v34 = vpack.c.bf16 %v322_v29, %v320_v27  ;;  %v326_v41 = vld [vmem:[%s6241_s1 + $0x258] sm:$0xff]  ;;  %v48_v42 = vld [vmem:[%s6242_s0 + $0xb0] sm:$0xff] }
  0x37   :  { %2751 = vmatprep.subr.bf16.mxu0 %v2750_v38  ;;  %v453_v38 = vld [vmem:[%s6241_s1 + $0x650] sm:$0xff]  ;;  %v323_v47 = vld [vmem:[%s6241_s1 + $0x240] sm:$0xff]  ;;  %v460_v54 = vld [vmem:[%s6241_s1 + $0x688] sm:$0xff] }
  0x38   :  { %v325_v48 = vld [vmem:[%s6241_s1 + $0x250] sm:$0xff]  ;;  %v58_v49 = vld [vmem:[%s6242_s0 + $0x100] sm:$0xff]  ;;  %v53_v62 = vld [vmem:[%s6242_s0 + $0xd8] sm:$0xff] }
  0x39   :  { %2625 = vmatpush1.bf16.msra.mxu1 %v2624_v44  ;;  %v458_v44 = vld [vmem:[%s6241_s1 + $0x678] sm:$0xff]  ;;  %v455_v51 = vld [vmem:[%s6241_s1 + $0x660] sm:$0xff]  ;;  %v457_v52 = vld [vmem:[%s6241_s1 + $0x670] sm:$0xff]  ;;  %v2644_v55 = vpack.c.bf16 %v325_v48, %v323_v47 }
  0x3a   :  { %2753 = vmatpush1.bf16.msra.mxu0 %v2752_v45  ;;  %2627 = vmatprep.subr.bf16.mxu1 %v2626_v46  ;;  %v2642_v45 = vpack.c.bf16 %v326_v41, %v324_v40  ;;  %v54_v46 = vld [vmem:[%s6242_s0 + $0xe0] sm:$0xff]  ;;  %v2774_v53 = vpack.c.bf16 %v458_v44, %v456_v43  ;;  %v57_v63 = vld [vmem:[%s6242_s0 + $0xf8] sm:$0xff]  ;;  %v63_v0 = vld [vmem:[%s6242_s0 + $0x128] sm:$0xff] }
  0x3b   :  { %2755 = vmatprep.subr.bf16.mxu0 %v2754_v50  ;;  %v2772_v50 = vpack.c.bf16 %v453_v38, %v451_v33  ;;  %v327_v60 = vld [vmem:[%s6241_s1 + $0x260] sm:$0xff]  ;;  %v67_v1 = vld [vmem:[%s6242_s0 + $0x148] sm:$0xff]  ;;  %v334_v9 = vld [vmem:[%s6241_s1 + $0x298] sm:$0xff] }
  0x3c   :  { %v464_v6 = vld [vmem:[%s6241_s1 + $0x6a8] sm:$0xff]  ;;  %v466_v10 = vld [vmem:[%s6241_s1 + $0x6b8] sm:$0xff]  ;;  %v331_v12 = vld [vmem:[%s6241_s1 + $0x280] sm:$0xff] }
  0x3d   :  { %2629 = vmatpush1.bf16.msra.mxu1 %v2628_v56  ;;  %v328_v56 = vld [vmem:[%s6241_s1 + $0x268] sm:$0xff]  ;;  %v333_v13 = vld [vmem:[%s6241_s1 + $0x290] sm:$0xff]  ;;  %v2782_v21 = vpack.c.bf16 %v466_v10, %v464_v6  ;;  %v463_v22 = vld [vmem:[%s6241_s1 + $0x6a0] sm:$0xff] }
  0x3e   :  { %2757 = vmatpush1.bf16.msra.mxu0 %v2756_v57  ;;  %2631 = vmatprep.subr.bf16.mxu1 %v2630_v58  ;;  %v330_v57 = vld [vmem:[%s6241_s1 + $0x278] sm:$0xff]  ;;  %v332_v8 = vld [vmem:[%s6241_s1 + $0x288] sm:$0xff]  ;;  %v2652_v25 = vpack.c.bf16 %v333_v13, %v331_v12  ;;  %v337_v29 = vld [vmem:[%s6241_s1 + $0x2b0] sm:$0xff] }
  0x3f   :  { %2759 = vmatprep.subr.bf16.mxu0 %v2758_v61  ;;  %v462_v58 = vld [vmem:[%s6241_s1 + $0x698] sm:$0xff]  ;;  %v2646_v59 = vpack.c.bf16 %v330_v57, %v328_v56  ;;  %v329_v61 = vld [vmem:[%s6241_s1 + $0x270] sm:$0xff]  ;;  %v71_v30 = vld [vmem:[%s6242_s0 + $0x168] sm:$0xff] }
  0x40   :  { %v2648_v7 = vpack.c.bf16 %v329_v61, %v327_v60  ;;  %v470_v26 = vld [vmem:[%s6241_s1 + $0x6d8] sm:$0xff]  ;;  %v340_v35 = vld [vmem:[%s6241_s1 + $0x2c8] sm:$0xff]  ;;  %v467_v38 = vld [vmem:[%s6241_s1 + $0x6c0] sm:$0xff] }
  0x41   :  { %2633 = vmatpush1.bf16.msra.mxu1 %v2632_v2  ;;  %v2776_v2 = vpack.c.bf16 %v457_v52, %v455_v51  ;;  %v85_v33 = vld [vmem:[%s6242_s0 + $0x1d8] sm:$0xff]  ;;  %v472_v40 = vld [vmem:[%s6241_s1 + $0x6e8] sm:$0xff]  ;;  %v339_v44 = vld [vmem:[%s6241_s1 + $0x2c0] sm:$0xff] }
  0x42   :  { %2761 = vmatpush1.bf16.msra.mxu0 %v2760_v3  ;;  %2635 = vmatprep.subr.bf16.mxu1 %v2634_v17  ;;  %v459_v3 = vld [vmem:[%s6241_s1 + $0x680] sm:$0xff]  ;;  %v76_v17 = vld [vmem:[%s6242_s0 + $0x190] sm:$0xff]  ;;  %v344_v47 = vld [vmem:[%s6241_s1 + $0x2e8] sm:$0xff] }
  0x43   :  { %2763 = vmatprep.subr.bf16.mxu0 %v2762_v5  ;;  %v2778_v5 = vpack.c.bf16 %v462_v58, %v460_v54  ;;  %v346_v48 = vld [vmem:[%s6241_s1 + $0x2f8] sm:$0xff]  ;;  %v94_v51 = vld [vmem:[%s6242_s0 + $0x220] sm:$0xff]  ;;  %v476_v56 = vld [vmem:[%s6241_s1 + $0x708] sm:$0xff] }
  0x44   :  { %616 = vmatmul.mubr.f32.vlgmr.msra.gmra.mrb[0].mxu1 %v26_v4  ;;  %v461_v4 = vld [vmem:[%s6241_s1 + $0x690] sm:$0xff]  ;;  %v471_v54 = vld [vmem:[%s6241_s1 + $0x6e0] sm:$0xff]  ;;  %v478_v58 = vld [vmem:[%s6241_s1 + $0x718] sm:$0xff] }
  0x45   :  { %1046 = vmatmul.mubr.f32.vlgmr.msra.gmra.mrb[0].mxu0 %v30_v11  ;;  %621 = vmatprep.mubr.f32.mxu1 %v36_v15  ;;  %v2650_v11 = vpack.c.bf16 %v334_v9, %v332_v8  ;;  %v66_v15 = vld [vmem:[%s6242_s0 + $0x140] sm:$0xff]  ;;  %v2780_v18 = vpack.c.bf16 %v461_v4, %v459_v3  ;;  %v345_v61 = vld [vmem:[%s6241_s1 + $0x2f0] sm:$0xff]  ;;  %v103_v3 = vld [vmem:[%s6242_s0 + $0x268] sm:$0xff] }
  0x46   :  { %2765 = vmatpush1.bf16.msra.mxu0 %v2764_v14  ;;  %1051 = vmatprep.mubr.f32.mxu0 %v40_v16  ;;  %v62_v14 = vld [vmem:[%s6242_s0 + $0x120] sm:$0xff]  ;;  %v72_v16 = vld [vmem:[%s6242_s0 + $0x170] sm:$0xff]  ;;  %v480_v8 = vld [vmem:[%s6241_s1 + $0x728] sm:$0xff] }
  0x47   :  { %2767 = vmatprep.subr.bf16.mxu0 %v2766_v20  ;;  %2637 = vmatpush1.bf16.msra.mxu1 %v2636_v23  ;;  %v338_v20 = vld [vmem:[%s6241_s1 + $0x2b8] sm:$0xff]  ;;  %v465_v23 = vld [vmem:[%s6241_s1 + $0x6b0] sm:$0xff]  ;;  %v343_v60 = vld [vmem:[%s6241_s1 + $0x2e0] sm:$0xff] }
  0x48   :  { %622 = vmatmul.mubr.f32.gmra.mrb[2].mxu1 %v35_v19  ;;  %2639 = vmatprep.subr.bf16.mxu1 %v2638_v34  ;;  %v336_v19 = vld [vmem:[%s6241_s1 + $0x2a8] sm:$0xff]  ;;  %v2784_v34 = vpack.c.bf16 %v465_v23, %v463_v22  ;;  %v475_v6 = vld [vmem:[%s6241_s1 + $0x700] sm:$0xff]  ;;  %v2664_v9 = vpack.c.bf16 %v345_v61, %v343_v60  ;;  %v482_v10 = vld [vmem:[%s6241_s1 + $0x738] sm:$0xff] }
  0x49   :  { %1052 = vmatmul.mubr.f32.gmra.mrb[2].mxu0 %v39_v24  ;;  %627 = vmatprep.mubr.f32.mxu1 %v45_v28  ;;  %v468_v24 = vld [vmem:[%s6241_s1 + $0x6c8] sm:$0xff]  ;;  %v2654_v27 = vpack.c.bf16 %v338_v20, %v336_v19  ;;  %v335_v28 = vld [vmem:[%s6241_s1 + $0x2a0] sm:$0xff]  ;;  %v349_v13 = vld [vmem:[%s6241_s1 + $0x310] sm:$0xff] }
  0x4a   :  { %1057 = vmatprep.mubr.f32.mxu0 %v49_v31  ;;  %2769 = vmatpush1.bf16.msra.mxu0 %v2768_v32  ;;  %v75_v31 = vld [vmem:[%s6242_s0 + $0x188] sm:$0xff]  ;;  %v81_v32 = vld [vmem:[%s6242_s0 + $0x1b8] sm:$0xff]  ;;  %v2656_v41 = vpack.c.bf16 %v337_v29, %v335_v28  ;;  %v347_v12 = vld [vmem:[%s6241_s1 + $0x300] sm:$0xff] }
  0x4b   :  { %2771 = vmatprep.subr.bf16.mxu0 %v2770_v37  ;;  %2641 = vmatpush1.bf16.msra.mxu1 %v2640_v39  ;;  %v2786_v37 = vpack.c.bf16 %v470_v26, %v468_v24  ;;  %v469_v39 = vld [vmem:[%s6241_s1 + $0x6d0] sm:$0xff]  ;;  %v479_v22 = vld [vmem:[%s6241_s1 + $0x720] sm:$0xff]  ;;  %v484_v24 = vld [vmem:[%s6241_s1 + $0x748] sm:$0xff] }
  0x4c   :  { %628 = vmatmul.mubr.f32.gmra.mrb[4].mxu1 %v44_v36  ;;  %2643 = vmatprep.subr.bf16.mxu1 %v2642_v45  ;;  %v342_v36 = vld [vmem:[%s6241_s1 + $0x2d8] sm:$0xff]  ;;  %v341_v45 = vld [vmem:[%s6241_s1 + $0x2d0] sm:$0xff]  ;;  %v2788_v52 = vpack.c.bf16 %v469_v39, %v467_v38  ;;  %v351_v28 = vld [vmem:[%s6241_s1 + $0x320] sm:$0xff] }
  0x4d   :  { %1058 = vmatmul.mubr.f32.gmra.mrb[4].mxu0 %v48_v42  ;;  %633 = vmatprep.mubr.f32.mxu1 %v54_v46  ;;  %v474_v42 = vld [vmem:[%s6241_s1 + $0x6f8] sm:$0xff]  ;;  %v2658_v43 = vpack.c.bf16 %v342_v36, %v340_v35  ;;  %v80_v46 = vld [vmem:[%s6242_s0 + $0x1b0] sm:$0xff]  ;;  %v2660_v57 = vpack.c.bf16 %v341_v45, %v339_v44  ;;  %v483_v38 = vld [vmem:[%s6241_s1 + $0x740] sm:$0xff] }
  0x4e   :  { %1063 = vmatprep.mubr.f32.mxu0 %v58_v49  ;;  %2773 = vmatpush1.bf16.msra.mxu0 %v2772_v50  ;;  %v84_v49 = vld [vmem:[%s6242_s0 + $0x1d0] sm:$0xff]  ;;  %v90_v50 = vld [vmem:[%s6242_s0 + $0x200] sm:$0xff]  ;;  %v486_v26 = vld [vmem:[%s6241_s1 + $0x758] sm:$0xff] }
  0x4f   :  { %2775 = vmatprep.subr.bf16.mxu0 %v2774_v53  ;;  %2645 = vmatpush1.bf16.msra.mxu1 %v2644_v55  ;;  %v2790_v53 = vpack.c.bf16 %v474_v42, %v472_v40  ;;  %v473_v55 = vld [vmem:[%s6241_s1 + $0x6f0] sm:$0xff]  ;;  %v121_v35 = vld [vmem:[%s6242_s0 + $0x2f8] sm:$0xff]  ;;  %v488_v40 = vld [vmem:[%s6241_s1 + $0x768] sm:$0xff] }
  0x50   :  { %634 = vmatmul.mubr.f32.gmra.mrb[6].mxu1 %v53_v62  ;;  %2647 = vmatprep.subr.bf16.mxu1 %v2646_v59  ;;  %v2662_v59 = vpack.c.bf16 %v346_v48, %v344_v47  ;;  %v89_v62 = vld [vmem:[%s6242_s0 + $0x1f8] sm:$0xff]  ;;  %v2792_v4 = vpack.c.bf16 %v473_v55, %v471_v54  ;;  %v112_v19 = vld [vmem:[%s6242_s0 + $0x2b0] sm:$0xff]  ;;  %v355_v44 = vld [vmem:[%s6241_s1 + $0x340] sm:$0xff] }
  0x51   :  { %1064 = vmatmul.mubr.f32.gmra.mrb[6].mxu0 %v57_v63  ;;  %639 = vmatprep.mubr.f32.mxu1 %v63_v0  ;;  %v348_v63 = vld [vmem:[%s6241_s1 + $0x308] sm:$0xff]  ;;  %v350_v0 = vld [vmem:[%s6241_s1 + $0x318] sm:$0xff]  ;;  %v481_v23 = vld [vmem:[%s6241_s1 + $0x730] sm:$0xff] }
  0x52   :  { %1069 = vmatprep.mubr.f32.mxu0 %v67_v1  ;;  %2777 = vmatpush1.bf16.msra.mxu0 %v2776_v2  ;;  %v93_v1 = vld [vmem:[%s6242_s0 + $0x218] sm:$0xff]  ;;  %v99_v2 = vld [vmem:[%s6242_s0 + $0x248] sm:$0xff]  ;;  %v353_v29 = vld [vmem:[%s6241_s1 + $0x330] sm:$0xff]  ;;  %v2800_v36 = vpack.c.bf16 %v481_v23, %v479_v22 }
  0x53   :  { %2779 = vmatprep.subr.bf16.mxu0 %v2778_v5  ;;  %2649 = vmatpush1.bf16.msra.mxu1 %v2648_v7  ;;  %v2794_v5 = vpack.c.bf16 %v478_v58, %v476_v56  ;;  %v477_v7 = vld [vmem:[%s6241_s1 + $0x710] sm:$0xff]  ;;  %v490_v42 = vld [vmem:[%s6241_s1 + $0x778] sm:$0xff]  ;;  %v360_v47 = vld [vmem:[%s6241_s1 + $0x368] sm:$0xff] }
  0x54   :  { %640 = vmatmul.mubr.f32.gmra.mrb[8].mxu1 %v62_v14  ;;  %2651 = vmatprep.subr.bf16.mxu1 %v2650_v11  ;;  %v2666_v11 = vpack.c.bf16 %v350_v0, %v348_v63  ;;  %v98_v14 = vld [vmem:[%s6242_s0 + $0x240] sm:$0xff]  ;;  %v2796_v20 = vpack.c.bf16 %v477_v7, %v475_v6  ;;  %v485_v39 = vld [vmem:[%s6241_s1 + $0x750] sm:$0xff]  ;;  %v362_v48 = vld [vmem:[%s6241_s1 + $0x378] sm:$0xff] }
  0x55   :  { %1070 = vmatmul.mubr.f32.gmra.mrb[8].mxu0 %v66_v15  ;;  %645 = vmatprep.mubr.f32.mxu1 %v72_v16  ;;  %v352_v15 = vld [vmem:[%s6241_s1 + $0x328] sm:$0xff]  ;;  %v354_v16 = vld [vmem:[%s6241_s1 + $0x338] sm:$0xff]  ;;  %v357_v45 = vld [vmem:[%s6241_s1 + $0x350] sm:$0xff] }
  0x56   :  { %1075 = vmatprep.mubr.f32.mxu0 %v76_v17  ;;  %2781 = vmatpush1.bf16.msra.mxu0 %v2780_v18  ;;  %v102_v17 = vld [vmem:[%s6242_s0 + $0x260] sm:$0xff]  ;;  %v108_v18 = vld [vmem:[%s6242_s0 + $0x290] sm:$0xff]  ;;  %v492_v56 = vld [vmem:[%s6241_s1 + $0x788] sm:$0xff] }
  0x57   :  { %2783 = vmatprep.subr.bf16.mxu0 %v2782_v21  ;;  %2653 = vmatpush1.bf16.msra.mxu1 %v2652_v25  ;;  %v2798_v21 = vpack.c.bf16 %v482_v10, %v480_v8  ;;  %v2668_v25 = vpack.c.bf16 %v349_v13, %v347_v12  ;;  %v487_v54 = vld [vmem:[%s6241_s1 + $0x760] sm:$0xff]  ;;  %v489_v55 = vld [vmem:[%s6241_s1 + $0x770] sm:$0xff]  ;;  %v494_v58 = vld [vmem:[%s6241_s1 + $0x798] sm:$0xff] }
  0x58   :  { %646 = vmatmul.mubr.f32.gmra.mrb[10].mxu1 %v71_v30  ;;  %2655 = vmatprep.subr.bf16.mxu1 %v2654_v27  ;;  %v2670_v27 = vpack.c.bf16 %v354_v16, %v352_v15  ;;  %v107_v30 = vld [vmem:[%s6242_s0 + $0x288] sm:$0xff]  ;;  %v359_v60 = vld [vmem:[%s6241_s1 + $0x360] sm:$0xff]  ;;  %v361_v61 = vld [vmem:[%s6241_s1 + $0x370] sm:$0xff] }
  0x59   :  { %1076 = vmatmul.mubr.f32.gmra.mrb[10].mxu0 %v75_v31  ;;  %651 = vmatprep.mubr.f32.mxu1 %v81_v32  ;;  %v356_v31 = vld [vmem:[%s6241_s1 + $0x348] sm:$0xff]  ;;  %v358_v32 = vld [vmem:[%s6241_s1 + $0x358] sm:$0xff]  ;;  %v491_v6 = vld [vmem:[%s6241_s1 + $0x780] sm:$0xff]  ;;  %v2680_v8 = vpack.c.bf16 %v361_v61, %v359_v60 }
  0x5a   :  { %1081 = vmatprep.mubr.f32.mxu0 %v85_v33  ;;  %2785 = vmatpush1.bf16.msra.mxu0 %v2784_v34  ;;  %v111_v33 = vld [vmem:[%s6242_s0 + $0x2a8] sm:$0xff]  ;;  %v117_v34 = vld [vmem:[%s6242_s0 + $0x2d8] sm:$0xff]  ;;  %v493_v7 = vld [vmem:[%s6241_s1 + $0x790] sm:$0xff] }
  0x5b   :  { %2787 = vmatprep.subr.bf16.mxu0 %v2786_v37  ;;  %2657 = vmatpush1.bf16.msra.mxu1 %v2656_v41  ;;  %v2802_v37 = vpack.c.bf16 %v486_v26, %v484_v24  ;;  %v2672_v41 = vpack.c.bf16 %v353_v29, %v351_v28  ;;  %v364_v63 = vld [vmem:[%s6241_s1 + $0x388] sm:$0xff]  ;;  %v366_v0 = vld [vmem:[%s6241_s1 + $0x398] sm:$0xff]  ;;  %v363_v12 = vld [vmem:[%s6241_s1 + $0x380] sm:$0xff] }
  0x5c   :  { %652 = vmatmul.mubr.f32.gmra.mrb[12].mxu1 %v80_v46  ;;  %2659 = vmatprep.subr.bf16.mxu1 %v2658_v43  ;;  %v2674_v43 = vpack.c.bf16 %v358_v32, %v356_v31  ;;  %v116_v46 = vld [vmem:[%s6242_s0 + $0x2d0] sm:$0xff]  ;;  %v498_v10 = vld [vmem:[%s6241_s1 + $0x7b8] sm:$0xff]  ;;  %v368_v15 = vld [vmem:[%s6241_s1 + $0x3a8] sm:$0xff] }
  0x5d   :  { %1082 = vmatmul.mubr.f32.gmra.mrb[12].mxu0 %v84_v49  ;;  %657 = vmatprep.mubr.f32.mxu1 %v90_v50  ;;  %v120_v49 = vld [vmem:[%s6242_s0 + $0x2f0] sm:$0xff]  ;;  %v126_v50 = vld [vmem:[%s6242_s0 + $0x320] sm:$0xff]  ;;  %v370_v16 = vld [vmem:[%s6241_s1 + $0x3b8] sm:$0xff] }
  0x5e   :  { %1087 = vmatprep.mubr.f32.mxu0 %v94_v51  ;;  %2789 = vmatpush1.bf16.msra.mxu0 %v2788_v52  ;;  %v130_v51 = vld [vmem:[%s6242_s0 + $0x340] sm:$0xff]  ;;  %v2804_v52 = vpack.c.bf16 %v485_v39, %v483_v38  ;;  %v365_v13 = vld [vmem:[%s6241_s1 + $0x390] sm:$0xff]  ;;  %v2686_v26 = vpack.c.bf16 %v370_v16, %v368_v15  ;;  %v372_v31 = vld [vmem:[%s6241_s1 + $0x3c8] sm:$0xff] }
  0x5f   :  { %2791 = vmatprep.subr.bf16.mxu0 %v2790_v53  ;;  %2661 = vmatpush1.bf16.msra.mxu1 %v2660_v57  ;;  %v2806_v53 = vpack.c.bf16 %v490_v42, %v488_v40  ;;  %v2676_v57 = vpack.c.bf16 %v357_v45, %v355_v44  ;;  %v495_v22 = vld [vmem:[%s6241_s1 + $0x7a0] sm:$0xff]  ;;  %v497_v23 = vld [vmem:[%s6241_s1 + $0x7b0] sm:$0xff]  ;;  %v2684_v24 = vpack.c.bf16 %v365_v13, %v363_v12  ;;  %v374_v32 = vld [vmem:[%s6241_s1 + $0x3d8] sm:$0xff] }
  0x60   :  { %658 = vmatmul.mubr.f32.gmra.mrb[14].mxu1 %v89_v62  ;;  %2663 = vmatprep.subr.bf16.mxu1 %v2662_v59  ;;  %v2678_v59 = vpack.c.bf16 %v362_v48, %v360_v47  ;;  %v125_v62 = vld [vmem:[%s6242_s0 + $0x318] sm:$0xff]  ;;  %v367_v28 = vld [vmem:[%s6241_s1 + $0x3a0] sm:$0xff]  ;;  %v369_v29 = vld [vmem:[%s6241_s1 + $0x3b0] sm:$0xff]  ;;  %v2690_v42 = vpack.c.bf16 %v374_v32, %v372_v31 }
  0x61   :  { %1088 = vmatmul.mubr.f32.gmra.mrb[14].mxu0 %v93_v1  ;;  %663 = vmatprep.mubr.f32.mxu1 %v99_v2  ;;  %v129_v1 = vld [vmem:[%s6242_s0 + $0x338] sm:$0xff]  ;;  %v135_v2 = vld [vmem:[%s6242_s0 + $0x368] sm:$0xff]  ;;  %v2688_v38 = vpack.c.bf16 %v369_v29, %v367_v28  ;;  %v499_v39 = vld [vmem:[%s6241_s1 + $0x7c0] sm:$0xff] }
  0x62   :  { %1093 = vmatprep.mubr.f32.mxu0 %v103_v3  ;;  %2793 = vmatpush1.bf16.msra.mxu0 %v2792_v4  ;;  %v139_v3 = vld [vmem:[%s6242_s0 + $0x388] sm:$0xff]  ;;  %v2808_v4 = vpack.c.bf16 %v489_v55, %v487_v54  ;;  %v501_v40 = vld [vmem:[%s6241_s1 + $0x7d0] sm:$0xff]  ;;  %v506_v45 = vld [vmem:[%s6241_s1 + $0x7f8] sm:$0xff] }
  0x63   :  { %2795 = vmatprep.subr.bf16.mxu0 %v2794_v5  ;;  %2665 = vmatpush1.bf16.msra.mxu1 %v2664_v9  ;;  %v2810_v5 = vpack.c.bf16 %v494_v58, %v492_v56  ;;  %v496_v9 = vld [vmem:[%s6241_s1 + $0x7a8] sm:$0xff]  ;;  %v378_v48 = vld [vmem:[%s6241_s1 + $0x3f8] sm:$0xff]  ;;  %v503_v55 = vld [vmem:[%s6241_s1 + $0x7e0] sm:$0xff] }
  0x64   :  { %664 = vmatmul.mubr.f32.gmra.mrb[16].mxu1 %v98_v14  ;;  %2667 = vmatprep.subr.bf16.mxu1 %v2666_v11  ;;  %v2682_v11 = vpack.c.bf16 %v366_v0, %v364_v63  ;;  %v134_v14 = vld [vmem:[%s6242_s0 + $0x360] sm:$0xff]  ;;  %v504_v44 = vld [vmem:[%s6241_s1 + $0x7e8] sm:$0xff]  ;;  %v505_v56 = vld [vmem:[%s6241_s1 + $0x7f0] sm:$0xff] }
  0x65   :  { %1094 = vmatmul.mubr.f32.gmra.mrb[16].mxu0 %v102_v17  ;;  %669 = vmatprep.mubr.f32.mxu1 %v108_v18  ;;  %v138_v17 = vld [vmem:[%s6242_s0 + $0x380] sm:$0xff]  ;;  %v144_v18 = vld [vmem:[%s6242_s0 + $0x3b0] sm:$0xff]  ;;  %v376_v47 = vld [vmem:[%s6241_s1 + $0x3e8] sm:$0xff]  ;;  %v2822_v54 = vpack.c.bf16 %v506_v45, %v504_v44 }
  0x66   :  { %1099 = vmatprep.mubr.f32.mxu0 %v112_v19  ;;  %2797 = vmatpush1.bf16.msra.mxu0 %v2796_v20  ;;  %v148_v19 = vld [vmem:[%s6242_s0 + $0x3d0] sm:$0xff]  ;;  %v2812_v20 = vpack.c.bf16 %v493_v7, %v491_v6  ;;  %v2694_v58 = vpack.c.bf16 %v378_v48, %v376_v47  ;;  %v508_v60 = vld [vmem:[%s6241_s1 + $0x808] sm:$0xff]  ;;  %v510_v61 = vld [vmem:[%s6241_s1 + $0x818] sm:$0xff] }
  0x67   :  { %2799 = vmatprep.subr.bf16.mxu0 %v2798_v21  ;;  %2669 = vmatpush1.bf16.msra.mxu1 %v2668_v25  ;;  %v2814_v21 = vpack.c.bf16 %v498_v10, %v496_v9  ;;  %v500_v25 = vld [vmem:[%s6241_s1 + $0x7c8] sm:$0xff]  ;;  %v165_v63 = vld [vmem:[%s6242_s0 + $0x458] sm:$0xff]  ;;  %v174_v6 = vld [vmem:[%s6242_s0 + $0x4a0] sm:$0xff] }
  0x68   :  { %670 = vmatmul.mubr.f32.gmra.mrb[18].mxu1 %v107_v30  ;;  %2671 = vmatprep.subr.bf16.mxu1 %v2670_v27  ;;  %v502_v27 = vld [vmem:[%s6241_s1 + $0x7d8] sm:$0xff]  ;;  %v143_v30 = vld [vmem:[%s6242_s0 + $0x3a8] sm:$0xff]  ;;  %v180_v7 = vld [vmem:[%s6242_s0 + $0x4d0] sm:$0xff] }
  0x69   :  { %1100 = vmatmul.mubr.f32.gmra.mrb[18].mxu0 %v111_v33  ;;  %675 = vmatprep.mubr.f32.mxu1 %v117_v34  ;;  %v147_v33 = vld [vmem:[%s6242_s0 + $0x3c8] sm:$0xff]  ;;  %v153_v34 = vld [vmem:[%s6242_s0 + $0x3f8] sm:$0xff]  ;;  %v188_v13 = vld [vmem:[%s6242_s0 + $0x510] sm:$0xff] }
  0x6a   :  { %1105 = vmatprep.mubr.f32.mxu0 %v121_v35  ;;  %2801 = vmatpush1.bf16.msra.mxu0 %v2800_v36  ;;  %v157_v35 = vld [vmem:[%s6242_s0 + $0x418] sm:$0xff]  ;;  %v2816_v36 = vpack.c.bf16 %v497_v23, %v495_v22  ;;  %v171_v0 = vld [vmem:[%s6242_s0 + $0x488] sm:$0xff]  ;;  %v198_v15 = vld [vmem:[%s6242_s0 + $0x560] sm:$0xff] }
  0x6b   :  { %2803 = vmatprep.subr.bf16.mxu0 %v2802_v37  ;;  %2673 = vmatpush1.bf16.msra.mxu1 %v2672_v41  ;;  %v2818_v37 = vpack.c.bf16 %v502_v27, %v500_v25  ;;  %v371_v41 = vld [vmem:[%s6241_s1 + $0x3c0] sm:$0xff]  ;;  %v179_v9 = vld [vmem:[%s6242_s0 + $0x4c8] sm:$0xff]  ;;  %v193_v12 = vld [vmem:[%s6242_s0 + $0x538] sm:$0xff] }
  0x6c   :  { %676 = vmatmul.mubr.f32.gmra.mrb[20].mxu1 %v116_v46  ;;  %2675 = vmatprep.subr.bf16.mxu1 %v2674_v43  ;;  %v373_v43 = vld [vmem:[%s6241_s1 + $0x3d0] sm:$0xff]  ;;  %v183_v10 = vld [vmem:[%s6242_s0 + $0x4e8] sm:$0xff]  ;;  %v202_v16 = vld [vmem:[%s6242_s0 + $0x580] sm:$0xff] }
  0x6d   :  { %1106 = vmatmul.mubr.f32.gmra.mrb[20].mxu0 %v120_v49  ;;  %681 = vmatprep.mubr.f32.mxu1 %v126_v50  ;;  %v152_v46 = vld [vmem:[%s6242_s0 + $0x3f0] sm:$0xff]  ;;  %v162_v50 = vld [vmem:[%s6242_s0 + $0x440] sm:$0xff]  ;;  %v215_v25 = vld [vmem:[%s6242_s0 + $0x5e8] sm:$0xff] }
  0x6e   :  { %1111 = vmatprep.mubr.f32.mxu0 %v130_v51  ;;  %2805 = vmatpush1.bf16.msra.mxu0 %v2804_v52  ;;  %v156_v49 = vld [vmem:[%s6242_s0 + $0x410] sm:$0xff]  ;;  %v166_v51 = vld [vmem:[%s6242_s0 + $0x460] sm:$0xff]  ;;  %v2820_v52 = vpack.c.bf16 %v501_v40, %v499_v39  ;;  %v225_v27 = vld [vmem:[%s6242_s0 + $0x638] sm:$0xff] }
  0x6f   :  { %2807 = vmatprep.subr.bf16.mxu0 %v2806_v53  ;;  %2677 = vmatpush1.bf16.msra.mxu1 %v2676_v57  ;;  %v2692_v53 = vpack.c.bf16 %v373_v43, %v371_v41  ;;  %v375_v57 = vld [vmem:[%s6241_s1 + $0x3e0] sm:$0xff]  ;;  %v216_v23 = vld [vmem:[%s6242_s0 + $0x5f0] sm:$0xff]  ;;  %v229_v28 = vld [vmem:[%s6242_s0 + $0x658] sm:$0xff] }
  0x70   :  { %682 = vmatmul.mubr.f32.gmra.mrb[22].mxu1 %v125_v62  ;;  %2679 = vmatprep.subr.bf16.mxu1 %v2678_v59  ;;  %v377_v59 = vld [vmem:[%s6241_s1 + $0x3f0] sm:$0xff]  ;;  %v161_v62 = vld [vmem:[%s6242_s0 + $0x438] sm:$0xff]  ;;  %v210_v22 = vld [vmem:[%s6242_s0 + $0x5c0] sm:$0xff] }
  0x71   :  { %1112 = vmatmul.mubr.f32.gmra.mrb[22].mxu0 %v129_v1  ;;  %687 = vmatprep.mubr.f32.mxu1 %v135_v2  ;;  %v2824_v1 = vpack.c.bf16 %v505_v56, %v503_v55  ;;  %v175_v2 = vld [vmem:[%s6242_s0 + $0x4a8] sm:$0xff]  ;;  %v224_v29 = vld [vmem:[%s6242_s0 + $0x630] sm:$0xff]  ;;  %v234_v31 = vld [vmem:[%s6242_s0 + $0x680] sm:$0xff] }
  0x72   :  { %1117 = vmatprep.mubr.f32.mxu0 %v139_v3  ;;  %2809 = vmatpush1.bf16.msra.mxu0 %v2808_v4  ;;  %v2696_v3 = vpack.c.bf16 %v377_v59, %v375_v57  ;;  %v2826_v4 = vpack.c.bf16 %v510_v61, %v508_v60  ;;  %v238_v32 = vld [vmem:[%s6242_s0 + $0x6a0] sm:$0xff]  ;;  %v29_v39 = vld [vmem:[%s6242_s0 + $0x18] sm:$0xff]  ;;  %v512_v43 = vld [vmem:[%s6241_s1 + $0x828] sm:$0xff] }
  0x73   :  { %2811 = vmatprep.subr.bf16.mxu0 %v2810_v5  ;;  %2681 = vmatpush1.bf16.msra.mxu1 %v2680_v8  ;;  %v170_v5 = vld [vmem:[%s6242_s0 + $0x480] sm:$0xff]  ;;  %v184_v8 = vld [vmem:[%s6242_s0 + $0x4f0] sm:$0xff]  ;;  %v33_v40 = vld [vmem:[%s6242_s0 + $0x38] sm:$0xff] }
  0x74   :  { %688 = vmatmul.mubr.f32.gmra.mrb[24].mxu1 %v134_v14  ;;  %2683 = vmatprep.subr.bf16.mxu1 %v2682_v11  ;;  %v189_v11 = vld [vmem:[%s6242_s0 + $0x518] sm:$0xff]  ;;  %v192_v14 = vld [vmem:[%s6242_s0 + $0x530] sm:$0xff]  ;;  %v507_v41 = vld [vmem:[%s6241_s1 + $0x800] sm:$0xff] }
  0x75   :  { %1118 = vmatmul.mubr.f32.gmra.mrb[24].mxu0 %v138_v17  ;;  %693 = vmatprep.mubr.f32.mxu1 %v144_v18  ;;  %v197_v17 = vld [vmem:[%s6242_s0 + $0x558] sm:$0xff]  ;;  %v28_v45 = vld [vmem:[%s6242_s0 + $0x10] sm:$0xff]  ;;  %v38_v48 = vld [vmem:[%s6242_s0 + $0x60] sm:$0xff] }
  0x76   :  { %1123 = vmatprep.mubr.f32.mxu0 %v148_v19  ;;  %2813 = vmatpush1.bf16.msra.mxu0 %v2812_v20  ;;  %v201_v18 = vld [vmem:[%s6242_s0 + $0x578] sm:$0xff]  ;;  %v207_v19 = vld [vmem:[%s6242_s0 + $0x5a8] sm:$0xff]  ;;  %v515_v61 = vld [vmem:[%s6241_s1 + $0x840] sm:$0xff] }
  0x77   :  { %2815 = vmatprep.subr.bf16.mxu0 %v2814_v21  ;;  %2685 = vmatpush1.bf16.msra.mxu1 %v2684_v24  ;;  %v211_v20 = vld [vmem:[%s6242_s0 + $0x5c8] sm:$0xff]  ;;  %v206_v21 = vld [vmem:[%s6242_s0 + $0x5a0] sm:$0xff]  ;;  %v220_v24 = vld [vmem:[%s6242_s0 + $0x610] sm:$0xff] }
  0x78   :  { %694 = vmatmul.mubr.f32.gmra.mrb[26].mxu1 %v143_v30  ;;  %2687 = vmatprep.subr.bf16.mxu1 %v2686_v26  ;;  %v219_v26 = vld [vmem:[%s6242_s0 + $0x608] sm:$0xff]  ;;  %v228_v30 = vld [vmem:[%s6242_s0 + $0x650] sm:$0xff]  ;;  %v514_v44 = vld [vmem:[%s6241_s1 + $0x838] sm:$0xff] }
  0x79   :  { %1124 = vmatmul.mubr.f32.gmra.mrb[26].mxu0 %v147_v33  ;;  %699 = vmatprep.mubr.f32.mxu1 %v153_v34  ;;  %v233_v33 = vld [vmem:[%s6242_s0 + $0x678] sm:$0xff]  ;;  %v47_v57 = vld [vmem:[%s6242_s0 + $0xa8] sm:$0xff] }
  0x7a   :  { %1129 = vmatprep.mubr.f32.mxu0 %v157_v35  ;;  %2817 = vmatpush1.bf16.msra.mxu0 %v2816_v36  ;;  %v237_v34 = vld [vmem:[%s6242_s0 + $0x698] sm:$0xff]  ;;  %v243_v35 = vld [vmem:[%s6242_s0 + $0x6c8] sm:$0xf] }
  0x7b   :  { %2819 = vmatprep.subr.bf16.mxu0 %v2818_v37  ;;  %2689 = vmatpush1.bf16.msra.mxu1 %v2688_v38  ;;  %v247_v36 = vld [vmem:[%s6242_s0 + $0x6e8] sm:$0xf]  ;;  %v242_v37 = vld [vmem:[%s6242_s0 + $0x6c0] sm:$0xf]  ;;  %v37_v55 = vld [vmem:[%s6242_s0 + $0x58] sm:$0xff] }
  0x7c   :  { %700 = vmatmul.mubr.f32.gmra.mrb[28].mxu1 %v152_v46  ;;  %2691 = vmatprep.subr.bf16.mxu1 %v2690_v42  ;;  %v246_v38 = vld [vmem:[%s6242_s0 + $0x6e0] sm:$0xf]  ;;  %v509_v42 = vld [vmem:[%s6241_s1 + $0x810] sm:$0xff]  ;;  %v41_v56 = vld [vmem:[%s6242_s0 + $0x78] sm:$0xff] }
  0x7d   :  { %1130 = vmatmul.mubr.f32.gmra.mrb[28].mxu0 %v156_v49  ;;  %705 = vmatprep.mubr.f32.mxu1 %v162_v50  ;;  %v32_v46 = vld [vmem:[%s6242_s0 + $0x30] sm:$0xff]  ;;  %v2828_v47 = vpack.c.bf16 %v509_v42, %v507_v41  ;;  %v42_v49 = vld [vmem:[%s6242_s0 + $0x80] sm:$0xff]  ;;  %v2830_v50 = vpack.c.bf16 %v514_v44, %v512_v43  ;;  %v51_v59 = vld [vmem:[%s6242_s0 + $0xc8] sm:$0xff] }
  0x7e   :  { %1135 = vmatprep.mubr.f32.mxu0 %v166_v51  ;;  %2821 = vmatpush1.bf16.msra.mxu0 %v2820_v52  ;;  %v511_v51 = vld [vmem:[%s6241_s1 + $0x820] sm:$0xff]  ;;  %v513_v52 = vld [vmem:[%s6241_s1 + $0x830] sm:$0xff] }
  0x7f   :  { %2693 = vmatpush1.bf16.msra.mxu1 %v2692_v53  ;;  %2823 = vmatprep.subr.bf16.mxu0 %v2822_v54  ;;  %v516_v53 = vld [vmem:[%s6241_s1 + $0x848] sm:$0xff]  ;;  %v518_v54 = vld [vmem:[%s6241_s1 + $0x858] sm:$0xff]  ;;  %v82_v41 = vld [vmem:[%s6242_s0 + $0x1c0] sm:$0xff] }
  0x80   :  { %706 = vmatmul.mubr.f32.gmra.mrb[30].mxu1 %v161_v62  ;;  %2695 = vmatprep.subr.bf16.mxu1 %v2694_v58  ;;  %v2832_v58 = vpack.c.bf16 %v513_v52, %v511_v51  ;;  %v2834_v60 = vpack.c.bf16 %v518_v54, %v516_v53  ;;  %v517_v62 = vld [vmem:[%s6241_s1 + $0x850] sm:$0xff]  ;;  %v86_v42 = vld [vmem:[%s6242_s0 + $0x1e0] sm:$0xff]  ;;  %v101_v51 = vld [vmem:[%s6242_s0 + $0x258] sm:$0xff] }
  0x81   :  { %1136 = vmatmul.mubr.f32.gmra.mrb[30].mxu0 %v165_v63  ;;  %711 = vmatprep.mubr.f32.mxu1 %v171_v0  ;;  %v520_v63 = vld [vmem:[%s6241_s1 + $0x868] sm:$0xff]  ;;  %v522_v0 = vld [vmem:[%s6241_s1 + $0x878] sm:$0xff]  ;;  %v92_v43 = vld [vmem:[%s6242_s0 + $0x210] sm:$0xff] }
  0x82   :  { %1141 = vmatprep.mubr.f32.mxu0 %v175_v2  ;;  %2825 = vmatpush1.bf16.msra.mxu0 %v2824_v1  ;;  %v46_v1 = vld [vmem:[%s6242_s0 + $0xa0] sm:$0xff]  ;;  %v105_v53 = vld [vmem:[%s6242_s0 + $0x278] sm:$0xff]  ;;  %v100_v54 = vld [vmem:[%s6242_s0 + $0x250] sm:$0xff] }
  0x83   :  { %2697 = vmatpush1.bf16.msra.mxu1 %v2696_v3  ;;  %2827 = vmatprep.subr.bf16.mxu0 %v2826_v4  ;;  %v50_v2 = vld [vmem:[%s6242_s0 + $0xc0] sm:$0xff]  ;;  %v56_v3 = vld [vmem:[%s6242_s0 + $0xf0] sm:$0xff]  ;;  %v2836_v4 = vpack.c.bf16 %v517_v62, %v515_v61  ;;  %v123_v61 = vld [vmem:[%s6242_s0 + $0x308] sm:$0xff] }
  0x84   :  { %712 = vmatmul.mubr.f32.gmra.mrb[32].mxu1 %v170_v5  ;;  %v60_v5 = vld [vmem:[%s6242_s0 + $0x110] sm:$0xff]  ;;  %v118_v62 = vld [vmem:[%s6242_s0 + $0x2e0] sm:$0xff] }
  0x85   :  { %1142 = vmatmul.mubr.f32.gmra.mrb[32].mxu0 %v174_v6  ;;  %717 = vmatprep.mubr.f32.mxu1 %v180_v7  ;;  %v2838_v6 = vpack.c.bf16 %v522_v0, %v520_v63  ;;  %v519_v7 = vld [vmem:[%s6241_s1 + $0x860] sm:$0xff]  ;;  %v128_v0 = vld [vmem:[%s6242_s0 + $0x330] sm:$0xff] }
  0x86   :  { %1147 = vmatprep.mubr.f32.mxu0 %v184_v8  ;;  %v521_v8 = vld [vmem:[%s6241_s1 + $0x870] sm:$0xff]  ;;  %v122_v63 = vld [vmem:[%s6242_s0 + $0x300] sm:$0xff] }
  0x88   :  { %718 = vmatmul.mubr.f32.gmra.mrb[34].mxu1 %v179_v9  ;;  %v524_v9 = vld [vmem:[%s6241_s1 + $0x888] sm:$0xff] }
  0x89   :  { %1148 = vmatmul.mubr.f32.gmra.mrb[34].mxu0 %v183_v10  ;;  %723 = vmatprep.mubr.f32.mxu1 %v189_v11  ;;  %v526_v10 = vld [vmem:[%s6241_s1 + $0x898] sm:$0xff]  ;;  %v55_v11 = vld [vmem:[%s6242_s0 + $0xe8] sm:$0xff] }
  0x8a   :  { %1153 = vmatprep.mubr.f32.mxu0 %v193_v12  ;;  %v59_v12 = vld [vmem:[%s6242_s0 + $0x108] sm:$0xff] }
  0x8c   :  { %724 = vmatmul.mubr.f32.gmra.mrb[36].mxu1 %v188_v13  ;;  %v65_v13 = vld [vmem:[%s6242_s0 + $0x138] sm:$0xff] }
  0x8d   :  { %1154 = vmatmul.mubr.f32.gmra.mrb[36].mxu0 %v192_v14  ;;  %729 = vmatprep.mubr.f32.mxu1 %v198_v15  ;;  %v2840_v14 = vpack.c.bf16 %v521_v8, %v519_v7  ;;  %v69_v15 = vld [vmem:[%s6242_s0 + $0x158] sm:$0xff]  ;;  %v140_v7 = vld [vmem:[%s6242_s0 + $0x390] sm:$0xff]  ;;  %v146_v8 = vld [vmem:[%s6242_s0 + $0x3c0] sm:$0xff] }
  0x8e   :  { %1159 = vmatprep.mubr.f32.mxu0 %v202_v16  ;;  %v2842_v16 = vpack.c.bf16 %v526_v10, %v524_v9  ;;  %v150_v9 = vld [vmem:[%s6242_s0 + $0x3e0] sm:$0xff]  ;;  %v145_v10 = vld [vmem:[%s6242_s0 + $0x3b8] sm:$0xff] }
  0x90   :  { %730 = vmatmul.mubr.f32.gmra.mrb[38].mxu1 %v197_v17  ;;  %v523_v17 = vld [vmem:[%s6241_s1 + $0x880] sm:$0xff] }
  0x91   :  { %1160 = vmatmul.mubr.f32.gmra.mrb[38].mxu0 %v201_v18  ;;  %735 = vmatprep.mubr.f32.mxu1 %v207_v19  ;;  %v525_v18 = vld [vmem:[%s6241_s1 + $0x890] sm:$0xff]  ;;  %v528_v19 = vld [vmem:[%s6241_s1 + $0x8a8] sm:$0xff] }
  0x92   :  { %1165 = vmatprep.mubr.f32.mxu0 %v211_v20  ;;  %v530_v20 = vld [vmem:[%s6241_s1 + $0x8b8] sm:$0xff] }
  0x94   :  { %736 = vmatmul.mubr.f32.gmra.mrb[40].mxu1 %v206_v21  ;;  %v64_v21 = vld [vmem:[%s6242_s0 + $0x130] sm:$0xff] }
  0x95   :  { %1166 = vmatmul.mubr.f32.gmra.mrb[40].mxu0 %v210_v22  ;;  %741 = vmatprep.mubr.f32.mxu1 %v216_v23  ;;  %v68_v22 = vld [vmem:[%s6242_s0 + $0x150] sm:$0xff]  ;;  %v74_v23 = vld [vmem:[%s6242_s0 + $0x180] sm:$0xff] }
  0x96   :  { %1171 = vmatprep.mubr.f32.mxu0 %v220_v24  ;;  %v2844_v24 = vpack.c.bf16 %v525_v18, %v523_v17  ;;  %v168_v17 = vld [vmem:[%s6242_s0 + $0x470] sm:$0xff]  ;;  %v163_v18 = vld [vmem:[%s6242_s0 + $0x448] sm:$0xff] }
  0x98   :  { %742 = vmatmul.mubr.f32.gmra.mrb[42].mxu1 %v215_v25  ;;  %v78_v25 = vld [vmem:[%s6242_s0 + $0x1a0] sm:$0xff] }
  0x99   :  { %1172 = vmatmul.mubr.f32.gmra.mrb[42].mxu0 %v219_v26  ;;  %747 = vmatprep.mubr.f32.mxu1 %v225_v27  ;;  %v2846_v26 = vpack.c.bf16 %v530_v20, %v528_v19  ;;  %v527_v27 = vld [vmem:[%s6241_s1 + $0x8a0] sm:$0xff]  ;;  %v167_v19 = vld [vmem:[%s6242_s0 + $0x468] sm:$0xff]  ;;  %v173_v20 = vld [vmem:[%s6242_s0 + $0x498] sm:$0xff] }
  0x9a   :  { %1177 = vmatprep.mubr.f32.mxu0 %v229_v28  ;;  %v529_v28 = vld [vmem:[%s6241_s1 + $0x8b0] sm:$0xff] }
  0x9c   :  { %748 = vmatmul.mubr.f32.gmra.mrb[44].mxu1 %v224_v29  ;;  %v532_v29 = vld [vmem:[%s6241_s1 + $0x8c8] sm:$0xff] }
  0x9d   :  { %1178 = vmatmul.mubr.f32.gmra.mrb[44].mxu0 %v228_v30  ;;  %753 = vmatprep.mubr.f32.mxu1 %v234_v31  ;;  %v534_v30 = vld [vmem:[%s6241_s1 + $0x8d8] sm:$0xff] }
  0x9e   :  { %1183 = vmatprep.mubr.f32.mxu0 %v238_v32  ;;  %v73_v31 = vld [vmem:[%s6242_s0 + $0x178] sm:$0xff] }
  0x9f   :  { %v77_v32 = vld [vmem:[%s6242_s0 + $0x198] sm:$0xff] }
  0xa0   :  { %754 = vmatmul.mubr.f32.gmra.mrb[46].mxu1 %v233_v33  ;;  %v83_v33 = vld [vmem:[%s6242_s0 + $0x1c8] sm:$0xff] }
  0xa1   :  { %1184 = vmatmul.mubr.f32.gmra.mrb[46].mxu0 %v237_v34  ;;  %759 = vmatprep.mubr.f32.mxu1 %v243_v35  ;;  %v2848_v34 = vpack.c.bf16 %v529_v28, %v527_v27  ;;  %v87_v35 = vld [vmem:[%s6242_s0 + $0x1e8] sm:$0xff]  ;;  %v185_v27 = vld [vmem:[%s6242_s0 + $0x4f8] sm:$0xff] }
  0xa2   :  { %1189 = vmatprep.mubr.f32.mxu0 %v247_v36  ;;  %v2850_v36 = vpack.c.bf16 %v534_v30, %v532_v29  ;;  %v191_v28 = vld [vmem:[%s6242_s0 + $0x528] sm:$0xff]  ;;  %v190_v30 = vld [vmem:[%s6242_s0 + $0x520] sm:$0xff] }
  0xa3   :  { %v195_v29 = vld [vmem:[%s6242_s0 + $0x548] sm:$0xff] }
  0xa4   :  { %760 = vmatmul.mubr.f32.gmra.mrb[48].mxu1 %v242_v37  ;;  %v531_v37 = vld [vmem:[%s6241_s1 + $0x8c0] sm:$0xff] }
  0xa5   :  { %1190 = vmatmul.mubr.f32.gmra.mrb[48].mxu0 %v246_v38  ;;  %830 = vmatprep.mubr.f32.mxu1 %v29_v39  ;;  %v533_v38 = vld [vmem:[%s6241_s1 + $0x8d0] sm:$0xff]  ;;  %v536_v39 = vld [vmem:[%s6241_s1 + $0x8e8] sm:$0xff] }
  0xa6   :  { %1260 = vmatprep.mubr.f32.mxu0 %v33_v40  ;;  %v538_v40 = vld [vmem:[%s6241_s1 + $0x8f8] sm:$0xff]  ;;  %v2852_v44 = vpack.c.bf16 %v533_v38, %v531_v37  ;;  %v208_v38 = vld [vmem:[%s6242_s0 + $0x5b0] sm:$0xff] }
  0xa7   :  { %v213_v37 = vld [vmem:[%s6242_s0 + $0x5d8] sm:$0xff] }
  0xa8   :  { %831 = vmatmul.mubr.f32.vlgmr.msra.gmra.mrb[0].mxu1 %v28_v45  ;;  %v96_v45 = vld [vmem:[%s6242_s0 + $0x230] sm:$0xff] }
  0xa9   :  { %1261 = vmatmul.mubr.f32.vlgmr.msra.gmra.mrb[0].mxu0 %v32_v46  ;;  %836 = vmatprep.mubr.f32.mxu1 %v38_v48  ;;  %v2854_v46 = vpack.c.bf16 %v538_v40, %v536_v39  ;;  %v537_v48 = vld [vmem:[%s6241_s1 + $0x8f0] sm:$0xff]  ;;  %v218_v40 = vld [vmem:[%s6242_s0 + $0x600] sm:$0xff] }
  0xaa   :  { %2829 = vmatpush1.bf16.msra.mxu0 %v2828_v47  ;;  %1266 = vmatprep.mubr.f32.mxu0 %v42_v49  ;;  %v535_v47 = vld [vmem:[%s6241_s1 + $0x8e0] sm:$0xff]  ;;  %v91_v49 = vld [vmem:[%s6242_s0 + $0x208] sm:$0xff]  ;;  %v212_v39 = vld [vmem:[%s6242_s0 + $0x5d0] sm:$0xff] }
  0xab   :  { %2831 = vmatprep.subr.bf16.mxu0 %v2830_v50  ;;  %v95_v50 = vld [vmem:[%s6242_s0 + $0x228] sm:$0xff]  ;;  %v2856_v52 = vpack.c.bf16 %v537_v48, %v535_v47  ;;  %v230_v47 = vld [vmem:[%s6242_s0 + $0x660] sm:$0xff]  ;;  %v236_v48 = vld [vmem:[%s6242_s0 + $0x690] sm:$0xff] }
  0xac   :  { %837 = vmatmul.mubr.f32.gmra.mrb[2].mxu1 %v37_v55  ;;  %v104_v55 = vld [vmem:[%s6242_s0 + $0x270] sm:$0xff] }
  0xad   :  { %1267 = vmatmul.mubr.f32.gmra.mrb[2].mxu0 %v41_v56  ;;  %842 = vmatprep.mubr.f32.mxu1 %v47_v57  ;;  %v110_v56 = vld [vmem:[%s6242_s0 + $0x2a0] sm:$0xff] }
  0xae   :  { %1272 = vmatprep.mubr.f32.mxu0 %v51_v59  ;;  %2833 = vmatpush1.bf16.msra.mxu0 %v2832_v58  ;;  %v114_v57 = vld [vmem:[%s6242_s0 + $0x2c0] sm:$0xff]  ;;  %v109_v58 = vld [vmem:[%s6242_s0 + $0x298] sm:$0xff] }
  0xaf   :  { %2835 = vmatprep.subr.bf16.mxu0 %v2834_v60  ;;  %v113_v59 = vld [vmem:[%s6242_s0 + $0x2b8] sm:$0xff]  ;;  %v119_v60 = vld [vmem:[%s6242_s0 + $0x2e8] sm:$0xff] }
  0xb0   :  { %843 = vmatmul.mubr.f32.gmra.mrb[4].mxu1 %v46_v1  ;;  %v132_v1 = vld [vmem:[%s6242_s0 + $0x350] sm:$0xff] }
  0xb1   :  { %1273 = vmatmul.mubr.f32.gmra.mrb[4].mxu0 %v50_v2  ;;  %848 = vmatprep.mubr.f32.mxu1 %v56_v3  ;;  %v127_v2 = vld [vmem:[%s6242_s0 + $0x328] sm:$0xff] }
  0xb2   :  { %1278 = vmatprep.mubr.f32.mxu0 %v60_v5  ;;  %2837 = vmatpush1.bf16.msra.mxu0 %v2836_v4  ;;  %v131_v3 = vld [vmem:[%s6242_s0 + $0x348] sm:$0xff]  ;;  %v137_v4 = vld [vmem:[%s6242_s0 + $0x378] sm:$0xff] }
  0xb3   :  { %2839 = vmatprep.subr.bf16.mxu0 %v2838_v6  ;;  %v141_v5 = vld [vmem:[%s6242_s0 + $0x398] sm:$0xff]  ;;  %v136_v6 = vld [vmem:[%s6242_s0 + $0x370] sm:$0xff] }
  0xb4   :  { %849 = vmatmul.mubr.f32.gmra.mrb[6].mxu1 %v55_v11  ;;  %v149_v11 = vld [vmem:[%s6242_s0 + $0x3d8] sm:$0xff] }
  0xb5   :  { %1279 = vmatmul.mubr.f32.gmra.mrb[6].mxu0 %v59_v12  ;;  %854 = vmatprep.mubr.f32.mxu1 %v65_v13  ;;  %v155_v12 = vld [vmem:[%s6242_s0 + $0x408] sm:$0xff] }
  0xb6   :  { %1284 = vmatprep.mubr.f32.mxu0 %v69_v15  ;;  %2841 = vmatpush1.bf16.msra.mxu0 %v2840_v14  ;;  %v159_v13 = vld [vmem:[%s6242_s0 + $0x428] sm:$0xff]  ;;  %v154_v14 = vld [vmem:[%s6242_s0 + $0x400] sm:$0xff] }
  0xb7   :  { %2843 = vmatprep.subr.bf16.mxu0 %v2842_v16  ;;  %v158_v15 = vld [vmem:[%s6242_s0 + $0x420] sm:$0xff]  ;;  %v164_v16 = vld [vmem:[%s6242_s0 + $0x450] sm:$0xff] }
  0xb8   :  { %855 = vmatmul.mubr.f32.gmra.mrb[8].mxu1 %v64_v21  ;;  %v177_v21 = vld [vmem:[%s6242_s0 + $0x4b8] sm:$0xff] }
  0xb9   :  { %1285 = vmatmul.mubr.f32.gmra.mrb[8].mxu0 %v68_v22  ;;  %860 = vmatprep.mubr.f32.mxu1 %v74_v23  ;;  %v172_v22 = vld [vmem:[%s6242_s0 + $0x490] sm:$0xff] }
  0xba   :  { %1290 = vmatprep.mubr.f32.mxu0 %v78_v25  ;;  %2845 = vmatpush1.bf16.msra.mxu0 %v2844_v24  ;;  %v176_v23 = vld [vmem:[%s6242_s0 + $0x4b0] sm:$0xff]  ;;  %v182_v24 = vld [vmem:[%s6242_s0 + $0x4e0] sm:$0xff] }
  0xbb   :  { %2847 = vmatprep.subr.bf16.mxu0 %v2846_v26  ;;  %v186_v25 = vld [vmem:[%s6242_s0 + $0x500] sm:$0xff]  ;;  %v181_v26 = vld [vmem:[%s6242_s0 + $0x4d8] sm:$0xff] }
  0xbc   :  { %861 = vmatmul.mubr.f32.gmra.mrb[10].mxu1 %v73_v31  ;;  %v194_v31 = vld [vmem:[%s6242_s0 + $0x540] sm:$0xff] }
  0xbd   :  { %1291 = vmatmul.mubr.f32.gmra.mrb[10].mxu0 %v77_v32  ;;  %866 = vmatprep.mubr.f32.mxu1 %v83_v33  ;;  %v200_v32 = vld [vmem:[%s6242_s0 + $0x570] sm:$0xff] }
  0xbe   :  { %1296 = vmatprep.mubr.f32.mxu0 %v87_v35  ;;  %2849 = vmatpush1.bf16.msra.mxu0 %v2848_v34  ;;  %v204_v33 = vld [vmem:[%s6242_s0 + $0x590] sm:$0xff]  ;;  %v199_v34 = vld [vmem:[%s6242_s0 + $0x568] sm:$0xff] }
  0xbf   :  { %2851 = vmatprep.subr.bf16.mxu0 %v2850_v36  ;;  %v203_v35 = vld [vmem:[%s6242_s0 + $0x588] sm:$0xff]  ;;  %v209_v36 = vld [vmem:[%s6242_s0 + $0x5b8] sm:$0xff] }
  0xc0   :  { %867 = vmatmul.mubr.f32.gmra.mrb[12].mxu1 %v82_v41  ;;  %v222_v41 = vld [vmem:[%s6242_s0 + $0x620] sm:$0xff] }
  0xc1   :  { %1297 = vmatmul.mubr.f32.gmra.mrb[12].mxu0 %v86_v42  ;;  %872 = vmatprep.mubr.f32.mxu1 %v92_v43  ;;  %v217_v42 = vld [vmem:[%s6242_s0 + $0x5f8] sm:$0xff] }
  0xc2   :  { %1302 = vmatprep.mubr.f32.mxu0 %v96_v45  ;;  %2853 = vmatpush1.bf16.msra.mxu0 %v2852_v44  ;;  %v221_v43 = vld [vmem:[%s6242_s0 + $0x618] sm:$0xff]  ;;  %v227_v44 = vld [vmem:[%s6242_s0 + $0x648] sm:$0xff] }
  0xc3   :  { %2855 = vmatprep.subr.bf16.mxu0 %v2854_v46  ;;  %v231_v45 = vld [vmem:[%s6242_s0 + $0x668] sm:$0xff]  ;;  %v226_v46 = vld [vmem:[%s6242_s0 + $0x640] sm:$0xff] }
  0xc4   :  { %873 = vmatmul.mubr.f32.gmra.mrb[14].mxu1 %v91_v49  ;;  %v240_v49 = vld [vmem:[%s6242_s0 + $0x6b0] sm:$0xff] }
  0xc5   :  { %1303 = vmatmul.mubr.f32.gmra.mrb[14].mxu0 %v95_v50  ;;  %878 = vmatprep.mubr.f32.mxu1 %v101_v51  ;;  %v235_v50 = vld [vmem:[%s6242_s0 + $0x688] sm:$0xff] }
  0xc6   :  { %1308 = vmatprep.mubr.f32.mxu0 %v105_v53  ;;  %2857 = vmatpush1.bf16.msra.mxu0 %v2856_v52  ;;  %v239_v51 = vld [vmem:[%s6242_s0 + $0x6a8] sm:$0xff]  ;;  %v245_v52 = vld [vmem:[%s6242_s0 + $0x6d8] sm:$0xf] }
  0xc7   :  { %v249_v53 = vld [vmem:[%s6242_s0 + $0x6f8] sm:$0xf] }
  0xc8   :  { %879 = vmatmul.mubr.f32.gmra.mrb[16].mxu1 %v100_v54  ;;  %v244_v54 = vld [vmem:[%s6242_s0 + $0x6d0] sm:$0xf] }
  0xc9   :  { %1309 = vmatmul.mubr.f32.gmra.mrb[16].mxu0 %v104_v55  ;;  %884 = vmatprep.mubr.f32.mxu1 %v110_v56  ;;  %v248_v55 = vld [vmem:[%s6242_s0 + $0x6f0] sm:$0xf]  ;;  %v6249_v56 = vmov 0.0  }
  0xca   :  { %1314 = vmatprep.mubr.f32.mxu0 %v114_v57  ;;  %v34_v57 = vld [vmem:[%s6242_s0 + $0x40] sm:$0xff] }
  0xcc   :  { %885 = vmatmul.mubr.f32.gmra.mrb[18].mxu1 %v109_v58  ;;  %v43_v58 = vld [vmem:[%s6242_s0 + $0x88] sm:$0xff] }
  0xcd   :  { %1315 = vmatmul.mubr.f32.gmra.mrb[18].mxu0 %v113_v59  ;;  %890 = vmatprep.mubr.f32.mxu1 %v119_v60  ;;  %v52_v59 = vld [vmem:[%s6242_s0 + $0xd0] sm:$0xff]  ;;  %v61_v60 = vld [vmem:[%s6242_s0 + $0x118] sm:$0xff] }
  0xce   :  { %1320 = vmatprep.mubr.f32.mxu0 %v123_v61  ;;  %v70_v61 = vld [vmem:[%s6242_s0 + $0x160] sm:$0xff] }
  0xd0   :  { %891 = vmatmul.mubr.f32.gmra.mrb[20].mxu1 %v118_v62  ;;  %v79_v62 = vld [vmem:[%s6242_s0 + $0x1a8] sm:$0xff] }
  0xd1   :  { %1321 = vmatmul.mubr.f32.gmra.mrb[20].mxu0 %v122_v63  ;;  %896 = vmatprep.mubr.f32.mxu1 %v128_v0  ;;  %v88_v63 = vld [vmem:[%s6242_s0 + $0x1f0] sm:$0xff]  ;;  %v97_v0 = vld [vmem:[%s6242_s0 + $0x238] sm:$0xff] }
  0xd2   :  { %1326 = vmatprep.mubr.f32.mxu0 %v132_v1  ;;  %v106_v1 = vld [vmem:[%s6242_s0 + $0x280] sm:$0xff] }
  0xd4   :  { %897 = vmatmul.mubr.f32.gmra.mrb[22].mxu1 %v127_v2  ;;  %v115_v2 = vld [vmem:[%s6242_s0 + $0x2c8] sm:$0xff] }
  0xd5   :  { %1327 = vmatmul.mubr.f32.gmra.mrb[22].mxu0 %v131_v3  ;;  %902 = vmatprep.mubr.f32.mxu1 %v137_v4  ;;  %v124_v3 = vld [vmem:[%s6242_s0 + $0x310] sm:$0xff]  ;;  %v133_v4 = vld [vmem:[%s6242_s0 + $0x358] sm:$0xff] }
  0xd6   :  { %1332 = vmatprep.mubr.f32.mxu0 %v141_v5  ;;  %v142_v5 = vld [vmem:[%s6242_s0 + $0x3a0] sm:$0xff] }
  0xd8   :  { %903 = vmatmul.mubr.f32.gmra.mrb[24].mxu1 %v136_v6  ;;  %v151_v6 = vld [vmem:[%s6242_s0 + $0x3e8] sm:$0xff] }
  0xd9   :  { %1333 = vmatmul.mubr.f32.gmra.mrb[24].mxu0 %v140_v7  ;;  %908 = vmatprep.mubr.f32.mxu1 %v146_v8  ;;  %v160_v7 = vld [vmem:[%s6242_s0 + $0x430] sm:$0xff]  ;;  %v169_v8 = vld [vmem:[%s6242_s0 + $0x478] sm:$0xff] }
  0xda   :  { %1338 = vmatprep.mubr.f32.mxu0 %v150_v9  ;;  %v178_v9 = vld [vmem:[%s6242_s0 + $0x4c0] sm:$0xff] }
  0xdc   :  { %909 = vmatmul.mubr.f32.gmra.mrb[26].mxu1 %v145_v10  ;;  %v187_v10 = vld [vmem:[%s6242_s0 + $0x508] sm:$0xff] }
  0xdd   :  { %1339 = vmatmul.mubr.f32.gmra.mrb[26].mxu0 %v149_v11  ;;  %914 = vmatprep.mubr.f32.mxu1 %v155_v12  ;;  %v196_v11 = vld [vmem:[%s6242_s0 + $0x550] sm:$0xff]  ;;  %v205_v12 = vld [vmem:[%s6242_s0 + $0x598] sm:$0xff] }
  0xde   :  { %1344 = vmatprep.mubr.f32.mxu0 %v159_v13  ;;  %v214_v13 = vld [vmem:[%s6242_s0 + $0x5e0] sm:$0xff] }
  0xe0   :  { %915 = vmatmul.mubr.f32.gmra.mrb[28].mxu1 %v154_v14  ;;  %v223_v14 = vld [vmem:[%s6242_s0 + $0x628] sm:$0xff] }
  0xe1   :  { %1345 = vmatmul.mubr.f32.gmra.mrb[28].mxu0 %v158_v15  ;;  %920 = vmatprep.mubr.f32.mxu1 %v164_v16  ;;  %v232_v15 = vld [vmem:[%s6242_s0 + $0x670] sm:$0xff]  ;;  %v241_v16 = vld [vmem:[%s6242_s0 + $0x6b8] sm:$0xff] }
  0xe2   :  { %1350 = vmatprep.mubr.f32.mxu0 %v168_v17  ;;  %v250_v17 = vld [vmem:[%s6242_s0 + $0x700] sm:$0xf] }
  0xe4   :  { %921 = vmatmul.mubr.f32.gmra.mrb[30].mxu1 %v163_v18  ;;  %v1692_v18 = vld [vmem:[%s6243_s5 + $0x80] sm:$0xff] }
  0xe5   :  { %1351 = vmatmul.mubr.f32.gmra.mrb[30].mxu0 %v167_v19  ;;  %926 = vmatprep.mubr.f32.mxu1 %v173_v20  ;;  %v1693_v19 = vld [vmem:[%s6243_s5 + $0x88] sm:$0xff]  ;;  %v1676_v20 = vld [vmem:[%s6243_s5] sm:$0xff] }
  0xe6   :  { %1356 = vmatprep.mubr.f32.mxu0 %v177_v21  ;;  %v4837_v21 = vpack.c.bf16 %v1693_v19, %v1692_v18 }
  0xe8   :  { %927 = vmatmul.mubr.f32.gmra.mrb[32].mxu1 %v172_v22  ;;  %6305 = vst [vmem:[#allocation2_spill] sm:$0xff] %v4837_v21  ;;  %v1677_v22 = vld [vmem:[%s6243_s5 + $0x8] sm:$0xff]  ;;  %2859 = vmatprep.subr.bf16.mxu1 %v4837_v21 }
  0xe9   :  { %1357 = vmatmul.mubr.f32.gmra.mrb[32].mxu0 %v176_v23  ;;  %932 = vmatprep.mubr.f32.mxu1 %v182_v24  ;;  %v4842_v23 = vpack.c.bf16 %v1677_v22, %v1676_v20  ;;  %v1687_v20 = vld [vmem:[%s6243_s5 + $0x58] sm:$0xff] }
  0xea   :  { %1362 = vmatprep.mubr.f32.mxu0 %v186_v25 }
  0xeb   :  { %6306 = vst [vmem:[#allocation3_spill] sm:$0xff] %v4842_v23  ;;  %2861 = vmatpush3.bf16.msra.mxu1 %v4842_v23 }
  0xec   :  { %933 = vmatmul.mubr.f32.gmra.mrb[34].mxu1 %v181_v26 }
  0xed   :  { %1363 = vmatmul.mubr.f32.gmra.mrb[34].mxu0 %v185_v27  ;;  %938 = vmatprep.mubr.f32.mxu1 %v191_v28  ;;  %v1694_v28 = vld [vmem:[%s6243_s5 + $0x90] sm:$0xff] }
  0xee   :  { %1368 = vmatprep.mubr.f32.mxu0 %v195_v29  ;;  %v1695_v29 = vld [vmem:[%s6243_s5 + $0x98] sm:$0xff] }
  0xf0   :  { %939 = vmatmul.mubr.f32.gmra.mrb[36].mxu1 %v190_v30 }
  0xf1   :  { %1369 = vmatmul.mubr.f32.gmra.mrb[36].mxu0 %v194_v31  ;;  %944 = vmatprep.mubr.f32.mxu1 %v200_v32  ;;  %v4862_v31 = vpack.c.bf16 %v1695_v29, %v1694_v28 }
  0xf2   :  { %1374 = vmatprep.mubr.f32.mxu0 %v204_v33  ;;  %v1678_v33 = vld [vmem:[%s6243_s5 + $0x10] sm:$0xff] }
  0xf3   :  { %6307 = vst [vmem:[#allocation4_spill] sm:$0xff] %v4862_v31  ;;  %2863 = vmatprep.subr.bf16.mxu1 %v4862_v31 }
  0xf4   :  { %945 = vmatmul.mubr.f32.gmra.mrb[38].mxu1 %v199_v34  ;;  %v1679_v34 = vld [vmem:[%s6243_s5 + $0x18] sm:$0xff] }
  0xf5   :  { %1375 = vmatmul.mubr.f32.gmra.mrb[38].mxu0 %v203_v35  ;;  %950 = vmatprep.mubr.f32.mxu1 %v209_v36  ;;  %v4873_v35 = vpack.c.bf16 %v1679_v34, %v1678_v33 }
  0xf6   :  { %1380 = vmatprep.mubr.f32.mxu0 %v213_v37 }
  0xf7   :  { %6308 = vst [vmem:[#allocation5_spill] sm:$0xff] %v4873_v35  ;;  %2865 = vmatpush3.bf16.msra.mxu1 %v4873_v35 }
  0xf8   :  { %951 = vmatmul.mubr.f32.gmra.mrb[40].mxu1 %v208_v38 }
  0xf9   :  { %1381 = vmatmul.mubr.f32.gmra.mrb[40].mxu0 %v212_v39  ;;  %956 = vmatprep.mubr.f32.mxu1 %v218_v40  ;;  %v1696_v40 = vld [vmem:[%s6243_s5 + $0xa0] sm:$0xff] }
  0xfa   :  { %1386 = vmatprep.mubr.f32.mxu0 %v222_v41  ;;  %v1697_v41 = vld [vmem:[%s6243_s5 + $0xa8] sm:$0xff] }
  0xfc   :  { %957 = vmatmul.mubr.f32.gmra.mrb[42].mxu1 %v217_v42 }
  0xfd   :  { %1387 = vmatmul.mubr.f32.gmra.mrb[42].mxu0 %v221_v43  ;;  %962 = vmatprep.mubr.f32.mxu1 %v227_v44  ;;  %v4892_v43 = vpack.c.bf16 %v1697_v41, %v1696_v40  ;;  %v1704_v41 = vld [vmem:[%s6243_s5 + $0xe0] sm:$0xff] }
  0xfe   :  { %1392 = vmatprep.mubr.f32.mxu0 %v231_v45  ;;  %v1680_v45 = vld [vmem:[%s6243_s5 + $0x20] sm:$0xff] }
  0xff   :  { %6309 = vst [vmem:[#allocation6_spill] sm:$0xff] %v4892_v43  ;;  %2867 = vmatprep.subr.bf16.mxu1 %v4892_v43 }
 0x100   :  { %963 = vmatmul.mubr.f32.gmra.mrb[44].mxu1 %v226_v46  ;;  %v1681_v46 = vld [vmem:[%s6243_s5 + $0x28] sm:$0xff] }
 0x101   :  { %1393 = vmatmul.mubr.f32.gmra.mrb[44].mxu0 %v230_v47  ;;  %968 = vmatprep.mubr.f32.mxu1 %v236_v48  ;;  %v4903_v47 = vpack.c.bf16 %v1681_v46, %v1680_v45  ;;  %v1705_v45 = vld [vmem:[%s6243_s5 + $0xe8] sm:$0xff]  ;;  %v1688_v46 = vld [vmem:[%s6243_s5 + $0x60] sm:$0xff] }
 0x102   :  { %1398 = vmatprep.mubr.f32.mxu0 %v240_v49 }
 0x103   :  { %6310 = vst [vmem:[#allocation7_spill] sm:$0xff] %v4903_v47  ;;  %2869 = vmatpush3.bf16.msra.mxu1 %v4903_v47 }
 0x104   :  { %969 = vmatmul.mubr.f32.gmra.mrb[46].mxu1 %v235_v50 }
 0x105   :  { %1399 = vmatmul.mubr.f32.gmra.mrb[46].mxu0 %v239_v51  ;;  %974 = vmatprep.mubr.f32.mxu1 %v245_v52 }
 0x106   :  { %1404 = vmatprep.mubr.f32.mxu0 %v249_v53 }
 0x108   :  { %975 = vmatmul.mubr.f32.gmra.mrb[48].mxu1 %v244_v54  ;;  %v1698_v54 = vld [vmem:[%s6243_s5 + $0xb0] sm:$0xff] }
 0x109   :  { %1405 = vmatmul.mubr.f32.gmra.mrb[48].mxu0 %v248_v55  ;;  %v1699_v55 = vld [vmem:[%s6243_s5 + $0xb8] sm:$0xff] }
 0x10a   :  { %1475 = vmatprep.mubr.f32.mxu0 %v6249_v56 }
 0x10d   :  { %1476 = vmatmul.mubr.f32.vlgmr.msra.gmra.mrb[0].mxu0 %v34_v57  ;;  %v4924_v57 = vpack.c.bf16 %v1699_v55, %v1698_v54  ;;  %v5019_v55 = vpack.c.bf16 %v1705_v45, %v1704_v41  ;;  %v1707_v41 = vld [vmem:[%s6243_s5 + $0xf8] sm:$0xff] }
 0x10e   :  { %1481 = vmatprep.mubr.f32.mxu0 %v6249_v56 }
 0x10f   :  { %6311 = vst [vmem:[#allocation8_spill] sm:$0xff] %v4924_v57  ;;  %2871 = vmatprep.subr.bf16.mxu1 %v4924_v57  ;;  %6317 = vst [vmem:[#allocation14_spill] sm:$0xff] %v5019_v55 }
 0x111   :  { %1482 = vmatmul.mubr.f32.gmra.mrb[2].mxu0 %v43_v58  ;;  %v1682_v58 = vld [vmem:[%s6243_s5 + $0x30] sm:$0xff] }
 0x112   :  { %1487 = vmatprep.mubr.f32.mxu0 %v6249_v56 }
 0x115   :  { %1488 = vmatmul.mubr.f32.gmra.mrb[4].mxu0 %v52_v59  ;;  %v1683_v59 = vld [vmem:[%s6243_s5 + $0x38] sm:$0xff] }
 0x116   :  { %1493 = vmatprep.mubr.f32.mxu0 %v6249_v56 }
 0x119   :  { %1494 = vmatmul.mubr.f32.gmra.mrb[6].mxu0 %v61_v60 }
 0x11a   :  { %1499 = vmatprep.mubr.f32.mxu0 %v6249_v56 }
 0x11d   :  { %1500 = vmatmul.mubr.f32.gmra.mrb[8].mxu0 %v70_v61  ;;  %v4934_v61 = vpack.c.bf16 %v1683_v59, %v1682_v58  ;;  %v1689_v58 = vld [vmem:[%s6243_s5 + $0x68] sm:$0xff] }
 0x11e   :  { %1505 = vmatprep.mubr.f32.mxu0 %v6249_v56 }
 0x11f   :  { %6312 = vst [vmem:[#allocation9_spill] sm:$0xff] %v4934_v61  ;;  %2873 = vmatpush3.bf16.msra.mxu1 %v4934_v61 }
 0x121   :  { %1506 = vmatmul.mubr.f32.gmra.mrb[10].mxu0 %v79_v62 }
 0x122   :  { %1511 = vmatprep.mubr.f32.mxu0 %v6249_v56 }
 0x125   :  { %1512 = vmatmul.mubr.f32.gmra.mrb[12].mxu0 %v88_v63 }
 0x126   :  { %1517 = vmatprep.mubr.f32.mxu0 %v6249_v56 }
 0x129   :  { %1518 = vmatmul.mubr.f32.gmra.mrb[14].mxu0 %v97_v0 }
 0x12a   :  { %1523 = vmatprep.mubr.f32.mxu0 %v6249_v56 }
 0x12d   :  { %1524 = vmatmul.mubr.f32.gmra.mrb[16].mxu0 %v106_v1 }
 0x12e   :  { %1529 = vmatprep.mubr.f32.mxu0 %v6249_v56 }
 0x131   :  { %1530 = vmatmul.mubr.f32.gmra.mrb[18].mxu0 %v115_v2 }
 0x132   :  { %1535 = vmatprep.mubr.f32.mxu0 %v6249_v56 }
 0x135   :  { %1536 = vmatmul.mubr.f32.gmra.mrb[20].mxu0 %v124_v3  ;;  %v1700_v3 = vld [vmem:[%s6243_s5 + $0xc0] sm:$0xff] }
 0x136   :  { %1541 = vmatprep.mubr.f32.mxu0 %v6249_v56 }
 0x139   :  { %1542 = vmatmul.mubr.f32.gmra.mrb[22].mxu0 %v133_v4  ;;  %v1701_v4 = vld [vmem:[%s6243_s5 + $0xc8] sm:$0xff] }
 0x13a   :  { %1547 = vmatprep.mubr.f32.mxu0 %v6249_v56 }
 0x13d   :  { %1548 = vmatmul.mubr.f32.gmra.mrb[24].mxu0 %v142_v5  ;;  %v4954_v5 = vpack.c.bf16 %v1701_v4, %v1700_v3  ;;  %v5026_v3 = vpack.c.bf16 %v1689_v58, %v1688_v46  ;;  %v1690_v58 = vld [vmem:[%s6243_s5 + $0x70] sm:$0xff] }
 0x13e   :  { %1553 = vmatprep.mubr.f32.mxu0 %v6249_v56 }
 0x13f   :  { %6313 = vst [vmem:[#allocation10_spill] sm:$0xff] %v4954_v5  ;;  %2875 = vmatprep.subr.bf16.mxu1 %v4954_v5  ;;  %6318 = vst [vmem:[#allocation15_spill] sm:$0xff] %v5026_v3 }
 0x141   :  { %1554 = vmatmul.mubr.f32.gmra.mrb[26].mxu0 %v151_v6  ;;  %v1684_v6 = vld [vmem:[%s6243_s5 + $0x40] sm:$0xff] }
 0x142   :  { %1559 = vmatprep.mubr.f32.mxu0 %v6249_v56 }
 0x145   :  { %1560 = vmatmul.mubr.f32.gmra.mrb[28].mxu0 %v160_v7  ;;  %v1685_v7 = vld [vmem:[%s6243_s5 + $0x48] sm:$0xff] }
 0x146   :  { %1565 = vmatprep.mubr.f32.mxu0 %v6249_v56 }
 0x149   :  { %1566 = vmatmul.mubr.f32.gmra.mrb[30].mxu0 %v169_v8 }
 0x14a   :  { %1571 = vmatprep.mubr.f32.mxu0 %v6249_v56 }
 0x14d   :  { %1572 = vmatmul.mubr.f32.gmra.mrb[32].mxu0 %v178_v9  ;;  %v4964_v9 = vpack.c.bf16 %v1685_v7, %v1684_v6 }
 0x14e   :  { %1577 = vmatprep.mubr.f32.mxu0 %v6249_v56 }
 0x14f   :  { %6314 = vst [vmem:[#allocation11_spill] sm:$0xff] %v4964_v9  ;;  %2877 = vmatpush3.bf16.msra.mxu1 %v4964_v9  ;;  %v1709_v9 = vld [vmem:[%s6245_s6 + $0x8] sm:$0xff] }
 0x151   :  { %1578 = vmatmul.mubr.f32.gmra.mrb[34].mxu0 %v187_v10 }
 0x152   :  { %1583 = vmatprep.mubr.f32.mxu0 %v6249_v56 }
 0x155   :  { %1584 = vmatmul.mubr.f32.gmra.mrb[36].mxu0 %v196_v11 }
 0x156   :  { %1589 = vmatprep.mubr.f32.mxu0 %v6249_v56 }
 0x159   :  { %1590 = vmatmul.mubr.f32.gmra.mrb[38].mxu0 %v205_v12 }
 0x15a   :  { %1595 = vmatprep.mubr.f32.mxu0 %v6249_v56 }
 0x15d   :  { %1596 = vmatmul.mubr.f32.gmra.mrb[40].mxu0 %v214_v13 }
 0x15e   :  { %1601 = vmatprep.mubr.f32.mxu0 %v6249_v56 }
 0x161   :  { %1602 = vmatmul.mubr.f32.gmra.mrb[42].mxu0 %v223_v14 }
 0x162   :  { %1607 = vmatprep.mubr.f32.mxu0 %v6249_v56 }
 0x165   :  { %1608 = vmatmul.mubr.f32.gmra.mrb[44].mxu0 %v232_v15  ;;  %v1702_v15 = vld [vmem:[%s6243_s5 + $0xd0] sm:$0xff] }
 0x166   :  { %1613 = vmatprep.mubr.f32.mxu0 %v6249_v56 }
 0x169   :  { %1614 = vmatmul.mubr.f32.gmra.mrb[46].mxu0 %v241_v16  ;;  %v1703_v16 = vld [vmem:[%s6243_s5 + $0xd8] sm:$0xff] }
 0x16a   :  { %1619 = vmatprep.mubr.f32.mxu0 %v6249_v56  ;;  %v4989_v19 = vpack.c.bf16 %v1703_v16, %v1702_v15  ;;  %v541_v16 = vlaneseq  ;;  %v1691_v56 = vld [vmem:[%s6243_s5 + $0x78] sm:$0xff] }
 0x16c   :  { %6315 = vst [vmem:[#allocation12_spill] sm:$0xff] %v4989_v19  ;;  %2879 = vmatprep.subr.bf16.mxu1 %v4989_v19 }
 0x16d   :  { %1620 = vmatmul.mubr.f32.gmra.mrb[48].mxu0 %v250_v17  ;;  %v1686_v17 = vld [vmem:[%s6243_s5 + $0x50] sm:$0xff] }
 0x16e   :  { %v4996_v28 = vpack.c.bf16 %v1687_v20, %v1686_v17  ;;  %v1706_v20 = vld [vmem:[%s6243_s5 + $0xf0] sm:$0xff] }
 0x16f   :  { %v5048_v46 = vpack.c.bf16 %v1707_v41, %v1706_v20 }
 0x170   :  { %6316 = vst [vmem:[#allocation13_spill] sm:$0xff] %v4996_v28  ;;  %2881 = vmatpush3.bf16.msra.mxu1 %v4996_v28 }
 0x171   :  { %2883 = vmatprep.subr.bf16.mxu1 %v5019_v55  ;;  %6319 = vst [vmem:[#allocation16_spill] sm:$0xff] %v5048_v46  ;;  %v542_v55 = vshrl.u32 %v541_v16, 7  ;;  %v539_v16 = vld [vmem:[%s6244_s2] sm:$0x3] }
 0x173   :  { %v5064_v20 = vsub.s32 0, %v542_v55 }
 0x174   :  { %2885 = vmatpush3.bf16.msra.mxu1 %v5026_v3  ;;  %v5056_v3 = vpack.c.bf16 %v1691_v56, %v1690_v58  ;;  %v1711_v56 = vld [vmem:[%s6245_s6 + $0x18] sm:$0xff]  ;;  %v547_v58 = vsub.s32 1, %v542_v55 }
 0x175   :  { %2887 = vmatprep.subr.bf16.mxu1 %v5048_v46  ;;  %6321 = vst [vmem:[#allocation18_spill] sm:$0xff] %v5064_v20  ;;  %v5079_v46 = vpack.c.bf16 %v1711_v56, %v1709_v9  ;;  %v5083_v5 = vrot.slane %v539_v16, %v5064_v20 }
 0x176   :  { %6320 = vst [vmem:[#allocation17_spill] sm:$0xff] %v5056_v3  ;;  %v5087_v57 = vrot.slane %v539_v16, %v547_v58 }
 0x177   :  { %6322 = vst [vmem:[#allocation19_spill] sm:$0xff] %v5079_v46 }
 0x178   :  { %2889 = vmatpush3.bf16.msra.mxu1 %v5056_v3 }
 0x179   :  { %2891 = vmatprep.subr.bf16.mxu1 %v5079_v46 }
 0x17b   :  { %v4845_v24 = vpop.f32.mrb[0].mxu1 }
 0x17c   :  { %v4848_v25 = vpop.f32.mrb[1].mxu1  ;;  %v2970_v43 = vadd.f32 %v4845_v24, %v5083_v5 }
 0x17d   :  { %v2972_v55 = vadd.f32 %v4848_v25, %v5087_v57 }
 0x17f   :  { %v4850_v26 = vpop.f32.mrb[2].mxu1 }
 0x180   :  { %v4852_v27 = vpop.f32.mrb[3].mxu1  ;;  %v2974_v20 = vadd.f32 %v4850_v26, %v5083_v5 }
 0x181   :  { %v2976_v16 = vadd.f32 %v4852_v27, %v5087_v57 }
 0x183   :  { %v4860_v30 = vpop.f32.mrb[4].mxu1 }
 0x184   :  { %v4864_v32 = vpop.f32.mrb[5].mxu1  ;;  %v2978_v25 = vadd.f32 %v4860_v30, %v5083_v5 }
 0x187   :  { %v4875_v36 = vpop.f32.mrb[6].mxu1 }
 0x188   :  { %v4877_v37 = vpop.f32.mrb[7].mxu1  ;;  %v2982_v27 = vadd.f32 %v4875_v36, %v5083_v5 }
 0x18b   :  { %v4880_v38 = vpop.f32.mrb[8].mxu1 }
 0x18c   :  { %v4882_v39 = vpop.f32.mrb[9].mxu1 }
 0x18f   :  { %v4890_v42 = vpop.f32.mrb[10].mxu1 }
 0x190   :  { %v4894_v44 = vpop.f32.mrb[11].mxu1 }
 0x193   :  { %v4905_v48 = vpop.f32.mrb[12].mxu1 }
 0x194   :  { %v4907_v49 = vpop.f32.mrb[13].mxu1 }
 0x197   :  { %v4910_v50 = vpop.f32.mrb[14].mxu1 }
 0x198   :  { %v4912_v51 = vpop.f32.mrb[15].mxu1 }
 0x19b   :  { %v4914_v52 = vpop.f32.mrb[16].mxu1 }
 0x19c   :  { %v4916_v53 = vpop.f32.mrb[17].mxu1 }
 0x19f   :  { %v4932_v60 = vpop.f32.mrb[18].mxu1 }
 0x1a0   :  { %v4936_v62 = vpop.f32.mrb[19].mxu1 }
 0x1a3   :  { %v4940_v63 = vpop.f32.mrb[20].mxu1 }
 0x1a4   :  { %v4942_v0 = vpop.f32.mrb[21].mxu1 }
 0x1a7   :  { %v4944_v1 = vpop.f32.mrb[22].mxu1 }
 0x1a8   :  { %v4946_v2 = vpop.f32.mrb[23].mxu1 }
 0x1ab   :  { %v4962_v8 = vpop.f32.mrb[24].mxu1 }
 0x1ac   :  { %v4966_v10 = vpop.f32.mrb[25].mxu1 }
 0x1af   :  { %v4970_v11 = vpop.f32.mrb[26].mxu1 }
 0x1b0   :  { %v4972_v12 = vpop.f32.mrb[27].mxu1 }
 0x1b3   :  { %v4974_v13 = vpop.f32.mrb[28].mxu1 }
 0x1b4   :  { %v4976_v14 = vpop.f32.mrb[29].mxu1 }
 0x1b7   :  { %v4987_v18 = vpop.f32.mrb[30].mxu1 }
 0x1b8   :  { %v4994_v22 = vpop.f32.mrb[31].mxu1 }
 0x1bb   :  { %v5000_v29 = vpop.f32.mrb[32].mxu1 }
 0x1bc   :  { %v5002_v33 = vpop.f32.mrb[33].mxu1 }
 0x1bf   :  { %v5004_v34 = vpop.f32.mrb[34].mxu1 }
 0x1c0   :  { %v5006_v40 = vpop.f32.mrb[35].mxu1 }
 0x1c3   :  { %v5017_v54 = vpop.f32.mrb[36].mxu1 }
 0x1c4   :  { %v5024_v59 = vpop.f32.mrb[37].mxu1 }
 0x1c7   :  { %v5030_v4 = vpop.f32.mrb[38].mxu1 }
 0x1c8   :  { %v5032_v6 = vpop.f32.mrb[39].mxu1 }
 0x1cb   :  { %v5034_v7 = vpop.f32.mrb[40].mxu1 }
 0x1cc   :  { %v5036_v15 = vpop.f32.mrb[41].mxu1 }
 0x1cf   :  { %v5038_v17 = vpop.f32.mrb[42].mxu1 }
 0x1d0   :  { %v5046_v45 = vpop.f32.mrb[43].mxu1 }
 0x1d3   :  { %v5059_v28 = vpop.f32.mrb[44].mxu1 }
 0x1d4   :  { %v5062_v19 = vpop.f32.mrb[45].mxu1 }
 0x1d7   :  { %v5066_v41 = vpop.f32.mrb[46].mxu1 }
 0x1d8   :  { %v5077_v3 = vpop.f32.mrb[47].mxu1 }
 0x1db   :  { %v5085_v61 = vpop.f32.mrb[48].mxu1 }
 0x1dc   :  { %v5089_v47 = vpop.f32.mrb[49].mxu1 }
 0x1dd   :  { %6323 = vst [vmem:[#allocation20_spill] sm:$0xff] %v5089_v47 }
 0x1e0   :  { %v1477_v35 = vpop.f32.mrb[0].mxu0 }
 0x1e1   :  { %v5095_v9 = vadd.f32 %v2970_v43, %v1477_v35  ;;  %v1479_v56 = vpop.f32.mrb[1].mxu0  ;;  %v2980_v35 = vadd.f32 %v4864_v32, %v5087_v57  ;;  %v2986_v32 = vadd.f32 %v4880_v38, %v5083_v5 }
 0x1e2   :  { %v5097_v46 = vadd.f32 %v2972_v55, %v1479_v56 }
 0x1e3   :  { %6324 = vst [vmem:[#allocation21_spill] sm:$0xff] %v5095_v9 }
 0x1e4   :  { %v1483_v58 = vpop.f32.mrb[2].mxu0 }
 0x1e5   :  { %v5103_v31 = vadd.f32 %v2974_v20, %v1483_v58  ;;  %v1485_v23 = vpop.f32.mrb[3].mxu0  ;;  %v2984_v20 = vadd.f32 %v4877_v37, %v5087_v57  ;;  %v2990_v37 = vadd.f32 %v4890_v42, %v5083_v5 }
 0x1e6   :  { %v5105_v24 = vadd.f32 %v2976_v16, %v1485_v23 }
 0x1e7   :  { %6325 = vst [vmem:[#allocation22_spill] sm:$0xff] %v5103_v31 }
 0x1e8   :  { %v1489_v43 = vpop.f32.mrb[4].mxu0 }
 0x1e9   :  { %v5111_v55 = vadd.f32 %v2978_v25, %v1489_v43  ;;  %v1491_v56 = vpop.f32.mrb[5].mxu0  ;;  %v2988_v25 = vadd.f32 %v4882_v39, %v5087_v57  ;;  %v2994_v39 = vadd.f32 %v4905_v48, %v5083_v5 }
 0x1ea   :  { %v5113_v26 = vadd.f32 %v2980_v35, %v1491_v56 }
 0x1ec   :  { %v1495_v23 = vpop.f32.mrb[6].mxu0 }
 0x1ed   :  { %v5119_v16 = vadd.f32 %v2982_v27, %v1495_v23  ;;  %v1497_v58 = vpop.f32.mrb[7].mxu0  ;;  %v2992_v27 = vadd.f32 %v4894_v44, %v5087_v57  ;;  %v2998_v44 = vadd.f32 %v4910_v50, %v5083_v5 }
 0x1ee   :  { %v5121_v30 = vadd.f32 %v2984_v20, %v1497_v58 }
 0x1f0   :  { %v1501_v35 = vpop.f32.mrb[8].mxu0 }
 0x1f1   :  { %v5127_v43 = vadd.f32 %v2986_v32, %v1501_v35  ;;  %v1503_v56 = vpop.f32.mrb[9].mxu0  ;;  %v2996_v32 = vadd.f32 %v4907_v49, %v5087_v57  ;;  %v3002_v49 = vadd.f32 %v4914_v52, %v5083_v5 }
 0x1f2   :  { %v5129_v36 = vadd.f32 %v2988_v25, %v1503_v56 }
 0x1f4   :  { %v1507_v20 = vpop.f32.mrb[10].mxu0 }
 0x1f5   :  { %v5135_v23 = vadd.f32 %v2990_v37, %v1507_v20  ;;  %v1509_v58 = vpop.f32.mrb[11].mxu0  ;;  %v3000_v37 = vadd.f32 %v4912_v51, %v5087_v57  ;;  %v3006_v51 = vadd.f32 %v4932_v60, %v5083_v5 }
 0x1f6   :  { %v5137_v38 = vadd.f32 %v2992_v27, %v1509_v58 }
 0x1f8   :  { %v1513_v25 = vpop.f32.mrb[12].mxu0 }
 0x1f9   :  { %v5143_v35 = vadd.f32 %v2994_v39, %v1513_v25  ;;  %v1515_v56 = vpop.f32.mrb[13].mxu0  ;;  %v3004_v39 = vadd.f32 %v4916_v53, %v5087_v57  ;;  %v3010_v53 = vadd.f32 %v4940_v63, %v5083_v5 }
 0x1fa   :  { %v5145_v42 = vadd.f32 %v2996_v32, %v1515_v56 }
 0x1fc   :  { %v1519_v27 = vpop.f32.mrb[14].mxu0 }
 0x1fd   :  { %v5151_v20 = vadd.f32 %v2998_v44, %v1519_v27  ;;  %v1521_v58 = vpop.f32.mrb[15].mxu0  ;;  %v3008_v44 = vadd.f32 %v4936_v62, %v5087_v57  ;;  %v3014_v62 = vadd.f32 %v4944_v1, %v5083_v5 }
 0x1fe   :  { %v5153_v48 = vadd.f32 %v3000_v37, %v1521_v58 }
 0x200   :  { %v1525_v32 = vpop.f32.mrb[16].mxu0 }
 0x201   :  { %v5159_v25 = vadd.f32 %v3002_v49, %v1525_v32  ;;  %v1527_v56 = vpop.f32.mrb[17].mxu0  ;;  %v3012_v49 = vadd.f32 %v4942_v0, %v5087_v57  ;;  %v3018_v0 = vadd.f32 %v4962_v8, %v5083_v5 }
 0x202   :  { %v5161_v50 = vadd.f32 %v3004_v39, %v1527_v56 }
 0x204   :  { %v1531_v37 = vpop.f32.mrb[18].mxu0 }
 0x205   :  { %v5167_v27 = vadd.f32 %v3006_v51, %v1531_v37  ;;  %v1533_v58 = vpop.f32.mrb[19].mxu0  ;;  %v3016_v51 = vadd.f32 %v4946_v2, %v5087_v57  ;;  %v3022_v2 = vadd.f32 %v4970_v11, %v5083_v5  ;;  %v3026_v11 = vadd.f32 %v4974_v13, %v5083_v5 }
 0x206   :  { %v5169_v52 = vadd.f32 %v3008_v44, %v1533_v58 }
 0x208   :  { %v1537_v39 = vpop.f32.mrb[20].mxu0 }
 0x209   :  { %v5175_v32 = vadd.f32 %v3010_v53, %v1537_v39  ;;  %v1539_v56 = vpop.f32.mrb[21].mxu0  ;;  %v3020_v53 = vadd.f32 %v4966_v10, %v5087_v57 }
 0x20a   :  { %v5177_v60 = vadd.f32 %v3012_v49, %v1539_v56 }
 0x20c   :  { %v1543_v44 = vpop.f32.mrb[22].mxu0 }
 0x20d   :  { %v5183_v37 = vadd.f32 %v3014_v62, %v1543_v44  ;;  %v1545_v58 = vpop.f32.mrb[23].mxu0  ;;  %v3024_v62 = vadd.f32 %v4972_v12, %v5087_v57 }
 0x20e   :  { %v5185_v63 = vadd.f32 %v3016_v51, %v1545_v58  ;;  %v3028_v51 = vadd.f32 %v4976_v14, %v5087_v57  ;;  %v6328_v14 = vmax.f32 %v5111_v55, 0.0 }
 0x210   :  { %v1549_v49 = vpop.f32.mrb[24].mxu0 }
 0x211   :  { %v5191_v39 = vadd.f32 %v3018_v0, %v1549_v49  ;;  %v1551_v56 = vpop.f32.mrb[25].mxu0  ;;  %v6273_v0 = vmax.f32 %v5095_v9, 0.0 }
 0x212   :  { %v5193_v1 = vadd.f32 %v3020_v53, %v1551_v56  ;;  %v6274_v56 = vmax.f32 %v5097_v46, 0.0 }
 0x214   :  { %v1555_v44 = vpop.f32.mrb[26].mxu0 }
 0x215   :  { %v5201_v58 = vadd.f32 %v3022_v2, %v1555_v44  ;;  %v1557_v10 = vpop.f32.mrb[27].mxu0  ;;  %v6326_v2 = vmax.f32 %v5103_v31, 0.0 }
 0x216   :  { %v5205_v53 = vadd.f32 %v3024_v62, %v1557_v10  ;;  %v6327_v62 = vmax.f32 %v5105_v24, 0.0  ;;  %v6275_v10 = vmax.f32 %v5121_v30, 0.0 }
 0x217   :  { %v1724_v44 = vadd.f32 %v6326_v2, %v6273_v0  ;;  %v3030_v2 = vadd.f32 %v4987_v18, %v5083_v5  ;;  %v6329_v0 = vmax.f32 %v5113_v26, 0.0 }
 0x218   :  { %v1561_v49 = vpop.f32.mrb[28].mxu0  ;;  %v1756_v13 = vadd.f32 %v6327_v62, %v6274_v56 }
 0x219   :  { %v5223_v21 = vadd.f32 %v3026_v11, %v1561_v49  ;;  %v1563_v12 = vpop.f32.mrb[29].mxu0  ;;  %v1725_v47 = vadd.f32 %v1724_v44, %v6328_v14  ;;  %v3032_v49 = vadd.f32 %v4994_v22, %v5087_v57  ;;  %v6330_v11 = vmax.f32 %v5119_v16, 0.0 }
 0x21a   :  { %v5228_v31 = vadd.f32 %v3028_v51, %v1563_v12  ;;  %v1757_v8 = vadd.f32 %v1756_v13, %v6329_v0  ;;  %v6276_v12 = vmax.f32 %v5137_v38, 0.0  ;;  %v6331_v0 = vmax.f32 %v5127_v43, 0.0 }
 0x21b   :  { %v1726_v56 = vadd.f32 %v1725_v47, %v6330_v11  ;;  %v3034_v47 = vadd.f32 %v5000_v29, %v5083_v5  ;;  %v6332_v11 = vmax.f32 %v5129_v36, 0.0 }
 0x21c   :  { %v1567_v14 = vpop.f32.mrb[30].mxu0  ;;  %v1758_v51 = vadd.f32 %v1757_v8, %v6275_v10 }
 0x21d   :  { %v5243_v18 = vadd.f32 %v3030_v2, %v1567_v14  ;;  %v1569_v9 = vpop.f32.mrb[31].mxu0  ;;  %v1727_v13 = vadd.f32 %v1726_v56, %v6331_v0  ;;  %v3036_v2 = vadd.f32 %v5002_v33, %v5087_v57  ;;  %v6333_v14 = vmax.f32 %v5135_v23, 0.0 }
 0x21e   :  { %v5248_v22 = vadd.f32 %v3032_v49, %v1569_v9  ;;  %v1759_v44 = vadd.f32 %v1758_v51, %v6332_v11  ;;  %v6277_v49 = vmax.f32 %v5153_v48, 0.0  ;;  %v6334_v51 = vmax.f32 %v5143_v35, 0.0 }
 0x21f   :  { %v1728_v10 = vadd.f32 %v1727_v13, %v6333_v14  ;;  %v3038_v13 = vadd.f32 %v5004_v34, %v5083_v5  ;;  %v6335_v14 = vmax.f32 %v5145_v42, 0.0 }
 0x220   :  { %v1573_v0 = vpop.f32.mrb[32].mxu0  ;;  %v1760_v9 = vadd.f32 %v1759_v44, %v6276_v12 }
 0x221   :  { %v5263_v29 = vadd.f32 %v3034_v47, %v1573_v0  ;;  %v1575_v62 = vpop.f32.mrb[33].mxu0  ;;  %v1729_v11 = vadd.f32 %v1728_v10, %v6334_v51  ;;  %v3040_v47 = vadd.f32 %v5006_v40, %v5087_v57  ;;  %v6336_v0 = vmax.f32 %v5151_v20, 0.0 }
 0x222   :  { %v5268_v33 = vadd.f32 %v3036_v2, %v1575_v62  ;;  %v1761_v56 = vadd.f32 %v1760_v9, %v6335_v14  ;;  %v6278_v2 = vmax.f32 %v5169_v52, 0.0  ;;  %v6337_v9 = vmax.f32 %v5159_v25, 0.0 }
 0x223   :  { %v1730_v12 = vadd.f32 %v1729_v11, %v6336_v0  ;;  %v3042_v11 = vadd.f32 %v5017_v54, %v5083_v5  ;;  %v6338_v0 = vmax.f32 %v5161_v50, 0.0 }
 0x224   :  { %v1579_v51 = vpop.f32.mrb[34].mxu0  ;;  %v1762_v62 = vadd.f32 %v1761_v56, %v6277_v49 }
 0x225   :  { %v5283_v34 = vadd.f32 %v3038_v13, %v1579_v51  ;;  %v1581_v8 = vpop.f32.mrb[35].mxu0  ;;  %v1731_v14 = vadd.f32 %v1730_v12, %v6337_v9  ;;  %v3044_v13 = vadd.f32 %v5024_v59, %v5087_v57  ;;  %v6339_v51 = vmax.f32 %v5167_v27, 0.0 }
 0x226   :  { %v5288_v40 = vadd.f32 %v3040_v47, %v1581_v8  ;;  %v1763_v10 = vadd.f32 %v1762_v62, %v6338_v0  ;;  %v6279_v47 = vmax.f32 %v5185_v63, 0.0  ;;  %v6340_v62 = vmax.f32 %v5175_v32, 0.0 }
 0x227   :  { %v1732_v49 = vadd.f32 %v1731_v14, %v6339_v51  ;;  %v3046_v14 = vadd.f32 %v5030_v4, %v5083_v5  ;;  %v6341_v51 = vmax.f32 %v5177_v60, 0.0 }
 0x228   :  { %v1585_v9 = vpop.f32.mrb[36].mxu0  ;;  %v1764_v8 = vadd.f32 %v1763_v10, %v6278_v2 }
 0x229   :  { %v5303_v54 = vadd.f32 %v3042_v11, %v1585_v9  ;;  %v1587_v44 = vpop.f32.mrb[37].mxu0  ;;  %v1733_v0 = vadd.f32 %v1732_v49, %v6340_v62  ;;  %v3048_v11 = vadd.f32 %v5032_v6, %v5087_v57  ;;  %v6342_v9 = vmax.f32 %v5183_v37, 0.0 }
 0x22a   :  { %v5308_v59 = vadd.f32 %v3044_v13, %v1587_v44  ;;  %v1765_v12 = vadd.f32 %v1764_v8, %v6341_v51  ;;  %v6280_v13 = vmax.f32 %v5205_v53, 0.0  ;;  %v6343_v8 = vmax.f32 %v5191_v39, 0.0 }
 0x22b   :  { %v1734_v2 = vadd.f32 %v1733_v0, %v6342_v9  ;;  %v3050_v0 = vadd.f32 %v5034_v7, %v5083_v5  ;;  %v6344_v9 = vmax.f32 %v5193_v1, 0.0 }
 0x22c   :  { %v1591_v62 = vpop.f32.mrb[38].mxu0  ;;  %v1766_v44 = vadd.f32 %v1765_v12, %v6279_v47 }
 0x22d   :  { %v5323_v4 = vadd.f32 %v3046_v14, %v1591_v62  ;;  %v1593_v56 = vpop.f32.mrb[39].mxu0  ;;  %v1735_v51 = vadd.f32 %v1734_v2, %v6343_v8  ;;  %v3052_v14 = vadd.f32 %v5036_v15, %v5087_v57  ;;  %v6345_v62 = vmax.f32 %v5201_v58, 0.0 }
 0x22e   :  { %v5328_v6 = vadd.f32 %v3048_v11, %v1593_v56  ;;  %v1767_v49 = vadd.f32 %v1766_v44, %v6344_v9  ;;  %v6281_v11 = vmax.f32 %v5248_v22, 0.0  ;;  %v6346_v44 = vmax.f32 %v5223_v21, 0.0 }
 0x22f   :  { %v1736_v47 = vadd.f32 %v1735_v51, %v6345_v62  ;;  %v3054_v51 = vadd.f32 %v5038_v17, %v5083_v5  ;;  %v6347_v62 = vmax.f32 %v5228_v31, 0.0 }
 0x230   :  { %v1597_v8 = vpop.f32.mrb[40].mxu0  ;;  %v1768_v56 = vadd.f32 %v1767_v49, %v6280_v13 }
 0x231   :  { %v5343_v7 = vadd.f32 %v3050_v0, %v1597_v8  ;;  %v1599_v10 = vpop.f32.mrb[41].mxu0  ;;  %v1737_v9 = vadd.f32 %v1736_v47, %v6346_v44  ;;  %v3056_v0 = vadd.f32 %v5046_v45, %v5087_v57  ;;  %v6348_v8 = vmax.f32 %v5243_v18, 0.0 }
 0x232   :  { %v5348_v15 = vadd.f32 %v3052_v14, %v1599_v10  ;;  %v1769_v2 = vadd.f32 %v1768_v56, %v6347_v62  ;;  %v6282_v14 = vmax.f32 %v5288_v40, 0.0  ;;  %v6350_v56 = vmax.f32 %v5263_v29, 0.0 }
 0x233   :  { %v1738_v13 = vadd.f32 %v1737_v9, %v6348_v8  ;;  %v3058_v9 = vadd.f32 %v5059_v28, %v5083_v5  ;;  %v6351_v8 = vmax.f32 %v5268_v33, 0.0 }
 0x234   :  { %v1603_v44 = vpop.f32.mrb[42].mxu0  ;;  %v1770_v10 = vadd.f32 %v1769_v2, %v6281_v11 }
 0x235   :  { %v5363_v17 = vadd.f32 %v3054_v51, %v1603_v44  ;;  %v1605_v12 = vpop.f32.mrb[43].mxu0  ;;  %v1739_v62 = vadd.f32 %v1738_v13, %v6350_v56  ;;  %v3060_v51 = vadd.f32 %v5062_v19, %v5087_v57  ;;  %v6352_v44 = vmax.f32 %v5283_v34, 0.0 }
 0x236   :  { %v5368_v45 = vadd.f32 %v3056_v0, %v1605_v12  ;;  %v1771_v47 = vadd.f32 %v1770_v10, %v6351_v8  ;;  %v6283_v0 = vmax.f32 %v5328_v6, 0.0  ;;  %v6354_v10 = vmax.f32 %v5303_v54, 0.0 }
 0x237   :  { %6349 = vst [vmem:[#allocation23_spill] sm:$0xff] %v5363_v17  ;;  %v1740_v11 = vadd.f32 %v1739_v62, %v6352_v44  ;;  %v3062_v62 = vadd.f32 %v5066_v41, %v5083_v5  ;;  %v6355_v44 = vmax.f32 %v5308_v59, 0.0 }
 0x238   :  { %v1609_v56 = vpop.f32.mrb[44].mxu0  ;;  %v1772_v12 = vadd.f32 %v1771_v47, %v6282_v14 }
 0x239   :  { %v5383_v28 = vadd.f32 %v3058_v9, %v1609_v56  ;;  %v1611_v49 = vpop.f32.mrb[45].mxu0  ;;  %v1741_v8 = vadd.f32 %v1740_v11, %v6354_v10  ;;  %v3064_v9 = vadd.f32 %v5077_v3, %v5087_v57  ;;  %v6356_v56 = vmax.f32 %v5323_v4, 0.0 }
 0x23a   :  { %v5388_v19 = vadd.f32 %v3060_v51, %v1611_v49  ;;  %v1773_v13 = vadd.f32 %v1772_v12, %v6355_v44  ;;  %v6358_v12 = vmax.f32 %v5343_v7, 0.0 }
 0x23b   :  { %6353 = vst [vmem:[#allocation24_spill] sm:$0xff] %v5383_v28  ;;  %v1742_v14 = vadd.f32 %v1741_v8, %v6356_v56  ;;  %v3066_v8 = vadd.f32 %v5085_v61, %v5083_v5  ;;  %v6359_v56 = vmax.f32 %v5348_v15, 0.0 }
 0x23c   :  { %v1615_v10 = vpop.f32.mrb[46].mxu0  ;;  %v1774_v49 = vadd.f32 %v1773_v13, %v6283_v0  ;;  %v6360_v0 = vld [vmem:[#allocation20_spill] sm:$0xff] }
 0x23d   :  { %v5403_v41 = vadd.f32 %v3062_v62, %v1615_v10  ;;  %v1617_v2 = vpop.f32.mrb[47].mxu0  ;;  %v1743_v44 = vadd.f32 %v1742_v14, %v6358_v12  ;;  %v3068_v62 = vadd.f32 %v6360_v0, %v5087_v57  ;;  %v6361_v10 = vmax.f32 %v5363_v17, 0.0 }
 0x23e   :  { %v5408_v3 = vadd.f32 %v3064_v9, %v1617_v2  ;;  %v1775_v11 = vadd.f32 %v1774_v49, %v6359_v56  ;;  %v6362_v2 = vmax.f32 %v5368_v45, 0.0  ;;  %v6363_v49 = vmax.f32 %v5383_v28, 0.0 }
 0x23f   :  { %6357 = vst [vmem:[#allocation25_spill] sm:$0xff] %v5403_v41  ;;  %v1744_v51 = vadd.f32 %v1743_v44, %v6361_v10  ;;  %v6284_v14 = vmax.f32 %v5403_v41, 0.0  ;;  %v6364_v57 = vmax.f32 %v5388_v19, 0.0 }
 0x240   :  { %v1621_v12 = vpop.f32.mrb[48].mxu0  ;;  %v1776_v9 = vadd.f32 %v1775_v11, %v6362_v2  ;;  %v6290_v47 = vmax.f32 %v5408_v3, 0.0 }
 0x241   :  { %v5423_v61 = vadd.f32 %v3066_v8, %v1621_v12  ;;  %v1623_v5 = vpop.f32.mrb[49].mxu0  ;;  %v1745_v56 = vadd.f32 %v1744_v51, %v6363_v49 }
 0x242   :  { %v5427_v13 = vadd.f32 %v3068_v62, %v1623_v5  ;;  %v1777_v0 = vadd.f32 %v1776_v9, %v6364_v57 }
 0x243   :  { %v6288_v44 = vmax.f32 %v5423_v61, 0.0  ;;  %v1746_v10 = vadd.f32 %v1745_v56, %v6284_v14 }
 0x244   :  { %v6289_v11 = vmax.f32 %v5427_v13, 0.0  ;;  %v1778_v8 = vadd.f32 %v1777_v0, %v6290_v47  ;;  %v1708_v0 = vld [vmem:[%s6245_s6] sm:$0xff]  ;;  %v6373_v47 = vld [vmem:[#allocation8_spill] sm:$0xff] }
 0x245   :  { %v1748_v51 = vsel %vm1747_vm0, %v6288_v44, 0.0  ;;  %v6369_v44 = vld [vmem:[#allocation4_spill] sm:$0xff] }
 0x246   :  { %v1749_v12 = vadd.f32 %v1748_v51, %v1746_v10  ;;  %v1779_v62 = vsel %vm1747_vm0, %v6289_v11, 0.0  ;;  %v1710_v10 = vld [vmem:[%s6245_s6 + $0x10] sm:$0xff]  ;;  %v6370_v11 = vld [vmem:[#allocation5_spill] sm:$0xff] }
 0x247   :  { %v1780_v2 = vadd.f32 %v1779_v62, %v1778_v8  ;;  %v1713_v8 = vld [vmem:[%s6245_s6 + $0x28] sm:$0xff] }
 0x248   :  { %v1750_v9 = vrot.slane %v1749_v12, 4 }
 0x249   :  { %v1781_v5 = vrot.slane %v1780_v2, 4 }
 0x24a   :  { %v1751_v49 = vadd.f32 %v1750_v9, %v1749_v12  ;;  %v1715_v12 = vld [vmem:[%s6245_s6 + $0x38] sm:$0xff] }
 0x24b   :  { %v1782_v57 = vadd.f32 %v1781_v5, %v1780_v2  ;;  %v5457_v9 = vpack.c.bf16 %v1715_v12, %v1713_v8  ;;  %v1712_v5 = vld [vmem:[%s6245_s6 + $0x20] sm:$0xff]  ;;  %v1721_v8 = vld [vmem:[%s6245_s6 + $0x68] sm:$0xff]  ;;  %v1723_v12 = vld [vmem:[%s6245_s6 + $0x78] sm:$0xff] }
 0x24c   :  { %v1752_v56 = vrot.slane %v1751_v49, 2 }
 0x24d   :  { %v1783_v14 = vrot.slane %v1782_v57, 2 }
 0x24e   :  { %v1753_v41 = vadd.f32 %v1752_v56, %v1751_v49  ;;  %v1714_v49 = vld [vmem:[%s6245_s6 + $0x30] sm:$0xff] }
 0x24f   :  { %v1784_v28 = vadd.f32 %v1783_v14, %v1782_v57  ;;  %v5455_v14 = vpack.c.bf16 %v1710_v10, %v1708_v0  ;;  %v1717_v57 = vld [vmem:[%s6245_s6 + $0x48] sm:$0xff]  ;;  %v1716_v0 = vld [vmem:[%s6245_s6 + $0x40] sm:$0xff]  ;;  %v1718_v10 = vld [vmem:[%s6245_s6 + $0x50] sm:$0xff] }
 0x250   :  { %v1754_v17 = vrot.slane %v1753_v41, 1 }
 0x251   :  { %v1785_v51 = vrot.slane %v1784_v28, 1 }
 0x252   :  { %v1755_v2 = vadd.f32 %v1754_v17, %v1753_v41  ;;  %v5472_v17 = vpack.c.bf16 %v1714_v49, %v1712_v5  ;;  %v6365_v41 = vmov 0.0   ;;  %v1722_v5 = vld [vmem:[%s6245_s6 + $0x70] sm:$0xff] }
 0x253   :  { %v1786_v62 = vadd.f32 %v1785_v51, %v1784_v28  ;;  %v1719_v28 = vld [vmem:[%s6245_s6 + $0x58] sm:$0xff]  ;;  %v5485_v51 = vpack.c.bf16 %v1718_v10, %v1716_v0 }
 0x254   :  { %v5476_v56 = vpack.c.bf16 %v1719_v28, %v1717_v57  ;;  %v6367_v57 = vld [vmem:[#allocation2_spill] sm:$0xff] }
 0x255   :  { %1851 = vmatprep.mubr.f32.mxu1 %v1786_v62  ;;  %v5495_v62 = vpack.c.bf16 %v1723_v12, %v1721_v8  ;;  %v6368_v12 = vld [vmem:[#allocation3_spill] sm:$0xff] }
 0x256   :  { %1852 = vmatmul.mubr.f32.vlgmr.msra.gmra.mrb[50].mxu1 %v1755_v2  ;;  %v1720_v2 = vld [vmem:[%s6245_s6 + $0x60] sm:$0xff] }
 0x257   :  { %2893 = vmatpush1.bf16.msra.mxu1 %v5455_v14  ;;  %1926 = vmatprep.mubr.f32.mxu1 %v6365_v41  ;;  %v5503_v49 = vpack.c.bf16 %v1722_v5, %v1720_v2  ;;  %v6371_v2 = vld [vmem:[#allocation6_spill] sm:$0xff]  ;;  %v6372_v5 = vld [vmem:[#allocation7_spill] sm:$0xff] }
 0x258   :  { %2895 = vmatprep.subr.bf16.mxu1 %v5457_v9 }
 0x259   :  { %6366 = vst [vmem:[#allocation20_spill] sm:$0xff] %v5503_v49 }
 0x25b   :  { %2897 = vmatpush1.bf16.msra.mxu1 %v5472_v17 }
 0x25c   :  { %2899 = vmatprep.subr.bf16.mxu1 %v5476_v56 }
 0x25f   :  { %2901 = vmatpush1.bf16.msra.mxu1 %v5485_v51 }
 0x260   :  { %2903 = vmatprep.subr.bf16.mxu1 %v5495_v62 }
 0x263   :  { %2905 = vmatpush1.bf16.msra.mxu1 %v5503_v49  ;;  %v6375_v49 = vld [vmem:[#allocation10_spill] sm:$0xff] }
 0x264   :  { %2907 = vmatprep.subr.bf16.mxu1 %v6367_v57  ;;  %v6374_v57 = vld [vmem:[#allocation9_spill] sm:$0xff] }
 0x329   :  { %v2532_v28 = vpop.f32.mrb[50].mxu1 }
 0x32a   :  { %v2533_v0 = vpop.f32.mrb[51].mxu1 }
 0x32b   :  { %v2534_v10 = vadd.f32 %v2533_v0, %v2532_v28  ;;  %v6376_v28 = vld [vmem:[#allocation11_spill] sm:$0xff]  ;;  %v6377_v0 = vld [vmem:[#allocation12_spill] sm:$0xff] }
 0x32d   :  { %v1857_v8 = vmul.f32 0.0012755102, %v2534_v10  ;;  %v6378_v10 = vld [vmem:[#allocation13_spill] sm:$0xff] }
 0x32f   :  { %2497 = vmatmul.mubr.msk.f32.vlgmr.msra.gmra.mrb[52].mxu1 %vm1858_vm1, %v1857_v8  ;;  %v6379_v8 = vld [vmem:[#allocation14_spill] sm:$0xff] }
 0x330   :  { %2909 = vmatpush3.bf16.msra.mxu1 %v6368_v12  ;;  %v6382_v12 = vld [vmem:[#allocation17_spill] sm:$0xff] }
 0x331   :  { %2911 = vmatprep.subr.bf16.mxu1 %v6369_v44  ;;  %v6380_v44 = vld [vmem:[#allocation15_spill] sm:$0xff] }
 0x334   :  { %2913 = vmatpush3.bf16.msra.mxu1 %v6370_v11  ;;  %v6381_v11 = vld [vmem:[#allocation16_spill] sm:$0xff] }
 0x335   :  { %2915 = vmatprep.subr.bf16.mxu1 %v6371_v2  ;;  %v6383_v2 = vld [vmem:[#allocation19_spill] sm:$0xff] }
 0x338   :  { %2917 = vmatpush3.bf16.msra.mxu1 %v6372_v5 }
 0x339   :  { %2919 = vmatprep.subr.bf16.mxu1 %v6373_v47 }
 0x33c   :  { %2921 = vmatpush3.bf16.msra.mxu1 %v6374_v57  ;;  %v6384_v57 = vld [vmem:[#allocation18_spill] sm:$0xff] }
 0x33d   :  { %2923 = vmatprep.subr.bf16.mxu1 %v6375_v49 }
 0x340   :  { %2925 = vmatpush3.bf16.msra.mxu1 %v6376_v28  ;;  %v6385_v28 = vmax.f32 %v5097_v46, 0.0  ;;  %v6391_v46 = vmax.f32 %v5121_v30, 0.0 }
 0x341   :  { %2927 = vmatprep.subr.bf16.mxu1 %v6377_v0 }
 0x344   :  { %2929 = vmatpush3.bf16.msra.mxu1 %v6378_v10  ;;  %v6387_v10 = vmax.f32 %v5105_v24, 0.0  ;;  %v6393_v24 = vmax.f32 %v5129_v36, 0.0  ;;  %v6395_v36 = vmax.f32 %v5145_v42, 0.0 }
 0x345   :  { %2931 = vmatprep.subr.bf16.mxu1 %v6379_v8 }
 0x348   :  { %2933 = vmatpush3.bf16.msra.mxu1 %v6380_v44  ;;  %v6389_v44 = vmax.f32 %v5113_v26, 0.0 }
 0x349   :  { %2935 = vmatprep.subr.bf16.mxu1 %v6381_v11 }
 0x34c   :  { %2937 = vmatpush3.bf16.msra.mxu1 %v6382_v12 }
 0x34d   :  { %2939 = vmatprep.subr.bf16.mxu1 %v6383_v2 }
 0x402   :  { %v1928_v47 = vpop.f32.mrb[52].mxu1 }
 0x403   :  { %v1930_v5 = vpop.f32.mrb[53].mxu1  ;;  %v5560_v2 = vrot.slane %v1928_v47, %v6384_v57  ;;  %v6397_v47 = vld [vmem:[#allocation21_spill] sm:$0xff] }
 0x404   :  { %v5526_v49 = vrot.slane %v1930_v5, %v6384_v57 }
 0x406   :  { %v5531_v0 = vsub.f32 %v6385_v28, %v5526_v49  ;;  %v5536_v8 = vsub.f32 %v6387_v10, %v5526_v49  ;;  %v5541_v11 = vsub.f32 %v6389_v44, %v5526_v49  ;;  %v5550_v28 = vsub.f32 %v6391_v46, %v5526_v49 }
 0x407   :  { %v5555_v10 = vsub.f32 %v6393_v24, %v5526_v49  ;;  %v5572_v24 = vsub.f32 %v6395_v36, %v5526_v49 }
 0x408   :  { %6386 = vst [vmem:[#allocation2_spill] sm:$0xff] %v5531_v0  ;;  %6388 = vst [vmem:[#allocation3_spill] sm:$0xff] %v5536_v8  ;;  %v1992_v12 = vmul.f32 %v5531_v0, %v5531_v0  ;;  %v1994_v5 = vmul.f32 %v5536_v8, %v5536_v8  ;;  %v1996_v26 = vmul.f32 %v5541_v11, %v5541_v11  ;;  %v6394_v8 = vmax.f32 %v5137_v38, 0.0 }
 0x409   :  { %6390 = vst [vmem:[#allocation4_spill] sm:$0xff] %v5541_v11  ;;  %6392 = vst [vmem:[#allocation5_spill] sm:$0xff] %v5550_v28  ;;  %v1998_v30 = vmul.f32 %v5550_v28, %v5550_v28  ;;  %v6398_v11 = vmax.f32 %v6397_v47, 0.0  ;;  %v6399_v38 = vmax.f32 %v5153_v48, 0.0  ;;  %v6404_v47 = vmax.f32 %v5169_v52, 0.0 }
 0x40a   :  { %v2072_v44 = vadd.f32 %v1994_v5, %v1992_v12  ;;  %v5565_v0 = vsub.f32 %v6394_v8, %v5526_v49  ;;  %6396 = vst [vmem:[#allocation6_spill] sm:$0xff] %v5572_v24  ;;  %v2000_v12 = vmul.f32 %v5555_v10, %v5555_v10  ;;  %v6406_v52 = vmax.f32 %v5177_v60, 0.0 }
 0x40b   :  { %v5579_v57 = vsub.f32 %v6398_v11, %v5560_v2  ;;  %v5584_v8 = vsub.f32 %v6399_v38, %v5526_v49  ;;  %v2004_v11 = vmul.f32 %v5572_v24, %v5572_v24  ;;  %v5603_v38 = vsub.f32 %v6404_v47, %v5526_v49 }
 0x40c   :  { %v2073_v46 = vadd.f32 %v2072_v44, %v1996_v26  ;;  %v2002_v26 = vmul.f32 %v5565_v0, %v5565_v0  ;;  %v6401_v44 = vld [vmem:[#allocation22_spill] sm:$0xff]  ;;  %v6407_v47 = vmax.f32 %v5119_v16, 0.0 }
 0x40d   :  { %6400 = vst [vmem:[#allocation7_spill] sm:$0xff] %v5584_v8  ;;  %v6402_v36 = vmax.f32 %v6401_v44, 0.0  ;;  %v2006_v44 = vmul.f32 %v5584_v8, %v5584_v8  ;;  %v2010_v8 = vmul.f32 %v5603_v38, %v5603_v38 }
 0x40e   :  { %v2074_v5 = vadd.f32 %v2073_v46, %v1998_v30  ;;  %v6403_v30 = vmax.f32 %v5161_v50, 0.0 }
 0x40f   :  { %v5591_v28 = vsub.f32 %v6402_v36, %v5560_v2  ;;  %v1991_v36 = vmul.f32 %v5579_v57, %v5579_v57 }
 0x410   :  { %v2075_v42 = vadd.f32 %v2074_v5, %v2000_v12  ;;  %v5596_v46 = vsub.f32 %v6403_v30, %v5526_v49  ;;  %v6405_v12 = vmax.f32 %v5111_v55, 0.0 }
 0x412   :  { %v2076_v48 = vadd.f32 %v2075_v42, %v2002_v26  ;;  %v5608_v5 = vsub.f32 %v6405_v12, %v5560_v2  ;;  %v1993_v26 = vmul.f32 %v5591_v28, %v5591_v28  ;;  %v5619_v42 = vsub.f32 %v6406_v52, %v5526_v49 }
 0x413   :  { %v2008_v55 = vmul.f32 %v5596_v46, %v5596_v46  ;;  %v5626_v12 = vsub.f32 %v6407_v47, %v5560_v2  ;;  %v6409_v52 = vmax.f32 %v5127_v43, 0.0 }
 0x414   :  { %v2077_v50 = vadd.f32 %v2076_v48, %v2004_v11  ;;  %v6408_v11 = vmax.f32 %v5185_v63, 0.0  ;;  %v2041_v16 = vadd.f32 %v1993_v26, %v1991_v36  ;;  %v2012_v63 = vmul.f32 %v5619_v42, %v5619_v42 }
 0x415   :  { %v5638_v24 = vsub.f32 %v6409_v52, %v5560_v2  ;;  %v1997_v43 = vmul.f32 %v5626_v12, %v5626_v12  ;;  %v6412_v36 = vmax.f32 %v5205_v53, 0.0 }
 0x416   :  { %v2078_v30 = vadd.f32 %v2077_v50, %v2006_v44  ;;  %v5631_v48 = vsub.f32 %v6408_v11, %v5526_v49  ;;  %v1995_v44 = vmul.f32 %v5608_v5, %v5608_v5  ;;  %v6410_v50 = vmax.f32 %v5193_v1, 0.0 }
 0x417   :  { %v5659_v26 = vsub.f32 %v6412_v36, %v5526_v49 }
 0x418   :  { %v2079_v60 = vadd.f32 %v2078_v30, %v2008_v55  ;;  %v5645_v47 = vsub.f32 %v6410_v50, %v5526_v49  ;;  %v6411_v55 = vmax.f32 %v5135_v23, 0.0  ;;  %v2042_v52 = vadd.f32 %v2041_v16, %v1995_v44 }
 0x419   :  { %v2014_v1 = vmul.f32 %v5631_v48, %v5631_v48  ;;  %v1999_v23 = vmul.f32 %v5638_v24, %v5638_v24  ;;  %v6414_v44 = vmax.f32 %v5228_v31, 0.0  ;;  %v2018_v31 = vmul.f32 %v5659_v26, %v5659_v26 }
 0x41a   :  { %v2080_v11 = vadd.f32 %v2079_v60, %v2010_v8  ;;  %v5652_v30 = vsub.f32 %v6411_v55, %v5560_v2  ;;  %v6413_v8 = vmax.f32 %v5143_v35, 0.0  ;;  %v2043_v55 = vadd.f32 %v2042_v52, %v1997_v43 }
 0x41b   :  { %v5673_v16 = vsub.f32 %v6414_v44, %v5526_v49  ;;  %v2016_v53 = vmul.f32 %v5645_v47, %v5645_v47  ;;  %v6416_v43 = vmax.f32 %v5248_v22, 0.0 }
 0x41c   :  { %v2081_v50 = vadd.f32 %v2080_v11, %v2012_v63  ;;  %v5666_v60 = vsub.f32 %v6413_v8, %v5560_v2  ;;  %v6415_v63 = vmax.f32 %v5151_v20, 0.0  ;;  %v2001_v35 = vmul.f32 %v5652_v30, %v5652_v30 }
 0x41d   :  { %v2044_v8 = vadd.f32 %v2043_v55, %v1999_v23  ;;  %v5687_v52 = vsub.f32 %v6416_v43, %v5526_v49  ;;  %v6418_v23 = vmax.f32 %v5268_v33, 0.0  ;;  %v2020_v22 = vmul.f32 %v5673_v16, %v5673_v16 }
 0x41e   :  { %v2082_v36 = vadd.f32 %v2081_v50, %v2014_v1  ;;  %v5680_v11 = vsub.f32 %v6415_v63, %v5560_v2  ;;  %v6417_v1 = vmax.f32 %v5159_v25, 0.0  ;;  %v2003_v20 = vmul.f32 %v5666_v60, %v5666_v60 }
 0x41f   :  { %v2045_v63 = vadd.f32 %v2044_v8, %v2001_v35  ;;  %v5701_v55 = vsub.f32 %v6418_v23, %v5526_v49  ;;  %v6420_v35 = vmax.f32 %v5288_v40, 0.0  ;;  %v2022_v33 = vmul.f32 %v5687_v52, %v5687_v52 }
 0x420   :  { %v2083_v44 = vadd.f32 %v2082_v36, %v2016_v53  ;;  %v5694_v50 = vsub.f32 %v6417_v1, %v5560_v2  ;;  %v6419_v53 = vmax.f32 %v5167_v27, 0.0  ;;  %v2005_v25 = vmul.f32 %v5680_v11, %v5680_v11 }
 0x421   :  { %v2046_v1 = vadd.f32 %v2045_v63, %v2003_v20  ;;  %v5715_v8 = vsub.f32 %v6420_v35, %v5526_v49  ;;  %v6422_v20 = vmax.f32 %v5308_v59, 0.0  ;;  %v2024_v40 = vmul.f32 %v5701_v55, %v5701_v55 }
 0x422   :  { %v2084_v43 = vadd.f32 %v2083_v44, %v2018_v31  ;;  %v5708_v36 = vsub.f32 %v6419_v53, %v5560_v2  ;;  %v6421_v31 = vmax.f32 %v5175_v32, 0.0  ;;  %v2007_v27 = vmul.f32 %v5694_v50, %v5694_v50 }
 0x423   :  { %v2047_v53 = vadd.f32 %v2046_v1, %v2005_v25  ;;  %v5729_v63 = vsub.f32 %v6422_v20, %v5526_v49  ;;  %v6424_v25 = vmax.f32 %v5328_v6, 0.0  ;;  %v2026_v59 = vmul.f32 %v5715_v8, %v5715_v8 }
 0x424   :  { %v2085_v23 = vadd.f32 %v2084_v43, %v2020_v22  ;;  %v5722_v44 = vsub.f32 %v6421_v31, %v5560_v2  ;;  %v6423_v22 = vmax.f32 %v5183_v37, 0.0  ;;  %v2009_v32 = vmul.f32 %v5708_v36, %v5708_v36 }
 0x425   :  { %v2048_v31 = vadd.f32 %v2047_v53, %v2007_v27  ;;  %v5743_v1 = vsub.f32 %v6424_v25, %v5526_v49  ;;  %v6426_v27 = vmax.f32 %v5348_v15, 0.0  ;;  %v2028_v6 = vmul.f32 %v5729_v63, %v5729_v63 }
 0x426   :  { %v2086_v35 = vadd.f32 %v2085_v23, %v2022_v33  ;;  %v5736_v43 = vsub.f32 %v6423_v22, %v5560_v2  ;;  %v6425_v33 = vmax.f32 %v5191_v39, 0.0  ;;  %v2011_v37 = vmul.f32 %v5722_v44, %v5722_v44 }
 0x427   :  { %v2049_v22 = vadd.f32 %v2048_v31, %v2009_v32  ;;  %v5757_v53 = vsub.f32 %v6426_v27, %v5526_v49  ;;  %v6429_v32 = vmax.f32 %v5368_v45, 0.0  ;;  %v2030_v15 = vmul.f32 %v5743_v1, %v5743_v1 }
 0x428   :  { %v2087_v20 = vadd.f32 %v2086_v35, %v2024_v40  ;;  %v5750_v23 = vsub.f32 %v6425_v33, %v5560_v2  ;;  %v6428_v40 = vmax.f32 %v5201_v58, 0.0  ;;  %v2013_v39 = vmul.f32 %v5736_v43, %v5736_v43 }
 0x429   :  { %6427 = vst [vmem:[#allocation8_spill] sm:$0xff] %v5757_v53  ;;  %v2050_v33 = vadd.f32 %v2049_v22, %v2011_v37  ;;  %v5771_v31 = vsub.f32 %v6429_v32, %v5526_v49  ;;  %v6432_v37 = vmax.f32 %v5388_v19, 0.0  ;;  %v2032_v45 = vmul.f32 %v5757_v53, %v5757_v53 }
 0x42a   :  { %v2088_v25 = vadd.f32 %v2087_v20, %v2026_v59  ;;  %v5764_v35 = vsub.f32 %v6428_v40, %v5560_v2  ;;  %v6431_v59 = vmax.f32 %v5223_v21, 0.0  ;;  %v2015_v58 = vmul.f32 %v5750_v23, %v5750_v23 }
 0x42b   :  { %6430 = vst [vmem:[#allocation9_spill] sm:$0xff] %v5771_v31  ;;  %v2051_v40 = vadd.f32 %v2050_v33, %v2013_v39  ;;  %v5785_v22 = vsub.f32 %v6432_v37, %v5526_v49  ;;  %v6435_v39 = vmax.f32 %v5408_v3, 0.0  ;;  %v6437_v19 = vmax.f32 %v5427_v13, 0.0 }
 0x42c   :  { %v2089_v27 = vadd.f32 %v2088_v25, %v2028_v6  ;;  %v5778_v20 = vsub.f32 %v6431_v59, %v5560_v2  ;;  %v6434_v6 = vmax.f32 %v5243_v18, 0.0  ;;  %v2017_v21 = vmul.f32 %v5764_v35, %v5764_v35 }
 0x42d   :  { %6433 = vst [vmem:[#allocation10_spill] sm:$0xff] %v5785_v22  ;;  %v2052_v59 = vadd.f32 %v2051_v40, %v2015_v58  ;;  %v5799_v33 = vsub.f32 %v6435_v39, %v5526_v49  ;;  %v5804_v37 = vsub.f32 %v6437_v19, %v5526_v49  ;;  %v2036_v40 = vmul.f32 %v5785_v22, %v5785_v22 }
 0x42e   :  { %v2090_v32 = vadd.f32 %v2089_v27, %v2030_v15  ;;  %v5792_v25 = vsub.f32 %v6434_v6, %v5560_v2  ;;  %v2034_v15 = vmul.f32 %v5771_v31, %v5771_v31  ;;  %v6439_v27 = vmax.f32 %v5263_v29, 0.0 }
 0x42f   :  { %6436 = vst [vmem:[#allocation11_spill] sm:$0xff] %v5799_v33  ;;  %6438 = vst [vmem:[#allocation12_spill] sm:$0xff] %v5804_v37  ;;  %v2019_v58 = vmul.f32 %v5778_v20, %v5778_v20  ;;  %v2053_v3 = vadd.f32 %v2052_v59, %v2017_v21  ;;  %v6440_v13 = vmax.f32 %v5283_v34, 0.0  ;;  %v2038_v29 = vmul.f32 %v5799_v33, %v5799_v33  ;;  %v6449_v33 = vld [vmem:[#allocation25_spill] sm:$0xff] }
 0x430   :  { %v2091_v18 = vadd.f32 %v2090_v32, %v2032_v45  ;;  %v5811_v6 = vsub.f32 %v6439_v27, %v5560_v2  ;;  %v2021_v45 = vmul.f32 %v5792_v25, %v5792_v25  ;;  %v2040_v19 = vmul.f32 %v5804_v37, %v5804_v37 }
 0x431   :  { %v5820_v49 = vsub.f32 %v6440_v13, %v5560_v2  ;;  %v2054_v32 = vadd.f32 %v2053_v3, %v2019_v58  ;;  %v6441_v59 = vmax.f32 %v5303_v54, 0.0  ;;  %v6442_v58 = vmax.f32 %v5323_v4, 0.0  ;;  %v6444_v4 = vld [vmem:[#allocation23_spill] sm:$0xff] }
 0x432   :  { %v2092_v39 = vadd.f32 %v2091_v18, %v2034_v15  ;;  %v2023_v34 = vmul.f32 %v5811_v6, %v5811_v6  ;;  %v6443_v54 = vmax.f32 %v5343_v7, 0.0  ;;  %v6450_v22 = vmax.f32 %v6449_v33, 0.0 }
 0x433   :  { %v5831_v15 = vsub.f32 %v6441_v59, %v5560_v2  ;;  %v2055_v18 = vadd.f32 %v2054_v32, %v2021_v45  ;;  %v5838_v3 = vsub.f32 %v6442_v58, %v5560_v2  ;;  %v2025_v13 = vmul.f32 %v5820_v49, %v5820_v49 }
 0x434   :  { %v2093_v21 = vadd.f32 %v2092_v39, %v2036_v40  ;;  %v2095_v40 = vsel %vm1747_vm0, %v2040_v19, 0.0  ;;  %v5846_v59 = vsub.f32 %v6443_v54, %v5560_v2 }
 0x435   :  { %v2056_v37 = vadd.f32 %v2055_v18, %v2023_v34  ;;  %v2027_v45 = vmul.f32 %v5831_v15, %v5831_v15  ;;  %v2029_v34 = vmul.f32 %v5838_v3, %v5838_v3 }
 0x436   :  { %v2094_v27 = vadd.f32 %v2093_v21, %v2038_v29  ;;  %v6445_v21 = vmax.f32 %v6444_v4, 0.0  ;;  %v2031_v54 = vmul.f32 %v5846_v59, %v5846_v59 }
 0x437   :  { %v2057_v32 = vadd.f32 %v2056_v37, %v2025_v13  ;;  %v6448_v13 = vmax.f32 %v5423_v61, 0.0 }
 0x438   :  { %v2096_v39 = vadd.f32 %v2095_v40, %v2094_v27  ;;  %v5853_v58 = vsub.f32 %v6445_v21, %v5560_v2  ;;  %v6446_v27 = vld [vmem:[#allocation24_spill] sm:$0xff] }
 0x439   :  { %v2058_v19 = vadd.f32 %v2057_v32, %v2027_v45  ;;  %v6447_v7 = vmax.f32 %v6446_v27, 0.0  ;;  %v5867_v4 = vsub.f32 %v6448_v13, %v5560_v2  ;;  %v5872_v45 = vsub.f32 %v6450_v22, %v5560_v2 }
 0x43a   :  { %v2097_v29 = vrot.slane %v2096_v39, 4 }
 0x43b   :  { %v5860_v40 = vsub.f32 %v6447_v7, %v5560_v2  ;;  %v2059_v37 = vadd.f32 %v2058_v19, %v2029_v34  ;;  %v2039_v61 = vmul.f32 %v5867_v4, %v5867_v4  ;;  %v2037_v7 = vmul.f32 %v5872_v45, %v5872_v45 }
 0x43c   :  { %v2098_v18 = vadd.f32 %v2097_v29, %v2096_v39  ;;  %v2033_v39 = vmul.f32 %v5853_v58, %v5853_v58 }
 0x43d   :  { %v2060_v32 = vadd.f32 %v2059_v37, %v2031_v54  ;;  %v2035_v27 = vmul.f32 %v5860_v40, %v5860_v40  ;;  %v2064_v22 = vsel %vm1747_vm0, %v2039_v61, 0.0 }
 0x43e   :  { %v2099_v21 = vrot.slane %v2098_v18, 2 }
 0x43f   :  { %v2061_v34 = vadd.f32 %v2060_v32, %v2033_v39  ;;  %v6452_v32 = vld [vmem:[#allocation19_spill] sm:$0xff] }
 0x440   :  { %v2100_v29 = vadd.f32 %v2099_v21, %v2098_v18 }
 0x441   :  { %v2062_v13 = vadd.f32 %v2061_v34, %v2035_v27 }
 0x442   :  { %v2101_v19 = vrot.slane %v2100_v29, 1 }
 0x443   :  { %v2063_v2 = vadd.f32 %v2062_v13, %v2037_v7 }
 0x444   :  { %v2102_v33 = vadd.f32 %v2101_v19, %v2100_v29  ;;  %v2174_v19 = vld [vmem:[%s6246_s3] sm:$0x1] }
 0x445   :  { %v2065_v31 = vadd.f32 %v2064_v22, %v2063_v2  ;;  %v6453_v2 = vld [vmem:[#allocation18_spill] sm:$0xff] }
 0x446   :  { %2167 = vmatprep.mubr.f32.mxu1 %v2102_v33  ;;  %v2252_v33 = vld [vmem:[%s6247_s4] sm:$0x1] }
 0x447   :  { %v2066_v54 = vrot.slane %v2065_v31, 4 }
 0x449   :  { %v2067_v18 = vadd.f32 %v2066_v54, %v2065_v31  ;;  %v6451_v31 = vld [vmem:[#allocation20_spill] sm:$0xff] }
 0x44b   :  { %v2068_v37 = vrot.slane %v2067_v18, 2 }
 0x44d   :  { %v2069_v21 = vadd.f32 %v2068_v37, %v2067_v18 }
 0x44f   :  { %v2070_v53 = vrot.slane %v2069_v21, 1 }
 0x451   :  { %v2071_v39 = vadd.f32 %v2070_v53, %v2069_v21 }
 0x453   :  { %2168 = vmatmul.mubr.f32.vlgmr.msra.gmra.mrb[54].mxu1 %v2071_v39 }
 0x454   :  { %2941 = vmatpush1.bf16.msra.mxu1 %v5455_v14  ;;  %2245 = vmatprep.mubr.f32.mxu1 %v6365_v41 }
 0x455   :  { %2943 = vmatprep.subr.bf16.mxu1 %v5457_v9 }
 0x458   :  { %2945 = vmatpush1.bf16.msra.mxu1 %v5472_v17 }
 0x459   :  { %2947 = vmatprep.subr.bf16.mxu1 %v5476_v56 }
 0x45c   :  { %2949 = vmatpush1.bf16.msra.mxu1 %v5485_v51 }
 0x45d   :  { %2951 = vmatprep.subr.bf16.mxu1 %v5495_v62 }
 0x460   :  { %2953 = vmatpush1.bf16.msra.mxu1 %v6451_v31 }
 0x461   :  { %2955 = vmatprep.subr.bf16.mxu1 %v6452_v32 }
 0x526   :  { %v2567_v53 = vpop.f32.mrb[54].mxu1 }
 0x527   :  { %v2568_v29 = vpop.f32.mrb[55].mxu1 }
 0x528   :  { %v2569_v27 = vadd.f32 %v2568_v29, %v2567_v53  ;;  %v6459_v29 = vld [vmem:[#allocation7_spill] sm:$0xff] }
 0x52a   :  { %v2173_v34 = vmul.f32 0.0012755102, %v2569_v27 }
 0x52c   :  { %v2175_v61 = vadd.f32 1e-05, %v2173_v34 }
 0x52e   :  { %3221 = vrsqrt.f32 %v2175_v61 }
 0x538   :  { %v3222_v7 = vpop.eup %3221 }
 0x539   :  { %v2177_v13 = vmul.f32 %v3222_v7, %v2174_v19 }
 0x53b   :  { %2498 = vmatmul.mubr.msk.f32.vlgmr.msra.gmra.mrb[56].mxu1 %vm1858_vm1, %v2177_v13 }
 0x53c   :  { %2957 = vmatpush1.bf16.msra.mxu1 %v5455_v14  ;;  %2320 = vmatprep.mubr.f32.mxu1 %v6365_v41 }
 0x53d   :  { %2959 = vmatprep.subr.bf16.mxu1 %v5457_v9 }
 0x540   :  { %2961 = vmatpush1.bf16.msra.mxu1 %v5472_v17 }
 0x541   :  { %2963 = vmatprep.subr.bf16.mxu1 %v5476_v56 }
 0x544   :  { %2965 = vmatpush1.bf16.msra.mxu1 %v5485_v51 }
 0x545   :  { %2967 = vmatprep.subr.bf16.mxu1 %v5495_v62 }
 0x548   :  { %2969 = vmatpush1.bf16.msra.mxu1 %v6451_v31 }
 0x54b   :  { %2499 = vmatmul.mubr.msk.f32.vlgmr.msra.gmra.mrb[58].mxu1 %vm1858_vm1, %v2252_v33 }
 0x60e   :  { %v2247_v14 = vpop.f32.mrb[56].mxu1 }
 0x60f   :  { %v2249_v41 = vpop.f32.mrb[57].mxu1  ;;  %v2330_v9 = vrot.slane %v2247_v14, %v6453_v2 }
 0x610   :  { %v2334_v17 = vrot.slane %v2249_v41, %v6453_v2 }
 0x611   :  { %v2335_v56 = vmul.f32 %v2330_v9, %v5579_v57  ;;  %v2337_v51 = vmul.f32 %v2330_v9, %v5591_v28  ;;  %v2339_v62 = vmul.f32 %v2330_v9, %v5608_v5  ;;  %v2341_v22 = vmul.f32 %v2330_v9, %v5626_v12 }
 0x612   :  { %v2343_v54 = vmul.f32 %v2330_v9, %v5638_v24  ;;  %v2345_v18 = vmul.f32 %v2330_v9, %v5652_v30  ;;  %v2347_v37 = vmul.f32 %v2330_v9, %v5666_v60  ;;  %v2349_v21 = vmul.f32 %v2330_v9, %v5680_v11 }
 0x613   :  { %v2351_v39 = vmul.f32 %v2330_v9, %v5694_v50  ;;  %v2353_v31 = vmul.f32 %v2330_v9, %v5708_v36  ;;  %v2355_v57 = vmul.f32 %v2330_v9, %v5722_v44  ;;  %v2357_v28 = vmul.f32 %v2330_v9, %v5736_v43 }
 0x614   :  { %v2359_v5 = vmul.f32 %v2330_v9, %v5750_v23  ;;  %v2361_v12 = vmul.f32 %v2330_v9, %v5764_v35  ;;  %v2363_v24 = vmul.f32 %v2330_v9, %v5778_v20  ;;  %v2365_v30 = vmul.f32 %v2330_v9, %v5792_v25  ;;  %v6454_v25 = vld [vmem:[#allocation2_spill] sm:$0xff] }
 0x615   :  { %v5927_v60 = vmul.f32 %v2330_v9, %v5811_v6  ;;  %v5930_v11 = vmul.f32 %v2330_v9, %v5820_v49  ;;  %v5933_v50 = vmul.f32 %v2330_v9, %v5831_v15  ;;  %v5936_v36 = vmul.f32 %v2330_v9, %v5838_v3  ;;  %v6455_v49 = vld [vmem:[#allocation3_spill] sm:$0xff]  ;;  %v6456_v3 = vld [vmem:[#allocation4_spill] sm:$0xff] }
 0x616   :  { %v5939_v44 = vmul.f32 %v2330_v9, %v5846_v59  ;;  %v5942_v43 = vmul.f32 %v2330_v9, %v5853_v58  ;;  %v5945_v23 = vmul.f32 %v2330_v9, %v5860_v40  ;;  %v5948_v35 = vmul.f32 %v2330_v9, %v5872_v45  ;;  %v6457_v58 = vld [vmem:[#allocation5_spill] sm:$0xff] }
 0x617   :  { %v5951_v20 = vmul.f32 %v2330_v9, %v5867_v4  ;;  %v5954_v6 = vmul.f32 %v2334_v17, %v6454_v25  ;;  %v5957_v15 = vmul.f32 %v2334_v17, %v6455_v49  ;;  %v5960_v59 = vmul.f32 %v2334_v17, %v6456_v3  ;;  %v6458_v4 = vld [vmem:[#allocation6_spill] sm:$0xff] }
 0x618   :  { %v5963_v32 = vmul.f32 %v2334_v17, %v6457_v58  ;;  %v5966_v40 = vmul.f32 %v2334_v17, %v5555_v10  ;;  %v5969_v45 = vmul.f32 %v2334_v17, %v5565_v0  ;;  %v5972_v53 = vmul.f32 %v2334_v17, %v6458_v4  ;;  %v6466_v9 = vld [vmem:[#allocation10_spill] sm:$0xff] }
 0x619   :  { %v5975_v27 = vmul.f32 %v2334_v17, %v6459_v29  ;;  %v5978_v34 = vmul.f32 %v2334_v17, %v5596_v46  ;;  %v5981_v61 = vmul.f32 %v2334_v17, %v5603_v38  ;;  %v5984_v19 = vmul.f32 %v2334_v17, %v5619_v42 }
 0x61a   :  { %v5987_v10 = vmul.f32 %v2334_v17, %v5631_v48  ;;  %v5990_v0 = vmul.f32 %v2334_v17, %v5645_v47  ;;  %v5993_v7 = vmul.f32 %v2334_v17, %v5659_v26  ;;  %v5996_v13 = vmul.f32 %v2334_v17, %v5673_v16  ;;  %v6462_v26 = vld [vmem:[#allocation8_spill] sm:$0xff]  ;;  %v6464_v16 = vld [vmem:[#allocation9_spill] sm:$0xff] }
 0x61b   :  { %v5999_v46 = vmul.f32 %v2334_v17, %v5687_v52  ;;  %v6002_v38 = vmul.f32 %v2334_v17, %v5701_v55  ;;  %v6005_v42 = vmul.f32 %v2334_v17, %v5715_v8  ;;  %v6008_v48 = vmul.f32 %v2334_v17, %v5729_v63  ;;  %v6468_v8 = vld [vmem:[#allocation11_spill] sm:$0xff]  ;;  %v6469_v63 = vld [vmem:[#allocation12_spill] sm:$0xff] }
 0x61c   :  { %v6011_v33 = vmul.f32 %v2334_v17, %v5743_v1  ;;  %v6014_v14 = vmul.f32 %v2334_v17, %v6462_v26  ;;  %v6017_v41 = vmul.f32 %v2334_v17, %v6464_v16  ;;  %v6021_v25 = vmul.f32 %v2334_v17, %v6466_v9 }
 0x61d   :  { %6460 = vst [vmem:[#allocation13_spill] sm:$0xff] %v6008_v48  ;;  %v6024_v49 = vmul.f32 %v2334_v17, %v6468_v8  ;;  %v6027_v3 = vmul.f32 %v2334_v17, %v6469_v63 }
 0x61e   :  { %v2322_v47 = vpop.f32.mrb[58].mxu1  ;;  %6461 = vst [vmem:[#allocation14_spill] sm:$0xff] %v6011_v33  ;;  %6463 = vst [vmem:[#allocation15_spill] sm:$0xff] %v6014_v14 }
 0x61f   :  { %6465 = vst [vmem:[#allocation16_spill] sm:$0xff] %v6017_v41  ;;  %v2388_v52 = vrot.slane %v2322_v47, %v6453_v2  ;;  %v2324_v55 = vpop.f32.mrb[59].mxu1  ;;  %6467 = vst [vmem:[#allocation17_spill] sm:$0xff] %v6021_v25 }
 0x620   :  { %v6030_v1 = vrot.slane %v2324_v55, %v6453_v2 }
 0x621   :  { %v2393_v58 = vadd.f32 %v2388_v52, %v2335_v56  ;;  %v2395_v4 = vadd.f32 %v2388_v52, %v2337_v51  ;;  %v2397_v29 = vadd.f32 %v2388_v52, %v2339_v62  ;;  %v2399_v26 = vadd.f32 %v2388_v52, %v2341_v22 }
 0x622   :  { %v2401_v16 = vadd.f32 %v2388_v52, %v2343_v54  ;;  %v2403_v41 = vadd.f32 %v2388_v52, %v2345_v18  ;;  %v2405_v47 = vadd.f32 %v2388_v52, %v2347_v37  ;;  %v2407_v14 = vadd.f32 %v2388_v52, %v2349_v21 }
 0x623   :  { %v2409_v33 = vadd.f32 %v2388_v52, %v2351_v39  ;;  %v2411_v9 = vadd.f32 %v2388_v52, %v2353_v31  ;;  %v2413_v25 = vadd.f32 %v2388_v52, %v2355_v57  ;;  %v2415_v48 = vadd.f32 %v2388_v52, %v2357_v28  ;;  %2443 = vst [vmem:[%s6248_s7] sm:$0xff] %v2393_v58 }
 0x624   :  { %2445 = vst [vmem:[%s6248_s7 + $0x10] sm:$0xff] %v2395_v4  ;;  %2447 = vst [vmem:[%s6248_s7 + $0x20] sm:$0xff] %v2397_v29  ;;  %v2417_v2 = vadd.f32 %v2388_v52, %v2359_v5  ;;  %v2419_v17 = vadd.f32 %v2388_v52, %v2361_v12  ;;  %v2421_v56 = vadd.f32 %v2388_v52, %v2363_v24 }
 0x625   :  { %2449 = vst [vmem:[%s6248_s7 + $0x30] sm:$0xff] %v2399_v26  ;;  %v2423_v51 = vadd.f32 %v2388_v52, %v2365_v30  ;;  %2451 = vst [vmem:[%s6248_s7 + $0x40] sm:$0xff] %v2401_v16  ;;  %v2425_v62 = vadd.f32 %v2388_v52, %v5927_v60  ;;  %v2427_v22 = vadd.f32 %v2388_v52, %v5930_v11 }
 0x626   :  { %2453 = vst [vmem:[%s6248_s7 + $0x50] sm:$0xff] %v2403_v41  ;;  %2455 = vst [vmem:[%s6248_s7 + $0x60] sm:$0xff] %v2405_v47  ;;  %v2429_v54 = vadd.f32 %v2388_v52, %v5933_v50  ;;  %v2431_v18 = vadd.f32 %v2388_v52, %v5936_v36  ;;  %v2433_v37 = vadd.f32 %v2388_v52, %v5939_v44 }
 0x627   :  { %2457 = vst [vmem:[%s6248_s7 + $0x70] sm:$0xff] %v2407_v14  ;;  %2459 = vst [vmem:[%s6248_s7 + $0x80] sm:$0xff] %v2409_v33  ;;  %v2435_v21 = vadd.f32 %v2388_v52, %v5942_v43  ;;  %v2437_v39 = vadd.f32 %v2388_v52, %v5945_v23  ;;  %v2439_v31 = vadd.f32 %v2388_v52, %v5948_v35 }
 0x628   :  { %2461 = vst [vmem:[%s6248_s7 + $0x90] sm:$0xff] %v2411_v9  ;;  %2463 = vst [vmem:[%s6248_s7 + $0xa0] sm:$0xff] %v2413_v25  ;;  %v2441_v57 = vadd.f32 %v2388_v52, %v5951_v20  ;;  %v2394_v28 = vadd.f32 %v6030_v1, %v5954_v6  ;;  %v2396_v5 = vadd.f32 %v6030_v1, %v5957_v15 }
 0x629   :  { %2465 = vst [vmem:[%s6248_s7 + $0xb0] sm:$0xff] %v2415_v48  ;;  %2467 = vst [vmem:[%s6248_s7 + $0xc0] sm:$0xff] %v2417_v2  ;;  %v2398_v12 = vadd.f32 %v6030_v1, %v5960_v59  ;;  %v2400_v24 = vadd.f32 %v6030_v1, %v5963_v32  ;;  %v2402_v30 = vadd.f32 %v6030_v1, %v5966_v40  ;;  %v6470_v40 = vld [vmem:[#allocation13_spill] sm:$0xff] }
 0x62a   :  { %2469 = vst [vmem:[%s6248_s7 + $0xd0] sm:$0xff] %v2419_v17  ;;  %2471 = vst [vmem:[%s6248_s7 + $0xe0] sm:$0xff] %v2421_v56  ;;  %v2404_v60 = vadd.f32 %v6030_v1, %v5969_v45  ;;  %v2406_v11 = vadd.f32 %v6030_v1, %v5972_v53  ;;  %v2408_v50 = vadd.f32 %v6030_v1, %v5975_v27  ;;  %v6471_v53 = vld [vmem:[#allocation14_spill] sm:$0xff] }
 0x62b   :  { %2473 = vst [vmem:[%s6248_s7 + $0xf0] sm:$0xff] %v2423_v51  ;;  %2475 = vst [vmem:[%s6248_s7 + $0x100] sm:$0xff] %v2425_v62  ;;  %v2410_v36 = vadd.f32 %v6030_v1, %v5978_v34  ;;  %v2412_v44 = vadd.f32 %v6030_v1, %v5981_v61  ;;  %v2414_v43 = vadd.f32 %v6030_v1, %v5984_v19  ;;  %v6472_v34 = vld [vmem:[#allocation15_spill] sm:$0xff]  ;;  %v6473_v19 = vld [vmem:[#allocation16_spill] sm:$0xff] }
 0x62c   :  { %2477 = vst [vmem:[%s6248_s7 + $0x110] sm:$0xff] %v2427_v22  ;;  %2479 = vst [vmem:[%s6248_s7 + $0x120] sm:$0xff] %v2429_v54  ;;  %v2416_v23 = vadd.f32 %v6030_v1, %v5987_v10  ;;  %v2418_v35 = vadd.f32 %v6030_v1, %v5990_v0  ;;  %v2420_v20 = vadd.f32 %v6030_v1, %v5993_v7  ;;  %v6474_v0 = vld [vmem:[#allocation17_spill] sm:$0xff] }
 0x62d   :  { %2481 = vst [vmem:[%s6248_s7 + $0x130] sm:$0xff] %v2431_v18  ;;  %2483 = vst [vmem:[%s6248_s7 + $0x140] sm:$0xff] %v2433_v37  ;;  %v2422_v6 = vadd.f32 %v6030_v1, %v5996_v13  ;;  %v2424_v15 = vadd.f32 %v6030_v1, %v5999_v46  ;;  %v2426_v59 = vadd.f32 %v6030_v1, %v6002_v38 }
 0x62e   :  { %2485 = vst [vmem:[%s6248_s7 + $0x150] sm:$0xff] %v2435_v21  ;;  %2487 = vst [vmem:[%s6248_s7 + $0x160] sm:$0xff] %v2437_v39  ;;  %v2428_v32 = vadd.f32 %v6030_v1, %v6005_v42  ;;  %v2430_v45 = vadd.f32 %v6030_v1, %v6470_v40  ;;  %v2432_v27 = vadd.f32 %v6030_v1, %v6471_v53 }
 0x62f   :  { %2489 = vst [vmem:[%s6248_s7 + $0x170] sm:$0xff] %v2439_v31  ;;  %2491 = vst [vmem:[%s6248_s7 + $0x180] sm:$0xf] %v2441_v57  ;;  %v2434_v61 = vadd.f32 %v6030_v1, %v6472_v34  ;;  %v2436_v10 = vadd.f32 %v6030_v1, %v6473_v19  ;;  %v2438_v7 = vadd.f32 %v6030_v1, %v6474_v0 }
 0x630   :  { %2444 = vst [vmem:[%s6248_s7 + $0x8] sm:$0xff] %v2394_v28  ;;  %2446 = vst [vmem:[%s6248_s7 + $0x18] sm:$0xff] %v2396_v5  ;;  %v2440_v13 = vadd.f32 %v6030_v1, %v6024_v49  ;;  %v2442_v46 = vadd.f32 %v6030_v1, %v6027_v3 }
 0x631   :  { %2448 = vst [vmem:[%s6248_s7 + $0x28] sm:$0xff] %v2398_v12  ;;  %2450 = vst [vmem:[%s6248_s7 + $0x38] sm:$0xff] %v2400_v24 }
 0x632   :  { %2452 = vst [vmem:[%s6248_s7 + $0x48] sm:$0xff] %v2402_v30  ;;  %2454 = vst [vmem:[%s6248_s7 + $0x58] sm:$0xff] %v2404_v60 }
 0x633   :  { %2456 = vst [vmem:[%s6248_s7 + $0x68] sm:$0xff] %v2406_v11  ;;  %2458 = vst [vmem:[%s6248_s7 + $0x78] sm:$0xff] %v2408_v50 }
 0x634   :  { %2460 = vst [vmem:[%s6248_s7 + $0x88] sm:$0xff] %v2410_v36  ;;  %2462 = vst [vmem:[%s6248_s7 + $0x98] sm:$0xff] %v2412_v44 }
 0x635   :  { %2464 = vst [vmem:[%s6248_s7 + $0xa8] sm:$0xff] %v2414_v43  ;;  %2466 = vst [vmem:[%s6248_s7 + $0xb8] sm:$0xff] %v2416_v23 }
 0x636   :  { %2468 = vst [vmem:[%s6248_s7 + $0xc8] sm:$0xff] %v2418_v35  ;;  %2470 = vst [vmem:[%s6248_s7 + $0xd8] sm:$0xff] %v2420_v20 }
 0x637   :  { %2472 = vst [vmem:[%s6248_s7 + $0xe8] sm:$0xff] %v2422_v6  ;;  %2474 = vst [vmem:[%s6248_s7 + $0xf8] sm:$0xff] %v2424_v15 }
 0x638   :  { %2476 = vst [vmem:[%s6248_s7 + $0x108] sm:$0xff] %v2426_v59  ;;  %2478 = vst [vmem:[%s6248_s7 + $0x118] sm:$0xff] %v2428_v32 }
 0x639   :  { %2480 = vst [vmem:[%s6248_s7 + $0x128] sm:$0xff] %v2430_v45  ;;  %2482 = vst [vmem:[%s6248_s7 + $0x138] sm:$0xff] %v2432_v27 }
 0x63a   :  { %2484 = vst [vmem:[%s6248_s7 + $0x148] sm:$0xff] %v2434_v61  ;;  %2486 = vst [vmem:[%s6248_s7 + $0x158] sm:$0xff] %v2436_v10 }
 0x63b   :  { %2488 = vst [vmem:[%s6248_s7 + $0x168] sm:$0xff] %v2438_v7  ;;  %2490 = vst [vmem:[%s6248_s7 + $0x178] sm:$0xff] %v2440_v13 }
 0x63c   :  { %2492 = vst [vmem:[%s6248_s7 + $0x188] sm:$0xf] %v2442_v46 }

// kernel: generator_forward.7
= control target key start
LH: loop header
LB: loop body
LE: loop exit
PB: predicated region body
PF: predicated region fallthrough
CT: control target
= control target key end

     0   :  { %v2061_v3 = vmov 0.0   ;;  %vm531_vm0 = vcmask 523264   ;;  %vm2063_vm1 = vmmov 0   ;;  %vm1405_vm2 = vcmask 125952   ;;  %s3676_s1 = inlined_call_operand.vmem [shape: f32[576,784], index: 1, kind: input, shape index: {}]   ;;  %s3677_s0 = inlined_call_operand.vmem [shape: f32[4,576], index: 0, kind: input, shape index: {}]   ;;  %s3678_s2 = inlined_call_operand.<no memory space> [shape: f32[1,1], index: 2, kind: input, shape index: {}]   ;;  %s3679_s3 = inlined_call_operand.vmem [shape: f32[4,784], index: 3, kind: output, shape index: {}]  }
   0x1   :  { %v19_v0 = vld [vmem:[%s3676_s1 + $0x8] sm:$0xff]  ;;  %v26_v1 = vld [vmem:[%s3676_s1 + $0x40] sm:$0xff]  ;;  %740 = vmatprep.mubr.f32.mxu1 %v2061_v3  ;;  %v25_v7 = vld [vmem:[%s3676_s1 + $0x38] sm:$0xff] }
   0x2   :  { %v467_v2 = vld [vmem:[%s3676_s1 + $0xe08] sm:$0xff]  ;;  %v1513_v4 = vpack.c.bf16 %v26_v1, %v19_v0  ;;  %v474_v5 = vld [vmem:[%s3676_s1 + $0xe40] sm:$0xff]  ;;  %v473_v11 = vld [vmem:[%s3676_s1 + $0xe38] sm:$0xff] }
   0x3   :  { %v18_v6 = vld [vmem:[%s3676_s1] sm:$0xff]  ;;  %v1641_v8 = vpack.c.bf16 %v474_v5, %v467_v2  ;;  %v33_v12 = vld [vmem:[%s3676_s1 + $0x78] sm:$0xff]  ;;  %v40_v14 = vld [vmem:[%s3676_s1 + $0xb0] sm:$0xff] }
   0x4   :  { %v1515_v9 = vpack.c.bf16 %v25_v7, %v18_v6  ;;  %v466_v10 = vld [vmem:[%s3676_s1 + $0xe00] sm:$0xff]  ;;  %1514 = vmatprep.subr.bf16.mxu0 %v1513_v4  ;;  %v481_v15 = vld [vmem:[%s3676_s1 + $0xe78] sm:$0xff]  ;;  %v488_v16 = vld [vmem:[%s3676_s1 + $0xeb0] sm:$0xff]  ;;  %v1517_v17 = vpack.c.bf16 %v40_v14, %v33_v12 }
   0x5   :  { %v1643_v13 = vpack.c.bf16 %v473_v11, %v466_v10  ;;  %1642 = vmatprep.subr.bf16.mxu1 %v1641_v8  ;;  %v1645_v18 = vpack.c.bf16 %v488_v16, %v481_v15  ;;  %v32_v19 = vld [vmem:[%s3676_s1 + $0x70] sm:$0xff]  ;;  %v39_v20 = vld [vmem:[%s3676_s1 + $0xa8] sm:$0xff]  ;;  %v54_v25 = vld [vmem:[%s3676_s1 + $0x120] sm:$0xff] }
   0x6   :  { %1516 = vmatpush1.bf16.msra.mxu0 %v1515_v9  ;;  %v480_v21 = vld [vmem:[%s3676_s1 + $0xe70] sm:$0xff]  ;;  %v1519_v22 = vpack.c.bf16 %v39_v20, %v32_v19  ;;  %v487_v23 = vld [vmem:[%s3676_s1 + $0xea8] sm:$0xff]  ;;  %v502_v29 = vld [vmem:[%s3676_s1 + $0xf20] sm:$0xff] }
   0x7   :  { %1644 = vmatpush1.bf16.msra.mxu1 %v1643_v13  ;;  %v47_v24 = vld [vmem:[%s3676_s1 + $0xe8] sm:$0xff]  ;;  %1518 = vmatprep.subr.bf16.mxu0 %v1517_v17  ;;  %v1647_v26 = vpack.c.bf16 %v487_v23, %v480_v21  ;;  %v46_v30 = vld [vmem:[%s3676_s1 + $0xe0] sm:$0xff]  ;;  %v53_v32 = vld [vmem:[%s3676_s1 + $0x118] sm:$0xff] }
   0x8   :  { %1646 = vmatprep.subr.bf16.mxu1 %v1645_v18  ;;  %v1521_v27 = vpack.c.bf16 %v54_v25, %v47_v24  ;;  %v495_v28 = vld [vmem:[%s3676_s1 + $0xee8] sm:$0xff]  ;;  %v494_v33 = vld [vmem:[%s3676_s1 + $0xee0] sm:$0xff]  ;;  %v501_v34 = vld [vmem:[%s3676_s1 + $0xf18] sm:$0xff]  ;;  %v1523_v35 = vpack.c.bf16 %v53_v32, %v46_v30 }
   0x9   :  { %v1649_v31 = vpack.c.bf16 %v502_v29, %v495_v28  ;;  %v61_v36 = vld [vmem:[%s3676_s1 + $0x158] sm:$0xff]  ;;  %v68_v37 = vld [vmem:[%s3676_s1 + $0x190] sm:$0xff]  ;;  %v1651_v39 = vpack.c.bf16 %v501_v34, %v494_v33  ;;  %v67_v43 = vld [vmem:[%s3676_s1 + $0x188] sm:$0xff] }
   0xa   :  { %1520 = vmatpush1.bf16.msra.mxu0 %v1519_v22  ;;  %v509_v38 = vld [vmem:[%s3676_s1 + $0xf58] sm:$0xff]  ;;  %v1525_v40 = vpack.c.bf16 %v68_v37, %v61_v36  ;;  %v516_v41 = vld [vmem:[%s3676_s1 + $0xf90] sm:$0xff]  ;;  %v515_v46 = vld [vmem:[%s3676_s1 + $0xf88] sm:$0xff] }
   0xb   :  { %1648 = vmatpush1.bf16.msra.mxu1 %v1647_v26  ;;  %1522 = vmatprep.subr.bf16.mxu0 %v1521_v27  ;;  %v60_v42 = vld [vmem:[%s3676_s1 + $0x150] sm:$0xff]  ;;  %v1653_v44 = vpack.c.bf16 %v516_v41, %v509_v38  ;;  %v75_v47 = vld [vmem:[%s3676_s1 + $0x1c8] sm:$0xff]  ;;  %v82_v48 = vld [vmem:[%s3676_s1 + $0x200] sm:$0xff] }
   0xc   :  { %1650 = vmatprep.subr.bf16.mxu1 %v1649_v31  ;;  %v508_v45 = vld [vmem:[%s3676_s1 + $0xf50] sm:$0xff]  ;;  %v21_v49 = vld [vmem:[%s3676_s1 + $0x18] sm:$0xff]  ;;  %v1527_v51 = vpack.c.bf16 %v67_v43, %v60_v42  ;;  %v2196_v52 = vld [vmem:[%s3677_s0] sm:$0xff]  ;;  %v1529_v54 = vpack.c.bf16 %v82_v48, %v75_v47 }
   0xd   :  { %v28_v50 = vld [vmem:[%s3676_s1 + $0x50] sm:$0xff]  ;;  %v1655_v53 = vpack.c.bf16 %v515_v46, %v508_v45  ;;  %v74_v55 = vld [vmem:[%s3676_s1 + $0x1c0] sm:$0xff]  ;;  %v81_v56 = vld [vmem:[%s3676_s1 + $0x1f8] sm:$0xff]  ;;  %v2209_v58 = vcombine.high %v2196_v52, %v2196_v52 }
   0xe   :  { %1524 = vmatpush1.bf16.msra.mxu0 %v1523_v35  ;;  %v20_v57 = vld [vmem:[%s3676_s1 + $0x10] sm:$0xff]  ;;  %v1657_v59 = vpack.c.bf16 %v28_v50, %v21_v49  ;;  %v27_v60 = vld [vmem:[%s3676_s1 + $0x48] sm:$0xff]  ;;  %v89_v61 = vld [vmem:[%s3676_s1 + $0x238] sm:$0xff]  ;;  %v1531_v1 = vpack.c.bf16 %v81_v56, %v74_v55 }
   0xf   :  { %1652 = vmatpush1.bf16.msra.mxu1 %v1651_v39  ;;  %1526 = vmatprep.subr.bf16.mxu0 %v1525_v40  ;;  %v96_v62 = vld [vmem:[%s3676_s1 + $0x270] sm:$0xff]  ;;  %v35_v63 = vld [vmem:[%s3676_s1 + $0x88] sm:$0xff]  ;;  %v42_v0 = vld [vmem:[%s3676_s1 + $0xc0] sm:$0xff]  ;;  %v1659_v4 = vpack.c.bf16 %v27_v60, %v20_v57 }
  0x10   :  { %1654 = vmatprep.subr.bf16.mxu1 %v1653_v44  ;;  %598 = vmatprep.mubr.f32.mxu0 %v2209_v58  ;;  %v17_v2 = vld [vmem:[%s3677_s0 + $0x10] sm:$0xf]  ;;  %v1533_v5 = vpack.c.bf16 %v96_v62, %v89_v61  ;;  %v95_v7 = vld [vmem:[%s3676_s1 + $0x268] sm:$0xff]  ;;  %v34_v8 = vld [vmem:[%s3676_s1 + $0x80] sm:$0xff]  ;;  %v1661_v9 = vpack.c.bf16 %v42_v0, %v35_v63 }
  0x11   :  { %v88_v6 = vld [vmem:[%s3676_s1 + $0x230] sm:$0xff]  ;;  %v41_v10 = vld [vmem:[%s3676_s1 + $0xb8] sm:$0xff]  ;;  %v103_v11 = vld [vmem:[%s3676_s1 + $0x2a8] sm:$0xff] }
  0x12   :  { %1528 = vmatpush1.bf16.msra.mxu0 %v1527_v51  ;;  %v110_v12 = vld [vmem:[%s3676_s1 + $0x2e0] sm:$0xff]  ;;  %v49_v13 = vld [vmem:[%s3676_s1 + $0xf8] sm:$0xff]  ;;  %v56_v14 = vld [vmem:[%s3676_s1 + $0x130] sm:$0xff]  ;;  %v1535_v15 = vpack.c.bf16 %v95_v7, %v88_v6  ;;  %v1663_v16 = vpack.c.bf16 %v41_v10, %v34_v8 }
  0x13   :  { %1656 = vmatpush1.bf16.msra.mxu1 %v1655_v53  ;;  %1530 = vmatprep.subr.bf16.mxu0 %v1529_v54  ;;  %v1537_v17 = vpack.c.bf16 %v110_v12, %v103_v11  ;;  %v102_v18 = vld [vmem:[%s3676_s1 + $0x2a0] sm:$0xff]  ;;  %v109_v19 = vld [vmem:[%s3676_s1 + $0x2d8] sm:$0xff]  ;;  %v48_v20 = vld [vmem:[%s3676_s1 + $0xf0] sm:$0xff]  ;;  %v1665_v21 = vpack.c.bf16 %v56_v14, %v49_v13 }
  0x14   :  { %1658 = vmatprep.subr.bf16.mxu1 %v1657_v59  ;;  %v55_v22 = vld [vmem:[%s3676_s1 + $0x128] sm:$0xff]  ;;  %v117_v23 = vld [vmem:[%s3676_s1 + $0x318] sm:$0xff]  ;;  %v124_v24 = vld [vmem:[%s3676_s1 + $0x350] sm:$0xff]  ;;  %v1539_v27 = vpack.c.bf16 %v109_v19, %v102_v18 }
  0x15   :  { %v63_v25 = vld [vmem:[%s3676_s1 + $0x168] sm:$0xff]  ;;  %v70_v26 = vld [vmem:[%s3676_s1 + $0x1a0] sm:$0xff]  ;;  %v1667_v28 = vpack.c.bf16 %v55_v22, %v48_v20  ;;  %v1541_v29 = vpack.c.bf16 %v124_v24, %v117_v23  ;;  %v116_v30 = vld [vmem:[%s3676_s1 + $0x310] sm:$0xff] }
  0x16   :  { %1532 = vmatpush1.bf16.msra.mxu0 %v1531_v1  ;;  %1411 = vmatmul.mubr.msk.f32.vlgmr.msra.gmra.mrb[0].mxu1 %vm531_vm0, %v17_v2  ;;  %v123_v31 = vld [vmem:[%s3676_s1 + $0x348] sm:$0xff]  ;;  %v62_v32 = vld [vmem:[%s3676_s1 + $0x160] sm:$0xff]  ;;  %v1669_v33 = vpack.c.bf16 %v70_v26, %v63_v25  ;;  %v69_v34 = vld [vmem:[%s3676_s1 + $0x198] sm:$0xff] }
  0x17   :  { %1660 = vmatpush1.bf16.msra.mxu1 %v1659_v4  ;;  %1534 = vmatprep.subr.bf16.mxu0 %v1533_v5  ;;  %v131_v35 = vld [vmem:[%s3676_s1 + $0x388] sm:$0xff]  ;;  %v138_v36 = vld [vmem:[%s3676_s1 + $0x3c0] sm:$0xff]  ;;  %v77_v37 = vld [vmem:[%s3676_s1 + $0x1d8] sm:$0xff]  ;;  %v1543_v39 = vpack.c.bf16 %v123_v31, %v116_v30  ;;  %v1671_v40 = vpack.c.bf16 %v69_v34, %v62_v32 }
  0x18   :  { %1662 = vmatprep.subr.bf16.mxu1 %v1661_v9  ;;  %811 = vmatprep.mubr.f32.mxu1 %v2209_v58  ;;  %v84_v38 = vld [vmem:[%s3676_s1 + $0x210] sm:$0xff]  ;;  %v1545_v41 = vpack.c.bf16 %v138_v36, %v131_v35  ;;  %v130_v42 = vld [vmem:[%s3676_s1 + $0x380] sm:$0xff]  ;;  %v137_v43 = vld [vmem:[%s3676_s1 + $0x3b8] sm:$0xff] }
  0x19   :  { %v76_v44 = vld [vmem:[%s3676_s1 + $0x1d0] sm:$0xff]  ;;  %v1673_v45 = vpack.c.bf16 %v84_v38, %v77_v37  ;;  %v83_v46 = vld [vmem:[%s3676_s1 + $0x208] sm:$0xff]  ;;  %v145_v47 = vld [vmem:[%s3676_s1 + $0x3f8] sm:$0xff]  ;;  %v1547_v51 = vpack.c.bf16 %v137_v43, %v130_v42 }
  0x1a   :  { %1536 = vmatpush1.bf16.msra.mxu0 %v1535_v15  ;;  %v152_v48 = vld [vmem:[%s3676_s1 + $0x430] sm:$0xff]  ;;  %v91_v49 = vld [vmem:[%s3676_s1 + $0x248] sm:$0xff]  ;;  %v98_v50 = vld [vmem:[%s3676_s1 + $0x280] sm:$0xff]  ;;  %v1675_v53 = vpack.c.bf16 %v83_v46, %v76_v44 }
  0x1b   :  { %1664 = vmatpush1.bf16.msra.mxu1 %v1663_v16  ;;  %1538 = vmatprep.subr.bf16.mxu0 %v1537_v17  ;;  %v1549_v54 = vpack.c.bf16 %v152_v48, %v145_v47  ;;  %v144_v55 = vld [vmem:[%s3676_s1 + $0x3f0] sm:$0xff]  ;;  %v151_v56 = vld [vmem:[%s3676_s1 + $0x428] sm:$0xff]  ;;  %v90_v57 = vld [vmem:[%s3676_s1 + $0x240] sm:$0xff]  ;;  %v1677_v59 = vpack.c.bf16 %v98_v50, %v91_v49 }
  0x1c   :  { %1666 = vmatprep.subr.bf16.mxu1 %v1665_v21  ;;  %v97_v60 = vld [vmem:[%s3676_s1 + $0x278] sm:$0xff]  ;;  %v159_v61 = vld [vmem:[%s3676_s1 + $0x468] sm:$0xff]  ;;  %v166_v62 = vld [vmem:[%s3676_s1 + $0x4a0] sm:$0xff]  ;;  %v1551_v1 = vpack.c.bf16 %v151_v56, %v144_v55 }
  0x1d   :  { %v105_v63 = vld [vmem:[%s3676_s1 + $0x2b8] sm:$0xff]  ;;  %v112_v0 = vld [vmem:[%s3676_s1 + $0x2f0] sm:$0xff]  ;;  %v1679_v2 = vpack.c.bf16 %v97_v60, %v90_v57  ;;  %v1553_v4 = vpack.c.bf16 %v166_v62, %v159_v61  ;;  %v158_v5 = vld [vmem:[%s3676_s1 + $0x460] sm:$0xff] }
  0x1e   :  { %1540 = vmatpush1.bf16.msra.mxu0 %v1539_v27  ;;  %v165_v6 = vld [vmem:[%s3676_s1 + $0x498] sm:$0xff]  ;;  %v104_v7 = vld [vmem:[%s3676_s1 + $0x2b0] sm:$0xff]  ;;  %v1681_v8 = vpack.c.bf16 %v112_v0, %v105_v63  ;;  %v111_v9 = vld [vmem:[%s3676_s1 + $0x2e8] sm:$0xff] }
  0x1f   :  { %1668 = vmatpush1.bf16.msra.mxu1 %v1667_v28  ;;  %1542 = vmatprep.subr.bf16.mxu0 %v1541_v29  ;;  %v173_v10 = vld [vmem:[%s3676_s1 + $0x4d8] sm:$0xff]  ;;  %v180_v11 = vld [vmem:[%s3676_s1 + $0x510] sm:$0xff]  ;;  %v119_v12 = vld [vmem:[%s3676_s1 + $0x328] sm:$0xff]  ;;  %v1555_v14 = vpack.c.bf16 %v165_v6, %v158_v5  ;;  %v1683_v15 = vpack.c.bf16 %v111_v9, %v104_v7 }
  0x20   :  { %1670 = vmatprep.subr.bf16.mxu1 %v1669_v33  ;;  %v126_v13 = vld [vmem:[%s3676_s1 + $0x360] sm:$0xff]  ;;  %v1557_v16 = vpack.c.bf16 %v180_v11, %v173_v10  ;;  %v172_v17 = vld [vmem:[%s3676_s1 + $0x4d0] sm:$0xff]  ;;  %v179_v18 = vld [vmem:[%s3676_s1 + $0x508] sm:$0xff] }
  0x21   :  { %v118_v19 = vld [vmem:[%s3676_s1 + $0x320] sm:$0xff]  ;;  %v1685_v20 = vpack.c.bf16 %v126_v13, %v119_v12  ;;  %v125_v21 = vld [vmem:[%s3676_s1 + $0x358] sm:$0xff]  ;;  %v187_v22 = vld [vmem:[%s3676_s1 + $0x548] sm:$0xff]  ;;  %v1559_v26 = vpack.c.bf16 %v179_v18, %v172_v17 }
  0x22   :  { %1544 = vmatpush1.bf16.msra.mxu0 %v1543_v39  ;;  %v194_v23 = vld [vmem:[%s3676_s1 + $0x580] sm:$0xff]  ;;  %v133_v24 = vld [vmem:[%s3676_s1 + $0x398] sm:$0xff]  ;;  %v140_v25 = vld [vmem:[%s3676_s1 + $0x3d0] sm:$0xff]  ;;  %v1687_v27 = vpack.c.bf16 %v125_v21, %v118_v19 }
  0x23   :  { %1672 = vmatpush1.bf16.msra.mxu1 %v1671_v40  ;;  %1546 = vmatprep.subr.bf16.mxu0 %v1545_v41  ;;  %v1561_v28 = vpack.c.bf16 %v194_v23, %v187_v22  ;;  %v186_v29 = vld [vmem:[%s3676_s1 + $0x540] sm:$0xff]  ;;  %v193_v30 = vld [vmem:[%s3676_s1 + $0x578] sm:$0xff]  ;;  %v132_v31 = vld [vmem:[%s3676_s1 + $0x390] sm:$0xff]  ;;  %v1689_v32 = vpack.c.bf16 %v140_v25, %v133_v24 }
  0x24   :  { %1674 = vmatprep.subr.bf16.mxu1 %v1673_v45  ;;  %v139_v33 = vld [vmem:[%s3676_s1 + $0x3c8] sm:$0xff]  ;;  %v201_v34 = vld [vmem:[%s3676_s1 + $0x5b8] sm:$0xff]  ;;  %v208_v35 = vld [vmem:[%s3676_s1 + $0x5f0] sm:$0xff]  ;;  %v1563_v38 = vpack.c.bf16 %v193_v30, %v186_v29 }
  0x25   :  { %v147_v36 = vld [vmem:[%s3676_s1 + $0x408] sm:$0xff]  ;;  %v154_v37 = vld [vmem:[%s3676_s1 + $0x440] sm:$0xff]  ;;  %v1691_v39 = vpack.c.bf16 %v139_v33, %v132_v31  ;;  %v1565_v40 = vpack.c.bf16 %v208_v35, %v201_v34  ;;  %v200_v41 = vld [vmem:[%s3676_s1 + $0x5b0] sm:$0xff] }
  0x26   :  { %1548 = vmatpush1.bf16.msra.mxu0 %v1547_v51  ;;  %v207_v42 = vld [vmem:[%s3676_s1 + $0x5e8] sm:$0xff]  ;;  %v146_v43 = vld [vmem:[%s3676_s1 + $0x400] sm:$0xff]  ;;  %v1693_v44 = vpack.c.bf16 %v154_v37, %v147_v36  ;;  %v153_v45 = vld [vmem:[%s3676_s1 + $0x438] sm:$0xff] }
  0x27   :  { %1676 = vmatpush1.bf16.msra.mxu1 %v1675_v53  ;;  %1550 = vmatprep.subr.bf16.mxu0 %v1549_v54  ;;  %v215_v46 = vld [vmem:[%s3676_s1 + $0x628] sm:$0xff]  ;;  %v222_v47 = vld [vmem:[%s3676_s1 + $0x660] sm:$0xff]  ;;  %v161_v48 = vld [vmem:[%s3676_s1 + $0x478] sm:$0xff]  ;;  %v1567_v50 = vpack.c.bf16 %v207_v42, %v200_v41  ;;  %v1695_v51 = vpack.c.bf16 %v153_v45, %v146_v43 }
  0x28   :  { %1678 = vmatprep.subr.bf16.mxu1 %v1677_v59  ;;  %v168_v49 = vld [vmem:[%s3676_s1 + $0x4b0] sm:$0xff]  ;;  %v1569_v53 = vpack.c.bf16 %v222_v47, %v215_v46  ;;  %v214_v54 = vld [vmem:[%s3676_s1 + $0x620] sm:$0xff]  ;;  %v221_v55 = vld [vmem:[%s3676_s1 + $0x658] sm:$0xff] }
  0x29   :  { %v160_v56 = vld [vmem:[%s3676_s1 + $0x470] sm:$0xff]  ;;  %v1697_v57 = vpack.c.bf16 %v168_v49, %v161_v48  ;;  %v167_v59 = vld [vmem:[%s3676_s1 + $0x4a8] sm:$0xff]  ;;  %v229_v60 = vld [vmem:[%s3676_s1 + $0x698] sm:$0xff]  ;;  %v1571_v0 = vpack.c.bf16 %v221_v55, %v214_v54 }
  0x2a   :  { %1552 = vmatpush1.bf16.msra.mxu0 %v1551_v1  ;;  %v236_v61 = vld [vmem:[%s3676_s1 + $0x6d0] sm:$0xff]  ;;  %v175_v62 = vld [vmem:[%s3676_s1 + $0x4e8] sm:$0xff]  ;;  %v182_v63 = vld [vmem:[%s3676_s1 + $0x520] sm:$0xff]  ;;  %v1699_v1 = vpack.c.bf16 %v167_v59, %v160_v56 }
  0x2b   :  { %1680 = vmatpush1.bf16.msra.mxu1 %v1679_v2  ;;  %1554 = vmatprep.subr.bf16.mxu0 %v1553_v4  ;;  %v1573_v2 = vpack.c.bf16 %v236_v61, %v229_v60  ;;  %v228_v4 = vld [vmem:[%s3676_s1 + $0x690] sm:$0xff]  ;;  %v235_v5 = vld [vmem:[%s3676_s1 + $0x6c8] sm:$0xff]  ;;  %v174_v6 = vld [vmem:[%s3676_s1 + $0x4e0] sm:$0xff]  ;;  %v1701_v7 = vpack.c.bf16 %v182_v63, %v175_v62 }
  0x2c   :  { %1682 = vmatprep.subr.bf16.mxu1 %v1681_v8  ;;  %v181_v8 = vld [vmem:[%s3676_s1 + $0x518] sm:$0xff]  ;;  %v243_v9 = vld [vmem:[%s3676_s1 + $0x708] sm:$0xff]  ;;  %v250_v10 = vld [vmem:[%s3676_s1 + $0x740] sm:$0xff] }
  0x2d   :  { %v189_v11 = vld [vmem:[%s3676_s1 + $0x558] sm:$0xff]  ;;  %v196_v12 = vld [vmem:[%s3676_s1 + $0x590] sm:$0xff]  ;;  %v2499_v13 = vld [vmem:[%s3677_s0 + $0x8] sm:$0xff] }
  0x2e   :  { %1556 = vmatpush1.bf16.msra.mxu0 %v1555_v14  ;;  %v1575_v14 = vpack.c.bf16 %v235_v5, %v228_v4  ;;  %v242_v17 = vld [vmem:[%s3676_s1 + $0x700] sm:$0xff]  ;;  %v249_v18 = vld [vmem:[%s3676_s1 + $0x738] sm:$0xff]  ;;  %v188_v19 = vld [vmem:[%s3676_s1 + $0x550] sm:$0xff] }
  0x2f   :  { %1684 = vmatpush1.bf16.msra.mxu1 %v1683_v15  ;;  %1558 = vmatprep.subr.bf16.mxu0 %v1557_v16  ;;  %v1703_v15 = vpack.c.bf16 %v181_v8, %v174_v6  ;;  %v1577_v16 = vpack.c.bf16 %v250_v10, %v243_v9  ;;  %v195_v21 = vld [vmem:[%s3676_s1 + $0x588] sm:$0xff]  ;;  %v257_v22 = vld [vmem:[%s3676_s1 + $0x778] sm:$0xff]  ;;  %v264_v23 = vld [vmem:[%s3676_s1 + $0x7b0] sm:$0xff] }
  0x30   :  { %1686 = vmatprep.subr.bf16.mxu1 %v1685_v20  ;;  %v1705_v20 = vpack.c.bf16 %v196_v12, %v189_v11  ;;  %v203_v24 = vld [vmem:[%s3676_s1 + $0x5c8] sm:$0xff]  ;;  %v210_v25 = vld [vmem:[%s3676_s1 + $0x600] sm:$0xff]  ;;  %v1581_v29 = vpack.c.bf16 %v264_v23, %v257_v22  ;;  %v256_v30 = vld [vmem:[%s3676_s1 + $0x770] sm:$0xff] }
  0x31   :  { %v263_v31 = vld [vmem:[%s3676_s1 + $0x7a8] sm:$0xff]  ;;  %v1709_v33 = vpack.c.bf16 %v210_v25, %v203_v24  ;;  %v209_v34 = vld [vmem:[%s3676_s1 + $0x5f8] sm:$0xff]  ;;  %v278_v36 = vld [vmem:[%s3676_s1 + $0x820] sm:$0xff] }
  0x32   :  { %1560 = vmatpush1.bf16.msra.mxu0 %v1559_v26  ;;  %v1579_v26 = vpack.c.bf16 %v249_v18, %v242_v17  ;;  %v271_v35 = vld [vmem:[%s3676_s1 + $0x7e8] sm:$0xff]  ;;  %v217_v37 = vld [vmem:[%s3676_s1 + $0x638] sm:$0xff]  ;;  %v270_v42 = vld [vmem:[%s3676_s1 + $0x7e0] sm:$0xff] }
  0x33   :  { %1688 = vmatpush1.bf16.msra.mxu1 %v1687_v27  ;;  %1562 = vmatprep.subr.bf16.mxu0 %v1561_v28  ;;  %v2527_v27 = vcombine.high %v2499_v13, %v2499_v13  ;;  %v1707_v28 = vpack.c.bf16 %v195_v21, %v188_v19  ;;  %v1585_v41 = vpack.c.bf16 %v278_v36, %v271_v35  ;;  %v277_v43 = vld [vmem:[%s3676_s1 + $0x818] sm:$0xff]  ;;  %v223_v46 = vld [vmem:[%s3676_s1 + $0x668] sm:$0xff]  ;;  %v292_v48 = vld [vmem:[%s3676_s1 + $0x890] sm:$0xff] }
  0x34   :  { %1690 = vmatprep.subr.bf16.mxu1 %v1689_v32  ;;  %v202_v32 = vld [vmem:[%s3676_s1 + $0x5c0] sm:$0xff]  ;;  %v285_v47 = vld [vmem:[%s3676_s1 + $0x858] sm:$0xff]  ;;  %v231_v49 = vld [vmem:[%s3676_s1 + $0x6a8] sm:$0xff] }
  0x35   :  { %v1589_v54 = vpack.c.bf16 %v292_v48, %v285_v47  ;;  %v284_v55 = vld [vmem:[%s3676_s1 + $0x850] sm:$0xff]  ;;  %v291_v56 = vld [vmem:[%s3676_s1 + $0x888] sm:$0xff]  ;;  %v237_v60 = vld [vmem:[%s3676_s1 + $0x6d8] sm:$0xff] }
  0x36   :  { %1564 = vmatpush1.bf16.msra.mxu0 %v1563_v38  ;;  %v224_v38 = vld [vmem:[%s3676_s1 + $0x670] sm:$0xff]  ;;  %v299_v61 = vld [vmem:[%s3676_s1 + $0x8c8] sm:$0xff]  ;;  %v306_v62 = vld [vmem:[%s3676_s1 + $0x900] sm:$0xff] }
  0x37   :  { %1692 = vmatpush1.bf16.msra.mxu1 %v1691_v39  ;;  %1566 = vmatprep.subr.bf16.mxu0 %v1565_v40  ;;  %v1583_v39 = vpack.c.bf16 %v263_v31, %v256_v30  ;;  %v1711_v40 = vpack.c.bf16 %v209_v34, %v202_v32  ;;  %v1713_v45 = vpack.c.bf16 %v224_v38, %v217_v37  ;;  %v245_v63 = vld [vmem:[%s3676_s1 + $0x718] sm:$0xff]  ;;  %v298_v5 = vld [vmem:[%s3676_s1 + $0x8c0] sm:$0xff]  ;;  %v251_v9 = vld [vmem:[%s3676_s1 + $0x748] sm:$0xff] }
  0x38   :  { %1694 = vmatprep.subr.bf16.mxu1 %v1693_v44  ;;  %v216_v44 = vld [vmem:[%s3676_s1 + $0x630] sm:$0xff]  ;;  %v1593_v4 = vpack.c.bf16 %v306_v62, %v299_v61  ;;  %v305_v6 = vld [vmem:[%s3676_s1 + $0x8f8] sm:$0xff]  ;;  %v259_v12 = vld [vmem:[%s3676_s1 + $0x788] sm:$0xff] }
  0x39   :  { %v313_v10 = vld [vmem:[%s3676_s1 + $0x938] sm:$0xff]  ;;  %v320_v11 = vld [vmem:[%s3676_s1 + $0x970] sm:$0xff]  ;;  %v319_v19 = vld [vmem:[%s3676_s1 + $0x968] sm:$0xff] }
  0x3a   :  { %1568 = vmatpush1.bf16.msra.mxu0 %v1567_v50  ;;  %v238_v50 = vld [vmem:[%s3676_s1 + $0x6e0] sm:$0xff]  ;;  %v1597_v17 = vpack.c.bf16 %v320_v11, %v313_v10  ;;  %v312_v18 = vld [vmem:[%s3676_s1 + $0x930] sm:$0xff]  ;;  %v265_v22 = vld [vmem:[%s3676_s1 + $0x7b8] sm:$0xff] }
  0x3b   :  { %1696 = vmatpush1.bf16.msra.mxu1 %v1695_v51  ;;  %1570 = vmatprep.subr.bf16.mxu0 %v1569_v53  ;;  %v1587_v51 = vpack.c.bf16 %v277_v43, %v270_v42  ;;  %v1715_v53 = vpack.c.bf16 %v223_v46, %v216_v44  ;;  %v1717_v59 = vpack.c.bf16 %v238_v50, %v231_v49  ;;  %v327_v23 = vld [vmem:[%s3676_s1 + $0x9a8] sm:$0xff]  ;;  %v334_v24 = vld [vmem:[%s3676_s1 + $0x9e0] sm:$0xff]  ;;  %v273_v25 = vld [vmem:[%s3676_s1 + $0x7f8] sm:$0xff] }
  0x3c   :  { %1698 = vmatprep.subr.bf16.mxu1 %v1697_v57  ;;  %v230_v57 = vld [vmem:[%s3676_s1 + $0x6a0] sm:$0xff]  ;;  %v1601_v30 = vpack.c.bf16 %v334_v24, %v327_v23  ;;  %v333_v32 = vld [vmem:[%s3676_s1 + $0x9d8] sm:$0xff]  ;;  %v348_v36 = vld [vmem:[%s3676_s1 + $0xa50] sm:$0xff] }
  0x3d   :  { %v326_v31 = vld [vmem:[%s3676_s1 + $0x9a0] sm:$0xff]  ;;  %v341_v35 = vld [vmem:[%s3676_s1 + $0xa18] sm:$0xff]  ;;  %v287_v37 = vld [vmem:[%s3676_s1 + $0x868] sm:$0xff] }
  0x3e   :  { %1572 = vmatpush1.bf16.msra.mxu0 %v1571_v0  ;;  %v252_v0 = vld [vmem:[%s3676_s1 + $0x750] sm:$0xff]  ;;  %v294_v38 = vld [vmem:[%s3676_s1 + $0x8a0] sm:$0xff]  ;;  %v347_v43 = vld [vmem:[%s3676_s1 + $0xa48] sm:$0xff] }
  0x3f   :  { %1700 = vmatpush1.bf16.msra.mxu1 %v1699_v1  ;;  %1574 = vmatprep.subr.bf16.mxu0 %v1573_v2  ;;  %v1591_v1 = vpack.c.bf16 %v291_v56, %v284_v55  ;;  %v1719_v2 = vpack.c.bf16 %v237_v60, %v230_v57  ;;  %v1721_v8 = vpack.c.bf16 %v252_v0, %v245_v63  ;;  %v340_v42 = vld [vmem:[%s3676_s1 + $0xa10] sm:$0xff]  ;;  %v286_v44 = vld [vmem:[%s3676_s1 + $0x860] sm:$0xff]  ;;  %v293_v46 = vld [vmem:[%s3676_s1 + $0x898] sm:$0xff] }
  0x40   :  { %1702 = vmatprep.subr.bf16.mxu1 %v1701_v7  ;;  %v244_v7 = vld [vmem:[%s3676_s1 + $0x710] sm:$0xff]  ;;  %v355_v47 = vld [vmem:[%s3676_s1 + $0xa88] sm:$0xff]  ;;  %v362_v48 = vld [vmem:[%s3676_s1 + $0xac0] sm:$0xff] }
  0x41   :  { %v301_v49 = vld [vmem:[%s3676_s1 + $0x8d8] sm:$0xff]  ;;  %v308_v50 = vld [vmem:[%s3676_s1 + $0x910] sm:$0xff]  ;;  %v354_v55 = vld [vmem:[%s3676_s1 + $0xa80] sm:$0xff] }
  0x42   :  { %1576 = vmatpush1.bf16.msra.mxu0 %v1575_v14  ;;  %v266_v14 = vld [vmem:[%s3676_s1 + $0x7c0] sm:$0xff]  ;;  %v361_v56 = vld [vmem:[%s3676_s1 + $0xab8] sm:$0xff]  ;;  %v300_v57 = vld [vmem:[%s3676_s1 + $0x8d0] sm:$0xff] }
  0x43   :  { %1704 = vmatpush1.bf16.msra.mxu1 %v1703_v15  ;;  %1578 = vmatprep.subr.bf16.mxu0 %v1577_v16  ;;  %v1595_v15 = vpack.c.bf16 %v305_v6, %v298_v5  ;;  %v1723_v16 = vpack.c.bf16 %v251_v9, %v244_v7  ;;  %v1725_v21 = vpack.c.bf16 %v266_v14, %v259_v12  ;;  %v307_v60 = vld [vmem:[%s3676_s1 + $0x908] sm:$0xff]  ;;  %v369_v61 = vld [vmem:[%s3676_s1 + $0xaf8] sm:$0xff]  ;;  %v376_v62 = vld [vmem:[%s3676_s1 + $0xb30] sm:$0xff] }
  0x44   :  { %1706 = vmatprep.subr.bf16.mxu1 %v1705_v20  ;;  %v258_v20 = vld [vmem:[%s3676_s1 + $0x780] sm:$0xff]  ;;  %v315_v63 = vld [vmem:[%s3676_s1 + $0x948] sm:$0xff]  ;;  %v368_v5 = vld [vmem:[%s3676_s1 + $0xaf0] sm:$0xff] }
  0x45   :  { %599 = vmatmul.mubr.f32.vlgmr.msra.gmra.mrb[0].mxu0 %v2196_v52  ;;  %v322_v0 = vld [vmem:[%s3676_s1 + $0x980] sm:$0xff]  ;;  %v375_v6 = vld [vmem:[%s3676_s1 + $0xb28] sm:$0xff]  ;;  %v321_v9 = vld [vmem:[%s3676_s1 + $0x978] sm:$0xff] }
  0x46   :  { %1580 = vmatpush1.bf16.msra.mxu0 %v1579_v26  ;;  %669 = vmatprep.mubr.f32.mxu0 %v2527_v27  ;;  %v280_v26 = vld [vmem:[%s3676_s1 + $0x830] sm:$0xff]  ;;  %v314_v7 = vld [vmem:[%s3676_s1 + $0x940] sm:$0xff]  ;;  %v383_v10 = vld [vmem:[%s3676_s1 + $0xb68] sm:$0xff] }
  0x47   :  { %1708 = vmatpush1.bf16.msra.mxu1 %v1707_v28  ;;  %1582 = vmatprep.subr.bf16.mxu0 %v1581_v29  ;;  %v1599_v28 = vpack.c.bf16 %v319_v19, %v312_v18  ;;  %v1727_v29 = vpack.c.bf16 %v265_v22, %v258_v20  ;;  %v1729_v34 = vpack.c.bf16 %v280_v26, %v273_v25  ;;  %v390_v11 = vld [vmem:[%s3676_s1 + $0xba0] sm:$0xff]  ;;  %v329_v12 = vld [vmem:[%s3676_s1 + $0x9b8] sm:$0xff]  ;;  %v336_v14 = vld [vmem:[%s3676_s1 + $0x9f0] sm:$0xff] }
  0x48   :  { %1710 = vmatprep.subr.bf16.mxu1 %v1709_v33  ;;  %v272_v33 = vld [vmem:[%s3676_s1 + $0x7f0] sm:$0xff]  ;;  %v382_v18 = vld [vmem:[%s3676_s1 + $0xb60] sm:$0xff]  ;;  %v389_v19 = vld [vmem:[%s3676_s1 + $0xb98] sm:$0xff] }
  0x49   :  { %v328_v20 = vld [vmem:[%s3676_s1 + $0x9b0] sm:$0xff]  ;;  %v335_v22 = vld [vmem:[%s3676_s1 + $0x9e8] sm:$0xff]  ;;  %v397_v23 = vld [vmem:[%s3676_s1 + $0xbd8] sm:$0xff] }
  0x4a   :  { %1584 = vmatpush1.bf16.msra.mxu0 %v1583_v39  ;;  %v1603_v39 = vpack.c.bf16 %v333_v32, %v326_v31  ;;  %v404_v24 = vld [vmem:[%s3676_s1 + $0xc10] sm:$0xff]  ;;  %v343_v25 = vld [vmem:[%s3676_s1 + $0xa28] sm:$0xff]  ;;  %v350_v26 = vld [vmem:[%s3676_s1 + $0xa60] sm:$0xff] }
  0x4b   :  { %1712 = vmatpush1.bf16.msra.mxu1 %v1711_v40  ;;  %1586 = vmatprep.subr.bf16.mxu0 %v1585_v41  ;;  %v1605_v41 = vpack.c.bf16 %v348_v36, %v341_v35  ;;  %v396_v31 = vld [vmem:[%s3676_s1 + $0xbd0] sm:$0xff]  ;;  %v403_v32 = vld [vmem:[%s3676_s1 + $0xc08] sm:$0xff]  ;;  %v418_v36 = vld [vmem:[%s3676_s1 + $0xc80] sm:$0xff] }
  0x4c   :  { %1714 = vmatprep.subr.bf16.mxu1 %v1713_v45  ;;  %v1733_v45 = vpack.c.bf16 %v294_v38, %v287_v37  ;;  %v411_v35 = vld [vmem:[%s3676_s1 + $0xc48] sm:$0xff]  ;;  %v357_v37 = vld [vmem:[%s3676_s1 + $0xa98] sm:$0xff]  ;;  %v364_v38 = vld [vmem:[%s3676_s1 + $0xad0] sm:$0xff] }
  0x4e   :  { %1588 = vmatpush1.bf16.msra.mxu0 %v1587_v51  ;;  %v1607_v51 = vpack.c.bf16 %v347_v43, %v340_v42  ;;  %v410_v42 = vld [vmem:[%s3676_s1 + $0xc40] sm:$0xff]  ;;  %v417_v43 = vld [vmem:[%s3676_s1 + $0xc78] sm:$0xff] }
  0x4f   :  { %1716 = vmatpush1.bf16.msra.mxu1 %v1715_v53  ;;  %1590 = vmatprep.subr.bf16.mxu0 %v1589_v54  ;;  %v1735_v53 = vpack.c.bf16 %v293_v46, %v286_v44  ;;  %v1609_v54 = vpack.c.bf16 %v362_v48, %v355_v47  ;;  %v356_v44 = vld [vmem:[%s3676_s1 + $0xa90] sm:$0xff]  ;;  %v363_v46 = vld [vmem:[%s3676_s1 + $0xac8] sm:$0xff]  ;;  %v425_v47 = vld [vmem:[%s3676_s1 + $0xcb8] sm:$0xff] }
  0x50   :  { %1718 = vmatprep.subr.bf16.mxu1 %v1717_v59  ;;  %v1737_v59 = vpack.c.bf16 %v308_v50, %v301_v49  ;;  %v432_v48 = vld [vmem:[%s3676_s1 + $0xcf0] sm:$0xff]  ;;  %v371_v49 = vld [vmem:[%s3676_s1 + $0xb08] sm:$0xff]  ;;  %v378_v50 = vld [vmem:[%s3676_s1 + $0xb40] sm:$0xff] }
  0x52   :  { %1592 = vmatpush1.bf16.msra.mxu0 %v1591_v1  ;;  %v1611_v1 = vpack.c.bf16 %v361_v56, %v354_v55  ;;  %v424_v55 = vld [vmem:[%s3676_s1 + $0xcb0] sm:$0xff]  ;;  %v431_v56 = vld [vmem:[%s3676_s1 + $0xce8] sm:$0xff] }
  0x53   :  { %1720 = vmatpush1.bf16.msra.mxu1 %v1719_v2  ;;  %1594 = vmatprep.subr.bf16.mxu0 %v1593_v4  ;;  %v1739_v2 = vpack.c.bf16 %v307_v60, %v300_v57  ;;  %v1613_v4 = vpack.c.bf16 %v376_v62, %v369_v61  ;;  %v370_v57 = vld [vmem:[%s3676_s1 + $0xb00] sm:$0xff]  ;;  %v377_v60 = vld [vmem:[%s3676_s1 + $0xb38] sm:$0xff]  ;;  %v439_v61 = vld [vmem:[%s3676_s1 + $0xd28] sm:$0xff] }
  0x54   :  { %1722 = vmatprep.subr.bf16.mxu1 %v1721_v8  ;;  %v1741_v8 = vpack.c.bf16 %v322_v0, %v315_v63  ;;  %v446_v62 = vld [vmem:[%s3676_s1 + $0xd60] sm:$0xff]  ;;  %v385_v63 = vld [vmem:[%s3676_s1 + $0xb78] sm:$0xff]  ;;  %v392_v0 = vld [vmem:[%s3676_s1 + $0xbb0] sm:$0xff] }
  0x56   :  { %1596 = vmatpush1.bf16.msra.mxu0 %v1595_v15  ;;  %812 = vmatmul.mubr.f32.vlgmr.msra.gmra.mrb[2].mxu1 %v2196_v52  ;;  %v279_v52 = vld [vmem:[%s3676_s1 + $0x828] sm:$0xff]  ;;  %v1615_v15 = vpack.c.bf16 %v375_v6, %v368_v5  ;;  %v438_v5 = vld [vmem:[%s3676_s1 + $0xd20] sm:$0xff]  ;;  %v445_v6 = vld [vmem:[%s3676_s1 + $0xd58] sm:$0xff] }
  0x57   :  { %1724 = vmatpush1.bf16.msra.mxu1 %v1723_v16  ;;  %1598 = vmatprep.subr.bf16.mxu0 %v1597_v17  ;;  %v1731_v40 = vpack.c.bf16 %v279_v52, %v272_v33  ;;  %v1743_v16 = vpack.c.bf16 %v321_v9, %v314_v7  ;;  %v1617_v17 = vpack.c.bf16 %v390_v11, %v383_v10  ;;  %v342_v33 = vld [vmem:[%s3676_s1 + $0xa20] sm:$0xff]  ;;  %v349_v52 = vld [vmem:[%s3676_s1 + $0xa58] sm:$0xff]  ;;  %v384_v7 = vld [vmem:[%s3676_s1 + $0xb70] sm:$0xff] }
  0x58   :  { %1726 = vmatprep.subr.bf16.mxu1 %v1725_v21  ;;  %882 = vmatprep.mubr.f32.mxu1 %v2527_v27  ;;  %v1745_v21 = vpack.c.bf16 %v336_v14, %v329_v12  ;;  %v391_v9 = vld [vmem:[%s3676_s1 + $0xba8] sm:$0xff]  ;;  %v453_v10 = vld [vmem:[%s3676_s1 + $0xd98] sm:$0xff]  ;;  %v460_v11 = vld [vmem:[%s3676_s1 + $0xdd0] sm:$0xff] }
  0x59   :  { %v399_v12 = vld [vmem:[%s3676_s1 + $0xbe8] sm:$0xff]  ;;  %v406_v14 = vld [vmem:[%s3676_s1 + $0xc20] sm:$0xff] }
  0x5a   :  { %1600 = vmatpush1.bf16.msra.mxu0 %v1599_v28  ;;  %v1619_v28 = vpack.c.bf16 %v389_v19, %v382_v18  ;;  %v452_v18 = vld [vmem:[%s3676_s1 + $0xd90] sm:$0xff]  ;;  %v459_v19 = vld [vmem:[%s3676_s1 + $0xdc8] sm:$0xff] }
  0x5b   :  { %1728 = vmatpush1.bf16.msra.mxu1 %v1727_v29  ;;  %1602 = vmatprep.subr.bf16.mxu0 %v1601_v30  ;;  %v1747_v29 = vpack.c.bf16 %v335_v22, %v328_v20  ;;  %v1621_v30 = vpack.c.bf16 %v404_v24, %v397_v23  ;;  %v398_v20 = vld [vmem:[%s3676_s1 + $0xbe0] sm:$0xff]  ;;  %v405_v22 = vld [vmem:[%s3676_s1 + $0xc18] sm:$0xff]  ;;  %v23_v23 = vld [vmem:[%s3676_s1 + $0x28] sm:$0xff] }
  0x5c   :  { %1730 = vmatprep.subr.bf16.mxu1 %v1729_v34  ;;  %v1749_v34 = vpack.c.bf16 %v350_v26, %v343_v25  ;;  %v30_v24 = vld [vmem:[%s3676_s1 + $0x60] sm:$0xff]  ;;  %v413_v25 = vld [vmem:[%s3676_s1 + $0xc58] sm:$0xff]  ;;  %v420_v26 = vld [vmem:[%s3676_s1 + $0xc90] sm:$0xff] }
  0x5e   :  { %1604 = vmatpush1.bf16.msra.mxu0 %v1603_v39  ;;  %v1623_v39 = vpack.c.bf16 %v403_v32, %v396_v31  ;;  %v412_v31 = vld [vmem:[%s3676_s1 + $0xc50] sm:$0xff]  ;;  %v22_v32 = vld [vmem:[%s3676_s1 + $0x20] sm:$0xff] }
  0x5f   :  { %1732 = vmatpush1.bf16.msra.mxu1 %v1731_v40  ;;  %1606 = vmatprep.subr.bf16.mxu0 %v1605_v41  ;;  %v1751_v40 = vpack.c.bf16 %v349_v52, %v342_v33  ;;  %v1625_v41 = vpack.c.bf16 %v418_v36, %v411_v35  ;;  %v29_v33 = vld [vmem:[%s3676_s1 + $0x58] sm:$0xff]  ;;  %v419_v52 = vld [vmem:[%s3676_s1 + $0xc88] sm:$0xff]  ;;  %v44_v36 = vld [vmem:[%s3676_s1 + $0xd0] sm:$0xff] }
  0x60   :  { %1734 = vmatprep.subr.bf16.mxu1 %v1733_v45  ;;  %v1753_v45 = vpack.c.bf16 %v364_v38, %v357_v37  ;;  %v37_v35 = vld [vmem:[%s3676_s1 + $0x98] sm:$0xff]  ;;  %v427_v37 = vld [vmem:[%s3676_s1 + $0xcc8] sm:$0xff]  ;;  %v434_v38 = vld [vmem:[%s3676_s1 + $0xd00] sm:$0xff] }
  0x62   :  { %1608 = vmatpush1.bf16.msra.mxu0 %v1607_v51  ;;  %v1627_v51 = vpack.c.bf16 %v417_v43, %v410_v42  ;;  %v426_v42 = vld [vmem:[%s3676_s1 + $0xcc0] sm:$0xff]  ;;  %v36_v43 = vld [vmem:[%s3676_s1 + $0x90] sm:$0xff] }
  0x63   :  { %1736 = vmatpush1.bf16.msra.mxu1 %v1735_v53  ;;  %1610 = vmatprep.subr.bf16.mxu0 %v1609_v54  ;;  %v1755_v53 = vpack.c.bf16 %v363_v46, %v356_v44  ;;  %v1629_v54 = vpack.c.bf16 %v432_v48, %v425_v47  ;;  %v43_v44 = vld [vmem:[%s3676_s1 + $0xc8] sm:$0xff]  ;;  %v433_v46 = vld [vmem:[%s3676_s1 + $0xcf8] sm:$0xff]  ;;  %v58_v48 = vld [vmem:[%s3676_s1 + $0x140] sm:$0xff] }
  0x64   :  { %1738 = vmatprep.subr.bf16.mxu1 %v1737_v59  ;;  %v1757_v59 = vpack.c.bf16 %v378_v50, %v371_v49  ;;  %v51_v47 = vld [vmem:[%s3676_s1 + $0x108] sm:$0xff]  ;;  %v441_v49 = vld [vmem:[%s3676_s1 + $0xd38] sm:$0xff]  ;;  %v448_v50 = vld [vmem:[%s3676_s1 + $0xd70] sm:$0xff] }
  0x66   :  { %1612 = vmatpush1.bf16.msra.mxu0 %v1611_v1  ;;  %v1631_v1 = vpack.c.bf16 %v431_v56, %v424_v55  ;;  %v440_v55 = vld [vmem:[%s3676_s1 + $0xd30] sm:$0xff]  ;;  %v50_v56 = vld [vmem:[%s3676_s1 + $0x100] sm:$0xff] }
  0x67   :  { %1740 = vmatpush1.bf16.msra.mxu1 %v1739_v2  ;;  %1614 = vmatprep.subr.bf16.mxu0 %v1613_v4  ;;  %v1759_v2 = vpack.c.bf16 %v377_v60, %v370_v57  ;;  %v1633_v4 = vpack.c.bf16 %v446_v62, %v439_v61  ;;  %v57_v57 = vld [vmem:[%s3676_s1 + $0x138] sm:$0xff]  ;;  %v447_v60 = vld [vmem:[%s3676_s1 + $0xd68] sm:$0xff]  ;;  %v72_v62 = vld [vmem:[%s3676_s1 + $0x1b0] sm:$0xff] }
  0x68   :  { %1742 = vmatprep.subr.bf16.mxu1 %v1741_v8  ;;  %v1761_v8 = vpack.c.bf16 %v392_v0, %v385_v63  ;;  %v65_v61 = vld [vmem:[%s3676_s1 + $0x178] sm:$0xff]  ;;  %v455_v63 = vld [vmem:[%s3676_s1 + $0xda8] sm:$0xff]  ;;  %v462_v0 = vld [vmem:[%s3676_s1 + $0xde0] sm:$0xff] }
  0x6a   :  { %1616 = vmatpush1.bf16.msra.mxu0 %v1615_v15  ;;  %v1635_v15 = vpack.c.bf16 %v445_v6, %v438_v5  ;;  %v454_v5 = vld [vmem:[%s3676_s1 + $0xda0] sm:$0xff]  ;;  %v64_v6 = vld [vmem:[%s3676_s1 + $0x170] sm:$0xff] }
  0x6b   :  { %1744 = vmatpush1.bf16.msra.mxu1 %v1743_v16  ;;  %1618 = vmatprep.subr.bf16.mxu0 %v1617_v17  ;;  %v1763_v16 = vpack.c.bf16 %v391_v9, %v384_v7  ;;  %v1637_v17 = vpack.c.bf16 %v460_v11, %v453_v10  ;;  %v71_v7 = vld [vmem:[%s3676_s1 + $0x1a8] sm:$0xff]  ;;  %v461_v9 = vld [vmem:[%s3676_s1 + $0xdd8] sm:$0xff]  ;;  %v86_v11 = vld [vmem:[%s3676_s1 + $0x220] sm:$0xff] }
  0x6c   :  { %1746 = vmatprep.subr.bf16.mxu1 %v1745_v21  ;;  %v1765_v21 = vpack.c.bf16 %v406_v14, %v399_v12  ;;  %v79_v10 = vld [vmem:[%s3676_s1 + $0x1e8] sm:$0xff]  ;;  %v469_v12 = vld [vmem:[%s3676_s1 + $0xe18] sm:$0xff]  ;;  %v476_v14 = vld [vmem:[%s3676_s1 + $0xe50] sm:$0xff] }
  0x6e   :  { %1620 = vmatpush1.bf16.msra.mxu0 %v1619_v28  ;;  %v1639_v28 = vpack.c.bf16 %v459_v19, %v452_v18  ;;  %v468_v18 = vld [vmem:[%s3676_s1 + $0xe10] sm:$0xff]  ;;  %v78_v19 = vld [vmem:[%s3676_s1 + $0x1e0] sm:$0xff] }
  0x6f   :  { %1748 = vmatpush1.bf16.msra.mxu1 %v1747_v29  ;;  %1622 = vmatprep.subr.bf16.mxu0 %v1621_v30  ;;  %v1767_v29 = vpack.c.bf16 %v405_v22, %v398_v20  ;;  %v1801_v30 = vpack.c.bf16 %v30_v24, %v23_v23  ;;  %v85_v20 = vld [vmem:[%s3676_s1 + $0x218] sm:$0xff]  ;;  %v475_v22 = vld [vmem:[%s3676_s1 + $0xe48] sm:$0xff]  ;;  %v100_v24 = vld [vmem:[%s3676_s1 + $0x290] sm:$0xff] }
  0x70   :  { %1750 = vmatprep.subr.bf16.mxu1 %v1749_v34  ;;  %v1769_v34 = vpack.c.bf16 %v420_v26, %v413_v25  ;;  %v93_v23 = vld [vmem:[%s3676_s1 + $0x258] sm:$0xff]  ;;  %v483_v25 = vld [vmem:[%s3676_s1 + $0xe88] sm:$0xff]  ;;  %v490_v26 = vld [vmem:[%s3676_s1 + $0xec0] sm:$0xff] }
  0x72   :  { %1624 = vmatpush1.bf16.msra.mxu0 %v1623_v39  ;;  %v1803_v39 = vpack.c.bf16 %v29_v33, %v22_v32  ;;  %v92_v32 = vld [vmem:[%s3676_s1 + $0x250] sm:$0xff]  ;;  %v99_v33 = vld [vmem:[%s3676_s1 + $0x288] sm:$0xff] }
  0x73   :  { %1752 = vmatpush1.bf16.msra.mxu1 %v1751_v40  ;;  %1626 = vmatprep.subr.bf16.mxu0 %v1625_v41  ;;  %v1771_v40 = vpack.c.bf16 %v419_v52, %v412_v31  ;;  %v1805_v41 = vpack.c.bf16 %v44_v36, %v37_v35  ;;  %v482_v31 = vld [vmem:[%s3676_s1 + $0xe80] sm:$0xff]  ;;  %v489_v52 = vld [vmem:[%s3676_s1 + $0xeb8] sm:$0xff]  ;;  %v107_v35 = vld [vmem:[%s3676_s1 + $0x2c8] sm:$0xff] }
  0x74   :  { %1754 = vmatprep.subr.bf16.mxu1 %v1753_v45  ;;  %v1773_v45 = vpack.c.bf16 %v434_v38, %v427_v37  ;;  %v114_v36 = vld [vmem:[%s3676_s1 + $0x300] sm:$0xff]  ;;  %v497_v37 = vld [vmem:[%s3676_s1 + $0xef8] sm:$0xff]  ;;  %v504_v38 = vld [vmem:[%s3676_s1 + $0xf30] sm:$0xff] }
  0x76   :  { %1628 = vmatpush1.bf16.msra.mxu0 %v1627_v51  ;;  %v1807_v51 = vpack.c.bf16 %v43_v44, %v36_v43  ;;  %v106_v43 = vld [vmem:[%s3676_s1 + $0x2c0] sm:$0xff]  ;;  %v113_v44 = vld [vmem:[%s3676_s1 + $0x2f8] sm:$0xff] }
  0x77   :  { %1756 = vmatpush1.bf16.msra.mxu1 %v1755_v53  ;;  %1630 = vmatprep.subr.bf16.mxu0 %v1629_v54  ;;  %v1775_v53 = vpack.c.bf16 %v433_v46, %v426_v42  ;;  %v1809_v54 = vpack.c.bf16 %v58_v48, %v51_v47  ;;  %v496_v42 = vld [vmem:[%s3676_s1 + $0xef0] sm:$0xff]  ;;  %v121_v46 = vld [vmem:[%s3676_s1 + $0x338] sm:$0xff]  ;;  %v511_v48 = vld [vmem:[%s3676_s1 + $0xf68] sm:$0xff] }
  0x78   :  { %1758 = vmatprep.subr.bf16.mxu1 %v1757_v59  ;;  %v1777_v59 = vpack.c.bf16 %v448_v50, %v441_v49  ;;  %v128_v47 = vld [vmem:[%s3676_s1 + $0x370] sm:$0xff]  ;;  %v518_v49 = vld [vmem:[%s3676_s1 + $0xfa0] sm:$0xff]  ;;  %v1827_v50 = vpack.c.bf16 %v113_v44, %v106_v43  ;;  %v183_v43 = vld [vmem:[%s3676_s1 + $0x528] sm:$0xff] }
  0x79   :  { %v512_v44 = vld [vmem:[%s3676_s1 + $0xf70] sm:$0xff] }
  0x7a   :  { %1632 = vmatpush1.bf16.msra.mxu0 %v1631_v1  ;;  %v1811_v1 = vpack.c.bf16 %v57_v57, %v50_v56  ;;  %v127_v56 = vld [vmem:[%s3676_s1 + $0x368] sm:$0xff]  ;;  %v1797_v57 = vpack.c.bf16 %v518_v49, %v511_v48  ;;  %v136_v48 = vld [vmem:[%s3676_s1 + $0x3b0] sm:$0xff] }
  0x7b   :  { %1760 = vmatpush1.bf16.msra.mxu1 %v1759_v2  ;;  %1634 = vmatprep.subr.bf16.mxu0 %v1633_v4  ;;  %v1779_v2 = vpack.c.bf16 %v447_v60, %v440_v55  ;;  %v1813_v4 = vpack.c.bf16 %v72_v62, %v65_v61  ;;  %v120_v55 = vld [vmem:[%s3676_s1 + $0x330] sm:$0xff]  ;;  %v135_v60 = vld [vmem:[%s3676_s1 + $0x3a8] sm:$0xff]  ;;  %v142_v61 = vld [vmem:[%s3676_s1 + $0x3e0] sm:$0xff] }
  0x7c   :  { %1762 = vmatprep.subr.bf16.mxu1 %v1761_v8  ;;  %v1781_v8 = vpack.c.bf16 %v462_v0, %v455_v63  ;;  %v471_v62 = vld [vmem:[%s3676_s1 + $0xe28] sm:$0xff]  ;;  %v478_v63 = vld [vmem:[%s3676_s1 + $0xe60] sm:$0xff]  ;;  %v1831_v0 = vpack.c.bf16 %v127_v56, %v120_v55  ;;  %v197_v55 = vld [vmem:[%s3676_s1 + $0x598] sm:$0xff] }
  0x7d   :  { %v143_v49 = vld [vmem:[%s3676_s1 + $0x3e8] sm:$0xff]  ;;  %v24_v56 = vld [vmem:[%s3676_s1 + $0x30] sm:$0xff] }
  0x7e   :  { %1636 = vmatpush1.bf16.msra.mxu0 %v1635_v15  ;;  %v1815_v15 = vpack.c.bf16 %v71_v7, %v64_v6  ;;  %v470_v6 = vld [vmem:[%s3676_s1 + $0xe20] sm:$0xff]  ;;  %v1929_v7 = vpack.c.bf16 %v478_v63, %v471_v62  ;;  %v157_v63 = vld [vmem:[%s3676_s1 + $0x458] sm:$0xff] }
  0x7f   :  { %1764 = vmatpush1.bf16.msra.mxu1 %v1763_v16  ;;  %1638 = vmatprep.subr.bf16.mxu0 %v1637_v17  ;;  %v1783_v16 = vpack.c.bf16 %v461_v9, %v454_v5  ;;  %v1817_v17 = vpack.c.bf16 %v86_v11, %v79_v10  ;;  %v141_v5 = vld [vmem:[%s3676_s1 + $0x3d8] sm:$0xff]  ;;  %v156_v10 = vld [vmem:[%s3676_s1 + $0x450] sm:$0xff]  ;;  %v150_v62 = vld [vmem:[%s3676_s1 + $0x420] sm:$0xff] }
  0x80   :  { %1766 = vmatprep.subr.bf16.mxu1 %v1765_v21  ;;  %v1785_v21 = vpack.c.bf16 %v476_v14, %v469_v12  ;;  %v149_v9 = vld [vmem:[%s3676_s1 + $0x418] sm:$0xff]  ;;  %v492_v12 = vld [vmem:[%s3676_s1 + $0xed0] sm:$0xff] }
  0x81   :  { %v485_v11 = vld [vmem:[%s3676_s1 + $0xe98] sm:$0xff] }
  0x82   :  { %1640 = vmatpush1.bf16.msra.mxu0 %v1639_v28  ;;  %v1819_v28 = vpack.c.bf16 %v85_v20, %v78_v19  ;;  %v484_v19 = vld [vmem:[%s3676_s1 + $0xe90] sm:$0xff]  ;;  %v1933_v20 = vpack.c.bf16 %v492_v12, %v485_v11  ;;  %v171_v12 = vld [vmem:[%s3676_s1 + $0x4c8] sm:$0xff] }
  0x83   :  { %1768 = vmatpush1.bf16.msra.mxu1 %v1767_v29  ;;  %1802 = vmatprep.subr.bf16.mxu0 %v1801_v30  ;;  %v1787_v29 = vpack.c.bf16 %v475_v22, %v468_v18  ;;  %v1821_v30 = vpack.c.bf16 %v100_v24, %v93_v23  ;;  %v155_v18 = vld [vmem:[%s3676_s1 + $0x448] sm:$0xff]  ;;  %v170_v23 = vld [vmem:[%s3676_s1 + $0x4c0] sm:$0xff]  ;;  %v164_v11 = vld [vmem:[%s3676_s1 + $0x490] sm:$0xff] }
  0x84   :  { %1770 = vmatprep.subr.bf16.mxu1 %v1769_v34  ;;  %v1789_v34 = vpack.c.bf16 %v490_v26, %v483_v25  ;;  %v163_v22 = vld [vmem:[%s3676_s1 + $0x488] sm:$0xff]  ;;  %v506_v25 = vld [vmem:[%s3676_s1 + $0xf40] sm:$0xff]  ;;  %v3140_v26 = vld [vmem:[%s3677_s0 + $0x10] sm:$0xf] }
  0x85   :  { %670 = vmatmul.mubr.f32.vlgmr.msra.gmra.mrb[0].mxu0 %v2499_v13  ;;  %v499_v24 = vld [vmem:[%s3676_s1 + $0xf08] sm:$0xff] }
  0x86   :  { %1804 = vmatpush1.bf16.msra.mxu0 %v1803_v39  ;;  %1024 = vmatprep.mubr.f32.mxu0 %v2209_v58  ;;  %v1823_v39 = vpack.c.bf16 %v99_v33, %v92_v32  ;;  %v169_v32 = vld [vmem:[%s3676_s1 + $0x4b8] sm:$0xff]  ;;  %v498_v33 = vld [vmem:[%s3676_s1 + $0xf00] sm:$0xff] }
  0x87   :  { %1772 = vmatpush1.bf16.msra.mxu1 %v1771_v40  ;;  %1806 = vmatprep.subr.bf16.mxu0 %v1805_v41  ;;  %v1791_v40 = vpack.c.bf16 %v489_v52, %v482_v31  ;;  %v1825_v41 = vpack.c.bf16 %v114_v36, %v107_v35  ;;  %v162_v31 = vld [vmem:[%s3676_s1 + $0x480] sm:$0xff]  ;;  %v505_v52 = vld [vmem:[%s3676_s1 + $0xf38] sm:$0xff]  ;;  %v184_v36 = vld [vmem:[%s3676_s1 + $0x530] sm:$0xff] }
  0x88   :  { %1774 = vmatprep.subr.bf16.mxu1 %v1773_v45  ;;  %v503_v45 = vld [vmem:[%s3676_s1 + $0xf28] sm:$0xff]  ;;  %v177_v35 = vld [vmem:[%s3676_s1 + $0x4f8] sm:$0xff] }
  0x8a   :  { %1808 = vmatpush1.bf16.msra.mxu0 %v1807_v51  ;;  %v1795_v51 = vpack.c.bf16 %v503_v45, %v496_v42  ;;  %v176_v42 = vld [vmem:[%s3676_s1 + $0x4f0] sm:$0xff]  ;;  %v519_v45 = vld [vmem:[%s3676_s1 + $0xfa8] sm:$0xff] }
  0x8b   :  { %1776 = vmatpush1.bf16.msra.mxu1 %v1775_v53  ;;  %1810 = vmatprep.subr.bf16.mxu0 %v1809_v54  ;;  %v1829_v53 = vpack.c.bf16 %v128_v47, %v121_v46  ;;  %v510_v54 = vld [vmem:[%s3676_s1 + $0xf60] sm:$0xff]  ;;  %v191_v46 = vld [vmem:[%s3676_s1 + $0x568] sm:$0xff] }
  0x8c   :  { %1778 = vmatprep.subr.bf16.mxu1 %v1777_v59  ;;  %v517_v59 = vld [vmem:[%s3676_s1 + $0xf98] sm:$0xff]  ;;  %v198_v47 = vld [vmem:[%s3676_s1 + $0x5a0] sm:$0xff] }
  0x8e   :  { %1812 = vmatpush1.bf16.msra.mxu0 %v1811_v1  ;;  %v1799_v1 = vpack.c.bf16 %v517_v59, %v510_v54  ;;  %v190_v54 = vld [vmem:[%s3676_s1 + $0x560] sm:$0xff]  ;;  %v31_v59 = vld [vmem:[%s3676_s1 + $0x68] sm:$0xff] }
  0x8f   :  { %1780 = vmatpush1.bf16.msra.mxu1 %v1779_v2  ;;  %1814 = vmatprep.subr.bf16.mxu0 %v1813_v4  ;;  %v1833_v2 = vpack.c.bf16 %v142_v61, %v135_v60  ;;  %v134_v4 = vld [vmem:[%s3676_s1 + $0x3a0] sm:$0xff]  ;;  %v205_v60 = vld [vmem:[%s3676_s1 + $0x5d8] sm:$0xff]  ;;  %v212_v61 = vld [vmem:[%s3676_s1 + $0x610] sm:$0xff] }
  0x90   :  { %1782 = vmatprep.subr.bf16.mxu1 %v1781_v8  ;;  %v477_v8 = vld [vmem:[%s3676_s1 + $0xe58] sm:$0xff]  ;;  %v1835_v14 = vpack.c.bf16 %v141_v5, %v134_v4  ;;  %v204_v4 = vld [vmem:[%s3676_s1 + $0x5d0] sm:$0xff]  ;;  %v211_v5 = vld [vmem:[%s3676_s1 + $0x608] sm:$0xff] }
  0x92   :  { %1816 = vmatpush1.bf16.msra.mxu0 %v1815_v15  ;;  %v1931_v15 = vpack.c.bf16 %v477_v8, %v470_v6  ;;  %v38_v6 = vld [vmem:[%s3676_s1 + $0xa0] sm:$0xff]  ;;  %v45_v8 = vld [vmem:[%s3676_s1 + $0xd8] sm:$0xff] }
  0x93   :  { %1784 = vmatpush1.bf16.msra.mxu1 %v1783_v16  ;;  %1818 = vmatprep.subr.bf16.mxu0 %v1817_v17  ;;  %v1837_v16 = vpack.c.bf16 %v156_v10, %v149_v9  ;;  %v148_v17 = vld [vmem:[%s3676_s1 + $0x410] sm:$0xff]  ;;  %v219_v9 = vld [vmem:[%s3676_s1 + $0x648] sm:$0xff]  ;;  %v226_v10 = vld [vmem:[%s3676_s1 + $0x680] sm:$0xff] }
  0x94   :  { %1786 = vmatprep.subr.bf16.mxu1 %v1785_v21  ;;  %v491_v21 = vld [vmem:[%s3676_s1 + $0xec8] sm:$0xff] }
  0x96   :  { %883 = vmatmul.mubr.f32.vlgmr.msra.gmra.mrb[2].mxu1 %v2499_v13  ;;  %1820 = vmatpush1.bf16.msra.mxu0 %v1819_v28  ;;  %v1793_v13 = vpack.c.bf16 %v504_v38, %v497_v37  ;;  %v1839_v28 = vpack.c.bf16 %v155_v18, %v148_v17  ;;  %v513_v37 = vld [vmem:[%s3676_s1 + $0xf78] sm:$0xff]  ;;  %v520_v38 = vld [vmem:[%s3676_s1 + $0xfb0] sm:$0xff]  ;;  %v218_v17 = vld [vmem:[%s3676_s1 + $0x640] sm:$0xff] }
  0x97   :  { %1788 = vmatpush1.bf16.msra.mxu1 %v1787_v29  ;;  %1822 = vmatprep.subr.bf16.mxu0 %v1821_v30  ;;  %v1935_v29 = vpack.c.bf16 %v491_v21, %v484_v19  ;;  %v1841_v30 = vpack.c.bf16 %v170_v23, %v163_v22  ;;  %v225_v18 = vld [vmem:[%s3676_s1 + $0x678] sm:$0xff]  ;;  %v52_v19 = vld [vmem:[%s3676_s1 + $0x110] sm:$0xff]  ;;  %v59_v21 = vld [vmem:[%s3676_s1 + $0x148] sm:$0xff] }
  0x98   :  { %1790 = vmatprep.subr.bf16.mxu1 %v1789_v34  ;;  %953 = vmatprep.mubr.f32.mxu1 %v2061_v3  ;;  %v1937_v34 = vpack.c.bf16 %v506_v25, %v499_v24  ;;  %v233_v22 = vld [vmem:[%s3676_s1 + $0x6b8] sm:$0xff]  ;;  %v240_v23 = vld [vmem:[%s3676_s1 + $0x6f0] sm:$0xff]  ;;  %v178_v24 = vld [vmem:[%s3676_s1 + $0x500] sm:$0xff] }
  0x99   :  { %v185_v25 = vld [vmem:[%s3676_s1 + $0x538] sm:$0xff] }
  0x9a   :  { %1824 = vmatpush1.bf16.msra.mxu0 %v1823_v39  ;;  %v1843_v39 = vpack.c.bf16 %v169_v32, %v162_v31  ;;  %v232_v31 = vld [vmem:[%s3676_s1 + $0x6b0] sm:$0xff]  ;;  %v66_v32 = vld [vmem:[%s3676_s1 + $0x180] sm:$0xff] }
  0x9b   :  { %1792 = vmatpush1.bf16.msra.mxu1 %v1791_v40  ;;  %1826 = vmatprep.subr.bf16.mxu0 %v1825_v41  ;;  %v1939_v40 = vpack.c.bf16 %v505_v52, %v498_v33  ;;  %v1845_v41 = vpack.c.bf16 %v184_v36, %v177_v35  ;;  %v1957_v33 = vpack.c.bf16 %v185_v25, %v178_v24  ;;  %v247_v52 = vld [vmem:[%s3676_s1 + $0x728] sm:$0xff]  ;;  %v254_v35 = vld [vmem:[%s3676_s1 + $0x760] sm:$0xff]  ;;  %v192_v36 = vld [vmem:[%s3676_s1 + $0x570] sm:$0xff] }
  0x9c   :  { %1794 = vmatprep.subr.bf16.mxu1 %v1793_v13  ;;  %v1941_v13 = vpack.c.bf16 %v520_v38, %v513_v37  ;;  %v199_v37 = vld [vmem:[%s3676_s1 + $0x5a8] sm:$0xff]  ;;  %v360_v24 = vld [vmem:[%s3676_s1 + $0xab0] sm:$0xff] }
  0x9d   :  { %v367_v25 = vld [vmem:[%s3676_s1 + $0xae8] sm:$0xff] }
  0x9e   :  { %1828 = vmatpush1.bf16.msra.mxu0 %v1827_v50  ;;  %v1847_v50 = vpack.c.bf16 %v183_v43, %v176_v42  ;;  %v253_v42 = vld [vmem:[%s3676_s1 + $0x758] sm:$0xff]  ;;  %v80_v43 = vld [vmem:[%s3676_s1 + $0x1f0] sm:$0xff] }
  0x9f   :  { %1796 = vmatpush1.bf16.msra.mxu1 %v1795_v51  ;;  %1830 = vmatprep.subr.bf16.mxu0 %v1829_v53  ;;  %v1943_v51 = vpack.c.bf16 %v519_v45, %v512_v44  ;;  %v1849_v53 = vpack.c.bf16 %v198_v47, %v191_v46  ;;  %v1961_v44 = vpack.c.bf16 %v199_v37, %v192_v36  ;;  %v261_v45 = vld [vmem:[%s3676_s1 + $0x798] sm:$0xff]  ;;  %v268_v46 = vld [vmem:[%s3676_s1 + $0x7d0] sm:$0xff]  ;;  %v206_v47 = vld [vmem:[%s3676_s1 + $0x5e0] sm:$0xff] }
  0xa0   :  { %1798 = vmatprep.subr.bf16.mxu1 %v1797_v57  ;;  %v1945_v57 = vpack.c.bf16 %v143_v49, %v136_v48  ;;  %v213_v48 = vld [vmem:[%s3676_s1 + $0x618] sm:$0xff]  ;;  %v374_v36 = vld [vmem:[%s3676_s1 + $0xb20] sm:$0xff] }
  0xa1   :  { %v381_v37 = vld [vmem:[%s3676_s1 + $0xb58] sm:$0xff] }
  0xa2   :  { %1832 = vmatpush1.bf16.msra.mxu0 %v1831_v0  ;;  %v1851_v0 = vpack.c.bf16 %v197_v55, %v190_v54  ;;  %v267_v54 = vld [vmem:[%s3676_s1 + $0x7c8] sm:$0xff]  ;;  %v94_v55 = vld [vmem:[%s3676_s1 + $0x260] sm:$0xff] }
  0xa3   :  { %1800 = vmatpush1.bf16.msra.mxu1 %v1799_v1  ;;  %1834 = vmatprep.subr.bf16.mxu0 %v1833_v2  ;;  %v1947_v1 = vpack.c.bf16 %v31_v59, %v24_v56  ;;  %v1853_v2 = vpack.c.bf16 %v212_v61, %v205_v60  ;;  %v1965_v56 = vpack.c.bf16 %v213_v48, %v206_v47  ;;  %v275_v59 = vld [vmem:[%s3676_s1 + $0x808] sm:$0xff]  ;;  %v282_v60 = vld [vmem:[%s3676_s1 + $0x840] sm:$0xff]  ;;  %v388_v47 = vld [vmem:[%s3676_s1 + $0xb90] sm:$0xff] }
  0xa4   :  { %1930 = vmatprep.subr.bf16.mxu1 %v1929_v7  ;;  %v1949_v7 = vpack.c.bf16 %v157_v63, %v150_v62  ;;  %v3337_v61 = vld [vmem:[%s3677_s0] sm:$0xff]  ;;  %v220_v62 = vld [vmem:[%s3676_s1 + $0x650] sm:$0xff]  ;;  %v227_v63 = vld [vmem:[%s3676_s1 + $0x688] sm:$0xff] }
  0xa5   :  { %v395_v48 = vld [vmem:[%s3676_s1 + $0xbc8] sm:$0xff] }
  0xa6   :  { %1412 = vmatmul.mubr.msk.f32.vlgmr.msra.gmra.mrb[2].mxu1 %vm531_vm0, %v3140_v26  ;;  %1836 = vmatpush1.bf16.msra.mxu0 %v1835_v14  ;;  %v1855_v14 = vpack.c.bf16 %v211_v5, %v204_v4  ;;  %v274_v4 = vld [vmem:[%s3676_s1 + $0x800] sm:$0xff]  ;;  %v281_v5 = vld [vmem:[%s3676_s1 + $0x838] sm:$0xff] }
  0xa7   :  { %1932 = vmatpush1.bf16.msra.mxu1 %v1931_v15  ;;  %1838 = vmatprep.subr.bf16.mxu0 %v1837_v16  ;;  %v1951_v15 = vpack.c.bf16 %v45_v8, %v38_v6  ;;  %v1857_v16 = vpack.c.bf16 %v226_v10, %v219_v9  ;;  %v108_v6 = vld [vmem:[%s3676_s1 + $0x2d0] sm:$0xff]  ;;  %v115_v8 = vld [vmem:[%s3676_s1 + $0x308] sm:$0xff]  ;;  %v289_v9 = vld [vmem:[%s3676_s1 + $0x878] sm:$0xff] }
  0xa8   :  { %1934 = vmatprep.subr.bf16.mxu1 %v1933_v20  ;;  %1166 = vmatprep.mubr.f32.mxu1 %v2061_v3  ;;  %v1953_v20 = vpack.c.bf16 %v171_v12, %v164_v11  ;;  %v296_v10 = vld [vmem:[%s3676_s1 + $0x8b0] sm:$0xff]  ;;  %v234_v11 = vld [vmem:[%s3676_s1 + $0x6c0] sm:$0xff]  ;;  %v241_v12 = vld [vmem:[%s3676_s1 + $0x6f8] sm:$0xff] }
  0xaa   :  { %1840 = vmatpush1.bf16.msra.mxu0 %v1839_v28  ;;  %v1859_v28 = vpack.c.bf16 %v225_v18, %v218_v17  ;;  %v288_v17 = vld [vmem:[%s3676_s1 + $0x870] sm:$0xff]  ;;  %v295_v18 = vld [vmem:[%s3676_s1 + $0x8a8] sm:$0xff] }
  0xab   :  { %1936 = vmatpush1.bf16.msra.mxu1 %v1935_v29  ;;  %1842 = vmatprep.subr.bf16.mxu0 %v1841_v30  ;;  %v1955_v29 = vpack.c.bf16 %v59_v21, %v52_v19  ;;  %v1861_v30 = vpack.c.bf16 %v240_v23, %v233_v22  ;;  %v122_v19 = vld [vmem:[%s3676_s1 + $0x340] sm:$0xff]  ;;  %v129_v21 = vld [vmem:[%s3676_s1 + $0x378] sm:$0xff]  ;;  %v303_v22 = vld [vmem:[%s3676_s1 + $0x8e8] sm:$0xff] }
  0xac   :  { %1938 = vmatprep.subr.bf16.mxu1 %v1937_v34  ;;  %v73_v34 = vld [vmem:[%s3676_s1 + $0x1b8] sm:$0xff]  ;;  %v310_v23 = vld [vmem:[%s3676_s1 + $0x920] sm:$0xff] }
  0xae   :  { %1844 = vmatpush1.bf16.msra.mxu0 %v1843_v39  ;;  %v1959_v39 = vpack.c.bf16 %v73_v34, %v66_v32  ;;  %v248_v32 = vld [vmem:[%s3676_s1 + $0x730] sm:$0xff]  ;;  %v255_v34 = vld [vmem:[%s3676_s1 + $0x768] sm:$0xff] }
  0xaf   :  { %1940 = vmatpush1.bf16.msra.mxu1 %v1939_v40  ;;  %1846 = vmatprep.subr.bf16.mxu0 %v1845_v41  ;;  %v1865_v40 = vpack.c.bf16 %v254_v35, %v247_v52  ;;  %v246_v41 = vld [vmem:[%s3676_s1 + $0x720] sm:$0xff]  ;;  %v317_v52 = vld [vmem:[%s3676_s1 + $0x958] sm:$0xff]  ;;  %v324_v35 = vld [vmem:[%s3676_s1 + $0x990] sm:$0xff] }
  0xb0   :  { %1942 = vmatprep.subr.bf16.mxu1 %v1941_v13  ;;  %v87_v13 = vld [vmem:[%s3676_s1 + $0x228] sm:$0xff]  ;;  %v1867_v49 = vpack.c.bf16 %v253_v42, %v246_v41  ;;  %v316_v41 = vld [vmem:[%s3676_s1 + $0x950] sm:$0xff] }
  0xb1   :  { %v323_v42 = vld [vmem:[%s3676_s1 + $0x988] sm:$0xff] }
  0xb2   :  { %1848 = vmatpush1.bf16.msra.mxu0 %v1847_v50  ;;  %v1963_v50 = vpack.c.bf16 %v87_v13, %v80_v43  ;;  %v262_v43 = vld [vmem:[%s3676_s1 + $0x7a0] sm:$0xff]  ;;  %v269_v13 = vld [vmem:[%s3676_s1 + $0x7d8] sm:$0xff] }
  0xb3   :  { %1944 = vmatpush1.bf16.msra.mxu1 %v1943_v51  ;;  %1850 = vmatprep.subr.bf16.mxu0 %v1849_v53  ;;  %v1869_v51 = vpack.c.bf16 %v268_v46, %v261_v45  ;;  %v260_v53 = vld [vmem:[%s3676_s1 + $0x790] sm:$0xff]  ;;  %v331_v45 = vld [vmem:[%s3676_s1 + $0x9c8] sm:$0xff]  ;;  %v338_v46 = vld [vmem:[%s3676_s1 + $0xa00] sm:$0xff] }
  0xb4   :  { %1946 = vmatprep.subr.bf16.mxu1 %v1945_v57  ;;  %v101_v57 = vld [vmem:[%s3676_s1 + $0x298] sm:$0xff] }
  0xb6   :  { %1852 = vmatpush1.bf16.msra.mxu0 %v1851_v0  ;;  %1413 = vmatmul.mubr.msk.f32.vlgmr.msra.gmra.mrb[4].mxu1 %vm531_vm0, %v3140_v26  ;;  %v1871_v0 = vpack.c.bf16 %v267_v54, %v260_v53  ;;  %v330_v53 = vld [vmem:[%s3676_s1 + $0x9c0] sm:$0xff]  ;;  %v337_v54 = vld [vmem:[%s3676_s1 + $0x9f8] sm:$0xff] }
  0xb7   :  { %1948 = vmatpush3.bf16.msra.mxu1 %v1947_v1  ;;  %1854 = vmatprep.subr.bf16.mxu0 %v1853_v2  ;;  %v1967_v1 = vpack.c.bf16 %v101_v57, %v94_v55  ;;  %v1873_v2 = vpack.c.bf16 %v282_v60, %v275_v59  ;;  %v276_v55 = vld [vmem:[%s3676_s1 + $0x810] sm:$0xff]  ;;  %v283_v57 = vld [vmem:[%s3676_s1 + $0x848] sm:$0xff]  ;;  %v345_v59 = vld [vmem:[%s3676_s1 + $0xa38] sm:$0xff] }
  0xb8   :  { %1950 = vmatprep.subr.bf16.mxu1 %v1949_v7  ;;  %1237 = vmatprep.mubr.f32.mxu1 %v2209_v58  ;;  %v239_v58 = vld [vmem:[%s3676_s1 + $0x6e8] sm:$0xff]  ;;  %v1969_v7 = vpack.c.bf16 %v227_v63, %v220_v62  ;;  %v352_v60 = vld [vmem:[%s3676_s1 + $0xa70] sm:$0xff]  ;;  %v409_v62 = vld [vmem:[%s3676_s1 + $0xc38] sm:$0xff]  ;;  %v1891_v63 = vpack.c.bf16 %v337_v54, %v330_v53 }
  0xb9   :  { %v1863_v38 = vpack.c.bf16 %v239_v58, %v232_v31  ;;  %v302_v31 = vld [vmem:[%s3676_s1 + $0x8e0] sm:$0xff]  ;;  %v309_v58 = vld [vmem:[%s3676_s1 + $0x918] sm:$0xff]  ;;  %v400_v53 = vld [vmem:[%s3676_s1 + $0xbf0] sm:$0xff] }
  0xba   :  { %1856 = vmatpush1.bf16.msra.mxu0 %v1855_v14  ;;  %v1875_v14 = vpack.c.bf16 %v281_v5, %v274_v4  ;;  %v290_v4 = vld [vmem:[%s3676_s1 + $0x880] sm:$0xff]  ;;  %v407_v54 = vld [vmem:[%s3676_s1 + $0xc28] sm:$0xff] }
  0xbb   :  { %1952 = vmatpush3.bf16.msra.mxu1 %v1951_v15  ;;  %1858 = vmatprep.subr.bf16.mxu0 %v1857_v16  ;;  %v1971_v15 = vpack.c.bf16 %v115_v8, %v108_v6  ;;  %v1877_v16 = vpack.c.bf16 %v296_v10, %v289_v9  ;;  %v297_v6 = vld [vmem:[%s3676_s1 + $0x8b8] sm:$0xff]  ;;  %v366_v8 = vld [vmem:[%s3676_s1 + $0xae0] sm:$0xff]  ;;  %v416_v9 = vld [vmem:[%s3676_s1 + $0xc70] sm:$0xff] }
  0xbc   :  { %1954 = vmatprep.subr.bf16.mxu1 %v1953_v20  ;;  %v1973_v20 = vpack.c.bf16 %v241_v12, %v234_v11  ;;  %v423_v10 = vld [vmem:[%s3676_s1 + $0xca8] sm:$0xff]  ;;  %v1991_v12 = vpack.c.bf16 %v297_v6, %v290_v4  ;;  %v429_v4 = vld [vmem:[%s3676_s1 + $0xcd8] sm:$0xff] }
  0xbe   :  { %1860 = vmatpush1.bf16.msra.mxu0 %v1859_v28  ;;  %v1879_v28 = vpack.c.bf16 %v295_v18, %v288_v17  ;;  %v304_v17 = vld [vmem:[%s3676_s1 + $0x8f0] sm:$0xff]  ;;  %v1993_v18 = vpack.c.bf16 %v423_v10, %v416_v9  ;;  %v435_v10 = vld [vmem:[%s3676_s1 + $0xd08] sm:$0xff] }
  0xbf   :  { %1956 = vmatpush3.bf16.msra.mxu1 %v1955_v29  ;;  %1862 = vmatprep.subr.bf16.mxu0 %v1861_v30  ;;  %v1975_v29 = vpack.c.bf16 %v129_v21, %v122_v19  ;;  %v1881_v30 = vpack.c.bf16 %v310_v23, %v303_v22  ;;  %v311_v19 = vld [vmem:[%s3676_s1 + $0x928] sm:$0xff]  ;;  %v380_v21 = vld [vmem:[%s3676_s1 + $0xb50] sm:$0xff]  ;;  %v430_v22 = vld [vmem:[%s3676_s1 + $0xce0] sm:$0xff] }
  0xc0   :  { %1958 = vmatprep.subr.bf16.mxu1 %v1957_v33  ;;  %v1977_v33 = vpack.c.bf16 %v367_v25, %v360_v24  ;;  %v437_v23 = vld [vmem:[%s3676_s1 + $0xd18] sm:$0xff]  ;;  %v1995_v25 = vpack.c.bf16 %v311_v19, %v304_v17  ;;  %v428_v9 = vld [vmem:[%s3676_s1 + $0xcd0] sm:$0xff]  ;;  %v2060_v17 = vld [vmem:[%s3677_s0 + $0x8] sm:$0xff] }
  0xc2   :  { %1864 = vmatpush1.bf16.msra.mxu0 %v1863_v38  ;;  %v1883_v38 = vpack.c.bf16 %v309_v58, %v302_v31  ;;  %v318_v31 = vld [vmem:[%s3676_s1 + $0x960] sm:$0xff]  ;;  %v1997_v58 = vpack.c.bf16 %v437_v23, %v430_v22  ;;  %v449_v22 = vld [vmem:[%s3676_s1 + $0xd78] sm:$0xff]  ;;  %v500_v23 = vld [vmem:[%s3676_s1 + $0xf10] sm:$0xff] }
  0xc3   :  { %1960 = vmatpush3.bf16.msra.mxu1 %v1959_v39  ;;  %1866 = vmatprep.subr.bf16.mxu0 %v1865_v40  ;;  %v1979_v39 = vpack.c.bf16 %v255_v34, %v248_v32  ;;  %v1885_v40 = vpack.c.bf16 %v324_v35, %v317_v52  ;;  %v325_v32 = vld [vmem:[%s3676_s1 + $0x998] sm:$0xff]  ;;  %v394_v34 = vld [vmem:[%s3676_s1 + $0xbc0] sm:$0xff]  ;;  %v444_v52 = vld [vmem:[%s3676_s1 + $0xd50] sm:$0xff] }
  0xc4   :  { %1962 = vmatprep.subr.bf16.mxu1 %v1961_v44  ;;  %v1981_v44 = vpack.c.bf16 %v381_v37, %v374_v36  ;;  %v451_v35 = vld [vmem:[%s3676_s1 + $0xd88] sm:$0xff]  ;;  %v1999_v37 = vpack.c.bf16 %v325_v32, %v318_v31 }
  0xc5   :  { %1025 = vmatmul.mubr.f32.vlgmr.msra.gmra.mrb[2].mxu0 %v3337_v61  ;;  %v463_v32 = vld [vmem:[%s3676_s1 + $0xde8] sm:$0xff] }
  0xc6   :  { %1868 = vmatpush1.bf16.msra.mxu0 %v1867_v49  ;;  %1095 = vmatprep.mubr.f32.mxu0 %v2527_v27  ;;  %v1887_v49 = vpack.c.bf16 %v323_v42, %v316_v41  ;;  %v332_v41 = vld [vmem:[%s3676_s1 + $0x9d0] sm:$0xff]  ;;  %v2001_v42 = vpack.c.bf16 %v451_v35, %v444_v52  ;;  %v523_v35 = vstv %s3678_s2 }
  0xc7   :  { %1964 = vmatpush3.bf16.msra.mxu1 %v1963_v50  ;;  %1870 = vmatprep.subr.bf16.mxu0 %v1869_v51  ;;  %v1983_v50 = vpack.c.bf16 %v269_v13, %v262_v43  ;;  %v1889_v51 = vpack.c.bf16 %v338_v46, %v331_v45  ;;  %v339_v43 = vld [vmem:[%s3676_s1 + $0xa08] sm:$0xff]  ;;  %v408_v13 = vld [vmem:[%s3676_s1 + $0xc30] sm:$0xff]  ;;  %v458_v46 = vld [vmem:[%s3676_s1 + $0xdc0] sm:$0xff] }
  0xc8   :  { %1966 = vmatprep.subr.bf16.mxu1 %v1965_v56  ;;  %v1985_v56 = vpack.c.bf16 %v395_v48, %v388_v47  ;;  %v465_v47 = vld [vmem:[%s3676_s1 + $0xdf8] sm:$0xff] }
  0xca   :  { %1872 = vmatpush1.bf16.msra.mxu0 %v1871_v0  ;;  %v1987_v0 = vpack.c.bf16 %v283_v57, %v276_v55  ;;  %v346_v55 = vld [vmem:[%s3676_s1 + $0xa40] sm:$0xff]  ;;  %v353_v57 = vld [vmem:[%s3676_s1 + $0xa78] sm:$0xff] }
  0xcb   :  { %1968 = vmatpush3.bf16.msra.mxu1 %v1967_v1  ;;  %1874 = vmatprep.subr.bf16.mxu0 %v1873_v2  ;;  %v1893_v1 = vpack.c.bf16 %v352_v60, %v345_v59  ;;  %v344_v2 = vld [vmem:[%s3676_s1 + $0xa30] sm:$0xff]  ;;  %v415_v59 = vld [vmem:[%s3676_s1 + $0xc68] sm:$0xff]  ;;  %v422_v60 = vld [vmem:[%s3676_s1 + $0xca0] sm:$0xff] }
  0xcc   :  { %1970 = vmatprep.subr.bf16.mxu1 %v1969_v7  ;;  %v359_v7 = vld [vmem:[%s3676_s1 + $0xaa8] sm:$0xff] }
  0xce   :  { %1876 = vmatpush1.bf16.msra.mxu0 %v1875_v14  ;;  %v1897_v14 = vpack.c.bf16 %v366_v8, %v359_v7 }
  0xcf   :  { %1972 = vmatpush3.bf16.msra.mxu1 %v1971_v15  ;;  %1878 = vmatprep.subr.bf16.mxu0 %v1877_v16  ;;  %v358_v15 = vld [vmem:[%s3676_s1 + $0xaa0] sm:$0xff]  ;;  %v365_v16 = vld [vmem:[%s3676_s1 + $0xad8] sm:$0xff] }
  0xd0   :  { %1974 = vmatprep.subr.bf16.mxu1 %v1973_v20  ;;  %v373_v20 = vld [vmem:[%s3676_s1 + $0xb18] sm:$0xff]  ;;  %v1899_v24 = vpack.c.bf16 %v365_v16, %v358_v15  ;;  %v443_v15 = vld [vmem:[%s3676_s1 + $0xd48] sm:$0xff]  ;;  %v450_v16 = vld [vmem:[%s3676_s1 + $0xd80] sm:$0xff] }
  0xd2   :  { %1880 = vmatpush1.bf16.msra.mxu0 %v1879_v28  ;;  %v1901_v28 = vpack.c.bf16 %v380_v21, %v373_v20  ;;  %v1921_v20 = vpack.c.bf16 %v450_v16, %v443_v15  ;;  %v442_v21 = vld [vmem:[%s3676_s1 + $0xd40] sm:$0xff] }
  0xd3   :  { %1976 = vmatpush3.bf16.msra.mxu1 %v1975_v29  ;;  %1882 = vmatprep.subr.bf16.mxu0 %v1881_v30  ;;  %v372_v29 = vld [vmem:[%s3676_s1 + $0xb10] sm:$0xff]  ;;  %v379_v30 = vld [vmem:[%s3676_s1 + $0xb48] sm:$0xff] }
  0xd4   :  { %1978 = vmatprep.subr.bf16.mxu1 %v1977_v33  ;;  %v387_v33 = vld [vmem:[%s3676_s1 + $0xb88] sm:$0xff]  ;;  %v1903_v36 = vpack.c.bf16 %v379_v30, %v372_v29  ;;  %v1923_v29 = vpack.c.bf16 %v449_v22, %v442_v21 }
  0xd6   :  { %1884 = vmatpush1.bf16.msra.mxu0 %v1883_v38  ;;  %1238 = vmatmul.mubr.f32.vlgmr.msra.gmra.mrb[6].mxu1 %v3337_v61  ;;  %v402_v61 = vld [vmem:[%s3676_s1 + $0xc00] sm:$0xff]  ;;  %v1905_v38 = vpack.c.bf16 %v394_v34, %v387_v33 }
  0xd7   :  { %1980 = vmatpush3.bf16.msra.mxu1 %v1979_v39  ;;  %1886 = vmatprep.subr.bf16.mxu0 %v1885_v40  ;;  %v1989_v5 = vpack.c.bf16 %v409_v62, %v402_v61  ;;  %v386_v39 = vld [vmem:[%s3676_s1 + $0xb80] sm:$0xff]  ;;  %v393_v40 = vld [vmem:[%s3676_s1 + $0xbb8] sm:$0xff]  ;;  %v1911_v61 = vpack.c.bf16 %v407_v54, %v400_v53  ;;  %v2007_v62 = vpack.c.bf16 %v353_v57, %v346_v55 }
  0xd8   :  { %1982 = vmatprep.subr.bf16.mxu1 %v1981_v44  ;;  %1307 = vmatprep.mubr.f32.mxu1 %v2527_v27  ;;  %v351_v27 = vld [vmem:[%s3676_s1 + $0xa68] sm:$0xff]  ;;  %v401_v44 = vld [vmem:[%s3676_s1 + $0xbf8] sm:$0xff]  ;;  %v514_v33 = vld [vmem:[%s3676_s1 + $0xf80] sm:$0xff] }
  0xd9   :  { %v1895_v11 = vpack.c.bf16 %v351_v27, %v344_v2  ;;  %v472_v2 = vld [vmem:[%s3676_s1 + $0xe30] sm:$0xff]  ;;  %v479_v27 = vld [vmem:[%s3676_s1 + $0xe68] sm:$0xff] }
  0xda   :  { %1888 = vmatpush1.bf16.msra.mxu0 %v1887_v49  ;;  %v1907_v49 = vpack.c.bf16 %v393_v40, %v386_v39  ;;  %v2010_v7 = vpack.c.bf16 %v479_v27, %v472_v2 }
  0xdb   :  { %1984 = vmatpush3.bf16.msra.mxu1 %v1983_v50  ;;  %1890 = vmatprep.subr.bf16.mxu0 %v1889_v51  ;;  %v2003_v50 = vpack.c.bf16 %v339_v43, %v332_v41  ;;  %v1909_v51 = vpack.c.bf16 %v408_v13, %v401_v44 }
  0xdc   :  { %1986 = vmatprep.subr.bf16.mxu1 %v1985_v56  ;;  %v2005_v56 = vpack.c.bf16 %v465_v47, %v458_v46 }
  0xde   :  { %1892 = vmatpush1.bf16.msra.mxu0 %v1891_v63  ;;  %v1913_v63 = vpack.c.bf16 %v422_v60, %v415_v59 }
  0xdf   :  { %1988 = vmatpush3.bf16.msra.mxu1 %v1987_v0  ;;  %1894 = vmatprep.subr.bf16.mxu0 %v1893_v1  ;;  %v414_v0 = vld [vmem:[%s3676_s1 + $0xc60] sm:$0xff]  ;;  %v421_v1 = vld [vmem:[%s3676_s1 + $0xc98] sm:$0xff] }
  0xe0   :  { %1990 = vmatprep.subr.bf16.mxu1 %v1989_v5  ;;  %v436_v5 = vld [vmem:[%s3676_s1 + $0xd10] sm:$0xff]  ;;  %v1915_v6 = vpack.c.bf16 %v421_v1, %v414_v0 }
  0xe1   :  { %v1917_v8 = vpack.c.bf16 %v436_v5, %v429_v4 }
  0xe2   :  { %1896 = vmatpush1.bf16.msra.mxu0 %v1895_v11  ;;  %v486_v11 = vld [vmem:[%s3676_s1 + $0xea0] sm:$0xff] }
  0xe3   :  { %1992 = vmatpush3.bf16.msra.mxu1 %v1991_v12  ;;  %1898 = vmatprep.subr.bf16.mxu0 %v1897_v14  ;;  %v2062_v12 = vmov 0.0|0.0   ;;  %v493_v14 = vld [vmem:[%s3676_s1 + $0xed8] sm:$0xff] }
  0xe4   :  { %1994 = vmatprep.subr.bf16.mxu1 %v1993_v18  ;;  %v1919_v18 = vpack.c.bf16 %v435_v10, %v428_v9  ;;  %v2013_v19 = vpack.c.bf16 %v493_v14, %v486_v11 }
  0xe6   :  { %1900 = vmatpush1.bf16.msra.mxu0 %v1899_v24  ;;  %v507_v24 = vld [vmem:[%s3676_s1 + $0xf48] sm:$0xff] }
  0xe7   :  { %1996 = vmatpush3.bf16.msra.mxu1 %v1995_v25  ;;  %1902 = vmatprep.subr.bf16.mxu0 %v1901_v28  ;;  %v457_v25 = vld [vmem:[%s3676_s1 + $0xdb8] sm:$0xff]  ;;  %v464_v28 = vld [vmem:[%s3676_s1 + $0xdf0] sm:$0xff]  ;;  %v2016_v30 = vpack.c.bf16 %v507_v24, %v500_v23 }
  0xe8   :  { %1998 = vmatprep.subr.bf16.mxu1 %v1997_v58  ;;  %v1925_v31 = vpack.c.bf16 %v464_v28, %v457_v25  ;;  %v456_v58 = vld [vmem:[%s3676_s1 + $0xdb0] sm:$0xff] }
  0xe9   :  { %v3559_v45 = vpop.f32.mrb[0].mxu1  ;;  %v1927_v34 = vpack.c.bf16 %v463_v32, %v456_v58 }
  0xea   :  { %1904 = vmatpush1.bf16.msra.mxu0 %v1903_v36  ;;  %v3567_v48 = vpop.f32.mrb[1].mxu1 }
  0xeb   :  { %2000 = vmatpush3.bf16.msra.mxu1 %v1999_v37  ;;  %1906 = vmatprep.subr.bf16.mxu0 %v1905_v38 }
  0xec   :  { %2002 = vmatprep.subr.bf16.mxu1 %v2001_v42 }
  0xee   :  { %1908 = vmatpush1.bf16.msra.mxu0 %v1907_v49 }
  0xef   :  { %2004 = vmatpush3.bf16.msra.mxu1 %v2003_v50  ;;  %1910 = vmatprep.subr.bf16.mxu0 %v1909_v51 }
  0xf0   :  { %2006 = vmatprep.subr.bf16.mxu1 %v2005_v56 }
  0xf2   :  { %1912 = vmatpush1.bf16.msra.mxu0 %v1911_v61 }
  0xf3   :  { %2008 = vmatpush3.bf16.msra.mxu1 %v2007_v62  ;;  %1914 = vmatprep.subr.bf16.mxu0 %v1913_v63 }
  0xf4   :  { %2009 = vmatprep.subr.bf16.mxu1 %v2062_v12 }
  0xf6   :  { %1308 = vmatmul.mubr.f32.vlgmr.msra.gmra.mrb[8].mxu1 %v2060_v17  ;;  %1916 = vmatpush1.bf16.msra.mxu0 %v1915_v6 }
  0xf7   :  { %2011 = vmatpush3.bf16.msra.mxu1 %v2010_v7  ;;  %1918 = vmatprep.subr.bf16.mxu0 %v1917_v8 }
  0xf8   :  { %2012 = vmatprep.subr.bf16.mxu1 %v2062_v12  ;;  %1510 = vmatprep.mubr.msk.f32.mxu1 %vm2063_vm1, %v2061_v3  ;;  %v521_v3 = vld [vmem:[%s3676_s1 + $0xfb8] sm:$0xff] }
  0xf9   :  { %v2019_v52 = vpack.c.bf16 %v521_v3, %v514_v33 }
  0xfa   :  { %1920 = vmatpush1.bf16.msra.mxu0 %v1919_v18 }
  0xfb   :  { %2014 = vmatpush3.bf16.msra.mxu1 %v2013_v19  ;;  %1922 = vmatprep.subr.bf16.mxu0 %v1921_v20 }
  0xfc   :  { %2015 = vmatprep.subr.bf16.mxu1 %v2062_v12 }
  0xfe   :  { %1924 = vmatpush1.bf16.msra.mxu0 %v1923_v29 }
  0xff   :  { %2017 = vmatpush3.bf16.msra.mxu1 %v2016_v30  ;;  %1926 = vmatprep.subr.bf16.mxu0 %v1925_v31 }
 0x100   :  { %2018 = vmatprep.subr.bf16.mxu1 %v2062_v12 }
 0x102   :  { %1928 = vmatpush1.bf16.msra.mxu0 %v1927_v34 }
 0x103   :  { %2020 = vmatpush3.bf16.msra.mxu1 %v2019_v52 }
 0x105   :  { %1096 = vmatmul.mubr.f32.vlgmr.msra.gmra.mrb[2].mxu0 %v2060_v17 }
 0x106   :  { %1511 = vmatmul.mubr.msk.f32.vlgmr.msra.gmra.mrb[10].mxu1 %vm531_vm0, %v3140_v26 }
 0x158   :  { %v671_v36 = vpop.f32.mrb[0].mxu0 }
 0x159   :  { %v2021_v37 = vadd.f32 %v671_v36, %v523_v35  ;;  %v673_v38 = vpop.f32.mrb[1].mxu0 }
 0x15a   :  { %v2023_v39 = vadd.f32 %v673_v38, %v523_v35 }
 0x15b   :  { %v2022_v40 = vadd.f32 %v2021_v37, %v3559_v45 }
 0x15c   :  { %v2024_v41 = vadd.f32 %v2023_v39, %v3567_v48 }
 0x15d   :  { %2044 = vtanh.f32 %v2022_v40 }
 0x15e   :  { %2046 = vtanh.f32 %v2024_v41 }
 0x167   :  { %v2045_v42 = vpop.eup %2044 }
 0x168   :  { %v2047_v43 = vpop.eup %2046 }
 0x169   :  { %v1396_v44 = vcombine.low %v2045_v42, %v2047_v43 }
 0x16b   :  { %1402 = vst [vmem:[%s3679_s3] sm:$0xff] %v1396_v44 }
 0x179   :  { %v955_v26 = vpop.f32.mrb[2].mxu1 }
 0x17a   :  { %v2025_v13 = vadd.f32 %v955_v26, %v523_v35  ;;  %v957_v46 = vpop.f32.mrb[3].mxu1 }
 0x17b   :  { %v2026_v47 = vadd.f32 %v957_v46, %v523_v35 }
 0x17c   :  { %2048 = vtanh.f32 %v2025_v13 }
 0x17d   :  { %2050 = vtanh.f32 %v2026_v47 }
 0x186   :  { %v2049_v49 = vpop.eup %2048 }
 0x187   :  { %v2051_v50 = vpop.eup %2050 }
 0x188   :  { %v1397_v45 = vcombine.low %v2049_v49, %v2051_v50 }
 0x189   :  { %v1168_v51 = vpop.f32.mrb[4].mxu1 }
 0x18a   :  { %1403 = vst [vmem:[%s3679_s3 + $0x8] sm:$0xff] %v1397_v45  ;;  %v1170_v48 = vpop.f32.mrb[5].mxu1 }
 0x1a9   :  { %v1447_v53 = vpop.f32.mrb[6].mxu1 }
 0x1aa   :  { %v1448_v54 = vpop.f32.mrb[7].mxu1 }
 0x1ab   :  { %v1449_v55 = vadd.f32 %v1448_v54, %v1447_v53 }
 0x1ad   :  { %v1240_v59 = vadd.f32 %v1449_v55, %v523_v35 }
 0x1c9   :  { %v1482_v56 = vpop.f32.mrb[8].mxu1 }
 0x1ca   :  { %v1483_v57 = vpop.f32.mrb[9].mxu1 }
 0x1cb   :  { %v1484_v60 = vadd.f32 %v1483_v57, %v1482_v56 }
 0x1cd   :  { %v1310_v61 = vadd.f32 %v1484_v60, %v1240_v59 }
 0x1d8   :  { %v1097_v62 = vpop.f32.mrb[2].mxu0 }
 0x1d9   :  { %v2027_v63 = vadd.f32 %v1097_v62, %v523_v35  ;;  %v1379_v0 = vpop.f32.mrb[10].mxu1  ;;  %v1099_v1 = vpop.f32.mrb[3].mxu0 }
 0x1da   :  { %v1380_v2 = vadd.f32 %v1379_v0, %v1310_v61  ;;  %v2029_v27 = vadd.f32 %v1099_v1, %v523_v35  ;;  %v1512_v4 = vpop.f32.mrb[11].mxu1 }
 0x1db   :  { %v2028_v5 = vadd.f32 %v2027_v63, %v1168_v51 }
 0x1dc   :  { %2052 = vtanh.f32 %v1380_v2  ;;  %v2030_v6 = vadd.f32 %v2029_v27, %v1170_v48 }
 0x1dd   :  { %2054 = vtanh.f32 %v2028_v5 }
 0x1de   :  { %2056 = vtanh.f32 %v2030_v6 }
 0x1e6   :  { %v2053_v7 = vpop.eup %2052 }
 0x1e7   :  { %v2055_v8 = vpop.eup %2054  ;;  %1406 = vst.msk [vmem:[%s3679_s3 + $0x18] sm:$0xf] %vm1405_vm2, %v2053_v7 }
 0x1e8   :  { %v2057_v9 = vpop.eup %2056 }
 0x1e9   :  { %v1398_v10 = vcombine.low %v2055_v8, %v2057_v9 }
 0x1eb   :  { %1404 = vst [vmem:[%s3679_s3 + $0x10] sm:$0xff] %v1398_v10 }

</bundles_post_ra>
